<compile_context>
chip_gen: v5e
topology: v5e:2x2
jax: 0.10.0
libtpu: 0.0.40
codegen_flags: <defaults>
</compile_context>

<pallas_src>
import math
import functools

import jax
import jax.numpy as jnp
from jax import lax
from jax.experimental import pallas as pl
from jax.experimental.pallas import tpu as pltpu


# Operand dtype fed to the MXU (f32 accumulation everywhere).
# Set to jnp.float32 for bit-closer parity with the f32 PyTorch reference.
MXU_DTYPE = jnp.bfloat16


# ----------------------------------------------------------------------------
# Fused Pallas kernel: all encoder layers + final fc in one launch
# ----------------------------------------------------------------------------
def fused_forward_kernel(x_ref,
                         wqkv_ref, bqkv_ref, wo_ref, bo_ref,
                         ln1g_ref, ln1b_ref, ln2g_ref, ln2b_ref,
                         w1_ref, b1_ref, w2_ref, b2_ref,
                         fcw_ref, fcb_ref,
                         o_ref,
                         *, num_layers, num_heads, seq_l, seq_n, last_row):
    L, N, H = seq_l, seq_n, num_heads
    E = x_ref.shape[-1]
    Dh = E // H
    LN = L * N
    scale = 1.0 / math.sqrt(Dh)
    cdt = wqkv_ref.dtype                                  # MXU operand dtype

    # Residual stream lives in registers/VMEM as a 2-D (L*N, E) f32 slab.
    x = x_ref[...].astype(jnp.float32)                    # (LN, E)

    for layer in range(num_layers):                       # static unrolled loop
        # ---- Multi-head self attention --------------------------------------
        wqkv = wqkv_ref[layer]                            # (E, 3E), pre-transposed
        qkv = jnp.dot(x.astype(cdt), wqkv,
                      preferred_element_type=jnp.float32) + bqkv_ref[layer]
        qkv3 = qkv.reshape(L, N, 3 * E)                   # major-dim split only

        wo = wo_ref[layer]                                # (E, E), pre-transposed
        attn = jnp.zeros((LN, E), jnp.float32)
        for h in range(H):                                # tiny per-head score/PV
            q_h = qkv3[:, :, h * Dh:(h + 1) * Dh].astype(cdt)            # (L,N,Dh)
            k_h = qkv3[:, :, E + h * Dh:E + (h + 1) * Dh].astype(cdt)
            v_h = qkv3[:, :, 2 * E + h * Dh:2 * E + (h + 1) * Dh].astype(cdt)
            s = jnp.einsum('lnd,lmd->lnm', q_h, k_h,
                           preferred_element_type=jnp.float32) * scale   # (L,N,N)
            s = s - jnp.max(s, axis=-1, keepdims=True)
            p = jnp.exp(s)
            p = p * pl.reciprocal(jnp.sum(p, axis=-1, keepdims=True), approx=True)
            ctx = jnp.einsum('lnm,lmd->lnd', p.astype(cdt), v_h,
                             preferred_element_type=jnp.float32)          # (L,N,Dh)
            # out_proj folded per head (no concatenate):
            #   concat_h(ctx_h) @ Wo^T == sum_h ctx_h @ Wo^T[h*Dh:(h+1)*Dh, :]
            attn = attn + jnp.dot(ctx.reshape(LN, Dh).astype(cdt),
                                  wo[h * Dh:(h + 1) * Dh, :],
                                  preferred_element_type=jnp.float32)
        attn = attn + bo_ref[layer]

        # ---- residual + LayerNorm 1 (f32) ------------------------------------
        x = x + attn
        mu = jnp.mean(x, axis=-1, keepdims=True)
        var = jnp.mean(jnp.square(x - mu), axis=-1, keepdims=True)
        x = (x - mu) * lax.rsqrt(var + 1e-5) * ln1g_ref[layer] + ln1b_ref[layer]

        # ---- feed-forward ----------------------------------------------------
        hdn = jnp.dot(x.astype(cdt), w1_ref[layer],
                      preferred_element_type=jnp.float32) + b1_ref[layer]
        hdn = jnp.maximum(hdn, 0.0)                       # relu
        ffo = jnp.dot(hdn.astype(cdt), w2_ref[layer],
                      preferred_element_type=jnp.float32) + b2_ref[layer]

        # ---- residual + LayerNorm 2 (f32) ------------------------------------
        x = x + ffo
        mu = jnp.mean(x, axis=-1, keepdims=True)
        var = jnp.mean(jnp.square(x - mu), axis=-1, keepdims=True)
        x = (x - mu) * lax.rsqrt(var + 1e-5) * ln2g_ref[layer] + ln2b_ref[layer]

    # ---- final fc on h[last_pad, 0, :] (static row of the (LN, E) slab) ------
    vec = x[last_row:last_row + 1, :]                     # (1, E)
    y = jnp.dot(vec.astype(cdt), fcw_ref[...],
                preferred_element_type=jnp.float32) + fcb_ref[...]
    o_ref[...] = y.astype(o_ref.dtype)


# ----------------------------------------------------------------------------
# pallas_call wrapper
# ----------------------------------------------------------------------------
def _full_spec(a):
    # Whole array as a single block (block dims == full dims, so no (8,128)
    # tiling constraint applies), grid=(1,).
    nd = a.ndim
    return pl.BlockSpec(a.shape, lambda i, _nd=nd: (0,) * _nd)


def run_fused(x2d, packed, *, num_layers, num_heads, L, N, last_row, output_size):
    args = (x2d,
            packed['wqkv_t'], packed['bqkv'], packed['wo_t'], packed['bo'],
            packed['ln1g'], packed['ln1b'], packed['ln2g'], packed['ln2b'],
            packed['w1_t'], packed['b1'], packed['w2_t'], packed['b2'],
            packed['fcw_t'], packed['fcb'])
    kernel = functools.partial(fused_forward_kernel,
                               num_layers=num_layers, num_heads=num_heads,
                               seq_l=L, seq_n=N, last_row=last_row)
    return pl.pallas_call(
        kernel,
        grid=(1,),
        in_specs=[_full_spec(a) for a in args],
        out_specs=pl.BlockSpec((1, output_size), lambda i: (0, 0)),
        out_shape=jax.ShapeDtypeStruct((1, output_size), jnp.float32),
        compiler_params=pltpu.CompilerParams(dimension_semantics=("arbitrary",)),
    )(*args)


# ----------------------------------------------------------------------------
# Parameter construction (PyTorch layout) + one-time packing for the kernel
# ----------------------------------------------------------------------------
def make_params(key, embed_dims, num_heads, num_layers, ff, output_size):
    E = embed_dims
    keys = iter(jax.random.split(key, 8 + 16 * num_layers))

    def rnd(shape, scale=0.1):
        return jax.random.normal(next(keys), shape, jnp.float32) * scale

    params = {}
    emb = rnd((255, E))
    emb = emb.at[ord('\n')].set(0.0)                 # padding_idx = 10
    params['embedding'] = emb
    params['fc_w'] = rnd((output_size, E))
    params['fc_b'] = rnd((1, output_size))

    layers = []
    for _ in range(num_layers):
        layers.append((
            rnd((3 * E, E)),                         # in_proj_weight
            rnd((1, 3 * E)),                         # in_proj_bias
            rnd((E, E)),                             # out_proj.weight
            rnd((1, E)),                             # out_proj.bias
            jnp.ones((1, E), jnp.float32),           # norm1.weight
            jnp.zeros((1, E), jnp.float32),          # norm1.bias
            jnp.ones((1, E), jnp.float32),           # norm2.weight
            jnp.zeros((1, E), jnp.float32),          # norm2.bias
            rnd((ff, E)),                            # linear1.weight
            rnd((1, ff)),                            # linear1.bias
            rnd((E, ff)),                            # linear2.weight
            rnd((1, E)),                             # linear2.bias
        ))
    params['layers'] = layers
    return params


def pack_params(params, mxu_dtype=MXU_DTYPE):
    """Stack per-layer weights along a leading axis and pre-transpose all matmul
    weights once so the kernel never transposes. Matmul operands are stored in
    the MXU feed dtype; biases / LN params stay float32."""
    layers = params['layers']
    st = lambda xs: jnp.stack(xs, axis=0)
    return {
        'wqkv_t': st([l[0].T for l in layers]).astype(mxu_dtype),   # (nl, E, 3E)
        'bqkv':   st([l[1] for l in layers]),                        # (nl, 1, 3E)
        'wo_t':   st([l[2].T for l in layers]).astype(mxu_dtype),    # (nl, E, E)
        'bo':     st([l[3] for l in layers]),                        # (nl, 1, E)
        'ln1g':   st([l[4] for l in layers]),
        'ln1b':   st([l[5] for l in layers]),
        'ln2g':   st([l[6] for l in layers]),
        'ln2b':   st([l[7] for l in layers]),
        'w1_t':   st([l[8].T for l in layers]).astype(mxu_dtype),    # (nl, E, ff)
        'b1':     st([l[9] for l in layers]),                        # (nl, 1, ff)
        'w2_t':   st([l[10].T for l in layers]).astype(mxu_dtype),   # (nl, ff, E)
        'b2':     st([l[11] for l in layers]),                       # (nl, 1, E)
        'fcw_t':  params['fc_w'].T.astype(mxu_dtype),                # (E, out)
        'fcb':    params['fc_b'],                                    # (1, out)
    }


def positional_encoding_table(max_seq_length, d_model):
    position = jnp.arange(0, max_seq_length, dtype=jnp.float32)[:, None]
    div_term = jnp.exp(jnp.arange(0, d_model, 2, dtype=jnp.float32) *
                       (-math.log(10000.0) / d_model))
    pe = jnp.zeros((max_seq_length, d_model), jnp.float32)
    pe = pe.at[:, 0::2].set(jnp.sin(position * div_term))
    pe = pe.at[:, 1::2].set(jnp.cos(position * div_term))
    return pe[None]                                  # (1, L, E)


def transformer_encoder_forward(params, packed, x_tokens, pos_embed,
                                num_heads, num_layers, output_size,
                                last_pad=-1):
    # Glue (embedding gather, positional add, transpose/flatten) in plain JAX;
    # everything else (all encoder layers + fc) runs in one fused Pallas kernel.
    # NOTE: dropout layers are identity (inference mode).
    N, L = x_tokens.shape
    embedded = params['embedding'][x_tokens]         # (N, L, E)
    embedded = embedded + pos_embed                  # broadcast (1, L, E)

    # (L, N, E) attention layout, flattened to a (L*N, E) slab for the kernel.
    h = jnp.transpose(embedded, (1, 0, 2)).reshape(L * N, -1)
    # PyTorch: encoded.permute(1,0,2)[last_pad, :, :][0] == h[last_pad, 0, :]
    last_row = (last_pad % L) * N                    # static Python int

    y = run_fused(h.astype(jnp.float32), packed,
                  num_layers=num_layers, num_heads=num_heads,
                  L=L, N=N, last_row=last_row, output_size=output_size)
    return y[0]                                      # (output_size,)


# ----------------------------------------------------------------------------
if __name__ == "__main__":
    # Small, module-consistent shapes.
    input_size = 16       # L: sequence length fed to positional encoding
    N = 4                 # leading dim of x (attention runs over this axis)
    embed_dims = 32
    num_heads = 4
    num_layers = 2
    ff = 16
    output_size = 8

    key = jax.random.PRNGKey(0)
    k_tok, k_par = jax.random.split(key)

    x_tokens = jax.random.randint(k_tok, (N, input_size), 0, 255, dtype=jnp.int32)
    params = make_params(k_par, embed_dims, num_heads, num_layers, ff, output_size)
    packed = pack_params(params)
    pos_embed = positional_encoding_table(input_size, embed_dims)

    y = transformer_encoder_forward(params, packed, x_tokens, pos_embed,
                                    num_heads, num_layers, output_size,
                                    last_pad=-1)
    y = jax.block_until_ready(y)
    assert y.shape == (output_size,)
    assert bool(jnp.all(jnp.isfinite(y)))
    print("KERNEL_OK")
</pallas_src>

<mosaic_0001>
module attributes {stable_mosaic.version = 11 : i64} {
  func.func @fused_forward_kernel(%arg0: i32, %arg1: memref<64x32xf32, #tpu.memory_space<vmem>>, %arg2: memref<2x32x96xbf16, #tpu.memory_space<vmem>>, %arg3: memref<2x1x96xf32, #tpu.memory_space<vmem>>, %arg4: memref<2x32x32xbf16, #tpu.memory_space<vmem>>, %arg5: memref<2x1x32xf32, #tpu.memory_space<vmem>>, %arg6: memref<2x1x32xf32, #tpu.memory_space<vmem>>, %arg7: memref<2x1x32xf32, #tpu.memory_space<vmem>>, %arg8: memref<2x1x32xf32, #tpu.memory_space<vmem>>, %arg9: memref<2x1x32xf32, #tpu.memory_space<vmem>>, %arg10: memref<2x32x16xbf16, #tpu.memory_space<vmem>>, %arg11: memref<2x1x16xf32, #tpu.memory_space<vmem>>, %arg12: memref<2x16x32xbf16, #tpu.memory_space<vmem>>, %arg13: memref<2x1x32xf32, #tpu.memory_space<vmem>>, %arg14: memref<32x8xbf16, #tpu.memory_space<vmem>>, %arg15: memref<1x8xf32, #tpu.memory_space<vmem>>, %arg16: memref<1x8xf32, #tpu.memory_space<vmem>>) attributes {dimension_semantics = [#tpu.dimension_semantics<arbitrary>], iteration_bounds = array<i64: 1>, scalar_prefetch = 0 : i64, scratch_operands = 0 : i64, tpu.core_type = #tpu.core_type<tc>, window_params = [{pipeline_mode = #tpu.pipeline_mode<synchronous>, transform_indices = @transform_0, window_bounds = array<i64: 64, 32>}, {pipeline_mode = #tpu.pipeline_mode<synchronous>, transform_indices = @transform_1, window_bounds = array<i64: 2, 32, 96>}, {pipeline_mode = #tpu.pipeline_mode<synchronous>, transform_indices = @transform_2, window_bounds = array<i64: 2, 1, 96>}, {pipeline_mode = #tpu.pipeline_mode<synchronous>, transform_indices = @transform_3, window_bounds = array<i64: 2, 32, 32>}, {pipeline_mode = #tpu.pipeline_mode<synchronous>, transform_indices = @transform_4, window_bounds = array<i64: 2, 1, 32>}, {pipeline_mode = #tpu.pipeline_mode<synchronous>, transform_indices = @transform_5, window_bounds = array<i64: 2, 1, 32>}, {pipeline_mode = #tpu.pipeline_mode<synchronous>, transform_indices = @transform_6, window_bounds = array<i64: 2, 1, 32>}, {pipeline_mode = #tpu.pipeline_mode<synchronous>, transform_indices = @transform_7, window_bounds = array<i64: 2, 1, 32>}, {pipeline_mode = #tpu.pipeline_mode<synchronous>, transform_indices = @transform_8, window_bounds = array<i64: 2, 1, 32>}, {pipeline_mode = #tpu.pipeline_mode<synchronous>, transform_indices = @transform_9, window_bounds = array<i64: 2, 32, 16>}, {pipeline_mode = #tpu.pipeline_mode<synchronous>, transform_indices = @transform_10, window_bounds = array<i64: 2, 1, 16>}, {pipeline_mode = #tpu.pipeline_mode<synchronous>, transform_indices = @transform_11, window_bounds = array<i64: 2, 16, 32>}, {pipeline_mode = #tpu.pipeline_mode<synchronous>, transform_indices = @transform_12, window_bounds = array<i64: 2, 1, 32>}, {pipeline_mode = #tpu.pipeline_mode<synchronous>, transform_indices = @transform_13, window_bounds = array<i64: 32, 8>}, {pipeline_mode = #tpu.pipeline_mode<synchronous>, transform_indices = @transform_14, window_bounds = array<i64: 1, 8>}, {pipeline_mode = #tpu.pipeline_mode<synchronous>, transform_indices = @transform_15, window_bounds = array<i64: 1, 8>}]} {
    %c0 = arith.constant 0 : index
    %c0_0 = arith.constant 0 : index
    %0 = vector.load %arg1[%c0, %c0_0] : memref<64x32xf32, #tpu.memory_space<vmem>>, vector<64x32xf32>
    %c0_1 = arith.constant 0 : index
    %c0_2 = arith.constant 0 : index
    %c0_3 = arith.constant 0 : index
    %1 = vector.load %arg2[%c0_1, %c0_2, %c0_3] : memref<2x32x96xbf16, #tpu.memory_space<vmem>>, vector<1x32x96xbf16>
    %2 = vector.shape_cast %1 : vector<1x32x96xbf16> to vector<32x96xbf16>
    %3 = arith.truncf %0 : vector<64x32xf32> to vector<64x32xbf16>
    %cst = arith.constant dense<0.000000e+00> : vector<64x96xf32>
    %4 = tpu.matmul %3, %2, %cst {dimension_numbers = #tpu.dot_dimension_numbers<[1], [0], [0], [1], [0, 0, 1, 1], [], []>} : vector<64x32xbf16>, vector<32x96xbf16>, vector<64x96xf32> -> vector<64x96xf32>
    %c0_4 = arith.constant 0 : index
    %c0_5 = arith.constant 0 : index
    %c0_6 = arith.constant 0 : index
    %5 = vector.load %arg3[%c0_4, %c0_5, %c0_6] : memref<2x1x96xf32, #tpu.memory_space<vmem>>, vector<1x1x96xf32>
    %6 = vector.shape_cast %5 : vector<1x1x96xf32> to vector<1x96xf32>
    %7 = vector.broadcast %6 : vector<1x96xf32> to vector<64x96xf32>
    %8 = arith.addf %4, %7 : vector<64x96xf32>
    %9 = vector.shape_cast %8 : vector<64x96xf32> to vector<16x4x96xf32>
    %c0_7 = arith.constant 0 : index
    %c0_8 = arith.constant 0 : index
    %c0_9 = arith.constant 0 : index
    %10 = vector.load %arg4[%c0_7, %c0_8, %c0_9] : memref<2x32x32xbf16, #tpu.memory_space<vmem>>, vector<1x32x32xbf16>
    %11 = vector.shape_cast %10 : vector<1x32x32xbf16> to vector<32x32xbf16>
    %cst_10 = arith.constant 0.000000e+00 : f32
    %12 = vector.broadcast %cst_10 : f32 to vector<64x32xf32>
    %13 = vector.extract_strided_slice %9 {offsets = [0, 0, 0], sizes = [16, 4, 8], strides = [1, 1, 1]} : vector<16x4x96xf32> to vector<16x4x8xf32>
    %14 = arith.truncf %13 : vector<16x4x8xf32> to vector<16x4x8xbf16>
    %15 = vector.extract_strided_slice %9 {offsets = [0, 0, 32], sizes = [16, 4, 8], strides = [1, 1, 1]} : vector<16x4x96xf32> to vector<16x4x8xf32>
    %16 = arith.truncf %15 : vector<16x4x8xf32> to vector<16x4x8xbf16>
    %17 = vector.extract_strided_slice %9 {offsets = [0, 0, 64], sizes = [16, 4, 8], strides = [1, 1, 1]} : vector<16x4x96xf32> to vector<16x4x8xf32>
    %18 = arith.truncf %17 : vector<16x4x8xf32> to vector<16x4x8xbf16>
    "tpu.trace_start"() <{level = 10 : i32, message = "lnd,lmd->lnm"}> : () -> ()
    %cst_11 = arith.constant dense<0.000000e+00> : vector<16x4x4xf32>
    %19 = tpu.matmul %14, %16, %cst_11 {dimension_numbers = #tpu.dot_dimension_numbers<[2], [2], [1], [1], [0, 0, 0, 1, 1, 1], [0], [0]>} : vector<16x4x8xbf16>, vector<16x4x8xbf16>, vector<16x4x4xf32> -> vector<16x4x4xf32>
    "tpu.trace_stop"() : () -> ()
    %cst_12 = arith.constant 0.353553385 : f32
    %20 = vector.broadcast %cst_12 : f32 to vector<16x4x4xf32>
    %21 = arith.mulf %19, %20 : vector<16x4x4xf32>
    %cst_13 = arith.constant dense<0xFF800000> : vector<16x4xf32>
    %22 = vector.multi_reduction <maximumf>, %21, %cst_13 [2] : vector<16x4x4xf32> to vector<16x4xf32>
    %23 = vector.shape_cast %22 : vector<16x4xf32> to vector<16x4x1xf32>
    %24 = vector.broadcast %23 : vector<16x4x1xf32> to vector<16x4x4xf32>
    %25 = arith.subf %21, %24 : vector<16x4x4xf32>
    %26 = math.exp %25 : vector<16x4x4xf32>
    %cst_14 = arith.constant dense<0.000000e+00> : vector<16x4xf32>
    %27 = vector.multi_reduction <add>, %26, %cst_14 [2] : vector<16x4x4xf32> to vector<16x4xf32>
    %28 = vector.shape_cast %27 : vector<16x4xf32> to vector<16x4x1xf32>
    %29 = tpu.reciprocal %28 {approx = true} : vector<16x4x1xf32> -> vector<16x4x1xf32>
    %30 = vector.broadcast %29 : vector<16x4x1xf32> to vector<16x4x4xf32>
    %31 = arith.mulf %26, %30 : vector<16x4x4xf32>
    %32 = arith.truncf %31 : vector<16x4x4xf32> to vector<16x4x4xbf16>
    "tpu.trace_start"() <{level = 10 : i32, message = "lnm,lmd->lnd"}> : () -> ()
    %cst_15 = arith.constant dense<0.000000e+00> : vector<16x4x8xf32>
    %33 = tpu.matmul %32, %18, %cst_15 {dimension_numbers = #tpu.dot_dimension_numbers<[2], [1], [1], [2], [0, 0, 0, 1, 1, 2], [0], [0]>} : vector<16x4x4xbf16>, vector<16x4x8xbf16>, vector<16x4x8xf32> -> vector<16x4x8xf32>
    "tpu.trace_stop"() : () -> ()
    %34 = vector.shape_cast %33 : vector<16x4x8xf32> to vector<64x8xf32>
    %35 = arith.truncf %34 : vector<64x8xf32> to vector<64x8xbf16>
    %36 = vector.extract_strided_slice %11 {offsets = [0, 0], sizes = [8, 32], strides = [1, 1]} : vector<32x32xbf16> to vector<8x32xbf16>
    %cst_16 = arith.constant dense<0.000000e+00> : vector<64x32xf32>
    %37 = tpu.matmul %35, %36, %cst_16 {dimension_numbers = #tpu.dot_dimension_numbers<[1], [0], [0], [1], [0, 0, 1, 1], [], []>} : vector<64x8xbf16>, vector<8x32xbf16>, vector<64x32xf32> -> vector<64x32xf32>
    %38 = arith.addf %12, %37 : vector<64x32xf32>
    %39 = vector.extract_strided_slice %9 {offsets = [0, 0, 8], sizes = [16, 4, 8], strides = [1, 1, 1]} : vector<16x4x96xf32> to vector<16x4x8xf32>
    %40 = arith.truncf %39 : vector<16x4x8xf32> to vector<16x4x8xbf16>
    %41 = vector.extract_strided_slice %9 {offsets = [0, 0, 40], sizes = [16, 4, 8], strides = [1, 1, 1]} : vector<16x4x96xf32> to vector<16x4x8xf32>
    %42 = arith.truncf %41 : vector<16x4x8xf32> to vector<16x4x8xbf16>
    %43 = vector.extract_strided_slice %9 {offsets = [0, 0, 72], sizes = [16, 4, 8], strides = [1, 1, 1]} : vector<16x4x96xf32> to vector<16x4x8xf32>
    %44 = arith.truncf %43 : vector<16x4x8xf32> to vector<16x4x8xbf16>
    "tpu.trace_start"() <{level = 10 : i32, message = "lnd,lmd->lnm"}> : () -> ()
    %cst_17 = arith.constant dense<0.000000e+00> : vector<16x4x4xf32>
    %45 = tpu.matmul %40, %42, %cst_17 {dimension_numbers = #tpu.dot_dimension_numbers<[2], [2], [1], [1], [0, 0, 0, 1, 1, 1], [0], [0]>} : vector<16x4x8xbf16>, vector<16x4x8xbf16>, vector<16x4x4xf32> -> vector<16x4x4xf32>
    "tpu.trace_stop"() : () -> ()
    %cst_18 = arith.constant 0.353553385 : f32
    %46 = vector.broadcast %cst_18 : f32 to vector<16x4x4xf32>
    %47 = arith.mulf %45, %46 : vector<16x4x4xf32>
    %cst_19 = arith.constant dense<0xFF800000> : vector<16x4xf32>
    %48 = vector.multi_reduction <maximumf>, %47, %cst_19 [2] : vector<16x4x4xf32> to vector<16x4xf32>
    %49 = vector.shape_cast %48 : vector<16x4xf32> to vector<16x4x1xf32>
    %50 = vector.broadcast %49 : vector<16x4x1xf32> to vector<16x4x4xf32>
    %51 = arith.subf %47, %50 : vector<16x4x4xf32>
    %52 = math.exp %51 : vector<16x4x4xf32>
    %cst_20 = arith.constant dense<0.000000e+00> : vector<16x4xf32>
    %53 = vector.multi_reduction <add>, %52, %cst_20 [2] : vector<16x4x4xf32> to vector<16x4xf32>
    %54 = vector.shape_cast %53 : vector<16x4xf32> to vector<16x4x1xf32>
    %55 = tpu.reciprocal %54 {approx = true} : vector<16x4x1xf32> -> vector<16x4x1xf32>
    %56 = vector.broadcast %55 : vector<16x4x1xf32> to vector<16x4x4xf32>
    %57 = arith.mulf %52, %56 : vector<16x4x4xf32>
    %58 = arith.truncf %57 : vector<16x4x4xf32> to vector<16x4x4xbf16>
    "tpu.trace_start"() <{level = 10 : i32, message = "lnm,lmd->lnd"}> : () -> ()
    %cst_21 = arith.constant dense<0.000000e+00> : vector<16x4x8xf32>
    %59 = tpu.matmul %58, %44, %cst_21 {dimension_numbers = #tpu.dot_dimension_numbers<[2], [1], [1], [2], [0, 0, 0, 1, 1, 2], [0], [0]>} : vector<16x4x4xbf16>, vector<16x4x8xbf16>, vector<16x4x8xf32> -> vector<16x4x8xf32>
    "tpu.trace_stop"() : () -> ()
    %60 = vector.shape_cast %59 : vector<16x4x8xf32> to vector<64x8xf32>
    %61 = arith.truncf %60 : vector<64x8xf32> to vector<64x8xbf16>
    %62 = vector.extract_strided_slice %11 {offsets = [8, 0], sizes = [8, 32], strides = [1, 1]} : vector<32x32xbf16> to vector<8x32xbf16>
    %cst_22 = arith.constant dense<0.000000e+00> : vector<64x32xf32>
    %63 = tpu.matmul %61, %62, %cst_22 {dimension_numbers = #tpu.dot_dimension_numbers<[1], [0], [0], [1], [0, 0, 1, 1], [], []>} : vector<64x8xbf16>, vector<8x32xbf16>, vector<64x32xf32> -> vector<64x32xf32>
    %64 = arith.addf %38, %63 : vector<64x32xf32>
    %65 = vector.extract_strided_slice %9 {offsets = [0, 0, 16], sizes = [16, 4, 8], strides = [1, 1, 1]} : vector<16x4x96xf32> to vector<16x4x8xf32>
    %66 = arith.truncf %65 : vector<16x4x8xf32> to vector<16x4x8xbf16>
    %67 = vector.extract_strided_slice %9 {offsets = [0, 0, 48], sizes = [16, 4, 8], strides = [1, 1, 1]} : vector<16x4x96xf32> to vector<16x4x8xf32>
    %68 = arith.truncf %67 : vector<16x4x8xf32> to vector<16x4x8xbf16>
    %69 = vector.extract_strided_slice %9 {offsets = [0, 0, 80], sizes = [16, 4, 8], strides = [1, 1, 1]} : vector<16x4x96xf32> to vector<16x4x8xf32>
    %70 = arith.truncf %69 : vector<16x4x8xf32> to vector<16x4x8xbf16>
    "tpu.trace_start"() <{level = 10 : i32, message = "lnd,lmd->lnm"}> : () -> ()
    %cst_23 = arith.constant dense<0.000000e+00> : vector<16x4x4xf32>
    %71 = tpu.matmul %66, %68, %cst_23 {dimension_numbers = #tpu.dot_dimension_numbers<[2], [2], [1], [1], [0, 0, 0, 1, 1, 1], [0], [0]>} : vector<16x4x8xbf16>, vector<16x4x8xbf16>, vector<16x4x4xf32> -> vector<16x4x4xf32>
    "tpu.trace_stop"() : () -> ()
    %cst_24 = arith.constant 0.353553385 : f32
    %72 = vector.broadcast %cst_24 : f32 to vector<16x4x4xf32>
    %73 = arith.mulf %71, %72 : vector<16x4x4xf32>
    %cst_25 = arith.constant dense<0xFF800000> : vector<16x4xf32>
    %74 = vector.multi_reduction <maximumf>, %73, %cst_25 [2] : vector<16x4x4xf32> to vector<16x4xf32>
    %75 = vector.shape_cast %74 : vector<16x4xf32> to vector<16x4x1xf32>
    %76 = vector.broadcast %75 : vector<16x4x1xf32> to vector<16x4x4xf32>
    %77 = arith.subf %73, %76 : vector<16x4x4xf32>
    %78 = math.exp %77 : vector<16x4x4xf32>
    %cst_26 = arith.constant dense<0.000000e+00> : vector<16x4xf32>
    %79 = vector.multi_reduction <add>, %78, %cst_26 [2] : vector<16x4x4xf32> to vector<16x4xf32>
    %80 = vector.shape_cast %79 : vector<16x4xf32> to vector<16x4x1xf32>
    %81 = tpu.reciprocal %80 {approx = true} : vector<16x4x1xf32> -> vector<16x4x1xf32>
    %82 = vector.broadcast %81 : vector<16x4x1xf32> to vector<16x4x4xf32>
    %83 = arith.mulf %78, %82 : vector<16x4x4xf32>
    %84 = arith.truncf %83 : vector<16x4x4xf32> to vector<16x4x4xbf16>
    "tpu.trace_start"() <{level = 10 : i32, message = "lnm,lmd->lnd"}> : () -> ()
    %cst_27 = arith.constant dense<0.000000e+00> : vector<16x4x8xf32>
    %85 = tpu.matmul %84, %70, %cst_27 {dimension_numbers = #tpu.dot_dimension_numbers<[2], [1], [1], [2], [0, 0, 0, 1, 1, 2], [0], [0]>} : vector<16x4x4xbf16>, vector<16x4x8xbf16>, vector<16x4x8xf32> -> vector<16x4x8xf32>
    "tpu.trace_stop"() : () -> ()
    %86 = vector.shape_cast %85 : vector<16x4x8xf32> to vector<64x8xf32>
    %87 = arith.truncf %86 : vector<64x8xf32> to vector<64x8xbf16>
    %88 = vector.extract_strided_slice %11 {offsets = [16, 0], sizes = [8, 32], strides = [1, 1]} : vector<32x32xbf16> to vector<8x32xbf16>
    %cst_28 = arith.constant dense<0.000000e+00> : vector<64x32xf32>
    %89 = tpu.matmul %87, %88, %cst_28 {dimension_numbers = #tpu.dot_dimension_numbers<[1], [0], [0], [1], [0, 0, 1, 1], [], []>} : vector<64x8xbf16>, vector<8x32xbf16>, vector<64x32xf32> -> vector<64x32xf32>
    %90 = arith.addf %64, %89 : vector<64x32xf32>
    %91 = vector.extract_strided_slice %9 {offsets = [0, 0, 24], sizes = [16, 4, 8], strides = [1, 1, 1]} : vector<16x4x96xf32> to vector<16x4x8xf32>
    %92 = arith.truncf %91 : vector<16x4x8xf32> to vector<16x4x8xbf16>
    %93 = vector.extract_strided_slice %9 {offsets = [0, 0, 56], sizes = [16, 4, 8], strides = [1, 1, 1]} : vector<16x4x96xf32> to vector<16x4x8xf32>
    %94 = arith.truncf %93 : vector<16x4x8xf32> to vector<16x4x8xbf16>
    %95 = vector.extract_strided_slice %9 {offsets = [0, 0, 88], sizes = [16, 4, 8], strides = [1, 1, 1]} : vector<16x4x96xf32> to vector<16x4x8xf32>
    %96 = arith.truncf %95 : vector<16x4x8xf32> to vector<16x4x8xbf16>
    "tpu.trace_start"() <{level = 10 : i32, message = "lnd,lmd->lnm"}> : () -> ()
    %cst_29 = arith.constant dense<0.000000e+00> : vector<16x4x4xf32>
    %97 = tpu.matmul %92, %94, %cst_29 {dimension_numbers = #tpu.dot_dimension_numbers<[2], [2], [1], [1], [0, 0, 0, 1, 1, 1], [0], [0]>} : vector<16x4x8xbf16>, vector<16x4x8xbf16>, vector<16x4x4xf32> -> vector<16x4x4xf32>
    "tpu.trace_stop"() : () -> ()
    %cst_30 = arith.constant 0.353553385 : f32
    %98 = vector.broadcast %cst_30 : f32 to vector<16x4x4xf32>
    %99 = arith.mulf %97, %98 : vector<16x4x4xf32>
    %cst_31 = arith.constant dense<0xFF800000> : vector<16x4xf32>
    %100 = vector.multi_reduction <maximumf>, %99, %cst_31 [2] : vector<16x4x4xf32> to vector<16x4xf32>
    %101 = vector.shape_cast %100 : vector<16x4xf32> to vector<16x4x1xf32>
    %102 = vector.broadcast %101 : vector<16x4x1xf32> to vector<16x4x4xf32>
    %103 = arith.subf %99, %102 : vector<16x4x4xf32>
    %104 = math.exp %103 : vector<16x4x4xf32>
    %cst_32 = arith.constant dense<0.000000e+00> : vector<16x4xf32>
    %105 = vector.multi_reduction <add>, %104, %cst_32 [2] : vector<16x4x4xf32> to vector<16x4xf32>
    %106 = vector.shape_cast %105 : vector<16x4xf32> to vector<16x4x1xf32>
    %107 = tpu.reciprocal %106 {approx = true} : vector<16x4x1xf32> -> vector<16x4x1xf32>
    %108 = vector.broadcast %107 : vector<16x4x1xf32> to vector<16x4x4xf32>
    %109 = arith.mulf %104, %108 : vector<16x4x4xf32>
    %110 = arith.truncf %109 : vector<16x4x4xf32> to vector<16x4x4xbf16>
    "tpu.trace_start"() <{level = 10 : i32, message = "lnm,lmd->lnd"}> : () -> ()
    %cst_33 = arith.constant dense<0.000000e+00> : vector<16x4x8xf32>
    %111 = tpu.matmul %110, %96, %cst_33 {dimension_numbers = #tpu.dot_dimension_numbers<[2], [1], [1], [2], [0, 0, 0, 1, 1, 2], [0], [0]>} : vector<16x4x4xbf16>, vector<16x4x8xbf16>, vector<16x4x8xf32> -> vector<16x4x8xf32>
    "tpu.trace_stop"() : () -> ()
    %112 = vector.shape_cast %111 : vector<16x4x8xf32> to vector<64x8xf32>
    %113 = arith.truncf %112 : vector<64x8xf32> to vector<64x8xbf16>
    %114 = vector.extract_strided_slice %11 {offsets = [24, 0], sizes = [8, 32], strides = [1, 1]} : vector<32x32xbf16> to vector<8x32xbf16>
    %cst_34 = arith.constant dense<0.000000e+00> : vector<64x32xf32>
    %115 = tpu.matmul %113, %114, %cst_34 {dimension_numbers = #tpu.dot_dimension_numbers<[1], [0], [0], [1], [0, 0, 1, 1], [], []>} : vector<64x8xbf16>, vector<8x32xbf16>, vector<64x32xf32> -> vector<64x32xf32>
    %116 = arith.addf %90, %115 : vector<64x32xf32>
    %c0_35 = arith.constant 0 : index
    %c0_36 = arith.constant 0 : index
    %c0_37 = arith.constant 0 : index
    %117 = vector.load %arg5[%c0_35, %c0_36, %c0_37] : memref<2x1x32xf32, #tpu.memory_space<vmem>>, vector<1x1x32xf32>
    %118 = vector.shape_cast %117 : vector<1x1x32xf32> to vector<1x32xf32>
    %119 = vector.broadcast %118 : vector<1x32xf32> to vector<64x32xf32>
    %120 = arith.addf %116, %119 : vector<64x32xf32>
    %121 = arith.addf %0, %120 : vector<64x32xf32>
    %cst_38 = arith.constant dense<0.000000e+00> : vector<64xf32>
    %122 = vector.multi_reduction <add>, %121, %cst_38 [1] : vector<64x32xf32> to vector<64xf32>
    %123 = vector.shape_cast %122 : vector<64xf32> to vector<64x1xf32>
    %cst_39 = arith.constant 3.200000e+01 : f32
    %124 = vector.broadcast %cst_39 : f32 to vector<64x1xf32>
    %125 = arith.divf %123, %124 : vector<64x1xf32>
    %126 = vector.broadcast %125 : vector<64x1xf32> to vector<64x32xf32>
    %127 = arith.subf %121, %126 : vector<64x32xf32>
    %128 = arith.mulf %127, %127 : vector<64x32xf32>
    %cst_40 = arith.constant dense<0.000000e+00> : vector<64xf32>
    %129 = vector.multi_reduction <add>, %128, %cst_40 [1] : vector<64x32xf32> to vector<64xf32>
    %130 = vector.shape_cast %129 : vector<64xf32> to vector<64x1xf32>
    %cst_41 = arith.constant 3.200000e+01 : f32
    %131 = vector.broadcast %cst_41 : f32 to vector<64x1xf32>
    %132 = arith.divf %130, %131 : vector<64x1xf32>
    %133 = vector.broadcast %125 : vector<64x1xf32> to vector<64x32xf32>
    %134 = arith.subf %121, %133 : vector<64x32xf32>
    %cst_42 = arith.constant 9.99999974E-6 : f32
    %135 = vector.broadcast %cst_42 : f32 to vector<64x1xf32>
    %136 = arith.addf %132, %135 : vector<64x1xf32>
    %137 = math.rsqrt %136 : vector<64x1xf32>
    %138 = vector.broadcast %137 : vector<64x1xf32> to vector<64x32xf32>
    %139 = arith.mulf %134, %138 : vector<64x32xf32>
    %c0_43 = arith.constant 0 : index
    %c0_44 = arith.constant 0 : index
    %c0_45 = arith.constant 0 : index
    %140 = vector.load %arg6[%c0_43, %c0_44, %c0_45] : memref<2x1x32xf32, #tpu.memory_space<vmem>>, vector<1x1x32xf32>
    %141 = vector.shape_cast %140 : vector<1x1x32xf32> to vector<1x32xf32>
    %142 = vector.broadcast %141 : vector<1x32xf32> to vector<64x32xf32>
    %143 = arith.mulf %139, %142 : vector<64x32xf32>
    %c0_46 = arith.constant 0 : index
    %c0_47 = arith.constant 0 : index
    %c0_48 = arith.constant 0 : index
    %144 = vector.load %arg7[%c0_46, %c0_47, %c0_48] : memref<2x1x32xf32, #tpu.memory_space<vmem>>, vector<1x1x32xf32>
    %145 = vector.shape_cast %144 : vector<1x1x32xf32> to vector<1x32xf32>
    %146 = vector.broadcast %145 : vector<1x32xf32> to vector<64x32xf32>
    %147 = arith.addf %143, %146 : vector<64x32xf32>
    %148 = arith.truncf %147 : vector<64x32xf32> to vector<64x32xbf16>
    %c0_49 = arith.constant 0 : index
    %c0_50 = arith.constant 0 : index
    %c0_51 = arith.constant 0 : index
    %149 = vector.load %arg10[%c0_49, %c0_50, %c0_51] : memref<2x32x16xbf16, #tpu.memory_space<vmem>>, vector<1x32x16xbf16>
    %150 = vector.shape_cast %149 : vector<1x32x16xbf16> to vector<32x16xbf16>
    %cst_52 = arith.constant dense<0.000000e+00> : vector<64x16xf32>
    %151 = tpu.matmul %148, %150, %cst_52 {dimension_numbers = #tpu.dot_dimension_numbers<[1], [0], [0], [1], [0, 0, 1, 1], [], []>} : vector<64x32xbf16>, vector<32x16xbf16>, vector<64x16xf32> -> vector<64x16xf32>
    %c0_53 = arith.constant 0 : index
    %c0_54 = arith.constant 0 : index
    %c0_55 = arith.constant 0 : index
    %152 = vector.load %arg11[%c0_53, %c0_54, %c0_55] : memref<2x1x16xf32, #tpu.memory_space<vmem>>, vector<1x1x16xf32>
    %153 = vector.shape_cast %152 : vector<1x1x16xf32> to vector<1x16xf32>
    %154 = vector.broadcast %153 : vector<1x16xf32> to vector<64x16xf32>
    %155 = arith.addf %151, %154 : vector<64x16xf32>
    %cst_56 = arith.constant 0.000000e+00 : f32
    %156 = vector.broadcast %cst_56 : f32 to vector<64x16xf32>
    %157 = arith.maximumf %155, %156 : vector<64x16xf32>
    %158 = arith.truncf %157 : vector<64x16xf32> to vector<64x16xbf16>
    %c0_57 = arith.constant 0 : index
    %c0_58 = arith.constant 0 : index
    %c0_59 = arith.constant 0 : index
    %159 = vector.load %arg12[%c0_57, %c0_58, %c0_59] : memref<2x16x32xbf16, #tpu.memory_space<vmem>>, vector<1x16x32xbf16>
    %160 = vector.shape_cast %159 : vector<1x16x32xbf16> to vector<16x32xbf16>
    %cst_60 = arith.constant dense<0.000000e+00> : vector<64x32xf32>
    %161 = tpu.matmul %158, %160, %cst_60 {dimension_numbers = #tpu.dot_dimension_numbers<[1], [0], [0], [1], [0, 0, 1, 1], [], []>} : vector<64x16xbf16>, vector<16x32xbf16>, vector<64x32xf32> -> vector<64x32xf32>
    %c0_61 = arith.constant 0 : index
    %c0_62 = arith.constant 0 : index
    %c0_63 = arith.constant 0 : index
    %162 = vector.load %arg13[%c0_61, %c0_62, %c0_63] : memref<2x1x32xf32, #tpu.memory_space<vmem>>, vector<1x1x32xf32>
    %163 = vector.shape_cast %162 : vector<1x1x32xf32> to vector<1x32xf32>
    %164 = vector.broadcast %163 : vector<1x32xf32> to vector<64x32xf32>
    %165 = arith.addf %161, %164 : vector<64x32xf32>
    %166 = arith.addf %147, %165 : vector<64x32xf32>
    %cst_64 = arith.constant dense<0.000000e+00> : vector<64xf32>
    %167 = vector.multi_reduction <add>, %166, %cst_64 [1] : vector<64x32xf32> to vector<64xf32>
    %168 = vector.shape_cast %167 : vector<64xf32> to vector<64x1xf32>
    %cst_65 = arith.constant 3.200000e+01 : f32
    %169 = vector.broadcast %cst_65 : f32 to vector<64x1xf32>
    %170 = arith.divf %168, %169 : vector<64x1xf32>
    %171 = vector.broadcast %170 : vector<64x1xf32> to vector<64x32xf32>
    %172 = arith.subf %166, %171 : vector<64x32xf32>
    %173 = arith.mulf %172, %172 : vector<64x32xf32>
    %cst_66 = arith.constant dense<0.000000e+00> : vector<64xf32>
    %174 = vector.multi_reduction <add>, %173, %cst_66 [1] : vector<64x32xf32> to vector<64xf32>
    %175 = vector.shape_cast %174 : vector<64xf32> to vector<64x1xf32>
    %cst_67 = arith.constant 3.200000e+01 : f32
    %176 = vector.broadcast %cst_67 : f32 to vector<64x1xf32>
    %177 = arith.divf %175, %176 : vector<64x1xf32>
    %178 = vector.broadcast %170 : vector<64x1xf32> to vector<64x32xf32>
    %179 = arith.subf %166, %178 : vector<64x32xf32>
    %cst_68 = arith.constant 9.99999974E-6 : f32
    %180 = vector.broadcast %cst_68 : f32 to vector<64x1xf32>
    %181 = arith.addf %177, %180 : vector<64x1xf32>
    %182 = math.rsqrt %181 : vector<64x1xf32>
    %183 = vector.broadcast %182 : vector<64x1xf32> to vector<64x32xf32>
    %184 = arith.mulf %179, %183 : vector<64x32xf32>
    %c0_69 = arith.constant 0 : index
    %c0_70 = arith.constant 0 : index
    %c0_71 = arith.constant 0 : index
    %185 = vector.load %arg8[%c0_69, %c0_70, %c0_71] : memref<2x1x32xf32, #tpu.memory_space<vmem>>, vector<1x1x32xf32>
    %186 = vector.shape_cast %185 : vector<1x1x32xf32> to vector<1x32xf32>
    %187 = vector.broadcast %186 : vector<1x32xf32> to vector<64x32xf32>
    %188 = arith.mulf %184, %187 : vector<64x32xf32>
    %c0_72 = arith.constant 0 : index
    %c0_73 = arith.constant 0 : index
    %c0_74 = arith.constant 0 : index
    %189 = vector.load %arg9[%c0_72, %c0_73, %c0_74] : memref<2x1x32xf32, #tpu.memory_space<vmem>>, vector<1x1x32xf32>
    %190 = vector.shape_cast %189 : vector<1x1x32xf32> to vector<1x32xf32>
    %191 = vector.broadcast %190 : vector<1x32xf32> to vector<64x32xf32>
    %192 = arith.addf %188, %191 : vector<64x32xf32>
    %c1 = arith.constant 1 : index
    %c0_75 = arith.constant 0 : index
    %c0_76 = arith.constant 0 : index
    %193 = vector.load %arg2[%c1, %c0_75, %c0_76] : memref<2x32x96xbf16, #tpu.memory_space<vmem>>, vector<1x32x96xbf16>
    %194 = vector.shape_cast %193 : vector<1x32x96xbf16> to vector<32x96xbf16>
    %195 = arith.truncf %192 : vector<64x32xf32> to vector<64x32xbf16>
    %cst_77 = arith.constant dense<0.000000e+00> : vector<64x96xf32>
    %196 = tpu.matmul %195, %194, %cst_77 {dimension_numbers = #tpu.dot_dimension_numbers<[1], [0], [0], [1], [0, 0, 1, 1], [], []>} : vector<64x32xbf16>, vector<32x96xbf16>, vector<64x96xf32> -> vector<64x96xf32>
    %c1_78 = arith.constant 1 : index
    %c0_79 = arith.constant 0 : index
    %c0_80 = arith.constant 0 : index
    %197 = vector.load %arg3[%c1_78, %c0_79, %c0_80] : memref<2x1x96xf32, #tpu.memory_space<vmem>>, vector<1x1x96xf32>
    %198 = vector.shape_cast %197 : vector<1x1x96xf32> to vector<1x96xf32>
    %199 = vector.broadcast %198 : vector<1x96xf32> to vector<64x96xf32>
    %200 = arith.addf %196, %199 : vector<64x96xf32>
    %201 = vector.shape_cast %200 : vector<64x96xf32> to vector<16x4x96xf32>
    %c1_81 = arith.constant 1 : index
    %c0_82 = arith.constant 0 : index
    %c0_83 = arith.constant 0 : index
    %202 = vector.load %arg4[%c1_81, %c0_82, %c0_83] : memref<2x32x32xbf16, #tpu.memory_space<vmem>>, vector<1x32x32xbf16>
    %203 = vector.shape_cast %202 : vector<1x32x32xbf16> to vector<32x32xbf16>
    %cst_84 = arith.constant 0.000000e+00 : f32
    %204 = vector.broadcast %cst_84 : f32 to vector<64x32xf32>
    %205 = vector.extract_strided_slice %201 {offsets = [0, 0, 0], sizes = [16, 4, 8], strides = [1, 1, 1]} : vector<16x4x96xf32> to vector<16x4x8xf32>
    %206 = arith.truncf %205 : vector<16x4x8xf32> to vector<16x4x8xbf16>
    %207 = vector.extract_strided_slice %201 {offsets = [0, 0, 32], sizes = [16, 4, 8], strides = [1, 1, 1]} : vector<16x4x96xf32> to vector<16x4x8xf32>
    %208 = arith.truncf %207 : vector<16x4x8xf32> to vector<16x4x8xbf16>
    %209 = vector.extract_strided_slice %201 {offsets = [0, 0, 64], sizes = [16, 4, 8], strides = [1, 1, 1]} : vector<16x4x96xf32> to vector<16x4x8xf32>
    %210 = arith.truncf %209 : vector<16x4x8xf32> to vector<16x4x8xbf16>
    "tpu.trace_start"() <{level = 10 : i32, message = "lnd,lmd->lnm"}> : () -> ()
    %cst_85 = arith.constant dense<0.000000e+00> : vector<16x4x4xf32>
    %211 = tpu.matmul %206, %208, %cst_85 {dimension_numbers = #tpu.dot_dimension_numbers<[2], [2], [1], [1], [0, 0, 0, 1, 1, 1], [0], [0]>} : vector<16x4x8xbf16>, vector<16x4x8xbf16>, vector<16x4x4xf32> -> vector<16x4x4xf32>
    "tpu.trace_stop"() : () -> ()
    %cst_86 = arith.constant 0.353553385 : f32
    %212 = vector.broadcast %cst_86 : f32 to vector<16x4x4xf32>
    %213 = arith.mulf %211, %212 : vector<16x4x4xf32>
    %cst_87 = arith.constant dense<0xFF800000> : vector<16x4xf32>
    %214 = vector.multi_reduction <maximumf>, %213, %cst_87 [2] : vector<16x4x4xf32> to vector<16x4xf32>
    %215 = vector.shape_cast %214 : vector<16x4xf32> to vector<16x4x1xf32>
    %216 = vector.broadcast %215 : vector<16x4x1xf32> to vector<16x4x4xf32>
    %217 = arith.subf %213, %216 : vector<16x4x4xf32>
    %218 = math.exp %217 : vector<16x4x4xf32>
    %cst_88 = arith.constant dense<0.000000e+00> : vector<16x4xf32>
    %219 = vector.multi_reduction <add>, %218, %cst_88 [2] : vector<16x4x4xf32> to vector<16x4xf32>
    %220 = vector.shape_cast %219 : vector<16x4xf32> to vector<16x4x1xf32>
    %221 = tpu.reciprocal %220 {approx = true} : vector<16x4x1xf32> -> vector<16x4x1xf32>
    %222 = vector.broadcast %221 : vector<16x4x1xf32> to vector<16x4x4xf32>
    %223 = arith.mulf %218, %222 : vector<16x4x4xf32>
    %224 = arith.truncf %223 : vector<16x4x4xf32> to vector<16x4x4xbf16>
    "tpu.trace_start"() <{level = 10 : i32, message = "lnm,lmd->lnd"}> : () -> ()
    %cst_89 = arith.constant dense<0.000000e+00> : vector<16x4x8xf32>
    %225 = tpu.matmul %224, %210, %cst_89 {dimension_numbers = #tpu.dot_dimension_numbers<[2], [1], [1], [2], [0, 0, 0, 1, 1, 2], [0], [0]>} : vector<16x4x4xbf16>, vector<16x4x8xbf16>, vector<16x4x8xf32> -> vector<16x4x8xf32>
    "tpu.trace_stop"() : () -> ()
    %226 = vector.shape_cast %225 : vector<16x4x8xf32> to vector<64x8xf32>
    %227 = arith.truncf %226 : vector<64x8xf32> to vector<64x8xbf16>
    %228 = vector.extract_strided_slice %203 {offsets = [0, 0], sizes = [8, 32], strides = [1, 1]} : vector<32x32xbf16> to vector<8x32xbf16>
    %cst_90 = arith.constant dense<0.000000e+00> : vector<64x32xf32>
    %229 = tpu.matmul %227, %228, %cst_90 {dimension_numbers = #tpu.dot_dimension_numbers<[1], [0], [0], [1], [0, 0, 1, 1], [], []>} : vector<64x8xbf16>, vector<8x32xbf16>, vector<64x32xf32> -> vector<64x32xf32>
    %230 = arith.addf %204, %229 : vector<64x32xf32>
    %231 = vector.extract_strided_slice %201 {offsets = [0, 0, 8], sizes = [16, 4, 8], strides = [1, 1, 1]} : vector<16x4x96xf32> to vector<16x4x8xf32>
    %232 = arith.truncf %231 : vector<16x4x8xf32> to vector<16x4x8xbf16>
    %233 = vector.extract_strided_slice %201 {offsets = [0, 0, 40], sizes = [16, 4, 8], strides = [1, 1, 1]} : vector<16x4x96xf32> to vector<16x4x8xf32>
    %234 = arith.truncf %233 : vector<16x4x8xf32> to vector<16x4x8xbf16>
    %235 = vector.extract_strided_slice %201 {offsets = [0, 0, 72], sizes = [16, 4, 8], strides = [1, 1, 1]} : vector<16x4x96xf32> to vector<16x4x8xf32>
    %236 = arith.truncf %235 : vector<16x4x8xf32> to vector<16x4x8xbf16>
    "tpu.trace_start"() <{level = 10 : i32, message = "lnd,lmd->lnm"}> : () -> ()
    %cst_91 = arith.constant dense<0.000000e+00> : vector<16x4x4xf32>
    %237 = tpu.matmul %232, %234, %cst_91 {dimension_numbers = #tpu.dot_dimension_numbers<[2], [2], [1], [1], [0, 0, 0, 1, 1, 1], [0], [0]>} : vector<16x4x8xbf16>, vector<16x4x8xbf16>, vector<16x4x4xf32> -> vector<16x4x4xf32>
    "tpu.trace_stop"() : () -> ()
    %cst_92 = arith.constant 0.353553385 : f32
    %238 = vector.broadcast %cst_92 : f32 to vector<16x4x4xf32>
    %239 = arith.mulf %237, %238 : vector<16x4x4xf32>
    %cst_93 = arith.constant dense<0xFF800000> : vector<16x4xf32>
    %240 = vector.multi_reduction <maximumf>, %239, %cst_93 [2] : vector<16x4x4xf32> to vector<16x4xf32>
    %241 = vector.shape_cast %240 : vector<16x4xf32> to vector<16x4x1xf32>
    %242 = vector.broadcast %241 : vector<16x4x1xf32> to vector<16x4x4xf32>
    %243 = arith.subf %239, %242 : vector<16x4x4xf32>
    %244 = math.exp %243 : vector<16x4x4xf32>
    %cst_94 = arith.constant dense<0.000000e+00> : vector<16x4xf32>
    %245 = vector.multi_reduction <add>, %244, %cst_94 [2] : vector<16x4x4xf32> to vector<16x4xf32>
    %246 = vector.shape_cast %245 : vector<16x4xf32> to vector<16x4x1xf32>
    %247 = tpu.reciprocal %246 {approx = true} : vector<16x4x1xf32> -> vector<16x4x1xf32>
    %248 = vector.broadcast %247 : vector<16x4x1xf32> to vector<16x4x4xf32>
    %249 = arith.mulf %244, %248 : vector<16x4x4xf32>
    %250 = arith.truncf %249 : vector<16x4x4xf32> to vector<16x4x4xbf16>
    "tpu.trace_start"() <{level = 10 : i32, message = "lnm,lmd->lnd"}> : () -> ()
    %cst_95 = arith.constant dense<0.000000e+00> : vector<16x4x8xf32>
    %251 = tpu.matmul %250, %236, %cst_95 {dimension_numbers = #tpu.dot_dimension_numbers<[2], [1], [1], [2], [0, 0, 0, 1, 1, 2], [0], [0]>} : vector<16x4x4xbf16>, vector<16x4x8xbf16>, vector<16x4x8xf32> -> vector<16x4x8xf32>
    "tpu.trace_stop"() : () -> ()
    %252 = vector.shape_cast %251 : vector<16x4x8xf32> to vector<64x8xf32>
    %253 = arith.truncf %252 : vector<64x8xf32> to vector<64x8xbf16>
    %254 = vector.extract_strided_slice %203 {offsets = [8, 0], sizes = [8, 32], strides = [1, 1]} : vector<32x32xbf16> to vector<8x32xbf16>
    %cst_96 = arith.constant dense<0.000000e+00> : vector<64x32xf32>
    %255 = tpu.matmul %253, %254, %cst_96 {dimension_numbers = #tpu.dot_dimension_numbers<[1], [0], [0], [1], [0, 0, 1, 1], [], []>} : vector<64x8xbf16>, vector<8x32xbf16>, vector<64x32xf32> -> vector<64x32xf32>
    %256 = arith.addf %230, %255 : vector<64x32xf32>
    %257 = vector.extract_strided_slice %201 {offsets = [0, 0, 16], sizes = [16, 4, 8], strides = [1, 1, 1]} : vector<16x4x96xf32> to vector<16x4x8xf32>
    %258 = arith.truncf %257 : vector<16x4x8xf32> to vector<16x4x8xbf16>
    %259 = vector.extract_strided_slice %201 {offsets = [0, 0, 48], sizes = [16, 4, 8], strides = [1, 1, 1]} : vector<16x4x96xf32> to vector<16x4x8xf32>
    %260 = arith.truncf %259 : vector<16x4x8xf32> to vector<16x4x8xbf16>
    %261 = vector.extract_strided_slice %201 {offsets = [0, 0, 80], sizes = [16, 4, 8], strides = [1, 1, 1]} : vector<16x4x96xf32> to vector<16x4x8xf32>
    %262 = arith.truncf %261 : vector<16x4x8xf32> to vector<16x4x8xbf16>
    "tpu.trace_start"() <{level = 10 : i32, message = "lnd,lmd->lnm"}> : () -> ()
    %cst_97 = arith.constant dense<0.000000e+00> : vector<16x4x4xf32>
    %263 = tpu.matmul %258, %260, %cst_97 {dimension_numbers = #tpu.dot_dimension_numbers<[2], [2], [1], [1], [0, 0, 0, 1, 1, 1], [0], [0]>} : vector<16x4x8xbf16>, vector<16x4x8xbf16>, vector<16x4x4xf32> -> vector<16x4x4xf32>
    "tpu.trace_stop"() : () -> ()
    %cst_98 = arith.constant 0.353553385 : f32
    %264 = vector.broadcast %cst_98 : f32 to vector<16x4x4xf32>
    %265 = arith.mulf %263, %264 : vector<16x4x4xf32>
    %cst_99 = arith.constant dense<0xFF800000> : vector<16x4xf32>
    %266 = vector.multi_reduction <maximumf>, %265, %cst_99 [2] : vector<16x4x4xf32> to vector<16x4xf32>
    %267 = vector.shape_cast %266 : vector<16x4xf32> to vector<16x4x1xf32>
    %268 = vector.broadcast %267 : vector<16x4x1xf32> to vector<16x4x4xf32>
    %269 = arith.subf %265, %268 : vector<16x4x4xf32>
    %270 = math.exp %269 : vector<16x4x4xf32>
    %cst_100 = arith.constant dense<0.000000e+00> : vector<16x4xf32>
    %271 = vector.multi_reduction <add>, %270, %cst_100 [2] : vector<16x4x4xf32> to vector<16x4xf32>
    %272 = vector.shape_cast %271 : vector<16x4xf32> to vector<16x4x1xf32>
    %273 = tpu.reciprocal %272 {approx = true} : vector<16x4x1xf32> -> vector<16x4x1xf32>
    %274 = vector.broadcast %273 : vector<16x4x1xf32> to vector<16x4x4xf32>
    %275 = arith.mulf %270, %274 : vector<16x4x4xf32>
    %276 = arith.truncf %275 : vector<16x4x4xf32> to vector<16x4x4xbf16>
    "tpu.trace_start"() <{level = 10 : i32, message = "lnm,lmd->lnd"}> : () -> ()
    %cst_101 = arith.constant dense<0.000000e+00> : vector<16x4x8xf32>
    %277 = tpu.matmul %276, %262, %cst_101 {dimension_numbers = #tpu.dot_dimension_numbers<[2], [1], [1], [2], [0, 0, 0, 1, 1, 2], [0], [0]>} : vector<16x4x4xbf16>, vector<16x4x8xbf16>, vector<16x4x8xf32> -> vector<16x4x8xf32>
    "tpu.trace_stop"() : () -> ()
    %278 = vector.shape_cast %277 : vector<16x4x8xf32> to vector<64x8xf32>
    %279 = arith.truncf %278 : vector<64x8xf32> to vector<64x8xbf16>
    %280 = vector.extract_strided_slice %203 {offsets = [16, 0], sizes = [8, 32], strides = [1, 1]} : vector<32x32xbf16> to vector<8x32xbf16>
    %cst_102 = arith.constant dense<0.000000e+00> : vector<64x32xf32>
    %281 = tpu.matmul %279, %280, %cst_102 {dimension_numbers = #tpu.dot_dimension_numbers<[1], [0], [0], [1], [0, 0, 1, 1], [], []>} : vector<64x8xbf16>, vector<8x32xbf16>, vector<64x32xf32> -> vector<64x32xf32>
    %282 = arith.addf %256, %281 : vector<64x32xf32>
    %283 = vector.extract_strided_slice %201 {offsets = [0, 0, 24], sizes = [16, 4, 8], strides = [1, 1, 1]} : vector<16x4x96xf32> to vector<16x4x8xf32>
    %284 = arith.truncf %283 : vector<16x4x8xf32> to vector<16x4x8xbf16>
    %285 = vector.extract_strided_slice %201 {offsets = [0, 0, 56], sizes = [16, 4, 8], strides = [1, 1, 1]} : vector<16x4x96xf32> to vector<16x4x8xf32>
    %286 = arith.truncf %285 : vector<16x4x8xf32> to vector<16x4x8xbf16>
    %287 = vector.extract_strided_slice %201 {offsets = [0, 0, 88], sizes = [16, 4, 8], strides = [1, 1, 1]} : vector<16x4x96xf32> to vector<16x4x8xf32>
    %288 = arith.truncf %287 : vector<16x4x8xf32> to vector<16x4x8xbf16>
    "tpu.trace_start"() <{level = 10 : i32, message = "lnd,lmd->lnm"}> : () -> ()
    %cst_103 = arith.constant dense<0.000000e+00> : vector<16x4x4xf32>
    %289 = tpu.matmul %284, %286, %cst_103 {dimension_numbers = #tpu.dot_dimension_numbers<[2], [2], [1], [1], [0, 0, 0, 1, 1, 1], [0], [0]>} : vector<16x4x8xbf16>, vector<16x4x8xbf16>, vector<16x4x4xf32> -> vector<16x4x4xf32>
    "tpu.trace_stop"() : () -> ()
    %cst_104 = arith.constant 0.353553385 : f32
    %290 = vector.broadcast %cst_104 : f32 to vector<16x4x4xf32>
    %291 = arith.mulf %289, %290 : vector<16x4x4xf32>
    %cst_105 = arith.constant dense<0xFF800000> : vector<16x4xf32>
    %292 = vector.multi_reduction <maximumf>, %291, %cst_105 [2] : vector<16x4x4xf32> to vector<16x4xf32>
    %293 = vector.shape_cast %292 : vector<16x4xf32> to vector<16x4x1xf32>
    %294 = vector.broadcast %293 : vector<16x4x1xf32> to vector<16x4x4xf32>
    %295 = arith.subf %291, %294 : vector<16x4x4xf32>
    %296 = math.exp %295 : vector<16x4x4xf32>
    %cst_106 = arith.constant dense<0.000000e+00> : vector<16x4xf32>
    %297 = vector.multi_reduction <add>, %296, %cst_106 [2] : vector<16x4x4xf32> to vector<16x4xf32>
    %298 = vector.shape_cast %297 : vector<16x4xf32> to vector<16x4x1xf32>
    %299 = tpu.reciprocal %298 {approx = true} : vector<16x4x1xf32> -> vector<16x4x1xf32>
    %300 = vector.broadcast %299 : vector<16x4x1xf32> to vector<16x4x4xf32>
    %301 = arith.mulf %296, %300 : vector<16x4x4xf32>
    %302 = arith.truncf %301 : vector<16x4x4xf32> to vector<16x4x4xbf16>
    "tpu.trace_start"() <{level = 10 : i32, message = "lnm,lmd->lnd"}> : () -> ()
    %cst_107 = arith.constant dense<0.000000e+00> : vector<16x4x8xf32>
    %303 = tpu.matmul %302, %288, %cst_107 {dimension_numbers = #tpu.dot_dimension_numbers<[2], [1], [1], [2], [0, 0, 0, 1, 1, 2], [0], [0]>} : vector<16x4x4xbf16>, vector<16x4x8xbf16>, vector<16x4x8xf32> -> vector<16x4x8xf32>
    "tpu.trace_stop"() : () -> ()
    %304 = vector.shape_cast %303 : vector<16x4x8xf32> to vector<64x8xf32>
    %305 = arith.truncf %304 : vector<64x8xf32> to vector<64x8xbf16>
    %306 = vector.extract_strided_slice %203 {offsets = [24, 0], sizes = [8, 32], strides = [1, 1]} : vector<32x32xbf16> to vector<8x32xbf16>
    %cst_108 = arith.constant dense<0.000000e+00> : vector<64x32xf32>
    %307 = tpu.matmul %305, %306, %cst_108 {dimension_numbers = #tpu.dot_dimension_numbers<[1], [0], [0], [1], [0, 0, 1, 1], [], []>} : vector<64x8xbf16>, vector<8x32xbf16>, vector<64x32xf32> -> vector<64x32xf32>
    %308 = arith.addf %282, %307 : vector<64x32xf32>
    %c1_109 = arith.constant 1 : index
    %c0_110 = arith.constant 0 : index
    %c0_111 = arith.constant 0 : index
    %309 = vector.load %arg5[%c1_109, %c0_110, %c0_111] : memref<2x1x32xf32, #tpu.memory_space<vmem>>, vector<1x1x32xf32>
    %310 = vector.shape_cast %309 : vector<1x1x32xf32> to vector<1x32xf32>
    %311 = vector.broadcast %310 : vector<1x32xf32> to vector<64x32xf32>
    %312 = arith.addf %308, %311 : vector<64x32xf32>
    %313 = arith.addf %192, %312 : vector<64x32xf32>
    %cst_112 = arith.constant dense<0.000000e+00> : vector<64xf32>
    %314 = vector.multi_reduction <add>, %313, %cst_112 [1] : vector<64x32xf32> to vector<64xf32>
    %315 = vector.shape_cast %314 : vector<64xf32> to vector<64x1xf32>
    %cst_113 = arith.constant 3.200000e+01 : f32
    %316 = vector.broadcast %cst_113 : f32 to vector<64x1xf32>
    %317 = arith.divf %315, %316 : vector<64x1xf32>
    %318 = vector.broadcast %317 : vector<64x1xf32> to vector<64x32xf32>
    %319 = arith.subf %313, %318 : vector<64x32xf32>
    %320 = arith.mulf %319, %319 : vector<64x32xf32>
    %cst_114 = arith.constant dense<0.000000e+00> : vector<64xf32>
    %321 = vector.multi_reduction <add>, %320, %cst_114 [1] : vector<64x32xf32> to vector<64xf32>
    %322 = vector.shape_cast %321 : vector<64xf32> to vector<64x1xf32>
    %cst_115 = arith.constant 3.200000e+01 : f32
    %323 = vector.broadcast %cst_115 : f32 to vector<64x1xf32>
    %324 = arith.divf %322, %323 : vector<64x1xf32>
    %325 = vector.broadcast %317 : vector<64x1xf32> to vector<64x32xf32>
    %326 = arith.subf %313, %325 : vector<64x32xf32>
    %cst_116 = arith.constant 9.99999974E-6 : f32
    %327 = vector.broadcast %cst_116 : f32 to vector<64x1xf32>
    %328 = arith.addf %324, %327 : vector<64x1xf32>
    %329 = math.rsqrt %328 : vector<64x1xf32>
    %330 = vector.broadcast %329 : vector<64x1xf32> to vector<64x32xf32>
    %331 = arith.mulf %326, %330 : vector<64x32xf32>
    %c1_117 = arith.constant 1 : index
    %c0_118 = arith.constant 0 : index
    %c0_119 = arith.constant 0 : index
    %332 = vector.load %arg6[%c1_117, %c0_118, %c0_119] : memref<2x1x32xf32, #tpu.memory_space<vmem>>, vector<1x1x32xf32>
    %333 = vector.shape_cast %332 : vector<1x1x32xf32> to vector<1x32xf32>
    %334 = vector.broadcast %333 : vector<1x32xf32> to vector<64x32xf32>
    %335 = arith.mulf %331, %334 : vector<64x32xf32>
    %c1_120 = arith.constant 1 : index
    %c0_121 = arith.constant 0 : index
    %c0_122 = arith.constant 0 : index
    %336 = vector.load %arg7[%c1_120, %c0_121, %c0_122] : memref<2x1x32xf32, #tpu.memory_space<vmem>>, vector<1x1x32xf32>
    %337 = vector.shape_cast %336 : vector<1x1x32xf32> to vector<1x32xf32>
    %338 = vector.broadcast %337 : vector<1x32xf32> to vector<64x32xf32>
    %339 = arith.addf %335, %338 : vector<64x32xf32>
    %340 = arith.truncf %339 : vector<64x32xf32> to vector<64x32xbf16>
    %c1_123 = arith.constant 1 : index
    %c0_124 = arith.constant 0 : index
    %c0_125 = arith.constant 0 : index
    %341 = vector.load %arg10[%c1_123, %c0_124, %c0_125] : memref<2x32x16xbf16, #tpu.memory_space<vmem>>, vector<1x32x16xbf16>
    %342 = vector.shape_cast %341 : vector<1x32x16xbf16> to vector<32x16xbf16>
    %cst_126 = arith.constant dense<0.000000e+00> : vector<64x16xf32>
    %343 = tpu.matmul %340, %342, %cst_126 {dimension_numbers = #tpu.dot_dimension_numbers<[1], [0], [0], [1], [0, 0, 1, 1], [], []>} : vector<64x32xbf16>, vector<32x16xbf16>, vector<64x16xf32> -> vector<64x16xf32>
    %c1_127 = arith.constant 1 : index
    %c0_128 = arith.constant 0 : index
    %c0_129 = arith.constant 0 : index
    %344 = vector.load %arg11[%c1_127, %c0_128, %c0_129] : memref<2x1x16xf32, #tpu.memory_space<vmem>>, vector<1x1x16xf32>
    %345 = vector.shape_cast %344 : vector<1x1x16xf32> to vector<1x16xf32>
    %346 = vector.broadcast %345 : vector<1x16xf32> to vector<64x16xf32>
    %347 = arith.addf %343, %346 : vector<64x16xf32>
    %cst_130 = arith.constant 0.000000e+00 : f32
    %348 = vector.broadcast %cst_130 : f32 to vector<64x16xf32>
    %349 = arith.maximumf %347, %348 : vector<64x16xf32>
    %350 = arith.truncf %349 : vector<64x16xf32> to vector<64x16xbf16>
    %c1_131 = arith.constant 1 : index
    %c0_132 = arith.constant 0 : index
    %c0_133 = arith.constant 0 : index
    %351 = vector.load %arg12[%c1_131, %c0_132, %c0_133] : memref<2x16x32xbf16, #tpu.memory_space<vmem>>, vector<1x16x32xbf16>
    %352 = vector.shape_cast %351 : vector<1x16x32xbf16> to vector<16x32xbf16>
    %cst_134 = arith.constant dense<0.000000e+00> : vector<64x32xf32>
    %353 = tpu.matmul %350, %352, %cst_134 {dimension_numbers = #tpu.dot_dimension_numbers<[1], [0], [0], [1], [0, 0, 1, 1], [], []>} : vector<64x16xbf16>, vector<16x32xbf16>, vector<64x32xf32> -> vector<64x32xf32>
    %c1_135 = arith.constant 1 : index
    %c0_136 = arith.constant 0 : index
    %c0_137 = arith.constant 0 : index
    %354 = vector.load %arg13[%c1_135, %c0_136, %c0_137] : memref<2x1x32xf32, #tpu.memory_space<vmem>>, vector<1x1x32xf32>
    %355 = vector.shape_cast %354 : vector<1x1x32xf32> to vector<1x32xf32>
    %356 = vector.broadcast %355 : vector<1x32xf32> to vector<64x32xf32>
    %357 = arith.addf %353, %356 : vector<64x32xf32>
    %358 = arith.addf %339, %357 : vector<64x32xf32>
    %cst_138 = arith.constant dense<0.000000e+00> : vector<64xf32>
    %359 = vector.multi_reduction <add>, %358, %cst_138 [1] : vector<64x32xf32> to vector<64xf32>
    %360 = vector.shape_cast %359 : vector<64xf32> to vector<64x1xf32>
    %cst_139 = arith.constant 3.200000e+01 : f32
    %361 = vector.broadcast %cst_139 : f32 to vector<64x1xf32>
    %362 = arith.divf %360, %361 : vector<64x1xf32>
    %363 = vector.broadcast %362 : vector<64x1xf32> to vector<64x32xf32>
    %364 = arith.subf %358, %363 : vector<64x32xf32>
    %365 = arith.mulf %364, %364 : vector<64x32xf32>
    %cst_140 = arith.constant dense<0.000000e+00> : vector<64xf32>
    %366 = vector.multi_reduction <add>, %365, %cst_140 [1] : vector<64x32xf32> to vector<64xf32>
    %367 = vector.shape_cast %366 : vector<64xf32> to vector<64x1xf32>
    %cst_141 = arith.constant 3.200000e+01 : f32
    %368 = vector.broadcast %cst_141 : f32 to vector<64x1xf32>
    %369 = arith.divf %367, %368 : vector<64x1xf32>
    %370 = vector.broadcast %362 : vector<64x1xf32> to vector<64x32xf32>
    %371 = arith.subf %358, %370 : vector<64x32xf32>
    %cst_142 = arith.constant 9.99999974E-6 : f32
    %372 = vector.broadcast %cst_142 : f32 to vector<64x1xf32>
    %373 = arith.addf %369, %372 : vector<64x1xf32>
    %374 = math.rsqrt %373 : vector<64x1xf32>
    %375 = vector.broadcast %374 : vector<64x1xf32> to vector<64x32xf32>
    %376 = arith.mulf %371, %375 : vector<64x32xf32>
    %c1_143 = arith.constant 1 : index
    %c0_144 = arith.constant 0 : index
    %c0_145 = arith.constant 0 : index
    %377 = vector.load %arg8[%c1_143, %c0_144, %c0_145] : memref<2x1x32xf32, #tpu.memory_space<vmem>>, vector<1x1x32xf32>
    %378 = vector.shape_cast %377 : vector<1x1x32xf32> to vector<1x32xf32>
    %379 = vector.broadcast %378 : vector<1x32xf32> to vector<64x32xf32>
    %380 = arith.mulf %376, %379 : vector<64x32xf32>
    %c1_146 = arith.constant 1 : index
    %c0_147 = arith.constant 0 : index
    %c0_148 = arith.constant 0 : index
    %381 = vector.load %arg9[%c1_146, %c0_147, %c0_148] : memref<2x1x32xf32, #tpu.memory_space<vmem>>, vector<1x1x32xf32>
    %382 = vector.shape_cast %381 : vector<1x1x32xf32> to vector<1x32xf32>
    %383 = vector.broadcast %382 : vector<1x32xf32> to vector<64x32xf32>
    %384 = arith.addf %380, %383 : vector<64x32xf32>
    %385 = vector.extract_strided_slice %384 {offsets = [60, 0], sizes = [1, 32], strides = [1, 1]} : vector<64x32xf32> to vector<1x32xf32>
    %386 = arith.truncf %385 : vector<1x32xf32> to vector<1x32xbf16>
    %c0_149 = arith.constant 0 : index
    %c0_150 = arith.constant 0 : index
    %387 = vector.load %arg14[%c0_149, %c0_150] : memref<32x8xbf16, #tpu.memory_space<vmem>>, vector<32x8xbf16>
    %cst_151 = arith.constant dense<0.000000e+00> : vector<1x8xf32>
    %388 = tpu.matmul %386, %387, %cst_151 {dimension_numbers = #tpu.dot_dimension_numbers<[1], [0], [0], [1], [0, 0, 1, 1], [], []>} : vector<1x32xbf16>, vector<32x8xbf16>, vector<1x8xf32> -> vector<1x8xf32>
    %c0_152 = arith.constant 0 : index
    %c0_153 = arith.constant 0 : index
    %389 = vector.load %arg15[%c0_152, %c0_153] : memref<1x8xf32, #tpu.memory_space<vmem>>, vector<1x8xf32>
    %390 = arith.addf %388, %389 : vector<1x8xf32>
    %c0_154 = arith.constant 0 : index
    %c0_155 = arith.constant 0 : index
    %391 = vector.load %arg16[%c0_154, %c0_155] : memref<1x8xf32, #tpu.memory_space<vmem>>, vector<1x8xf32>
    tpu.vector_store %arg16[%c0_154, %c0_155], %390 {strides = array<i32>} : memref<1x8xf32, #tpu.memory_space<vmem>>, vector<1x8xf32>,
    return
  }
  func.func @transform_0(%arg0: i32) -> (i32, i32) {
    %c0_i32 = arith.constant 0 : i32
    %c0_i32_0 = arith.constant 0 : i32
    %c0_i32_1 = arith.constant 0 : i32
    return %c0_i32, %c0_i32_0 : i32, i32
  }
  func.func @transform_1(%arg0: i32) -> (i32, i32, i32) {
    %c0_i32 = arith.constant 0 : i32
    %c0_i32_0 = arith.constant 0 : i32
    %c0_i32_1 = arith.constant 0 : i32
    %c0_i32_2 = arith.constant 0 : i32
    return %c0_i32, %c0_i32_0, %c0_i32_1 : i32, i32, i32
  }
  func.func @transform_2(%arg0: i32) -> (i32, i32, i32) {
    %c0_i32 = arith.constant 0 : i32
    %c0_i32_0 = arith.constant 0 : i32
    %c0_i32_1 = arith.constant 0 : i32
    %c0_i32_2 = arith.constant 0 : i32
    return %c0_i32, %c0_i32_0, %c0_i32_1 : i32, i32, i32
  }
  func.func @transform_3(%arg0: i32) -> (i32, i32, i32) {
    %c0_i32 = arith.constant 0 : i32
    %c0_i32_0 = arith.constant 0 : i32
    %c0_i32_1 = arith.constant 0 : i32
    %c0_i32_2 = arith.constant 0 : i32
    return %c0_i32, %c0_i32_0, %c0_i32_1 : i32, i32, i32
  }
  func.func @transform_4(%arg0: i32) -> (i32, i32, i32) {
    %c0_i32 = arith.constant 0 : i32
    %c0_i32_0 = arith.constant 0 : i32
    %c0_i32_1 = arith.constant 0 : i32
    %c0_i32_2 = arith.constant 0 : i32
    return %c0_i32, %c0_i32_0, %c0_i32_1 : i32, i32, i32
  }
  func.func @transform_5(%arg0: i32) -> (i32, i32, i32) {
    %c0_i32 = arith.constant 0 : i32
    %c0_i32_0 = arith.constant 0 : i32
    %c0_i32_1 = arith.constant 0 : i32
    %c0_i32_2 = arith.constant 0 : i32
    return %c0_i32, %c0_i32_0, %c0_i32_1 : i32, i32, i32
  }
  func.func @transform_6(%arg0: i32) -> (i32, i32, i32) {
    %c0_i32 = arith.constant 0 : i32
    %c0_i32_0 = arith.constant 0 : i32
    %c0_i32_1 = arith.constant 0 : i32
    %c0_i32_2 = arith.constant 0 : i32
    return %c0_i32, %c0_i32_0, %c0_i32_1 : i32, i32, i32
  }
  func.func @transform_7(%arg0: i32) -> (i32, i32, i32) {
    %c0_i32 = arith.constant 0 : i32
    %c0_i32_0 = arith.constant 0 : i32
    %c0_i32_1 = arith.constant 0 : i32
    %c0_i32_2 = arith.constant 0 : i32
    return %c0_i32, %c0_i32_0, %c0_i32_1 : i32, i32, i32
  }
  func.func @transform_8(%arg0: i32) -> (i32, i32, i32) {
    %c0_i32 = arith.constant 0 : i32
    %c0_i32_0 = arith.constant 0 : i32
    %c0_i32_1 = arith.constant 0 : i32
    %c0_i32_2 = arith.constant 0 : i32
    return %c0_i32, %c0_i32_0, %c0_i32_1 : i32, i32, i32
  }
  func.func @transform_9(%arg0: i32) -> (i32, i32, i32) {
    %c0_i32 = arith.constant 0 : i32
    %c0_i32_0 = arith.constant 0 : i32
    %c0_i32_1 = arith.constant 0 : i32
    %c0_i32_2 = arith.constant 0 : i32
    return %c0_i32, %c0_i32_0, %c0_i32_1 : i32, i32, i32
  }
  func.func @transform_10(%arg0: i32) -> (i32, i32, i32) {
    %c0_i32 = arith.constant 0 : i32
    %c0_i32_0 = arith.constant 0 : i32
    %c0_i32_1 = arith.constant 0 : i32
    %c0_i32_2 = arith.constant 0 : i32
    return %c0_i32, %c0_i32_0, %c0_i32_1 : i32, i32, i32
  }
  func.func @transform_11(%arg0: i32) -> (i32, i32, i32) {
    %c0_i32 = arith.constant 0 : i32
    %c0_i32_0 = arith.constant 0 : i32
    %c0_i32_1 = arith.constant 0 : i32
    %c0_i32_2 = arith.constant 0 : i32
    return %c0_i32, %c0_i32_0, %c0_i32_1 : i32, i32, i32
  }
  func.func @transform_12(%arg0: i32) -> (i32, i32, i32) {
    %c0_i32 = arith.constant 0 : i32
    %c0_i32_0 = arith.constant 0 : i32
    %c0_i32_1 = arith.constant 0 : i32
    %c0_i32_2 = arith.constant 0 : i32
    return %c0_i32, %c0_i32_0, %c0_i32_1 : i32, i32, i32
  }
  func.func @transform_13(%arg0: i32) -> (i32, i32) {
    %c0_i32 = arith.constant 0 : i32
    %c0_i32_0 = arith.constant 0 : i32
    %c0_i32_1 = arith.constant 0 : i32
    return %c0_i32, %c0_i32_0 : i32, i32
  }
  func.func @transform_14(%arg0: i32) -> (i32, i32) {
    %c0_i32 = arith.constant 0 : i32
    %c0_i32_0 = arith.constant 0 : i32
    %c0_i32_1 = arith.constant 0 : i32
    return %c0_i32, %c0_i32_0 : i32, i32
  }
  func.func @transform_15(%arg0: i32) -> (i32, i32) {
    %c0_i32 = arith.constant 0 : i32
    %c0_i32_0 = arith.constant 0 : i32
    %c0_i32_1 = arith.constant 0 : i32
    return %c0_i32, %c0_i32_0 : i32, i32
  }
}

</mosaic_0001>

<bundles_post_ra>
// kernel: tpu_custom_call.1
= control target key start
LH: loop header
LB: loop body
LE: loop exit
PB: predicated region body
PF: predicated region fallthrough
CT: control target
= control target key end

     0   :  { %vm84_vm0 = vcmask 261120   ;;  %s14295_s0 = inlined_call_operand.vmem [shape: f32[64,32], index: 0, kind: input, shape index: {}]   ;;  %s14296_s1 = inlined_call_operand.vmem [shape: bf16[2,32,96], index: 1, kind: input, shape index: {}]   ;;  %s14297_s2 = inlined_call_operand.vmem [shape: f32[2,1,96], index: 2, kind: input, shape index: {}]   ;;  %s14298_s3 = inlined_call_operand.vmem [shape: bf16[2,32,32], index: 3, kind: input, shape index: {}]   ;;  %s14299_s4 = inlined_call_operand.vmem [shape: f32[2,1,32], index: 4, kind: input, shape index: {}]   ;;  %s14300_s5 = inlined_call_operand.vmem [shape: f32[2,1,32], index: 5, kind: input, shape index: {}]   ;;  %s14301_s6 = inlined_call_operand.vmem [shape: f32[2,1,32], index: 6, kind: input, shape index: {}]   ;;  %s14302_s7 = inlined_call_operand.vmem [shape: f32[2,1,32], index: 7, kind: input, shape index: {}]   ;;  %s14303_s8 = inlined_call_operand.vmem [shape: f32[2,1,32], index: 8, kind: input, shape index: {}]   ;;  %s14304_s9 = inlined_call_operand.vmem [shape: bf16[2,32,16], index: 9, kind: input, shape index: {}]   ;;  %s14305_s10 = inlined_call_operand.vmem [shape: f32[2,1,16], index: 10, kind: input, shape index: {}]   ;;  %s14306_s11 = inlined_call_operand.vmem [shape: bf16[2,16,32], index: 11, kind: input, shape index: {}]   ;;  %s14307_s12 = inlined_call_operand.vmem [shape: f32[2,1,32], index: 12, kind: input, shape index: {}]   ;;  %s14308_s13 = inlined_call_operand.vmem [shape: bf16[32,8], index: 13, kind: input, shape index: {}]   ;;  %s14309_s14 = inlined_call_operand.vmem [shape: f32[1,8], index: 14, kind: input, shape index: {}]   ;;  %s14310_s15 = inlined_call_operand.hbm [shape: f32[1,8], index: 15, kind: output, shape index: {}]  }
   0x1   :  { %v9860_v0 = vld [vmem:[%s14296_s1 + $0x8] sm:$0xff]  ;;  %v9859_v1 = vld [vmem:[%s14296_s1] sm:$0xff] }
   0x2   :  { %103 = vmatpush.bf16.msra.mxu0 %v9860_v0  ;;  %v52_v2 = vld [vmem:[%s14295_s0] sm:$0xff]  ;;  %v53_v3 = vld [vmem:[%s14295_s0 + $0x8] sm:$0xff] }
   0x3   :  { %v64_v4 = vpack.c.bf16 %v53_v3, %v52_v2 }
   0x6   :  { %104 = vmatpush.bf16.msra.mxu0 %v9859_v1 }
   0x7   :  { %20 = vsyncpa [#allocation3], 0  ;;  %v54_v5 = vld [vmem:[%s14295_s0 + $0x10] sm:$0xff]  ;;  %v55_v6 = vld [vmem:[%s14295_s0 + $0x18] sm:$0xff]  ;;  %s10498_s25 = smov 96   ;;  %s10499_s26 = smov 64  }
   0x8   :  { %v65_v7 = vpack.c.bf16 %v55_v6, %v54_v5  ;;  %v56_v8 = vld [vmem:[%s14295_s0 + $0x20] sm:$0xff]  ;;  %v57_v9 = vld [vmem:[%s14295_s0 + $0x28] sm:$0xff]  ;;  %v58_v11 = vld [vmem:[%s14295_s0 + $0x30] sm:$0xff]  ;;  %s10500_s27 = smov 88   ;;  %s10501_s28 = smov 120   ;;  %vm175_vm1 = vcmask 64512  }
   0x9   :  { %9484 = vmatmul.msk.bf16.vlgmr.msra.gmra.mxu0 %vm84_vm0, %v64_v4  ;;  %v66_v10 = vpack.c.bf16 %v57_v9, %v56_v8  ;;  %v59_v12 = vld [vmem:[%s14295_s0 + $0x38] sm:$0xff]  ;;  %v10628_v14 = vld [vmem:[%s14297_s2] ss:$0 sm:$0xff]  ;;  %vm770_vm2 = vcmask 1041408   ;;  %vm571_vm3 = vcmask 27648   ;;  %vm766_vm4 = vcmask 31744  }
   0xa   :  { %v67_v13 = vpack.c.bf16 %v59_v12, %v58_v11  ;;  %s10502_s29 = smov 56   ;;  %s10503_s30 = smov 112   ;;  %vm2144_vm5 = vcmask 1043456  }
   0xb   :  { %s10504_s16 = smov 80   ;;  %s10505_s17 = smov 48  }
   0xc   :  { %s10506_s22 = smov 72   ;;  %s10507_s23 = smov 104  }
   0xd   :  { %s10508_s24 = smov 40  }
  0x19   :  { %9485 = vmatmul.msk.bf16.gmra.mxu0 %vm84_vm0, %v65_v7 }
  0x29   :  { %9486 = vmatmul.msk.bf16.gmra.mxu0 %vm84_vm0, %v66_v10 }
  0x39   :  { %9487 = vmatmul.msk.bf16.gmra.mxu0 %vm84_vm0, %v67_v13 }
  0x86   :  { %v106_v15 = vpop.f32.mrf.mxu0 }
  0x87   :  { %v107_v16 = vadd.f32 %v10628_v14, %v106_v15 }
  0x89   :  { %v134_v17 = vrot.slane %v107_v16, 4  ;;  %v10631_v18 = vpack.c.bf16 %v107_v16, %v107_v16 }
  0x8b   :  { %v10633_v19 = vpack.c.bf16 %v134_v17, %v134_v17  ;;  %v171_v20 = vunpack.c.l.b16 %v10631_v18 }
  0x8d   :  { %v10636_v21 = vpack.c.b16 %v171_v20, %v171_v20  ;;  %v196_v22 = vunpack.c.l.b16 %v10633_v19 }
  0x8e   :  { %v108_v23 = vpop.f32.mrf.mxu0 }
  0x8f   :  { %v10639_v24 = vpack.c.b16 %v196_v22, %v196_v22  ;;  %v109_v25 = vadd.f32 %v10628_v14, %v108_v23  ;;  %173 = vrot.lane.b32.xlu0 %v10636_v21, %s10498_s25 }
  0x91   :  { %v135_v26 = vrot.slane %v109_v25, 4  ;;  %v10644_v27 = vpack.c.bf16 %v109_v25, %v109_v25  ;;  %198 = vrot.lane.b32.xlu1 %v10639_v24, %s10498_s25 }
  0x93   :  { %v220_v28 = vunpack.c.l.b16 %v10644_v27  ;;  %v10649_v29 = vpack.c.bf16 %v135_v26, %v135_v26 }
  0x95   :  { %v10651_v30 = vpack.c.b16 %v220_v28, %v220_v28  ;;  %v244_v33 = vunpack.c.l.b16 %v10649_v29 }
  0x96   :  { %v111_v31 = vpop.f32.mrf.mxu0 }
  0x97   :  { %v112_v32 = vadd.f32 %v10628_v14, %v111_v31  ;;  %222 = vrot.lane.b32.xlu0 %v10651_v30, %s10498_s25  ;;  %v10662_v38 = vpack.c.b16 %v244_v33, %v244_v33 }
  0x99   :  { %v136_v34 = vrot.slane %v112_v32, 4  ;;  %v10657_v35 = vpack.c.bf16 %v112_v32, %v112_v32 }
  0x9b   :  { %v10659_v36 = vpack.c.bf16 %v136_v34, %v136_v34  ;;  %v268_v37 = vunpack.c.l.b16 %v10657_v35 }
  0x9d   :  { %v10664_v39 = vpack.c.b16 %v268_v37, %v268_v37  ;;  %v292_v40 = vunpack.c.l.b16 %v10659_v36 }
  0x9e   :  { %v113_v41 = vpop.f32.mrf.mxu0 }
  0x9f   :  { %v10667_v42 = vpack.c.b16 %v292_v40, %v292_v40  ;;  %v114_v43 = vadd.f32 %v10628_v14, %v113_v41  ;;  %246 = vrot.lane.b32.xlu0 %v10662_v38, %s10498_s25  ;;  %270 = vrot.lane.b32.xlu2 %v10664_v39, %s10498_s25 }
  0xa1   :  { %v137_v44 = vrot.slane %v114_v43, 4  ;;  %v10674_v45 = vpack.c.bf16 %v114_v43, %v114_v43  ;;  %294 = vrot.lane.b32.xlu1 %v10667_v42, %s10498_s25 }
  0xa3   :  { %v10678_v46 = vpack.c.bf16 %v137_v44, %v137_v44  ;;  %v316_v47 = vunpack.c.l.b16 %v10674_v45 }
  0xa5   :  { %v10681_v48 = vpack.c.b16 %v316_v47, %v316_v47  ;;  %v340_v49 = vunpack.c.l.b16 %v10678_v46 }
  0xa6   :  { %v116_v50 = vpop.f32.mrf.mxu0 }
  0xa7   :  { %v10684_v51 = vpack.c.b16 %v340_v49, %v340_v49  ;;  %v117_v52 = vadd.f32 %v10628_v14, %v116_v50  ;;  %318 = vrot.lane.b32.xlu0 %v10681_v48, %s10498_s25 }
  0xa9   :  { %v10689_v53 = vpack.c.bf16 %v117_v52, %v117_v52  ;;  %342 = vrot.lane.b32.xlu1 %v10684_v51, %s10498_s25  ;;  %v138_v3 = vrot.slane %v117_v52, 4 }
  0xab   :  { %v364_v54 = vunpack.c.l.b16 %v10689_v53  ;;  %v10717_v6 = vpack.c.bf16 %v138_v3, %v138_v3 }
  0xad   :  { %v10694_v55 = vpack.c.b16 %v364_v54, %v364_v54  ;;  %v388_v11 = vunpack.c.l.b16 %v10717_v6 }
  0xae   :  { %v118_v56 = vpop.f32.mrf.mxu0 }
  0xaf   :  { %v119_v57 = vadd.f32 %v10628_v14, %v118_v56  ;;  %366 = vrot.lane.b32.xlu2 %v10694_v55, %s10498_s25  ;;  %v10734_v20 = vpack.c.b16 %v388_v11, %v388_v11 }
  0xb1   :  { %v139_v58 = vrot.slane %v119_v57, 4  ;;  %v10699_v59 = vpack.c.bf16 %v119_v57, %v119_v57 }
  0xb3   :  { %v10701_v60 = vpack.c.bf16 %v139_v58, %v139_v58  ;;  %v412_v61 = vunpack.c.l.b16 %v10699_v59 }
  0xb5   :  { %v10704_v62 = vpack.c.b16 %v412_v61, %v412_v61  ;;  %v436_v63 = vunpack.c.l.b16 %v10701_v60 }
  0xb6   :  { %v121_v0 = vpop.f32.mrf.mxu0 }
  0xb7   :  { %v10707_v1 = vpack.c.b16 %v436_v63, %v436_v63  ;;  %v122_v2 = vadd.f32 %v10628_v14, %v121_v0  ;;  %414 = vrot.lane.b32.xlu1 %v10704_v62, %s10498_s25 }
  0xb9   :  { %v10712_v4 = vpack.c.bf16 %v122_v2, %v122_v2  ;;  %438 = vrot.lane.b32.xlu2 %v10707_v1, %s10498_s25  ;;  %v140_v9 = vrot.slane %v122_v2, 4 }
  0xbb   :  { %v460_v5 = vunpack.c.l.b16 %v10712_v4  ;;  %v10729_v15 = vpack.c.bf16 %v140_v9, %v140_v9 }
  0xbd   :  { %v10719_v7 = vpack.c.b16 %v460_v5, %v460_v5  ;;  %v484_v22 = vunpack.c.l.b16 %v10729_v15 }
  0xbe   :  { %v123_v8 = vpop.f32.mrf.mxu0 }
  0xbf   :  { %v124_v10 = vadd.f32 %v10628_v14, %v123_v8  ;;  %829 = vrot.lane.b32.xlu1 %v10662_v38, %s10499_s26  ;;  %v10746_v25 = vpack.c.b16 %v484_v22, %v484_v22 }
  0xc1   :  { %v141_v12 = vrot.slane %v124_v10, 4  ;;  %v10725_v13 = vpack.c.bf16 %v124_v10, %v124_v10  ;;  %462 = vrot.lane.b32.xlu2 %v10719_v7, %s10498_s25 }
  0xc3   :  { %v10731_v16 = vpack.c.bf16 %v141_v12, %v141_v12  ;;  %v508_v17 = vunpack.c.l.b16 %v10725_v13 }
  0xc5   :  { %v10736_v14 = vpack.c.b16 %v508_v17, %v508_v17  ;;  %v532_v23 = vunpack.c.l.b16 %v10731_v16 }
  0xc7   :  { %510 = vrot.lane.b32.xlu0 %v10736_v14, %s10498_s25  ;;  %764 = vrot.lane.b32.xlu1 %v10636_v21, %s10499_s26  ;;  %v10748_v26 = vpack.c.b16 %v532_v23, %v532_v23 }
  0xc9   :  { %390 = vrot.lane.b32.xlu2 %v10734_v20, %s10498_s25 }
  0xcf   :  { %486 = vrot.lane.b32.xlu0 %v10746_v25, %s10498_s25  ;;  %534 = vrot.lane.b32.xlu1 %v10748_v26, %s10498_s25 }
  0xd1   :  { %787 = vrot.lane.b32.xlu2 %v10639_v24, %s10499_s26 }
  0xd7   :  { %808 = vrot.lane.b32.xlu0 %v10651_v30, %s10499_s26  ;;  %892 = vrot.lane.b32.xlu1 %v10681_v48, %s10499_s26 }
  0xd9   :  { %976 = vrot.lane.b32.xlu2 %v10704_v62, %s10499_s26 }
  0xdf   :  { %850 = vrot.lane.b32.xlu0 %v10664_v39, %s10499_s26  ;;  %913 = vrot.lane.b32.xlu1 %v10684_v51, %s10499_s26 }
  0xe1   :  { %1060 = vrot.lane.b32.xlu2 %v10736_v14, %s10499_s26 }
  0xe7   :  { %997 = vrot.lane.b32.xlu0 %v10707_v1, %s10499_s26  ;;  %871 = vrot.lane.b32.xlu1 %v10667_v42, %s10499_s26 }
  0xe9   :  { %1018 = vrot.lane.b32.xlu2 %v10719_v7, %s10499_s26 }
  0xef   :  { %934 = vrot.lane.b32.xlu0 %v10694_v55, %s10499_s26  ;;  %955 = vrot.lane.b32.xlu1 %v10734_v20, %s10499_s26 }
  0xf1   :  { %1039 = vrot.lane.b32.xlu2 %v10746_v25, %s10499_s26 }
  0xf7   :  { %1186 = vrot.lane.b32.xlu0 %v10639_v24, %s10500_s27  ;;  %1230 = vrot.lane.b32.xlu1 %v10662_v38, %s10501_s28 }
  0xf9   :  { %1209 = vrot.lane.b32.xlu2 %v10651_v30, %s10500_s27  ;;  %v271_v28 = vpop.permute.xlu2 %270 }
  0xfa   :  { %v276_v34 = vsel %vm175_vm1, %v271_v28, 0 }
  0xff   :  { %1161 = vrot.lane.b32.xlu0 %v10636_v21, %s10501_s28 }
 0x101   :  { %v174_v31 = vpop.permute.xlu0 %173  ;;  %1232 = vrot.lane.b32.xlu2 %v10662_v38, %s10500_s27 }
 0x102   :  { %v180_v32 = vsel %vm175_vm1, %v174_v31, 0 }
 0x103   :  { %189 = vmatpush.bf16.xpose.msra.mxu3 %v180_v32  ;;  %v199_v33 = vpop.permute.xlu1 %198 }
 0x104   :  { %v204_v37 = vsel %vm175_vm1, %v199_v33, 0 }
 0x105   :  { %213 = vmatpush.bf16.xpose.msra.mxu2 %v204_v37 }
 0x107   :  { %1081 = vrot.lane.b32.xlu0 %v10748_v26, %s10499_s26 }
 0x109   :  { %v223_v40 = vpop.permute.xlu0 %222  ;;  %1207 = vrot.lane.b32.xlu2 %v10651_v30, %s10501_s28  ;;  %v367_v41 = vpop.permute.xlu2 %366 }
 0x10a   :  { %9488 = vmatmul.msk.bf16.vlgmr.msra.gmra.mxu3 %vm175_vm1, %v10631_v18  ;;  %v228_v43 = vsel %vm175_vm1, %v223_v40, 0  ;;  %v372_v18 = vsel %vm175_vm1, %v367_v41, 0 }
 0x10b   :  { %237 = vmatpush.bf16.xpose.msrb.mxu3 %v228_v43 }
 0x10c   :  { %9489 = vmatmul.msk.bf16.vlgmr.msra.gmra.mxu2 %vm175_vm1, %v10633_v19 }
 0x10d   :  { %285 = vmatpush.bf16.xpose.msrb.mxu2 %v276_v34 }
 0x111   :  { %v247_v44 = vpop.permute.xlu0 %246  ;;  %1163 = vrot.lane.b32.xlu2 %v10636_v21, %s10500_s27 }
 0x112   :  { %v252_v47 = vsel %vm175_vm1, %v247_v44, 0 }
 0x113   :  { %v439_v49 = vpop.permute.xlu2 %438  ;;  %261 = vmatpush.bf16.xpose.msra.mxu1 %v252_v47  ;;  %v295_v50 = vpop.permute.xlu1 %294 }
 0x114   :  { %v300_v52 = vsel %vm175_vm1, %v295_v50, 0 }
 0x115   :  { %309 = vmatpush.bf16.xpose.msra.mxu3 %v300_v52 }
 0x119   :  { %1301 = vrot.lane.b32.xlu2 %v10681_v48, %s10500_s27  ;;  %v319_v54 = vpop.permute.xlu0 %318 }
 0x11a   :  { %9490 = vmatmul.msk.bf16.vlgmr.msrb.gmra.mxu3 %vm175_vm1, %v10644_v27  ;;  %9491 = vmatmul.msk.bf16.vlgmr.msra.gmra.mxu1 %vm175_vm1, %v10649_v29  ;;  %v324_v19 = vsel %vm175_vm1, %v319_v54, 0  ;;  %v444_v29 = vsel %vm175_vm1, %v439_v49, 0 }
 0x11b   :  { %v463_v56 = vpop.permute.xlu2 %462  ;;  %v343_v57 = vpop.permute.xlu1 %342  ;;  %333 = vmatpush.bf16.xpose.msrb.mxu1 %v324_v19 }
 0x11c   :  { %9492 = vmatmul.msk.bf16.vlgmr.msrb.gmra.mxu2 %vm175_vm1, %v10657_v35  ;;  %v348_v58 = vsel %vm175_vm1, %v343_v57, 0  ;;  %v468_v2 = vsel %vm175_vm1, %v463_v56, 0 }
 0x11d   :  { %381 = vmatpush.bf16.xpose.msrb.mxu3 %v372_v18  ;;  %357 = vmatpush.bf16.xpose.msra.mxu2 %v348_v58 }
 0x121   :  { %1324 = vrot.lane.b32.xlu2 %v10684_v51, %s10500_s27 }
 0x123   :  { %v391_v61 = vpop.permute.xlu2 %390 }
 0x124   :  { %v396_v27 = vsel %vm175_vm1, %v391_v61, 0 }
 0x125   :  { %405 = vmatpush.bf16.xpose.msra.mxu1 %v396_v27 }
 0x129   :  { %v415_v63 = vpop.permute.xlu1 %414 }
 0x12a   :  { %v420_v0 = vsel %vm175_vm1, %v415_v63, 0  ;;  %9493 = vmatmul.msk.bf16.vlgmr.msra.gmra.mxu3 %vm175_vm1, %v10659_v36  ;;  %9494 = vmatmul.msk.bf16.vlgmr.msrb.gmra.mxu1 %vm175_vm1, %v10674_v45 }
 0x12b   :  { %429 = vmatpush.bf16.xpose.msrb.mxu2 %v420_v0  ;;  %453 = vmatpush.bf16.xpose.msra.mxu3 %v444_v29  ;;  %v788_v45 = vpop.permute.xlu2 %787 }
 0x12c   :  { %9495 = vmatmul.msk.bf16.vlgmr.msra.gmra.mxu2 %vm175_vm1, %v10678_v46  ;;  %v793_v11 = vsel %vm770_vm2, %v788_v45, 0 }
 0x131   :  { %v830_v35 = vpop.permute.xlu1 %829 }
 0x132   :  { %v835_v32 = vsel %vm770_vm2, %v830_v35, 0 }
 0x133   :  { %v10876_v57 = vpop.permute.xlu2 %976 }
 0x139   :  { %v511_v3 = vpop.permute.xlu0 %510  ;;  %v765_v5 = vpop.permute.xlu1 %764 }
 0x13a   :  { %v516_v8 = vsel %vm175_vm1, %v511_v3, 0  ;;  %9496 = vmatmul.msk.bf16.vlgmr.msrb.gmra.mxu3 %vm175_vm1, %v10689_v53  ;;  %9497 = vmatmul.msk.bf16.vlgmr.msra.gmra.mxu1 %vm175_vm1, %v10717_v6  ;;  %v772_v36 = vsel %vm770_vm2, %v765_v5, 0 }
 0x13b   :  { %781 = vmatpush.bf16.msrb.mxu0 %v772_v36  ;;  %525 = vmatpush.bf16.xpose.msra.mxu2 %v516_v8  ;;  %v10882_v35 = vpop.permute.xlu2 %1060 }
 0x13c   :  { %9498 = vmatmul.msk.bf16.vlgmr.msrb.gmra.mxu2 %vm175_vm1, %v10699_v59  ;;  %477 = vmatpush.bf16.xpose.msrb.mxu3 %v468_v2 }
 0x141   :  { %v487_v46 = vpop.permute.xlu0 %486  ;;  %v535_v9 = vpop.permute.xlu1 %534 }
 0x142   :  { %v492_v10 = vsel %vm175_vm1, %v487_v46, 0  ;;  %v540_v53 = vsel %vm175_vm1, %v535_v9, 0 }
 0x143   :  { %501 = vmatpush.bf16.xpose.msrb.mxu1 %v492_v10 }
 0x149   :  { %v809_v6 = vpop.permute.xlu0 %808  ;;  %v893_v12 = vpop.permute.xlu1 %892 }
 0x14a   :  { %v814_v17 = vsel %vm770_vm2, %v809_v6, 0  ;;  %v898_v22 = vsel %vm770_vm2, %v893_v12, 0  ;;  %9499 = vmatmul.msk.bf16.vlgmr.msra.gmra.mxu3 %vm175_vm1, %v10701_v60  ;;  %9501 = vmatmul.msk.bf16.vlgmr.msrb.gmra.mxu1 %vm175_vm1, %v10729_v15 }
 0x14b   :  { %802 = vmatpush.bf16.msra.mxu1 %v793_v11  ;;  %823 = vmatpush.bf16.msrb.mxu2 %v814_v17  ;;  %v10892_v11 = vpop.permute.xlu2 %1018 }
 0x14c   :  { %549 = vmatpush.bf16.xpose.msra.mxu3 %v540_v53  ;;  %9502 = vmatmul.msk.bf16.vlgmr.msra.gmra.mxu2 %vm175_vm1, %v10725_v13 }
 0x14f   :  { %907 = vmatpush.bf16.msra.mxu2 %v898_v22 }
 0x151   :  { %v851_v59 = vpop.permute.xlu0 %850  ;;  %v914_v23 = vpop.permute.xlu1 %913 }
 0x152   :  { %v856_v28 = vsel %vm770_vm2, %v851_v59, 0  ;;  %v919_v60 = vsel %vm770_vm2, %v914_v23, 0 }
 0x153   :  { %865 = vmatpush.bf16.msra.mxu0 %v856_v28 }
 0x159   :  { %v872_v31 = vpop.permute.xlu1 %871 }
 0x15a   :  { %v877_v33 = vsel %vm770_vm2, %v872_v31, 0  ;;  %9500 = vmatmul.msk.bf16.vlgmr.msrb.gmra.mxu3 %vm175_vm1, %v10712_v4  ;;  %v10904_v31 = vpop.permute.xlu2 %1039 }
 0x15b   :  { %844 = vmatpush.bf16.msrb.mxu3 %v835_v32  ;;  %886 = vmatpush.bf16.msrb.mxu1 %v877_v33 }
 0x16a   :  { %9503 = vmatmul.msk.bf16.vlgmr.msra.gmra.mxu3 %vm175_vm1, %v10731_v16 }
 0x16b   :  { %928 = vmatpush.bf16.msra.mxu3 %v919_v60 }
 0x18d   :  { %v191_v13 = vpop.f32.mrf.mxu3 }
 0x18e   :  { %v10856_v15 = vmul.f32 0.35355338, %v191_v13 }
 0x18f   :  { %v215_v34 = vpop.f32.mrf.mxu2 }
 0x190   :  { %v10858_v37 = vmul.f32 0.35355338, %v215_v34  ;;  %v572_v40 = vsel %vm571_vm3, %v10856_v15, -inf }
 0x191   :  { %573 = vmax.xlane.f32.xlu0 %v572_v40 }
 0x192   :  { %v575_v4 = vsel %vm571_vm3, %v10858_v37, -inf }
 0x193   :  { %576 = vmax.xlane.f32.xlu2 %v575_v4  ;;  %v10912_v4 = vpop.permute.xlu2 %1209 }
 0x195   :  { %v193_v41 = vpop.f32.mrf.mxu3 }
 0x197   :  { %v217_v43 = vpop.f32.mrf.mxu2  ;;  %v263_v44 = vpop.f32.mrf.mxu1 }
 0x198   :  { %v10864_v16 = vmul.f32 0.35355338, %v263_v44 }
 0x19a   :  { %v581_v47 = vsel %vm571_vm3, %v10864_v16, -inf }
 0x19b   :  { %582 = vmax.xlane.f32.xlu2 %v581_v47 }
 0x19d   :  { %v239_v49 = vpop.f32.mrf.mxu3 }
 0x19e   :  { %v10868_v50 = vmul.f32 0.35355338, %v239_v49 }
 0x19f   :  { %v265_v52 = vpop.f32.mrf.mxu1  ;;  %v287_v18 = vpop.f32.mrf.mxu2 }
 0x1a0   :  { %v10870_v54 = vmul.f32 0.35355338, %v287_v18  ;;  %v578_v19 = vsel %vm571_vm3, %v10868_v50, -inf  ;;  %v10918_v52 = vpop.permute.xlu0 %997 }
 0x1a1   :  { %579 = vmax.xlane.f32.xlu1 %v578_v19 }
 0x1a2   :  { %v584_v56 = vsel %vm571_vm3, %v10870_v54, -inf }
 0x1a3   :  { %585 = vmax.xlane.f32.xlu0 %v584_v56  ;;  %v10922_v56 = vpop.permute.xlu2 %1232 }
 0x1a5   :  { %v241_v58 = vpop.f32.mrf.mxu3 }
 0x1a7   :  { %v289_v61 = vpop.f32.mrf.mxu2  ;;  %v335_v27 = vpop.f32.mrf.mxu1 }
 0x1a8   :  { %v10878_v29 = vmul.f32 0.35355338, %v335_v27 }
 0x1aa   :  { %v590_v63 = vsel %vm571_vm3, %v10878_v29, -inf }
 0x1ab   :  { %591 = vmax.xlane.f32.xlu1 %v590_v63  ;;  %v10926_v63 = vpop.permute.xlu0 %934 }
 0x1ad   :  { %v311_v0 = vpop.f32.mrf.mxu3 }
 0x1ae   :  { %v10884_v2 = vmul.f32 0.35355338, %v311_v0 }
 0x1af   :  { %v337_v3 = vpop.f32.mrf.mxu1  ;;  %v359_v5 = vpop.f32.mrf.mxu2 }
 0x1b0   :  { %v10886_v8 = vmul.f32 0.35355338, %v359_v5  ;;  %v587_v36 = vsel %vm571_vm3, %v10884_v2, -inf  ;;  %v10930_v3 = vpop.permute.xlu2 %1207 }
 0x1b2   :  { %v593_v45 = vsel %vm571_vm3, %v10886_v8, -inf }
 0x1b3   :  { %588 = vmax.xlane.f32.xlu1 %v587_v36  ;;  %594 = vmax.xlane.f32.xlu2 %v593_v45  ;;  %v10934_v45 = vpop.permute.xlu0 %1186 }
 0x1b5   :  { %v313_v46 = vpop.f32.mrf.mxu3 }
 0x1b7   :  { %v361_v9 = vpop.f32.mrf.mxu2  ;;  %v407_v10 = vpop.f32.mrf.mxu1 }
 0x1b8   :  { %v10894_v53 = vmul.f32 0.35355338, %v407_v10  ;;  %v10936_v46 = vpop.permute.xlu2 %1163 }
 0x1ba   :  { %v599_v6 = vsel %vm571_vm3, %v10894_v53, -inf }
 0x1bb   :  { %600 = vmax.xlane.f32.xlu2 %v599_v6 }
 0x1bd   :  { %v383_v12 = vpop.f32.mrf.mxu3 }
 0x1be   :  { %v10898_v17 = vmul.f32 0.35355338, %v383_v12  ;;  %v10942_v12 = vpop.permute.xlu0 %1161 }
 0x1bf   :  { %v409_v22 = vpop.f32.mrf.mxu1  ;;  %v431_v59 = vpop.f32.mrf.mxu2 }
 0x1c0   :  { %v10900_v23 = vmul.f32 0.35355338, %v431_v59  ;;  %v596_v28 = vsel %vm571_vm3, %v10898_v17, -inf  ;;  %v10944_v22 = vpop.permute.xlu2 %1301 }
 0x1c1   :  { %597 = vmax.xlane.f32.xlu1 %v596_v28 }
 0x1c2   :  { %v602_v32 = vsel %vm571_vm3, %v10900_v23, -inf }
 0x1c3   :  { %603 = vmax.xlane.f32.xlu2 %v602_v32 }
 0x1c5   :  { %v385_v33 = vpop.f32.mrf.mxu3 }
 0x1c6   :  { %v10946_v28 = vpop.permute.xlu0 %1081  ;;  %v10950_v33 = vpop.permute.xlu1 %955 }
 0x1c7   :  { %v433_v60 = vpop.f32.mrf.mxu2  ;;  %v503_v13 = vpop.f32.mrf.mxu1 }
 0x1c8   :  { %v10908_v34 = vmul.f32 0.35355338, %v503_v13  ;;  %v10948_v32 = vpop.permute.xlu2 %1324 }
 0x1ca   :  { %v611_v40 = vsel %vm571_vm3, %v10908_v34, -inf }
 0x1cb   :  { %612 = vmax.xlane.f32.xlu2 %v611_v40 }
 0x1cd   :  { %v455_v41 = vpop.f32.mrf.mxu3 }
 0x1ce   :  { %v10914_v43 = vmul.f32 0.35355338, %v455_v41 }
 0x1cf   :  { %v505_v44 = vpop.f32.mrf.mxu1  ;;  %v527_v47 = vpop.f32.mrf.mxu2 }
 0x1d0   :  { %v605_v49 = vsel %vm571_vm3, %v10914_v43, -inf  ;;  %v10920_v18 = vmul.f32 0.35355338, %v527_v47 }
 0x1d1   :  { %606 = vmax.xlane.f32.xlu0 %v605_v49  ;;  %v10954_v49 = vpop.permute.xlu1 %1230 }
 0x1d2   :  { %v614_v61 = vsel %vm571_vm3, %v10920_v18, -inf }
 0x1d5   :  { %v457_v19 = vpop.f32.mrf.mxu3 }
 0x1d7   :  { %v529_v58 = vpop.f32.mrf.mxu2 }
 0x1d9   :  { %615 = vmax.xlane.f32.xlu0 %v614_v61 }
 0x1dd   :  { %v479_v27 = vpop.f32.mrf.mxu3 }
 0x1de   :  { %v10928_v0 = vmul.f32 0.35355338, %v479_v27 }
 0x1e0   :  { %v608_v5 = vsel %vm571_vm3, %v10928_v0, -inf }
 0x1e1   :  { %609 = vmax.xlane.f32.xlu1 %v608_v5 }
 0x1e5   :  { %v481_v36 = vpop.f32.mrf.mxu3 }
 0x1ed   :  { %v551_v9 = vpop.f32.mrf.mxu3 }
 0x1ee   :  { %v10938_v10 = vmul.f32 0.35355338, %v551_v9 }
 0x1f0   :  { %v617_v6 = vsel %vm571_vm3, %v10938_v10, -inf }
 0x1f1   :  { %618 = vmax.xlane.f32.xlu1 %v617_v6 }
 0x1f5   :  { %v553_v59 = vpop.f32.mrf.mxu3 }
 0x204   :  { %v574_v60 = vpop.xlane.xlu0 %573 }
 0x205   :  { %v620_v13 = vsub.f32 %v10856_v15, %v574_v60 }
 0x206   :  { %v577_v40 = vpop.xlane.xlu2 %576 }
 0x207   :  { %v636_v41 = vmul.f32 1.442695, %v620_v13  ;;  %v621_v44 = vsub.f32 %v10858_v37, %v577_v40 }
 0x209   :  { %9900 = vpow2.f32 %v636_v41  ;;  %v638_v47 = vmul.f32 1.442695, %v621_v44 }
 0x20b   :  { %9902 = vpow2.f32 %v638_v47 }
 0x20e   :  { %v583_v19 = vpop.xlane.xlu2 %582 }
 0x20f   :  { %v10956_v58 = vpop.eup %9900  ;;  %v623_v61 = vsub.f32 %v10864_v16, %v583_v19 }
 0x210   :  { %v668_v27 = vsel %vm571_vm3, %v10956_v58, 0.0 }
 0x211   :  { %v642_v5 = vmul.f32 1.442695, %v623_v61  ;;  %669 = vadd.xlane.f32.xlu2 %v668_v27  ;;  %v10961_v36 = vpop.eup %9902 }
 0x212   :  { %v671_v60 = vsel %vm571_vm3, %v10961_v36, 0.0 }
 0x213   :  { %9904 = vpow2.f32 %v642_v5 }
 0x214   :  { %v580_v15 = vpop.xlane.xlu1 %579 }
 0x215   :  { %v622_v37 = vsub.f32 %v10868_v50, %v580_v15 }
 0x216   :  { %v586_v9 = vpop.xlane.xlu0 %585 }
 0x217   :  { %v640_v6 = vmul.f32 1.442695, %v622_v37  ;;  %v624_v59 = vsub.f32 %v10870_v54, %v586_v9 }
 0x219   :  { %v10967_v13 = vpop.eup %9904  ;;  %9906 = vpow2.f32 %v640_v6  ;;  %v644_v16 = vmul.f32 1.442695, %v624_v59  ;;  %672 = vadd.xlane.f32.xlu2 %v671_v60 }
 0x21a   :  { %v677_v40 = vsel %vm571_vm3, %v10967_v13, 0.0 }
 0x21b   :  { %9908 = vpow2.f32 %v644_v16  ;;  %678 = vadd.xlane.f32.xlu0 %v677_v40 }
 0x21e   :  { %v592_v41 = vpop.xlane.xlu1 %591 }
 0x21f   :  { %v10971_v44 = vpop.eup %9906  ;;  %v626_v50 = vsub.f32 %v10878_v29, %v592_v41 }
 0x220   :  { %v674_v54 = vsel %vm571_vm3, %v10971_v44, 0.0 }
 0x221   :  { %v10976_v47 = vpop.eup %9908  ;;  %v648_v19 = vmul.f32 1.442695, %v626_v50  ;;  %675 = vadd.xlane.f32.xlu2 %v674_v54 }
 0x222   :  { %v680_v61 = vsel %vm571_vm3, %v10976_v47, 0.0 }
 0x223   :  { %9910 = vpow2.f32 %v648_v19  ;;  %681 = vadd.xlane.f32.xlu1 %v680_v61 }
 0x226   :  { %v595_v27 = vpop.xlane.xlu2 %594  ;;  %v589_v5 = vpop.xlane.xlu1 %588 }
 0x227   :  { %v625_v15 = vsub.f32 %v10884_v2, %v589_v5  ;;  %v627_v29 = vsub.f32 %v10886_v8, %v595_v27 }
 0x229   :  { %v10981_v37 = vpop.eup %9910  ;;  %v646_v9 = vmul.f32 1.442695, %v625_v15  ;;  %v650_v59 = vmul.f32 1.442695, %v627_v29 }
 0x22a   :  { %v686_v6 = vsel %vm571_vm3, %v10981_v37, 0.0 }
 0x22b   :  { %687 = vadd.xlane.f32.xlu0 %v686_v6  ;;  %9912 = vpow2.f32 %v646_v9 }
 0x22c   :  { %9914 = vpow2.f32 %v650_v59 }
 0x22e   :  { %v601_v60 = vpop.xlane.xlu2 %600 }
 0x231   :  { %v10986_v16 = vpop.eup %9912 }
 0x232   :  { %v683_v40 = vsel %vm571_vm3, %v10986_v16, 0.0  ;;  %v10992_v19 = vpop.eup %9914 }
 0x233   :  { %684 = vadd.xlane.f32.xlu2 %v683_v40  ;;  %v689_v27 = vsel %vm571_vm3, %v10992_v19, 0.0 }
 0x234   :  { %v598_v2 = vpop.xlane.xlu1 %597 }
 0x235   :  { %v628_v41 = vsub.f32 %v10898_v17, %v598_v2 }
 0x236   :  { %v604_v50 = vpop.xlane.xlu2 %603 }
 0x237   :  { %v652_v54 = vmul.f32 1.442695, %v628_v41  ;;  %v630_v8 = vsub.f32 %v10900_v23, %v604_v50  ;;  %v629_v50 = vsub.f32 %v10894_v53, %v601_v60 }
 0x239   :  { %9916 = vpow2.f32 %v652_v54  ;;  %v656_v61 = vmul.f32 1.442695, %v630_v8 }
 0x23b   :  { %690 = vadd.xlane.f32.xlu2 %v689_v27  ;;  %9918 = vpow2.f32 %v656_v61 }
 0x23c   :  { %1299 = vrot.lane.b32.xlu1 %v10681_v48, %s10501_s28 }
 0x23e   :  { %v613_v5 = vpop.xlane.xlu2 %612 }
 0x23f   :  { %v10998_v15 = vpop.eup %9916  ;;  %v633_v17 = vsub.f32 %v10908_v34, %v613_v5 }
 0x240   :  { %v692_v23 = vsel %vm571_vm3, %v10998_v15, 0.0 }
 0x241   :  { %693 = vadd.xlane.f32.xlu0 %v692_v23  ;;  %v662_v9 = vmul.f32 1.442695, %v633_v17  ;;  %v11003_v6 = vpop.eup %9918 }
 0x242   :  { %v698_v40 = vsel %vm571_vm3, %v11003_v6, 0.0 }
 0x243   :  { %9920 = vpow2.f32 %v662_v9 }
 0x244   :  { %v607_v29 = vpop.xlane.xlu0 %606 }
 0x245   :  { %v631_v59 = vsub.f32 %v10914_v43, %v607_v29  ;;  %v654_v43 = vmul.f32 1.442695, %v629_v50 }
 0x247   :  { %v658_v2 = vmul.f32 1.442695, %v631_v59 }
 0x249   :  { %699 = vadd.xlane.f32.xlu0 %v698_v40  ;;  %v11008_v41 = vpop.eup %9920  ;;  %9922 = vpow2.f32 %v658_v2 }
 0x24a   :  { %v707_v34 = vsel %vm571_vm3, %v11008_v41, 0.0  ;;  %9924 = vpow2.f32 %v654_v43 }
 0x24c   :  { %v616_v5 = vpop.xlane.xlu0 %615 }
 0x24d   :  { %v634_v53 = vsub.f32 %v10920_v18, %v616_v5 }
 0x24f   :  { %v11015_v54 = vpop.eup %9922  ;;  %v664_v60 = vmul.f32 1.442695, %v634_v53 }
 0x250   :  { %v701_v8 = vsel %vm571_vm3, %v11015_v54, 0.0  ;;  %v11019_v61 = vpop.eup %9924 }
 0x251   :  { %708 = vadd.xlane.f32.xlu0 %v707_v34  ;;  %v695_v27 = vsel %vm571_vm3, %v11019_v61, 0.0  ;;  %9926 = vpow2.f32 %v664_v60 }
 0x253   :  { %1184 = vrot.lane.b32.xlu2 %v10639_v24, %s10501_s28 }
 0x254   :  { %v610_v23 = vpop.xlane.xlu1 %609 }
 0x257   :  { %v11026_v17 = vpop.eup %9926 }
 0x258   :  { %v710_v9 = vsel %vm571_vm3, %v11026_v17, 0.0 }
 0x259   :  { %702 = vadd.xlane.f32.xlu0 %v701_v8 }
 0x264   :  { %v619_v29 = vpop.xlane.xlu1 %618 }
 0x265   :  { %v635_v59 = vsub.f32 %v10938_v10, %v619_v29 }
 0x266   :  { %696 = vadd.xlane.f32.xlu1 %v695_v27  ;;  %v940_v27 = vsel %vm770_vm2, %v10926_v63, 0 }
 0x267   :  { %v666_v18 = vmul.f32 1.442695, %v635_v59 }
 0x26d   :  { %1322 = vrot.lane.b32.xlu0 %v10684_v51, %s10501_s28 }
 0x27c   :  { %711 = vadd.xlane.f32.xlu2 %v710_v9 }
 0x27f   :  { %1278 = vrot.lane.b32.xlu1 %v10667_v42, %s10500_s27 }
 0x284   :  { %v670_v40 = vpop.xlane.xlu2 %669 }
 0x285   :  { %9928 = vrcp.f32 %v670_v40  ;;  %v632_v40 = vsub.f32 %v10928_v0, %v610_v23 }
 0x286   :  { %9930 = vpow2.f32 %v666_v18 }
 0x28b   :  { %v9929_v2 = vpop.eup %9928 }
 0x28c   :  { %v673_v34 = vpop.xlane.xlu2 %672  ;;  %v732_v50 = vmul.f32 %v9929_v2, %v10956_v58  ;;  %v11037_v10 = vpop.eup %9930  ;;  %v1003_v2 = vsel %vm770_vm2, %v10918_v52, 0 }
 0x28d   :  { %9932 = vrcp.f32 %v673_v34  ;;  %v713_v63 = vsel %vm571_vm3, %v11037_v10, 0.0  ;;  %v660_v34 = vmul.f32 1.442695, %v632_v40 }
 0x28e   :  { %v679_v43 = vpop.xlane.xlu0 %678  ;;  %v748_v8 = vpack.c.bf16 %v732_v50, %v732_v50 }
 0x28f   :  { %9934 = vrcp.f32 %v679_v43 }
 0x290   :  { %9504 = vmatmul.msk.bf16.vlgmr.msrb.gmra.mxu0 %vm766_vm4, %v748_v8  ;;  %v982_v8 = vsel %vm770_vm2, %v10876_v57, 0 }
 0x291   :  { %949 = vmatpush.bf16.msrb.mxu0 %v940_v27 }
 0x293   :  { %v9933_v5 = vpop.eup %9932 }
 0x294   :  { %v733_v53 = vmul.f32 %v9933_v5, %v10961_v36  ;;  %v676_v60 = vpop.xlane.xlu2 %675  ;;  %1255 = vrot.lane.b32.xlu2 %v10664_v39, %s10500_s27  ;;  %v961_v36 = vsel %vm770_vm2, %v10950_v33, 0 }
 0x295   :  { %v9935_v9 = vpop.eup %9934  ;;  %9936 = vrcp.f32 %v676_v60 }
 0x296   :  { %v749_v58 = vpack.c.bf16 %v733_v53, %v733_v53  ;;  %v735_v29 = vmul.f32 %v9935_v9, %v10967_v13  ;;  %v682_v59 = vpop.xlane.xlu1 %681 }
 0x297   :  { %9938 = vrcp.f32 %v682_v59  ;;  %714 = vadd.xlane.f32.xlu0 %v713_v63 }
 0x298   :  { %v751_v18 = vpack.c.bf16 %v735_v29, %v735_v29  ;;  %9505 = vmatmul.msk.bf16.vlgmr.msra.gmra.mxu1 %vm766_vm4, %v749_v58  ;;  %9940 = vpow2.f32 %v660_v34  ;;  %v1066_v29 = vsel %vm770_vm2, %v10882_v35, 0 }
 0x299   :  { %970 = vmatpush.bf16.msra.mxu1 %v961_v36 }
 0x29a   :  { %9507 = vmatmul.msk.bf16.vlgmr.msrb.gmra.mxu3 %vm766_vm4, %v751_v18  ;;  %v1087_v18 = vsel %vm770_vm2, %v10946_v28, 0 }
 0x29b   :  { %v9937_v13 = vpop.eup %9936  ;;  %1012 = vmatpush.bf16.msrb.mxu3 %v1003_v2 }
 0x29c   :  { %v734_v50 = vmul.f32 %v9937_v13, %v10971_v44  ;;  %1416 = vrot.lane.b32.xlu2 %v10707_v1, %s10500_s27  ;;  %v1024_v44 = vsel %vm770_vm2, %v10892_v11, 0 }
 0x29d   :  { %v9939_v0 = vpop.eup %9938 }
 0x29e   :  { %v750_v23 = vpack.c.bf16 %v734_v50, %v734_v50  ;;  %v736_v33 = vmul.f32 %v9939_v0, %v10976_v47  ;;  %v688_v43 = vpop.xlane.xlu0 %687  ;;  %v11062_v27 = vpop.eup %9940 }
 0x29f   :  { %9942 = vrcp.f32 %v688_v43  ;;  %v704_v57 = vsel %vm571_vm3, %v11062_v27, 0.0  ;;  %v1238_v43 = vsel %vm175_vm1, %v10922_v56, 0  ;;  %v1192_v56 = vsel %vm175_vm1, %v10934_v45, 0 }
 0x2a0   :  { %v752_v52 = vpack.c.bf16 %v736_v33, %v736_v33  ;;  %9506 = vmatmul.msk.bf16.vlgmr.msrb.gmra.mxu2 %vm766_vm4, %v750_v23 }
 0x2a1   :  { %991 = vmatpush.bf16.msrb.mxu2 %v982_v8 }
 0x2a2   :  { %9508 = vmatmul.msk.bf16.vlgmr.msra.gmra.mxu0 %vm766_vm4, %v752_v52 }
 0x2a3   :  { %1033 = vmatpush.bf16.msra.mxu0 %v1024_v44 }
 0x2a4   :  { %1391 = vrot.lane.b32.xlu2 %v10704_v62, %s10501_s28 }
 0x2a5   :  { %v9943_v47 = vpop.eup %9942 }
 0x2a6   :  { %v685_v5 = vpop.xlane.xlu2 %684  ;;  %v738_v53 = vmul.f32 %v9943_v47, %v10981_v37  ;;  %v1045_v37 = vsel %vm770_vm2, %v10904_v31, 0 }
 0x2a7   :  { %9944 = vrcp.f32 %v685_v5 }
 0x2a8   :  { %v754_v60 = vpack.c.bf16 %v738_v53, %v738_v53 }
 0x2a9   :  { %705 = vadd.xlane.f32.xlu1 %v704_v57 }
 0x2ab   :  { %1393 = vrot.lane.b32.xlu0 %v10704_v62, %s10500_s27 }
 0x2ac   :  { %1370 = vrot.lane.b32.xlu2 %v10734_v20, %s10500_s27 }
 0x2ad   :  { %v9945_v11 = vpop.eup %9944 }
 0x2ae   :  { %v737_v9 = vmul.f32 %v9945_v11, %v10986_v16  ;;  %v691_v58 = vpop.xlane.xlu2 %690 }
 0x2af   :  { %9946 = vrcp.f32 %v691_v58 }
 0x2b0   :  { %9510 = vmatmul.msk.bf16.vlgmr.msra.gmra.mxu2 %vm766_vm4, %v754_v60  ;;  %v753_v59 = vpack.c.bf16 %v737_v9, %v737_v9 }
 0x2b1   :  { %1075 = vmatpush.bf16.msra.mxu2 %v1066_v29  ;;  %v1307_v29 = vsel %vm175_vm1, %v10944_v22, 0 }
 0x2b2   :  { %9509 = vmatmul.msk.bf16.vlgmr.msrb.gmra.mxu1 %vm766_vm4, %v753_v59 }
 0x2b3   :  { %1276 = vrot.lane.b32.xlu0 %v10667_v42, %s10501_s28  ;;  %1054 = vmatpush.bf16.msrb.mxu1 %v1045_v37 }
 0x2b4   :  { %v694_v63 = vpop.xlane.xlu0 %693  ;;  %1345 = vrot.lane.b32.xlu2 %v10694_v55, %s10501_s28 }
 0x2b5   :  { %9948 = vrcp.f32 %v694_v63  ;;  %v9947_v35 = vpop.eup %9946 }
 0x2b6   :  { %v739_v16 = vmul.f32 %v9947_v35, %v10992_v19  ;;  %v1169_v19 = vsel %vm175_vm1, %v10936_v46, 0  ;;  %v1215_v46 = vsel %vm175_vm1, %v10912_v4, 0  ;;  %v1185_v47 = vpop.permute.xlu2 %1184 }
 0x2b8   :  { %v755_v40 = vpack.c.bf16 %v739_v16, %v739_v16 }
 0x2ba   :  { %9511 = vmatmul.msk.bf16.vlgmr.msra.gmra.mxu3 %vm766_vm4, %v755_v40 }
 0x2bb   :  { %v9949_v36 = vpop.eup %9948  ;;  %1347 = vrot.lane.b32.xlu0 %v10694_v55, %s10500_s27  ;;  %1096 = vmatpush.bf16.msra.mxu3 %v1087_v18 }
 0x2bc   :  { %v740_v31 = vmul.f32 %v9949_v36, %v10998_v15  ;;  %v700_v2 = vpop.xlane.xlu0 %699  ;;  %1506 = vrot.lane.b32.xlu2 %v10748_v26, %s10501_s28 }
 0x2bd   :  { %9950 = vrcp.f32 %v700_v2 }
 0x2be   :  { %v756_v13 = vpack.c.bf16 %v740_v31, %v740_v31 }
 0x2c0   :  { %9512 = vmatmul.msk.bf16.vlgmr.msrb.gmra.mxu0 %vm766_vm4, %v756_v13  ;;  %v1330_v13 = vsel %vm175_vm1, %v10948_v32, 0 }
 0x2c1   :  { %1178 = vmatpush.bf16.xpose.msrb.mxu0 %v1169_v19 }
 0x2c2   :  { %1253 = vrot.lane.b32.xlu1 %v10664_v39, %s10501_s28 }
 0x2c3   :  { %v9951_v28 = vpop.eup %9950  ;;  %1508 = vrot.lane.b32.xlu0 %v10748_v26, %s10500_s27 }
 0x2c4   :  { %v742_v15 = vmul.f32 %v9951_v28, %v11003_v6  ;;  %v709_v34 = vpop.xlane.xlu0 %708  ;;  %1437 = vrot.lane.b32.xlu2 %v10719_v7, %s10501_s28  ;;  %v11112_v6 = vpop.permute.xlu1 %1299 }
 0x2c6   :  { %v758_v50 = vpack.c.bf16 %v742_v15, %v742_v15 }
 0x2c8   :  { %9514 = vmatmul.msk.bf16.vlgmr.msrb.gmra.mxu2 %vm766_vm4, %v758_v50 }
 0x2c9   :  { %1224 = vmatpush.bf16.xpose.msrb.mxu2 %v1215_v46 }
 0x2ca   :  { %1414 = vrot.lane.b32.xlu1 %v10707_v1, %s10501_s28 }
 0x2cb   :  { %1483 = vrot.lane.b32.xlu0 %v10736_v14, %s10501_s28 }
 0x2cc   :  { %v703_v0 = vpop.xlane.xlu0 %702  ;;  %1737 = vrot.lane.b32.xlu2 %v10636_v21, %s10502_s29 }
 0x2cd   :  { %9952 = vrcp.f32 %v703_v0 }
 0x2d2   :  { %1485 = vrot.lane.b32.xlu1 %v10736_v14, %s10500_s27 }
 0x2d3   :  { %v9953_v4 = vpop.eup %9952  ;;  %1462 = vrot.lane.b32.xlu0 %v10746_v25, %s10500_s27 }
 0x2d4   :  { %v743_v23 = vmul.f32 %v9953_v4, %v11015_v54  ;;  %1863 = vrot.lane.b32.xlu2 %v10681_v48, %s10502_s29 }
 0x2d6   :  { %v759_v33 = vpack.c.bf16 %v743_v23, %v743_v23 }
 0x2d8   :  { %9515 = vmatmul.msk.bf16.vlgmr.msrb.gmra.mxu3 %vm766_vm4, %v759_v33 }
 0x2d9   :  { %1247 = vmatpush.bf16.xpose.msrb.mxu3 %v1238_v43  ;;  %v697_v8 = vpop.xlane.xlu1 %696 }
 0x2da   :  { %9954 = vrcp.f32 %v697_v8  ;;  %1368 = vrot.lane.b32.xlu1 %v10734_v20, %s10501_s28 }
 0x2db   :  { %1800 = vrot.lane.b32.xlu0 %v10662_v38, %s10502_s29  ;;  %9956 = vrcp.f32 %v709_v34 }
 0x2df   :  { %v1323_v37 = vpop.permute.xlu0 %1322 }
 0x2e0   :  { %v9955_v52 = vpop.eup %9954 }
 0x2e1   :  { %v741_v54 = vmul.f32 %v9955_v52, %v11019_v61  ;;  %v9957_v61 = vpop.eup %9956 }
 0x2e2   :  { %1439 = vrot.lane.b32.xlu1 %v10719_v7, %s10500_s27  ;;  %v745_v5 = vmul.f32 %v9957_v61, %v11008_v41 }
 0x2e3   :  { %v757_v44 = vpack.c.bf16 %v741_v54, %v741_v54  ;;  %1758 = vrot.lane.b32.xlu0 %v10639_v24, %s10502_s29 }
 0x2e4   :  { %v761_v45 = vpack.c.bf16 %v745_v5, %v745_v5 }
 0x2e5   :  { %9513 = vmatmul.msk.bf16.vlgmr.msra.gmra.mxu1 %vm766_vm4, %v757_v44 }
 0x2e6   :  { %1201 = vmatpush.bf16.xpose.msra.mxu1 %v1192_v56 }
 0x2ea   :  { %1460 = vrot.lane.b32.xlu1 %v10746_v25, %s10501_s28 }
 0x2eb   :  { %1884 = vrot.lane.b32.xlu0 %v10684_v51, %s10502_s29 }
 0x2ef   :  { %v712_v57 = vpop.xlane.xlu2 %711 }
 0x2f0   :  { %9958 = vrcp.f32 %v712_v57 }
 0x2f1   :  { %v1279_v53 = vpop.permute.xlu1 %1278 }
 0x2f2   :  { %1779 = vrot.lane.b32.xlu1 %v10651_v30, %s10502_s29  ;;  %v1284_v11 = vsel %vm175_vm1, %v1279_v53, 0 }
 0x2f3   :  { %1842 = vrot.lane.b32.xlu0 %v10667_v42, %s10502_s29 }
 0x2f5   :  { %9517 = vmatmul.msk.bf16.vlgmr.msrb.gmra.mxu1 %vm766_vm4, %v761_v45 }
 0x2f6   :  { %1293 = vmatpush.bf16.xpose.msrb.mxu1 %v1284_v11  ;;  %v9959_v60 = vpop.eup %9958 }
 0x2f7   :  { %v746_v9 = vmul.f32 %v9959_v60, %v11026_v17  ;;  %v1256_v58 = vpop.permute.xlu2 %1255 }
 0x2f8   :  { %v1261_v43 = vsel %vm175_vm1, %v1256_v58, 0 }
 0x2f9   :  { %v762_v41 = vpack.c.bf16 %v746_v9, %v746_v9 }
 0x2fa   :  { %1821 = vrot.lane.b32.xlu1 %v10664_v39, %s10502_s29 }
 0x2fb   :  { %9518 = vmatmul.msk.bf16.vlgmr.msra.gmra.mxu2 %vm766_vm4, %v762_v41 }
 0x2fc   :  { %1316 = vmatpush.bf16.xpose.msra.mxu2 %v1307_v29 }
 0x2ff   :  { %v1417_v59 = vpop.permute.xlu2 %1416 }
 0x300   :  { %v1422_v4 = vsel %vm175_vm1, %v1417_v59, 0 }
 0x305   :  { %9521 = vmatmul.msk.bf16.vlgmr.msra.gmra.mxu1 %vm175_vm1, %v1185_v47 }
 0x307   :  { %v1392_v63 = vpop.permute.xlu2 %1391 }
 0x30a   :  { %v715_v35 = vpop.xlane.xlu0 %714 }
 0x30b   :  { %9960 = vrcp.f32 %v715_v35  ;;  %9522 = vmatmul.msk.bf16.vlgmr.msrb.gmra.mxu2 %vm175_vm1, %v10930_v3 }
 0x30d   :  { %v783_v17 = vpop.f32.mrf.mxu0 }
 0x30e   :  { %1118 = vst [vmem:[#allocation1] ss:$2 sm:$0xff] %v783_v17 }
 0x30f   :  { %v1371_v16 = vpop.permute.xlu2 %1370 }
 0x310   :  { %v1376_v36 = vsel %vm175_vm1, %v1371_v16, 0 }
 0x311   :  { %v9961_v40 = vpop.eup %9960  ;;  %1385 = vmatpush.bf16.xpose.msra.mxu1 %v1376_v36 }
 0x312   :  { %v747_v22 = vmul.f32 %v9961_v40, %v11037_v10 }
 0x314   :  { %v763_v18 = vpack.c.bf16 %v747_v22, %v747_v22 }
 0x315   :  { %v785_v31 = vpop.f32.mrf.mxu0  ;;  %v804_v2 = vpop.f32.mrf.mxu1 }
 0x316   :  { %1120 = vst [vmem:[#allocation1 + $0x1] ss:$2 sm:$0xff] %v804_v2  ;;  %9519 = vmatmul.msk.bf16.vlgmr.msra.gmra.mxu3 %vm766_vm4, %v763_v18 }
 0x317   :  { %1339 = vmatpush.bf16.xpose.msra.mxu3 %v1330_v13 }
 0x31b   :  { %9526 = vmatmul.msk.bf16.vlgmr.msra.gmra.mxu2 %vm175_vm1, %v11112_v6 }
 0x31c   :  { %v706_v3 = vpop.xlane.xlu1 %705 }
 0x31d   :  { %9962 = vrcp.f32 %v706_v3  ;;  %v806_v19 = vpop.f32.mrf.mxu1  ;;  %v846_v28 = vpop.f32.mrf.mxu3  ;;  %v11177_v45 = vld.sshfl [vmem:[#allocation1] sm:$0xff pattern:$0x75316420] }
 0x31e   :  { %1124 = vst [vmem:[#allocation1 + $0x11] ss:$2 sm:$0xff] %v846_v28  ;;  %v1394_v10 = vpop.permute.xlu0 %1393 }
 0x31f   :  { %v1399_v15 = vsel %vm175_vm1, %v1394_v10, 0  ;;  %v867_v34 = vpop.f32.mrf.mxu0 }
 0x320   :  { %1126 = vst [vmem:[#allocation1 + $0x20] ss:$2 sm:$0xff] %v867_v34  ;;  %1408 = vmatpush.bf16.xpose.msrb.mxu2 %v1399_v15 }
 0x323   :  { %v9963_v50 = vpop.eup %9962  ;;  %v825_v32 = vpop.f32.mrf.mxu2 }
 0x324   :  { %v744_v46 = vmul.f32 %v9963_v50, %v11062_v27  ;;  %1122 = vst [vmem:[#allocation1 + $0x10] ss:$2 sm:$0xff] %v825_v32 }
 0x325   :  { %v848_v0 = vpop.f32.mrf.mxu3 }
 0x326   :  { %v760_v6 = vpack.c.bf16 %v744_v46, %v744_v46  ;;  %v1277_v23 = vpop.permute.xlu0 %1276  ;;  %9523 = vmatmul.msk.bf16.vlgmr.msrb.gmra.mxu3 %vm175_vm1, %v10954_v49  ;;  %v1346_v49 = vpop.permute.xlu2 %1345 }
 0x327   :  { %9525 = vmatmul.msk.bf16.vlgmr.msrb.gmra.mxu1 %vm175_vm1, %v1277_v23  ;;  %1431 = vmatpush.bf16.xpose.msrb.mxu3 %v1422_v4  ;;  %v869_v33 = vpop.f32.mrf.mxu0 }
 0x328   :  { %9516 = vmatmul.msk.bf16.vlgmr.msra.gmra.mxu0 %vm766_vm4, %v760_v6 }
 0x329   :  { %1270 = vmatpush.bf16.xpose.msra.mxu0 %v1261_v43 }
 0x32b   :  { %v827_v8 = vpop.f32.mrf.mxu2  ;;  %9530 = vmatmul.msk.bf16.vlgmr.msrb.gmra.mxu2 %vm175_vm1, %v1392_v63  ;;  %v11183_v35 = vld.sshfl [vmem:[#allocation1 + $0x10] sm:$0xff pattern:$0x75316420] }
 0x32e   :  { %v1348_v27 = vpop.permute.xlu0 %1347  ;;  %v1507_v58 = vpop.permute.xlu2 %1506 }
 0x32f   :  { %v888_v52 = vpop.f32.mrf.mxu1  ;;  %v1353_v61 = vsel %vm175_vm1, %v1348_v27, 0 }
 0x330   :  { %1128 = vst [vmem:[#allocation1 + $0x21] ss:$2 sm:$0xff] %v888_v52 }
 0x333   :  { %v909_v54 = vpop.f32.mrf.mxu2 }
 0x334   :  { %1130 = vst [vmem:[#allocation1 + $0x30] ss:$2 sm:$0xff] %v909_v54  ;;  %v1254_v44 = vpop.permute.xlu1 %1253 }
 0x336   :  { %v1509_v56 = vpop.permute.xlu0 %1508  ;;  %9527 = vmatmul.msk.bf16.vlgmr.msra.gmra.mxu3 %vm175_vm1, %v1323_v37  ;;  %v1438_v17 = vpop.permute.xlu2 %1437 }
 0x337   :  { %v1514_v47 = vsel %vm175_vm1, %v1509_v56, 0  ;;  %v890_v5 = vpop.f32.mrf.mxu1  ;;  %v11200_v54 = vld.sshfl [vmem:[#allocation1 + $0x20] sm:$0xff pattern:$0x75316420] }
 0x338   :  { %1523 = vmatpush.bf16.xpose.msra.mxu3 %v1514_v47  ;;  %9520 = vmatmul.msk.bf16.vlgmr.msrb.gmra.mxu0 %vm175_vm1, %v10942_v12 }
 0x339   :  { %1362 = vmatpush.bf16.xpose.msrb.mxu0 %v1353_v61 }
 0x33b   :  { %v911_v57 = vpop.f32.mrf.mxu2 }
 0x33c   :  { %v1415_v53 = vpop.permute.xlu1 %1414 }
 0x33d   :  { %v951_v11 = vpop.f32.mrf.mxu0  ;;  %v930_v60 = vpop.f32.mrf.mxu3 }
 0x33e   :  { %v1484_v9 = vpop.permute.xlu0 %1483  ;;  %1137 = vst [vmem:[#allocation1] ss:$2 sm:$0xff] %v951_v11  ;;  %v1738_v2 = vpop.permute.xlu2 %1737 }
 0x33f   :  { %1132 = vst [vmem:[#allocation1 + $0x31] ss:$2 sm:$0xff] %v930_v60  ;;  %v1743_v28 = vsel %vm770_vm2, %v1738_v2, 0 }
 0x344   :  { %v1486_v41 = vpop.permute.xlu1 %1485 }
 0x345   :  { %v1491_v29 = vsel %vm175_vm1, %v1486_v41, 0  ;;  %v953_v59 = vpop.f32.mrf.mxu0  ;;  %v932_v37 = vpop.f32.mrf.mxu3 }
 0x346   :  { %v1463_v63 = vpop.permute.xlu0 %1462  ;;  %9531 = vmatmul.msk.bf16.vlgmr.msrb.gmra.mxu3 %vm175_vm1, %v1415_v53  ;;  %1500 = vmatpush.bf16.xpose.msra.mxu2 %v1491_v29  ;;  %v1864_v46 = vpop.permute.xlu2 %1863 }
 0x347   :  { %v1468_v12 = vsel %vm175_vm1, %v1463_v63, 0  ;;  %v1869_v23 = vsel %vm770_vm2, %v1864_v46, 0 }
 0x348   :  { %1477 = vmatpush.bf16.xpose.msrb.mxu1 %v1468_v12  ;;  %9524 = vmatmul.msk.bf16.vlgmr.msra.gmra.mxu0 %vm175_vm1, %v1254_v44 }
 0x34b   :  { %v993_v16 = vpop.f32.mrf.mxu2 }
 0x34c   :  { %1139 = vst [vmem:[#allocation1 + $0x10] ss:$2 sm:$0xff] %v993_v16  ;;  %v1369_v40 = vpop.permute.xlu1 %1368 }
 0x34d   :  { %9529 = vmatmul.msk.bf16.vlgmr.msra.gmra.mxu1 %vm175_vm1, %v1369_v40  ;;  %9534 = vmatmul.msk.bf16.vlgmr.msra.gmra.mxu2 %vm175_vm1, %v1484_v9 }
 0x34e   :  { %v1801_v36 = vpop.permute.xlu0 %1800 }
 0x34f   :  { %v1806_v22 = vsel %vm770_vm2, %v1801_v36, 0 }
 0x350   :  { %1815 = vmatpush.bf16.msrb.mxu3 %v1806_v22 }
 0x353   :  { %v995_v18 = vpop.f32.mrf.mxu2 }
 0x354   :  { %v1440_v31 = vpop.permute.xlu1 %1439 }
 0x355   :  { %v1445_v13 = vsel %vm175_vm1, %v1440_v31, 0 }
 0x356   :  { %v1759_v3 = vpop.permute.xlu0 %1758  ;;  %1454 = vmatpush.bf16.xpose.msra.mxu0 %v1445_v13  ;;  %9535 = vmatmul.msk.bf16.vlgmr.msra.gmra.mxu3 %vm175_vm1, %v1507_v58 }
 0x357   :  { %v1764_v19 = vsel %vm770_vm2, %v1759_v3, 0 }
 0x358   :  { %1773 = vmatpush.bf16.msra.mxu1 %v1764_v19  ;;  %9528 = vmatmul.msk.bf16.vlgmr.msrb.gmra.mxu0 %vm175_vm1, %v1346_v49  ;;  %v11202_v49 = vld.sshfl [vmem:[#allocation1 + $0x30] sm:$0xff pattern:$0x75316420] }
 0x35b   :  { %v1014_v10 = vpop.f32.mrf.mxu3 }
 0x35c   :  { %1140 = vst [vmem:[#allocation1 + $0x11] ss:$2 sm:$0xff] %v1014_v10  ;;  %v1461_v15 = vpop.permute.xlu1 %1460 }
 0x35d   :  { %9533 = vmatmul.msk.bf16.vlgmr.msrb.gmra.mxu1 %vm175_vm1, %v1461_v15 }
 0x35e   :  { %1752 = vmatpush.bf16.msrb.mxu0 %v1743_v28  ;;  %v1885_v34 = vpop.permute.xlu0 %1884 }
 0x35f   :  { %v1890_v50 = vsel %vm770_vm2, %v1885_v34, 0 }
 0x360   :  { %1899 = vmatpush.bf16.msra.mxu3 %v1890_v50 }
 0x362   :  { %v972_v32 = vpop.f32.mrf.mxu1 }
 0x363   :  { %1138 = vst [vmem:[#allocation1 + $0x1] ss:$2 sm:$0xff] %v972_v32  ;;  %v1016_v0 = vpop.f32.mrf.mxu3 }
 0x364   :  { %v1780_v4 = vpop.permute.xlu1 %1779 }
 0x365   :  { %v1785_v6 = vsel %vm770_vm2, %v1780_v4, 0 }
 0x366   :  { %v1843_v33 = vpop.permute.xlu0 %1842  ;;  %1794 = vmatpush.bf16.msrb.mxu2 %v1785_v6 }
 0x367   :  { %v1848_v43 = vsel %vm770_vm2, %v1843_v33, 0 }
 0x368   :  { %1857 = vmatpush.bf16.msrb.mxu1 %v1848_v43  ;;  %9532 = vmatmul.msk.bf16.vlgmr.msra.gmra.mxu0 %vm175_vm1, %v1438_v17 }
 0x36a   :  { %1878 = vmatpush.bf16.msra.mxu2 %v1869_v23  ;;  %v974_v8 = vpop.f32.mrf.mxu1 }
 0x36c   :  { %v1822_v27 = vpop.permute.xlu1 %1821 }
 0x36d   :  { %v1827_v52 = vsel %vm770_vm2, %v1822_v27, 0 }
 0x36e   :  { %1836 = vmatpush.bf16.msra.mxu0 %v1827_v52 }
 0x372   :  { %v1056_v44 = vpop.f32.mrf.mxu1 }
 0x373   :  { %1142 = vst [vmem:[#allocation1 + $0x21] ss:$2 sm:$0xff] %v1056_v44 }
 0x37a   :  { %v1058_v56 = vpop.f32.mrf.mxu1 }
 0x37e   :  { %v1077_v47 = vpop.f32.mrf.mxu2 }
 0x37f   :  { %1143 = vst [vmem:[#allocation1 + $0x30] ss:$2 sm:$0xff] %v1077_v47 }
 0x382   :  { %v1203_v61 = vpop.f32.mrf.mxu1 }
 0x383   :  { %v11204_v5 = vmul.f32 0.35355338, %v1203_v61 }
 0x385   :  { %v1548_v57 = vsel %vm571_vm3, %v11204_v5, -inf }
 0x386   :  { %1549 = vmax.xlane.f32.xlu0 %v1548_v57  ;;  %v1079_v53 = vpop.f32.mrf.mxu2 }
 0x38a   :  { %v1205_v11 = vpop.f32.mrf.mxu1 }
 0x38e   :  { %v1226_v60 = vpop.f32.mrf.mxu2 }
 0x38f   :  { %v11208_v9 = vmul.f32 0.35355338, %v1226_v60 }
 0x391   :  { %v1551_v58 = vsel %vm571_vm3, %v11208_v9, -inf }
 0x392   :  { %1552 = vmax.xlane.f32.xlu0 %v1551_v58 }
 0x396   :  { %v1228_v41 = vpop.f32.mrf.mxu2 }
 0x399   :  { %v1098_v29 = vpop.f32.mrf.mxu3 }
 0x39a   :  { %1144 = vst [vmem:[#allocation1 + $0x31] ss:$2 sm:$0xff] %v1098_v29 }
 0x39e   :  { %v1318_v59 = vpop.f32.mrf.mxu2 }
 0x39f   :  { %v11216_v22 = vmul.f32 0.35355338, %v1318_v59 }
 0x3a1   :  { %v1100_v37 = vpop.f32.mrf.mxu3  ;;  %v1563_v13 = vsel %vm571_vm3, %v11216_v22, -inf }
 0x3a4   :  { %v1295_v63 = vpop.f32.mrf.mxu1 }
 0x3a5   :  { %v11212_v12 = vmul.f32 0.35355338, %v1295_v63  ;;  %v1035_v17 = vpop.f32.mrf.mxu0 }
 0x3a6   :  { %1141 = vst [vmem:[#allocation1 + $0x20] ss:$2 sm:$0xff] %v1035_v17  ;;  %v1320_v16 = vpop.f32.mrf.mxu2 }
 0x3a7   :  { %v1560_v40 = vsel %vm571_vm3, %v11212_v12, -inf }
 0x3a8   :  { %1561 = vmax.xlane.f32.xlu2 %v1560_v40 }
 0x3a9   :  { %v1249_v36 = vpop.f32.mrf.mxu3 }
 0x3aa   :  { %v11220_v19 = vmul.f32 0.35355338, %v1249_v36 }
 0x3ac   :  { %v1297_v18 = vpop.f32.mrf.mxu1  ;;  %v1554_v34 = vsel %vm571_vm3, %v11220_v19, -inf }
 0x3ad   :  { %v1037_v31 = vpop.f32.mrf.mxu0 }
 0x3ae   :  { %v1410_v2 = vpop.f32.mrf.mxu2 }
 0x3af   :  { %v11236_v56 = vmul.f32 0.35355338, %v1410_v2 }
 0x3b0   :  { %1564 = vmax.xlane.f32.xlu2 %v1563_v13 }
 0x3b1   :  { %v1251_v3 = vpop.f32.mrf.mxu3  ;;  %v1575_v53 = vsel %vm571_vm3, %v11236_v56, -inf }
 0x3b5   :  { %v1180_v28 = vpop.f32.mrf.mxu0 }
 0x3b6   :  { %v11222_v10 = vmul.f32 0.35355338, %v1180_v28  ;;  %v1412_v15 = vpop.f32.mrf.mxu2 }
 0x3b8   :  { %1555 = vmax.xlane.f32.xlu2 %v1554_v34  ;;  %v1545_v50 = vsel %vm571_vm3, %v11222_v10, -inf }
 0x3b9   :  { %v1341_v32 = vpop.f32.mrf.mxu3  ;;  %1546 = vmax.xlane.f32.xlu1 %v1545_v50 }
 0x3ba   :  { %v11250_v17 = vmul.f32 0.35355338, %v1341_v32 }
 0x3bc   :  { %v1566_v18 = vsel %vm571_vm3, %v11250_v17, -inf }
 0x3bd   :  { %v1182_v46 = vpop.f32.mrf.mxu0 }
 0x3c1   :  { %v1343_v0 = vpop.f32.mrf.mxu3 }
 0x3c5   :  { %v1272_v4 = vpop.f32.mrf.mxu0 }
 0x3c6   :  { %v11228_v6 = vmul.f32 0.35355338, %v1272_v4 }
 0x3c8   :  { %v1557_v23 = vsel %vm571_vm3, %v11228_v6, -inf }
 0x3c9   :  { %1558 = vmax.xlane.f32.xlu0 %v1557_v23  ;;  %v1433_v33 = vpop.f32.mrf.mxu3 }
 0x3ca   :  { %v1387_v43 = vpop.f32.mrf.mxu1  ;;  %v11266_v28 = vmul.f32 0.35355338, %v1433_v33 }
 0x3cb   :  { %v11232_v8 = vmul.f32 0.35355338, %v1387_v43 }
 0x3cc   :  { %v1578_v34 = vsel %vm571_vm3, %v11266_v28, -inf }
 0x3cd   :  { %v1274_v27 = vpop.f32.mrf.mxu0  ;;  %v1572_v52 = vsel %vm571_vm3, %v11232_v8, -inf }
 0x3ce   :  { %1573 = vmax.xlane.f32.xlu1 %v1572_v52 }
 0x3d0   :  { %v1502_v44 = vpop.f32.mrf.mxu2 }
 0x3d1   :  { %v1435_v47 = vpop.f32.mrf.mxu3  ;;  %v11262_v2 = vmul.f32 0.35355338, %v1502_v44 }
 0x3d2   :  { %v1389_v61 = vpop.f32.mrf.mxu1 }
 0x3d3   :  { %v1587_v3 = vsel %vm571_vm3, %v11262_v2, -inf }
 0x3d5   :  { %v1364_v57 = vpop.f32.mrf.mxu0 }
 0x3d6   :  { %v11240_v11 = vmul.f32 0.35355338, %v1364_v57  ;;  %1576 = vmax.xlane.f32.xlu1 %v1575_v53 }
 0x3d8   :  { %v1504_v60 = vpop.f32.mrf.mxu2  ;;  %v1569_v58 = vsel %vm571_vm3, %v11240_v11, -inf }
 0x3d9   :  { %1570 = vmax.xlane.f32.xlu2 %v1569_v58  ;;  %v1525_v41 = vpop.f32.mrf.mxu3 }
 0x3da   :  { %v1479_v29 = vpop.f32.mrf.mxu1 }
 0x3db   :  { %v11244_v59 = vmul.f32 0.35355338, %v1479_v29 }
 0x3dd   :  { %1968 = vrot.lane.b32.xlu0 %v10707_v1, %s10502_s29  ;;  %v1366_v37 = vpop.f32.mrf.mxu0  ;;  %v1584_v63 = vsel %vm571_vm3, %v11244_v59, -inf }
 0x3de   :  { %1585 = vmax.xlane.f32.xlu1 %v1584_v63 }
 0x3e1   :  { %v1527_v16 = vpop.f32.mrf.mxu3 }
 0x3e2   :  { %v1481_v40 = vpop.f32.mrf.mxu1 }
 0x3e5   :  { %1926 = vrot.lane.b32.xlu0 %v10734_v20, %s10502_s29  ;;  %v1456_v36 = vpop.f32.mrf.mxu0 }
 0x3e6   :  { %1567 = vmax.xlane.f32.xlu1 %v1566_v18  ;;  %v11271_v0 = vmul.f32 0.35355338, %v1456_v36 }
 0x3e8   :  { %v1581_v33 = vsel %vm571_vm3, %v11271_v0, -inf }
 0x3ed   :  { %v1458_v31 = vpop.f32.mrf.mxu0 }
 0x3f1   :  { %1905 = vrot.lane.b32.xlu2 %v10694_v55, %s10502_s29 }
 0x3f9   :  { %2031 = vrot.lane.b32.xlu2 %v10736_v14, %s10502_s29  ;;  %v1550_v13 = vpop.xlane.xlu0 %1549 }
 0x3fa   :  { %v1594_v23 = vsub.f32 %v11204_v5, %v1550_v13 }
 0x3fc   :  { %v1611_v27 = vmul.f32 1.442695, %v1594_v23 }
 0x3ff   :  { %1947 = vrot.lane.b32.xlu1 %v10704_v62, %s10502_s29 }
 0x405   :  { %v1553_v15 = vpop.xlane.xlu0 %1552 }
 0x406   :  { %v1595_v50 = vsub.f32 %v11208_v9, %v1553_v15  ;;  %v11279_v9 = vmul.f32 0.35355338, %v1525_v41 }
 0x408   :  { %v1613_v32 = vmul.f32 1.442695, %v1595_v50  ;;  %v1590_v5 = vsel %vm571_vm3, %v11279_v9, -inf }
 0x40a   :  { %9964 = vpow2.f32 %v1613_v32 }
 0x40f   :  { %1588 = vmax.xlane.f32.xlu0 %v1587_v3 }
 0x410   :  { %v11277_v44 = vpop.eup %9964 }
 0x417   :  { %1579 = vmax.xlane.f32.xlu0 %v1578_v34 }
 0x41b   :  { %v1562_v46 = vpop.xlane.xlu2 %1561 }
 0x41c   :  { %v1598_v4 = vsub.f32 %v11212_v12, %v1562_v46  ;;  %v1647_v12 = vsel %vm571_vm3, %v11277_v44, 0.0 }
 0x41e   :  { %v1619_v43 = vmul.f32 1.442695, %v1598_v4 }
 0x420   :  { %9966 = vpow2.f32 %v1619_v43 }
 0x421   :  { %9968 = vpow2.f32 %v1611_v27 }
 0x422   :  { %1582 = vmax.xlane.f32.xlu2 %v1581_v33 }
 0x423   :  { %v1565_v52 = vpop.xlane.xlu2 %1564 }
 0x424   :  { %v1599_v47 = vsub.f32 %v11216_v22, %v1565_v52 }
 0x426   :  { %v1621_v61 = vmul.f32 1.442695, %v1599_v47  ;;  %v11286_v53 = vpop.eup %9966 }
 0x427   :  { %v11289_v58 = vpop.eup %9968  ;;  %v1656_v22 = vsel %vm571_vm3, %v11286_v53, 0.0 }
 0x428   :  { %9970 = vpow2.f32 %v1621_v61  ;;  %v1644_v29 = vsel %vm571_vm3, %v11289_v58, 0.0 }
 0x429   :  { %1648 = vadd.xlane.f32.xlu1 %v1647_v12 }
 0x42a   :  { %1591 = vmax.xlane.f32.xlu2 %v1590_v5 }
 0x42b   :  { %v1556_v40 = vpop.xlane.xlu2 %1555 }
 0x42c   :  { %v1547_v57 = vpop.xlane.xlu1 %1546  ;;  %v1596_v31 = vsub.f32 %v11220_v19, %v1556_v40 }
 0x42d   :  { %v1593_v60 = vsub.f32 %v11222_v10, %v1547_v57 }
 0x42e   :  { %v11295_v37 = vpop.eup %9970  ;;  %v1615_v34 = vmul.f32 1.442695, %v1596_v31 }
 0x42f   :  { %v1609_v41 = vmul.f32 1.442695, %v1593_v60  ;;  %v1659_v10 = vsel %vm571_vm3, %v11295_v37, 0.0 }
 0x431   :  { %9972 = vpow2.f32 %v1609_v41  ;;  %1657 = vadd.xlane.f32.xlu1 %v1656_v22 }
 0x432   :  { %1645 = vadd.xlane.f32.xlu2 %v1644_v29 }
 0x437   :  { %v11297_v63 = vpop.eup %9972 }
 0x438   :  { %v1641_v16 = vsel %vm571_vm3, %v11297_v63, 0.0 }
 0x439   :  { %1660 = vadd.xlane.f32.xlu1 %v1659_v10  ;;  %1642 = vadd.xlane.f32.xlu0 %v1641_v16 }
 0x43c   :  { %v1559_v36 = vpop.xlane.xlu0 %1558 }
 0x43d   :  { %v1597_v18 = vsub.f32 %v11228_v6, %v1559_v36 }
 0x43f   :  { %v1617_v13 = vmul.f32 1.442695, %v1597_v18 }
 0x441   :  { %9974 = vpow2.f32 %v1617_v13  ;;  %v1574_v3 = vpop.xlane.xlu1 %1573 }
 0x442   :  { %v1602_v15 = vsub.f32 %v11232_v8, %v1574_v3 }
 0x444   :  { %v1627_v50 = vmul.f32 1.442695, %v1602_v15 }
 0x446   :  { %9976 = vpow2.f32 %v1627_v50 }
 0x447   :  { %v11306_v32 = vpop.eup %9974  ;;  %9978 = vpow2.f32 %v1615_v34 }
 0x448   :  { %v1653_v46 = vsel %vm571_vm3, %v11306_v32, 0.0 }
 0x449   :  { %1654 = vadd.xlane.f32.xlu0 %v1653_v46  ;;  %v1577_v4 = vpop.xlane.xlu1 %1576 }
 0x44a   :  { %v1603_v6 = vsub.f32 %v11236_v56, %v1577_v4 }
 0x44c   :  { %v11311_v23 = vpop.eup %9976  ;;  %v1629_v19 = vmul.f32 1.442695, %v1603_v6  ;;  %v1571_v33 = vpop.xlane.xlu2 %1570 }
 0x44d   :  { %v11313_v43 = vpop.eup %9978  ;;  %v1601_v8 = vsub.f32 %v11240_v11, %v1571_v33  ;;  %v1668_v27 = vsel %vm571_vm3, %v11311_v23, 0.0 }
 0x44e   :  { %9980 = vpow2.f32 %v1629_v19  ;;  %1669 = vadd.xlane.f32.xlu2 %v1668_v27  ;;  %v1650_v47 = vsel %vm571_vm3, %v11313_v43, 0.0 }
 0x44f   :  { %v1625_v52 = vmul.f32 1.442695, %v1601_v8  ;;  %v11338_v36 = vpop.permute.xlu0 %1968 }
 0x451   :  { %9982 = vpow2.f32 %v1625_v52  ;;  %1651 = vadd.xlane.f32.xlu0 %v1650_v47  ;;  %v1586_v56 = vpop.xlane.xlu1 %1585 }
 0x452   :  { %v1606_v12 = vsub.f32 %v11244_v59, %v1586_v56 }
 0x454   :  { %v11321_v5 = vpop.eup %9980  ;;  %v1635_v61 = vmul.f32 1.442695, %v1606_v12  ;;  %v1906_v13 = vpop.permute.xlu2 %1905 }
 0x455   :  { %v1671_v11 = vsel %vm571_vm3, %v11321_v5, 0.0 }
 0x456   :  { %9984 = vpow2.f32 %v1635_v61  ;;  %1672 = vadd.xlane.f32.xlu2 %v1671_v11 }
 0x457   :  { %v11325_v57 = vpop.eup %9982  ;;  %v1927_v18 = vpop.permute.xlu0 %1926 }
 0x458   :  { %v1665_v60 = vsel %vm571_vm3, %v11325_v57, 0.0 }
 0x459   :  { %1666 = vadd.xlane.f32.xlu0 %v1665_v60  ;;  %v1568_v41 = vpop.xlane.xlu1 %1567 }
 0x45a   :  { %v1600_v22 = vsub.f32 %v11250_v17, %v1568_v41 }
 0x45c   :  { %v11330_v29 = vpop.eup %9984  ;;  %v1623_v59 = vmul.f32 1.442695, %v1600_v22  ;;  %v2032_v46 = vpop.permute.xlu2 %2031 }
 0x45d   :  { %v1680_v10 = vsel %vm571_vm3, %v11330_v29, 0.0 }
 0x45e   :  { %9986 = vpow2.f32 %v1623_v59  ;;  %1681 = vadd.xlane.f32.xlu1 %v1680_v10 }
 0x464   :  { %v11334_v16 = vpop.eup %9986 }
 0x465   :  { %v1662_v40 = vsel %vm571_vm3, %v11334_v16, 0.0 }
 0x466   :  { %1663 = vadd.xlane.f32.xlu2 %v1662_v40 }
 0x471   :  { %v1948_v19 = vpop.permute.xlu1 %1947 }
 0x472   :  { %v1953_v40 = vsel %vm770_vm2, %v1948_v19, 0 }
 0x482   :  { %v1589_v31 = vpop.xlane.xlu0 %1588 }
 0x483   :  { %v1607_v17 = vsub.f32 %v11262_v2, %v1589_v31 }
 0x485   :  { %v1637_v3 = vmul.f32 1.442695, %v1607_v17 }
 0x487   :  { %9988 = vpow2.f32 %v1637_v3 }
 0x48a   :  { %v1580_v15 = vpop.xlane.xlu0 %1579 }
 0x48b   :  { %v1604_v34 = vsub.f32 %v11266_v28, %v1580_v15 }
 0x48d   :  { %v11342_v50 = vpop.eup %9988  ;;  %v1631_v4 = vmul.f32 1.442695, %v1604_v34  ;;  %v1932_v34 = vsel %vm770_vm2, %v1927_v18, 0  ;;  %v2037_v18 = vsel %vm770_vm2, %v2032_v46, 0 }
 0x48e   :  { %v1683_v6 = vsel %vm571_vm3, %v11342_v50, 0.0 }
 0x48f   :  { %9990 = vpow2.f32 %v1631_v4  ;;  %1684 = vadd.xlane.f32.xlu1 %v1683_v6 }
 0x495   :  { %v11346_v33 = vpop.eup %9990  ;;  %v1583_v8 = vpop.xlane.xlu2 %1582 }
 0x496   :  { %v1605_v2 = vsub.f32 %v11271_v0, %v1583_v8  ;;  %v1674_v27 = vsel %vm571_vm3, %v11346_v33, 0.0 }
 0x497   :  { %1675 = vadd.xlane.f32.xlu1 %v1674_v27 }
 0x498   :  { %v1633_v28 = vmul.f32 1.442695, %v1605_v2 }
 0x49a   :  { %9992 = vpow2.f32 %v1633_v28  ;;  %v1911_v28 = vsel %vm770_vm2, %v1906_v13, 0 }
 0x49c   :  { %v1649_v52 = vpop.xlane.xlu1 %1648 }
 0x49d   :  { %9994 = vrcp.f32 %v1649_v52  ;;  %v1592_v47 = vpop.xlane.xlu2 %1591 }
 0x49e   :  { %v1608_v56 = vsub.f32 %v11279_v9, %v1592_v47 }
 0x4a0   :  { %v11352_v12 = vpop.eup %9992  ;;  %v1639_v61 = vmul.f32 1.442695, %v1608_v56 }
 0x4a1   :  { %v1677_v11 = vsel %vm571_vm3, %v11352_v12, 0.0 }
 0x4a2   :  { %9996 = vpow2.f32 %v1639_v61  ;;  %1678 = vadd.xlane.f32.xlu0 %v1677_v11 }
 0x4a3   :  { %v9995_v0 = vpop.eup %9994 }
 0x4a4   :  { %v1707_v60 = vmul.f32 %v9995_v0, %v11277_v44  ;;  %v1658_v41 = vpop.xlane.xlu1 %1657 }
 0x4a5   :  { %v1646_v22 = vpop.xlane.xlu2 %1645 }
 0x4a6   :  { %v1723_v59 = vpack.c.bf16 %v1707_v60, %v1707_v60  ;;  %9998 = vrcp.f32 %v1646_v22 }
 0x4a8   :  { %v11357_v10 = vpop.eup %9996  ;;  %9538 = vmatmul.msk.bf16.vlgmr.msrb.gmra.mxu2 %vm766_vm4, %v1723_v59 }
 0x4a9   :  { %1962 = vmatpush.bf16.msrb.mxu2 %v1953_v40  ;;  %v1686_v9 = vsel %vm571_vm3, %v11357_v10, 0.0 }
 0x4aa   :  { %1687 = vadd.xlane.f32.xlu2 %v1686_v9  ;;  %v1974_v9 = vsel %vm770_vm2, %v11338_v36, 0 }
 0x4ac   :  { %v9999_v31 = vpop.eup %9998  ;;  %v1643_v17 = vpop.xlane.xlu0 %1642 }
 0x4ad   :  { %v1661_v3 = vpop.xlane.xlu1 %1660  ;;  %v1706_v44 = vmul.f32 %v9999_v31, %v11289_v58  ;;  %10000 = vrcp.f32 %v1643_v17 }
 0x4ae   :  { %10002 = vrcp.f32 %v1661_v3 }
 0x4af   :  { %v1722_v15 = vpack.c.bf16 %v1706_v44, %v1706_v44  ;;  %10004 = vrcp.f32 %v1658_v41 }
 0x4b0   :  { %1989 = vrot.lane.b32.xlu1 %v10719_v7, %s10502_s29 }
 0x4b1   :  { %9537 = vmatmul.msk.bf16.vlgmr.msra.gmra.mxu1 %vm766_vm4, %v1722_v15 }
 0x4b2   :  { %1941 = vmatpush.bf16.msra.mxu1 %v1932_v34 }
 0x4b3   :  { %v10001_v4 = vpop.eup %10000 }
 0x4b4   :  { %v10003_v6 = vpop.eup %10002  ;;  %v1705_v19 = vmul.f32 %v10001_v4, %v11297_v63 }
 0x4b5   :  { %v1711_v8 = vmul.f32 %v10003_v6, %v11295_v37  ;;  %v10005_v27 = vpop.eup %10004 }
 0x4b6   :  { %v1721_v2 = vpack.c.bf16 %v1705_v19, %v1705_v19  ;;  %2052 = vrot.lane.b32.xlu0 %v10748_v26, %s10502_s29  ;;  %v1710_v37 = vmul.f32 %v10005_v27, %v11286_v53 }
 0x4b7   :  { %v1727_v58 = vpack.c.bf16 %v1711_v8, %v1711_v8 }
 0x4b8   :  { %9536 = vmatmul.msk.bf16.vlgmr.msrb.gmra.mxu0 %vm766_vm4, %v1721_v2  ;;  %2244 = vrot.lane.b32.xlu1 %v10639_v24, %s10503_s30  ;;  %v1726_v13 = vpack.c.bf16 %v1710_v37, %v1710_v37 }
 0x4b9   :  { %1920 = vmatpush.bf16.msrb.mxu0 %v1911_v28  ;;  %9542 = vmatmul.msk.bf16.vlgmr.msra.gmra.mxu2 %vm766_vm4, %v1727_v58 }
 0x4ba   :  { %2046 = vmatpush.bf16.msra.mxu2 %v2037_v18 }
 0x4bc   :  { %v1655_v63 = vpop.xlane.xlu0 %1654 }
 0x4bd   :  { %10006 = vrcp.f32 %v1655_v63  ;;  %v150_v63 = vld [vmem:[%s14298_s3] sm:$0xf] }
 0x4be   :  { %2223 = vrot.lane.b32.xlu0 %v10636_v21, %s10504_s16 }
 0x4c0   :  { %2267 = vrot.lane.b32.xlu1 %v10651_v30, %s10503_s30 }
 0x4c1   :  { %v1670_v52 = vpop.xlane.xlu2 %1669  ;;  %9541 = vmatmul.msk.bf16.vlgmr.msrb.gmra.mxu1 %vm766_vm4, %v1726_v13 }
 0x4c2   :  { %10008 = vrcp.f32 %v1670_v52  ;;  %2010 = vrot.lane.b32.xlu2 %v10746_v25, %s10502_s29 }
 0x4c3   :  { %v10007_v46 = vpop.eup %10006 }
 0x4c4   :  { %v1709_v53 = vmul.f32 %v10007_v46, %v11306_v32  ;;  %v1652_v47 = vpop.xlane.xlu0 %1651 }
 0x4c5   :  { %10010 = vrcp.f32 %v1652_v47 }
 0x4c6   :  { %v1725_v56 = vpack.c.bf16 %v1709_v53, %v1709_v53  ;;  %2221 = vrot.lane.b32.xlu0 %v10636_v21, %s10503_s30 }
 0x4c8   :  { %v10009_v61 = vpop.eup %10008  ;;  %9540 = vmatmul.msk.bf16.vlgmr.msra.gmra.mxu0 %vm766_vm4, %v1725_v56  ;;  %2338 = vrot.lane.b32.xlu1 %v10667_v42, %s10504_s16  ;;  %v2190_v56 = vsel %vm2144_vm5, %v150_v63, 0 }
 0x4c9   :  { %v1673_v11 = vpop.xlane.xlu2 %1672  ;;  %v1714_v32 = vmul.f32 %v10009_v61, %v11311_v23 }
 0x4ca   :  { %10012 = vrcp.f32 %v1673_v11  ;;  %2246 = vrot.lane.b32.xlu2 %v10639_v24, %s10504_s16 }
 0x4cb   :  { %v10011_v0 = vpop.eup %10010  ;;  %v1730_v59 = vpack.c.bf16 %v1714_v32, %v1714_v32 }
 0x4cc   :  { %v1708_v60 = vmul.f32 %v10011_v0, %v11313_v43  ;;  %v1667_v41 = vpop.xlane.xlu0 %1666 }
 0x4cd   :  { %10014 = vrcp.f32 %v1667_v41 }
 0x4ce   :  { %v1724_v22 = vpack.c.bf16 %v1708_v60, %v1708_v60  ;;  %2292 = vrot.lane.b32.xlu0 %v10662_v38, %s10504_s16  ;;  %v11488_v60 = vld.sshfl [vmem:[#allocation1 + $0x10] sm:$0xff pattern:$0x75316420] }
 0x4d0   :  { %v10013_v40 = vpop.eup %10012  ;;  %9539 = vmatmul.msk.bf16.vlgmr.msrb.gmra.mxu3 %vm766_vm4, %v1724_v22  ;;  %2361 = vrot.lane.b32.xlu1 %v10681_v48, %s10504_s16 }
 0x4d1   :  { %v1715_v23 = vmul.f32 %v10013_v40, %v11321_v5  ;;  %1983 = vmatpush.bf16.msrb.mxu3 %v1974_v9  ;;  %9545 = vmatmul.msk.bf16.vlgmr.msra.gmra.mxu1 %vm766_vm4, %v1730_v59  ;;  %v11490_v40 = vld.sshfl [vmem:[#allocation1] sm:$0xff pattern:$0x75316420] }
 0x4d2   :  { %2269 = vrot.lane.b32.xlu2 %v10651_v30, %s10504_s16 }
 0x4d3   :  { %v10015_v43 = vpop.eup %10014  ;;  %v1731_v31 = vpack.c.bf16 %v1715_v23, %v1715_v23 }
 0x4d4   :  { %v1713_v17 = vmul.f32 %v10015_v43, %v11325_v57 }
 0x4d5   :  { %9546 = vmatmul.msk.bf16.vlgmr.msrb.gmra.mxu2 %vm766_vm4, %v1731_v31 }
 0x4d6   :  { %v1729_v36 = vpack.c.bf16 %v1713_v17, %v1713_v17  ;;  %2315 = vrot.lane.b32.xlu0 %v10664_v39, %s10504_s16 }
 0x4d8   :  { %9544 = vmatmul.msk.bf16.vlgmr.msrb.gmra.mxu0 %vm766_vm4, %v1729_v36  ;;  %2382 = vrot.lane.b32.xlu1 %v10684_v51, %s10503_s30 }
 0x4d9   :  { %v1664_v5 = vpop.xlane.xlu2 %1663 }
 0x4da   :  { %10016 = vrcp.f32 %v1664_v5  ;;  %2290 = vrot.lane.b32.xlu2 %v10662_v38, %s10503_s30 }
 0x4de   :  { %2336 = vrot.lane.b32.xlu0 %v10667_v42, %s10503_s30 }
 0x4e0   :  { %v10017_v57 = vpop.eup %10016  ;;  %2451 = vrot.lane.b32.xlu1 %v10704_v62, %s10503_s30 }
 0x4e1   :  { %v1712_v3 = vmul.f32 %v10017_v57, %v11334_v16  ;;  %v1682_v16 = vpop.xlane.xlu1 %1681 }
 0x4e2   :  { %2313 = vrot.lane.b32.xlu2 %v10664_v39, %s10503_s30 }
 0x4e3   :  { %v1728_v44 = vpack.c.bf16 %v1712_v3, %v1712_v3 }
 0x4e5   :  { %9543 = vmatmul.msk.bf16.vlgmr.msra.gmra.mxu3 %vm766_vm4, %v1728_v44 }
 0x4e6   :  { %2359 = vrot.lane.b32.xlu0 %v10681_v48, %s10503_s30 }
 0x4e8   :  { %2430 = vrot.lane.b32.xlu1 %v10734_v20, %s10504_s16 }
 0x4ea   :  { %2384 = vrot.lane.b32.xlu2 %v10684_v51, %s10504_s16 }
 0x4ee   :  { %2476 = vrot.lane.b32.xlu0 %v10707_v1, %s10504_s16 }
 0x4f0   :  { %2405 = vrot.lane.b32.xlu1 %v10694_v55, %s10503_s30 }
 0x4f2   :  { %2453 = vrot.lane.b32.xlu2 %v10704_v62, %s10504_s16 }
 0x4f6   :  { %2407 = vrot.lane.b32.xlu0 %v10694_v55, %s10504_s16 }
 0x4f8   :  { %2566 = vrot.lane.b32.xlu1 %v10748_v26, %s10503_s30 }
 0x4fa   :  { %2474 = vrot.lane.b32.xlu2 %v10707_v1, %s10503_s30 }
 0x4fe   :  { %2568 = vrot.lane.b32.xlu0 %v10748_v26, %s10504_s16 }
 0x500   :  { %2497 = vrot.lane.b32.xlu1 %v10719_v7, %s10503_s30 }
 0x502   :  { %2545 = vrot.lane.b32.xlu2 %v10736_v14, %s10504_s16  ;;  %v1685_v15 = vpop.xlane.xlu1 %1684 }
 0x503   :  { %10018 = vrcp.f32 %v1685_v15 }
 0x506   :  { %2543 = vrot.lane.b32.xlu0 %v10736_v14, %s10503_s30 }
 0x508   :  { %2797 = vrot.lane.b32.xlu1 %v10636_v21, %s10505_s17 }
 0x509   :  { %v10019_v34 = vpop.eup %10018 }
 0x50a   :  { %v1719_v4 = vmul.f32 %v10019_v34, %v11342_v50  ;;  %2428 = vrot.lane.b32.xlu2 %v10734_v20, %s10503_s30  ;;  %v1676_v6 = vpop.xlane.xlu1 %1675  ;;  %v151_v34 = vld [vmem:[%s14298_s3 + $0x4] sm:$0xf] }
 0x50b   :  { %10020 = vrcp.f32 %v1676_v6 }
 0x50c   :  { %v1735_v19 = vpack.c.bf16 %v1719_v4, %v1719_v4  ;;  %v11505_v4 = vld.sshfl [vmem:[#allocation1 + $0x30] sm:$0xff pattern:$0x75316420] }
 0x50e   :  { %2522 = vrot.lane.b32.xlu0 %v10746_v25, %s10504_s16  ;;  %9550 = vmatmul.msk.bf16.vlgmr.msra.gmra.mxu2 %vm766_vm4, %v1735_v19  ;;  %v2146_v19 = vsel %vm2144_vm5, %v151_v34, 0 }
 0x510   :  { %2923 = vrot.lane.b32.xlu1 %v10681_v48, %s10505_s17 }
 0x511   :  { %v10021_v8 = vpop.eup %10020 }
 0x512   :  { %v1716_v2 = vmul.f32 %v10021_v8, %v11346_v33  ;;  %2499 = vrot.lane.b32.xlu2 %v10719_v7, %s10504_s16 }
 0x514   :  { %v1732_v50 = vpack.c.bf16 %v1716_v2, %v1716_v2 }
 0x515   :  { %v1679_v58 = vpop.xlane.xlu0 %1678 }
 0x516   :  { %2860 = vrot.lane.b32.xlu0 %v10662_v38, %s10505_s17  ;;  %9547 = vmatmul.msk.bf16.vlgmr.msrb.gmra.mxu3 %vm766_vm4, %v1732_v50  ;;  %10022 = vrcp.f32 %v1679_v58  ;;  %v11508_v50 = vld.sshfl [vmem:[#allocation1 + $0x20] sm:$0xff pattern:$0x75316420] }
 0x517   :  { %10024 = vrcp.f32 %v1682_v16  ;;  %v1157_v16 = vpack.c.bf16 %v11183_v35, %v11177_v45 }
 0x51a   :  { %2520 = vrot.lane.b32.xlu2 %v10746_v25, %s10503_s30 }
 0x51c   :  { %v10023_v28 = vpop.eup %10022 }
 0x51d   :  { %v1688_v27 = vpop.xlane.xlu2 %1687  ;;  %v10025_v33 = vpop.eup %10024  ;;  %v1717_v18 = vmul.f32 %v10023_v28, %v11352_v12 }
 0x51e   :  { %2818 = vrot.lane.b32.xlu0 %v10639_v24, %s10505_s17  ;;  %10026 = vrcp.f32 %v1688_v27  ;;  %v1718_v52 = vmul.f32 %v10025_v33, %v11330_v29 }
 0x51f   :  { %v1733_v53 = vpack.c.bf16 %v1717_v18, %v1717_v18 }
 0x520   :  { %v1734_v61 = vpack.c.bf16 %v1718_v52, %v1718_v52  ;;  %v1158_v52 = vpack.c.bf16 %v11202_v49, %v11200_v54 }
 0x522   :  { %2839 = vrot.lane.b32.xlu2 %v10651_v30, %s10505_s17  ;;  %v1990_v37 = vpop.permute.xlu1 %1989 }
 0x523   :  { %v1995_v13 = vsel %vm770_vm2, %v1990_v37, 0 }
 0x524   :  { %2004 = vmatpush.bf16.msra.mxu0 %v1995_v13  ;;  %v10027_v46 = vpop.eup %10026 }
 0x525   :  { %v2011_v47 = vpop.permute.xlu2 %2010  ;;  %v1720_v11 = vmul.f32 %v10027_v46, %v11357_v10 }
 0x526   :  { %v2016_v12 = vsel %vm770_vm2, %v2011_v47, 0  ;;  %2944 = vrot.lane.b32.xlu0 %v10684_v51, %s10505_s17 }
 0x527   :  { %9548 = vmatmul.msk.bf16.vlgmr.msra.gmra.mxu0 %vm766_vm4, %v1733_v53  ;;  %2025 = vmatpush.bf16.msrb.mxu1 %v2016_v12  ;;  %v1736_v22 = vpack.c.bf16 %v1720_v11, %v1720_v11 }
 0x528   :  { %v2053_v0 = vpop.permute.xlu0 %2052  ;;  %2155 = vmatpush.bf16.msrb.mxu0 %v2146_v19  ;;  %v1160_v19 = vpack.c.bf16 %v11505_v4, %v11508_v50 }
 0x529   :  { %v2058_v29 = vsel %vm770_vm2, %v2053_v0, 0 }
 0x52a   :  { %2881 = vrot.lane.b32.xlu2 %v10664_v39, %s10505_s17  ;;  %9549 = vmatmul.msk.bf16.vlgmr.msrb.gmra.mxu1 %vm766_vm4, %v1734_v61  ;;  %v2245_v32 = vpop.permute.xlu1 %2244 }
 0x52b   :  { %2199 = vmatpush.bf16.msra.mxu1 %v2190_v56  ;;  %2067 = vmatpush.bf16.msra.mxu3 %v2058_v29  ;;  %v1796_v41 = vpop.f32.mrf.mxu2 }
 0x52c   :  { %2093 = vst [vmem:[#allocation1 + $0x10] ss:$2 sm:$0xff] %v1796_v41 }
 0x52d   :  { %v2247_v59 = vpop.permute.xlu2 %2246 }
 0x52e   :  { %v2252_v10 = vsel %vm175_vm1, %v2247_v59, 0  ;;  %9551 = vmatmul.msk.bf16.vlgmr.msra.gmra.mxu3 %vm766_vm4, %v1736_v22  ;;  %v1775_v9 = vpop.f32.mrf.mxu1  ;;  %2902 = vrot.lane.b32.xlu0 %v10667_v42, %s10505_s17 }
 0x52f   :  { %2091 = vst [vmem:[#allocation1 + $0x1] ss:$2 sm:$0xff] %v1775_v9  ;;  %2261 = vmatpush.bf16.xpose.msrb.mxu3 %v2252_v10  ;;  %v1159_v9 = vpack.c.bf16 %v11488_v60, %v11490_v40 }
 0x530   :  { %v2224_v23 = vpop.permute.xlu0 %2223 }
 0x531   :  { %v2229_v43 = vsel %vm175_vm1, %v2224_v23, 0 }
 0x532   :  { %2238 = vmatpush.bf16.xpose.msrb.mxu2 %v2229_v43  ;;  %v2268_v31 = vpop.permute.xlu1 %2267 }
 0x533   :  { %v1798_v17 = vpop.f32.mrf.mxu2 }
 0x535   :  { %v1754_v36 = vpop.f32.mrf.mxu0  ;;  %v2270_v5 = vpop.permute.xlu2 %2269 }
 0x536   :  { %2089 = vst [vmem:[#allocation1] ss:$2 sm:$0xff] %v1754_v36  ;;  %v2275_v57 = vsel %vm175_vm1, %v2270_v5, 0  ;;  %v1777_v3 = vpop.f32.mrf.mxu1 }
 0x538   :  { %v2222_v44 = vpop.permute.xlu0 %2221 }
 0x539   :  { %9560 = vmatmul.msk.bf16.vlgmr.msrb.gmra.mxu2 %vm175_vm1, %v2222_v44 }
 0x53a   :  { %2284 = vmatpush.bf16.xpose.msra.mxu2 %v2275_v57  ;;  %9556 = vmatmul.msk.bf16.vlgmr.msra.gmra.mxu1 %vm175_vm1, %v1157_v16  ;;  %v2339_v15 = vpop.permute.xlu1 %2338 }
 0x53b   :  { %v2344_v27 = vsel %vm175_vm1, %v2339_v15, 0 }
 0x53c   :  { %v1880_v6 = vpop.f32.mrf.mxu2 }
 0x53d   :  { %2101 = vst [vmem:[#allocation1 + $0x30] ss:$2 sm:$0xff] %v1880_v6  ;;  %v1756_v8 = vpop.f32.mrf.mxu0  ;;  %v2291_v2 = vpop.permute.xlu2 %2290  ;;  %v2104_v61 = vld.sshfl [vmem:[#allocation1] sm:$0xff pattern:$0x75316420] }
 0x53e   :  { %9561 = vmatmul.msk.bf16.vlgmr.msrb.gmra.mxu3 %vm175_vm1, %v2245_v32  ;;  %v1859_v45 = vpop.f32.mrf.mxu1 }
 0x53f   :  { %2099 = vst [vmem:[#allocation1 + $0x21] ss:$2 sm:$0xff] %v1859_v45 }
 0x540   :  { %v2293_v35 = vpop.permute.xlu0 %2292 }
 0x541   :  { %v2298_v58 = vsel %vm175_vm1, %v2293_v35, 0 }
 0x542   :  { %2307 = vmatpush.bf16.xpose.msra.mxu3 %v2298_v58  ;;  %v2362_v28 = vpop.permute.xlu1 %2361 }
 0x543   :  { %v2367_v53 = vsel %vm175_vm1, %v2362_v28, 0 }
 0x544   :  { %v1882_v33 = vpop.f32.mrf.mxu2 }
 0x545   :  { %v1838_v18 = vpop.f32.mrf.mxu0  ;;  %v2314_v37 = vpop.permute.xlu2 %2313 }
 0x546   :  { %2097 = vst [vmem:[#allocation1 + $0x20] ss:$2 sm:$0xff] %v1838_v18  ;;  %v1861_v63 = vpop.f32.mrf.mxu1 }
 0x548   :  { %v2316_v13 = vpop.permute.xlu0 %2315 }
 0x549   :  { %v2321_v46 = vsel %vm175_vm1, %v2316_v13, 0  ;;  %9562 = vmatmul.msk.bf16.vlgmr.msra.gmra.mxu2 %vm175_vm1, %v2268_v31 }
 0x54a   :  { %2353 = vmatpush.bf16.xpose.msrb.mxu3 %v2344_v27  ;;  %9557 = vmatmul.msk.bf16.gmra.mxu1 %vm175_vm1, %v1158_v52  ;;  %v2383_v47 = vpop.permute.xlu1 %2382 }
 0x54b   :  { %2330 = vmatpush.bf16.xpose.msrb.mxu2 %v2321_v46 }
 0x54d   :  { %v1840_v56 = vpop.f32.mrf.mxu0  ;;  %v2385_v12 = vpop.permute.xlu2 %2384  ;;  %v2106_v58 = vld.sshfl [vmem:[#allocation1 + $0x20] sm:$0xff pattern:$0x75316420] }
 0x54e   :  { %v2390_v11 = vsel %vm175_vm1, %v2385_v12, 0  ;;  %9563 = vmatmul.msk.bf16.vlgmr.msra.gmra.mxu3 %vm175_vm1, %v2291_v2  ;;  %v1943_v0 = vpop.f32.mrf.mxu1 }
 0x54f   :  { %2109 = vst [vmem:[#allocation1 + $0x1] ss:$2 sm:$0xff] %v1943_v0 }
 0x550   :  { %v2337_v54 = vpop.permute.xlu0 %2336 }
 0x552   :  { %2399 = vmatpush.bf16.xpose.msra.mxu3 %v2390_v11  ;;  %v2452_v49 = vpop.permute.xlu1 %2451 }
 0x553   :  { %2376 = vmatpush.bf16.xpose.msra.mxu2 %v2367_v53  ;;  %v1817_v29 = vpop.f32.mrf.mxu3 }
 0x554   :  { %2095 = vst [vmem:[#allocation1 + $0x11] ss:$2 sm:$0xff] %v1817_v29 }
 0x555   :  { %v1922_v32 = vpop.f32.mrf.mxu0  ;;  %v2454_v41 = vpop.permute.xlu2 %2453 }
 0x556   :  { %2108 = vst [vmem:[#allocation1] ss:$2 sm:$0xff] %v1922_v32  ;;  %v1945_v22 = vpop.f32.mrf.mxu1  ;;  %v2459_v23 = vsel %vm175_vm1, %v2454_v41, 0 }
 0x558   :  { %v2360_v59 = vpop.permute.xlu0 %2359  ;;  %v1964_v10 = vpop.f32.mrf.mxu2 }
 0x559   :  { %9564 = vmatmul.msk.bf16.vlgmr.msrb.gmra.mxu2 %vm175_vm1, %v2314_v37 }
 0x55a   :  { %9558 = vmatmul.msk.bf16.gmra.mxu1 %vm175_vm1, %v1159_v9  ;;  %v2431_v43 = vpop.permute.xlu1 %2430 }
 0x55b   :  { %2468 = vmatpush.bf16.xpose.msrb.mxu2 %v2459_v23  ;;  %v2105_v31 = vld.sshfl [vmem:[#allocation1 + $0x10] sm:$0xff pattern:$0x75316420]  ;;  %v2436_v17 = vsel %vm175_vm1, %v2431_v43, 0  ;;  %v1819_v36 = vpop.f32.mrf.mxu3 }
 0x55c   :  { %2110 = vst [vmem:[#allocation1 + $0x10] ss:$2 sm:$0xff] %v1964_v10  ;;  %2445 = vmatpush.bf16.xpose.msrb.mxu1 %v2436_v17  ;;  %v2128_v5 = vpack.c.bf16 %v2105_v31, %v2104_v61 }
 0x55d   :  { %v1924_v57 = vpop.f32.mrf.mxu0  ;;  %v2475_v3 = vpop.permute.xlu2 %2474  ;;  %v2116_v9 = vld.sshfl [vmem:[#allocation1] sm:$0xff pattern:$0x75316420] }
 0x55e   :  { %9565 = vmatmul.msk.bf16.vlgmr.msrb.gmra.mxu3 %vm175_vm1, %v2337_v54  ;;  %9552 = vmatmul.msk.bf16.vlgmr.msrb.gmra.mxu0 %vm175_vm1, %v2128_v5 }
 0x560   :  { %v2477_v60 = vpop.permute.xlu0 %2476  ;;  %v1966_v40 = vpop.f32.mrf.mxu2 }
 0x561   :  { %v2482_v44 = vsel %vm175_vm1, %v2477_v60, 0 }
 0x562   :  { %2491 = vmatpush.bf16.xpose.msrb.mxu3 %v2482_v44  ;;  %v11530_v16 = vpop.permute.xlu1 %2405 }
 0x565   :  { %v2546_v15 = vpop.permute.xlu2 %2545 }
 0x566   :  { %v2551_v8 = vsel %vm175_vm1, %v2546_v15, 0 }
 0x568   :  { %v2408_v34 = vpop.permute.xlu0 %2407  ;;  %v1901_v6 = vpop.f32.mrf.mxu3 }
 0x569   :  { %v2413_v2 = vsel %vm175_vm1, %v2408_v34, 0  ;;  %2103 = vst [vmem:[#allocation1 + $0x31] ss:$2 sm:$0xff] %v1901_v6  ;;  %9566 = vmatmul.msk.bf16.vlgmr.msra.gmra.mxu2 %vm175_vm1, %v2360_v59 }
 0x56a   :  { %2560 = vmatpush.bf16.xpose.msra.mxu2 %v2551_v8  ;;  %9559 = vmatmul.msk.bf16.gmra.mxu1 %vm175_vm1, %v1160_v19  ;;  %v2567_v45 = vpop.permute.xlu1 %2566 }
 0x56b   :  { %2422 = vmatpush.bf16.xpose.msra.mxu0 %v2413_v2 }
 0x56d   :  { %v2429_v35 = vpop.permute.xlu2 %2428 }
 0x56e   :  { %9567 = vmatmul.msk.bf16.vlgmr.msra.gmra.mxu3 %vm175_vm1, %v2383_v47 }
 0x570   :  { %v2107_v27 = vld.sshfl [vmem:[#allocation1 + $0x30] sm:$0xff pattern:$0x75316420]  ;;  %v2569_v28 = vpop.permute.xlu0 %2568  ;;  %v1903_v33 = vpop.f32.mrf.mxu3 }
 0x571   :  { %v2574_v4 = vsel %vm175_vm1, %v2569_v28, 0  ;;  %v2129_v50 = vpack.c.bf16 %v2107_v27, %v2106_v58 }
 0x572   :  { %2583 = vmatpush.bf16.xpose.msra.mxu3 %v2574_v4  ;;  %v11540_v18 = vpop.permute.xlu1 %2497 }
 0x573   :  { %9553 = vmatmul.msk.bf16.gmra.mxu0 %vm175_vm1, %v2129_v50 }
 0x575   :  { %v2500_v37 = vpop.permute.xlu2 %2499 }
 0x576   :  { %v2505_v63 = vsel %vm175_vm1, %v2500_v37, 0 }
 0x577   :  { %2514 = vmatpush.bf16.xpose.msrb.mxu0 %v2505_v63 }
 0x578   :  { %v2544_v13 = vpop.permute.xlu0 %2543 }
 0x579   :  { %9570 = vmatmul.msk.bf16.vlgmr.msrb.gmra.mxu2 %vm175_vm1, %v2452_v49 }
 0x57a   :  { %9569 = vmatmul.msk.bf16.vlgmr.msrb.gmra.mxu1 %vm175_vm1, %v2429_v35  ;;  %v2798_v52 = vpop.permute.xlu1 %2797 }
 0x57b   :  { %v2803_v4 = vsel %vm770_vm2, %v2798_v52, 0 }
 0x57d   :  { %v2521_v46 = vpop.permute.xlu2 %2520 }
 0x57e   :  { %9571 = vmatmul.msk.bf16.vlgmr.msrb.gmra.mxu3 %vm175_vm1, %v2475_v3 }
 0x580   :  { %v2523_v53 = vpop.permute.xlu0 %2522 }
 0x581   :  { %v2528_v47 = vsel %vm175_vm1, %v2523_v53, 0 }
 0x582   :  { %2537 = vmatpush.bf16.xpose.msra.mxu1 %v2528_v47  ;;  %v2924_v12 = vpop.permute.xlu1 %2923 }
 0x583   :  { %v2929_v0 = vsel %vm770_vm2, %v2924_v12, 0 }
 0x585   :  { %v2840_v56 = vpop.permute.xlu2 %2839 }
 0x586   :  { %v2845_v61 = vsel %vm770_vm2, %v2840_v56, 0 }
 0x587   :  { %2854 = vmatpush.bf16.msrb.mxu2 %v2845_v61 }
 0x588   :  { %v2861_v11 = vpop.permute.xlu0 %2860 }
 0x589   :  { %v2866_v54 = vsel %vm770_vm2, %v2861_v11, 0  ;;  %9574 = vmatmul.msk.bf16.vlgmr.msra.gmra.mxu2 %vm175_vm1, %v2544_v13 }
 0x58a   :  { %9573 = vmatmul.msk.bf16.vlgmr.msra.gmra.mxu1 %vm175_vm1, %v2521_v46  ;;  %2875 = vmatpush.bf16.msrb.mxu3 %v2866_v54 }
 0x58b   :  { %2938 = vmatpush.bf16.msra.mxu2 %v2929_v0 }
 0x58d   :  { %v2882_v61 = vpop.permute.xlu2 %2881 }
 0x58e   :  { %9575 = vmatmul.msk.bf16.vlgmr.msra.gmra.mxu3 %vm175_vm1, %v2567_v45  ;;  %v2887_v54 = vsel %vm770_vm2, %v2882_v61, 0 }
 0x590   :  { %v2819_v49 = vpop.permute.xlu0 %2818 }
 0x591   :  { %v2824_v29 = vsel %vm770_vm2, %v2819_v49, 0  ;;  %v2048_v32 = vpop.f32.mrf.mxu2 }
 0x592   :  { %2114 = vst [vmem:[#allocation1 + $0x30] ss:$2 sm:$0xff] %v2048_v32  ;;  %2833 = vmatpush.bf16.msrb.mxu1 %v2824_v29 }
 0x598   :  { %v2945_v41 = vpop.permute.xlu0 %2944 }
 0x599   :  { %v2950_v22 = vsel %vm770_vm2, %v2945_v41, 0  ;;  %v1985_v59 = vpop.f32.mrf.mxu3  ;;  %v2050_v10 = vpop.f32.mrf.mxu2 }
 0x59a   :  { %2111 = vst [vmem:[#allocation1 + $0x11] ss:$2 sm:$0xff] %v1985_v59  ;;  %2959 = vmatpush.bf16.msra.mxu3 %v2950_v22 }
 0x5a0   :  { %v2903_v23 = vpop.permute.xlu0 %2902 }
 0x5a1   :  { %v2117_v43 = vld.sshfl [vmem:[#allocation1 + $0x10] sm:$0xff pattern:$0x75316420]  ;;  %v2908_v31 = vsel %vm770_vm2, %v2903_v23, 0  ;;  %v1987_v17 = vpop.f32.mrf.mxu3 }
 0x5a2   :  { %2917 = vmatpush.bf16.msra.mxu1 %v2908_v31  ;;  %v2130_v36 = vpack.c.bf16 %v2117_v43, %v2116_v9 }
 0x5a4   :  { %v2006_v5 = vpop.f32.mrf.mxu0  ;;  %9554 = vmatmul.msk.bf16.gmra.mxu0 %vm175_vm1, %v2130_v36 }
 0x5a5   :  { %2112 = vst [vmem:[#allocation1 + $0x20] ss:$2 sm:$0xff] %v2006_v5 }
 0x5a7   :  { %v2027_v57 = vpop.f32.mrf.mxu1 }
 0x5a8   :  { %2113 = vst [vmem:[#allocation1 + $0x21] ss:$2 sm:$0xff] %v2027_v57 }
 0x5ac   :  { %v2008_v3 = vpop.f32.mrf.mxu0 }
 0x5af   :  { %v2029_v60 = vpop.f32.mrf.mxu1  ;;  %v2118_v15 = vld.sshfl [vmem:[#allocation1 + $0x20] sm:$0xff pattern:$0x75316420] }
 0x5b1   :  { %v2069_v40 = vpop.f32.mrf.mxu3 }
 0x5b2   :  { %2115 = vst [vmem:[#allocation1 + $0x31] ss:$2 sm:$0xff] %v2069_v40 }
 0x5b7   :  { %v2201_v44 = vpop.f32.mrf.mxu1 }
 0x5b9   :  { %v2119_v34 = vld.sshfl [vmem:[#allocation1 + $0x30] sm:$0xff pattern:$0x75316420]  ;;  %v2071_v6 = vpop.f32.mrf.mxu3 }
 0x5ba   :  { %v2131_v19 = vpack.c.bf16 %v2119_v34, %v2118_v15 }
 0x5bc   :  { %9555 = vmatmul.msk.bf16.gmra.mxu0 %vm175_vm1, %v2131_v19  ;;  %v2240_v8 = vpop.f32.mrf.mxu2 }
 0x5bd   :  { %v11559_v2 = vmul.f32 0.35355338, %v2240_v8 }
 0x5bf   :  { %v11561_v45 = vpop.f32.mrf.mxu1  ;;  %v2605_v35 = vsel %vm571_vm3, %v11559_v2, -inf }
 0x5c0   :  { %2606 = vmax.xlane.f32.xlu2 %v2605_v35 }
 0x5c1   :  { %v2263_v58 = vpop.f32.mrf.mxu3 }
 0x5c2   :  { %v11576_v47 = vmul.f32 0.35355338, %v2263_v58 }
 0x5c4   :  { %v2242_v27 = vpop.f32.mrf.mxu2  ;;  %v2608_v12 = vsel %vm571_vm3, %v11576_v47, -inf }
 0x5c7   :  { %v2206_v28 = vpop.f32.mrf.mxu1 }
 0x5c9   :  { %v2265_v33 = vpop.f32.mrf.mxu3 }
 0x5cc   :  { %9568 = vmatmul.msk.bf16.vlgmr.msra.gmra.mxu0 %vm175_vm1, %v11530_v16  ;;  %v2286_v50 = vpop.f32.mrf.mxu2 }
 0x5cd   :  { %2812 = vmatpush.bf16.msra.mxu0 %v2803_v4  ;;  %v11568_v37 = vmul.f32 0.35355338, %v2286_v50 }
 0x5cf   :  { %v11570_v63 = vpop.f32.mrf.mxu1  ;;  %v2611_v13 = vsel %vm571_vm3, %v11568_v37, -inf }
 0x5d0   :  { %2612 = vmax.xlane.f32.xlu0 %v2611_v13 }
 0x5d1   :  { %v2309_v46 = vpop.f32.mrf.mxu3 }
 0x5d2   :  { %v11574_v53 = vmul.f32 0.35355338, %v2309_v46 }
 0x5d4   :  { %v2614_v52 = vsel %vm571_vm3, %v11574_v53, -inf  ;;  %v2288_v56 = vpop.f32.mrf.mxu2 }
 0x5d5   :  { %2615 = vmax.xlane.f32.xlu1 %v2614_v52 }
 0x5d7   :  { %v11580_v16 = vpop.f32.mrf.mxu1 }
 0x5d8   :  { %2609 = vmax.xlane.f32.xlu0 %v2608_v12 }
 0x5d9   :  { %v2311_v11 = vpop.f32.mrf.mxu3 }
 0x5db   :  { %v2157_v0 = vpop.f32.mrf.mxu0 }
 0x5dc   :  { %v11585_v49 = vadd.f32 %v2201_v44, %v2157_v0  ;;  %9572 = vmatmul.msk.bf16.vlgmr.msrb.gmra.mxu0 %vm175_vm1, %v11540_v18  ;;  %v2332_v29 = vpop.f32.mrf.mxu2 }
 0x5dd   :  { %2896 = vmatpush.bf16.msrb.mxu0 %v2887_v54  ;;  %v11589_v32 = vmul.f32 0.35355338, %v2332_v29 }
 0x5df   :  { %v11591_v41 = vpop.f32.mrf.mxu1  ;;  %v2617_v22 = vsel %vm571_vm3, %v11589_v32, -inf }
 0x5e0   :  { %2618 = vmax.xlane.f32.xlu0 %v2617_v22 }
 0x5e1   :  { %v2355_v59 = vpop.f32.mrf.mxu3 }
 0x5e2   :  { %v11607_v60 = vmul.f32 0.35355338, %v2355_v59 }
 0x5e3   :  { %v11597_v23 = vpop.f32.mrf.mxu0 }
 0x5e4   :  { %v2334_v10 = vpop.f32.mrf.mxu2  ;;  %v2620_v15 = vsel %vm571_vm3, %v11607_v60, -inf }
 0x5e7   :  { %v11595_v9 = vpop.f32.mrf.mxu1 }
 0x5e9   :  { %v2357_v43 = vpop.f32.mrf.mxu3 }
 0x5ec   :  { %v2378_v31 = vpop.f32.mrf.mxu2 }
 0x5ed   :  { %v11599_v17 = vmul.f32 0.35355338, %v2378_v31 }
 0x5ef   :  { %v11601_v18 = vpop.f32.mrf.mxu1  ;;  %v2623_v36 = vsel %vm571_vm3, %v11599_v17, -inf }
 0x5f0   :  { %v2162_v5 = vpop.f32.mrf.mxu0  ;;  %2624 = vmax.xlane.f32.xlu1 %v2623_v36 }
 0x5f1   :  { %v11605_v57 = vadd.f32 %v2206_v28, %v2162_v5  ;;  %v2401_v3 = vpop.f32.mrf.mxu3 }
 0x5f2   :  { %v11627_v56 = vmul.f32 0.35355338, %v2401_v3 }
 0x5f4   :  { %3028 = vrot.lane.b32.xlu0 %v10707_v1, %s10505_s17  ;;  %v2380_v40 = vpop.f32.mrf.mxu2  ;;  %v2626_v11 = vsel %vm571_vm3, %v11627_v56, -inf }
 0x5f7   :  { %v2447_v44 = vpop.f32.mrf.mxu1 }
 0x5f8   :  { %v11613_v34 = vmul.f32 0.35355338, %v2447_v44  ;;  %2621 = vmax.xlane.f32.xlu1 %v2620_v15  ;;  %v11633_v29 = vpop.f32.mrf.mxu0 }
 0x5f9   :  { %v2403_v6 = vpop.f32.mrf.mxu3 }
 0x5fa   :  { %v2632_v19 = vsel %vm571_vm3, %v11613_v34, -inf }
 0x5fb   :  { %2633 = vmax.xlane.f32.xlu2 %v2632_v19 }
 0x5fc   :  { %2986 = vrot.lane.b32.xlu0 %v10734_v20, %s10505_s17  ;;  %v2470_v8 = vpop.f32.mrf.mxu2 }
 0x5fd   :  { %v11619_v35 = vmul.f32 0.35355338, %v2470_v8 }
 0x5ff   :  { %v2449_v58 = vpop.f32.mrf.mxu1  ;;  %v2635_v28 = vsel %vm571_vm3, %v11619_v35, -inf }
 0x601   :  { %v2493_v27 = vpop.f32.mrf.mxu3 }
 0x602   :  { %v11641_v43 = vmul.f32 0.35355338, %v2493_v27 }
 0x603   :  { %2636 = vmax.xlane.f32.xlu2 %v2635_v28 }
 0x604   :  { %v2472_v33 = vpop.f32.mrf.mxu2  ;;  %v2638_v31 = vsel %vm571_vm3, %v11641_v43, -inf }
 0x607   :  { %v2539_v4 = vpop.f32.mrf.mxu1 }
 0x608   :  { %v11623_v50 = vmul.f32 0.35355338, %v2539_v4 }
 0x609   :  { %v2495_v13 = vpop.f32.mrf.mxu3 }
 0x60a   :  { %v2644_v46 = vsel %vm571_vm3, %v11623_v50, -inf }
 0x60b   :  { %2645 = vmax.xlane.f32.xlu2 %v2644_v46 }
 0x60c   :  { %v2562_v52 = vpop.f32.mrf.mxu2 }
 0x60d   :  { %v11635_v22 = vmul.f32 0.35355338, %v2562_v52 }
 0x60f   :  { %v2541_v12 = vpop.f32.mrf.mxu1  ;;  %v2647_v59 = vsel %vm571_vm3, %v11635_v22, -inf }
 0x611   :  { %v2585_v61 = vpop.f32.mrf.mxu3  ;;  %2965 = vrot.lane.b32.xlu1 %v10694_v55, %s10505_s17 }
 0x612   :  { %v11650_v40 = vmul.f32 0.35355338, %v2585_v61 }
 0x613   :  { %2627 = vmax.xlane.f32.xlu2 %v2626_v11 }
 0x614   :  { %v2564_v0 = vpop.f32.mrf.mxu2  ;;  %v2650_v6 = vsel %vm571_vm3, %v11650_v40, -inf }
 0x619   :  { %v2587_v54 = vpop.f32.mrf.mxu3 }
 0x621   :  { %v11639_v10 = vpop.f32.mrf.mxu0 }
 0x626   :  { %2648 = vmax.xlane.f32.xlu0 %v2647_v59 }
 0x629   :  { %v11647_v36 = vpop.f32.mrf.mxu0 }
 0x62b   :  { %3007 = vrot.lane.b32.xlu2 %v10704_v62, %s10505_s17 }
 0x62e   :  { %2639 = vmax.xlane.f32.xlu0 %v2638_v31 }
 0x633   :  { %v2607_v5 = vpop.xlane.xlu2 %2606 }
 0x634   :  { %v2653_v3 = vsub.f32 %v11559_v2, %v2607_v5 }
 0x636   :  { %v2669_v44 = vmul.f32 1.442695, %v2653_v3 }
 0x638   :  { %10028 = vpow2.f32 %v2669_v44 }
 0x639   :  { %v11652_v15 = vpop.f32.mrf.mxu0 }
 0x63b   :  { %2651 = vmax.xlane.f32.xlu1 %v2650_v6 }
 0x63e   :  { %v11656_v19 = vpop.eup %10028 }
 0x63f   :  { %v2701_v8 = vsel %vm571_vm3, %v11656_v19, 0.0 }
 0x640   :  { %2702 = vadd.xlane.f32.xlu0 %v2701_v8 }
 0x641   :  { %v11660_v58 = vpop.f32.mrf.mxu0 }
 0x643   :  { %v2613_v27 = vpop.xlane.xlu0 %2612 }
 0x644   :  { %v2655_v2 = vsub.f32 %v11568_v37, %v2613_v27 }
 0x646   :  { %v2673_v28 = vmul.f32 1.442695, %v2655_v2 }
 0x648   :  { %10030 = vpow2.f32 %v2673_v28  ;;  %v2616_v61 = vpop.xlane.xlu1 %2615 }
 0x649   :  { %v2424_v33 = vpop.f32.mrf.mxu0  ;;  %v2656_v59 = vsub.f32 %v11574_v53, %v2616_v61 }
 0x64a   :  { %v11674_v44 = vmul.f32 0.35355338, %v2424_v33 }
 0x64b   :  { %v2610_v4 = vpop.xlane.xlu0 %2609  ;;  %v2675_v3 = vmul.f32 1.442695, %v2656_v59 }
 0x64c   :  { %v2654_v13 = vsub.f32 %v11576_v47, %v2610_v4  ;;  %v2629_v8 = vsel %vm571_vm3, %v11674_v44, -inf }
 0x64e   :  { %v2671_v46 = vmul.f32 1.442695, %v2654_v13  ;;  %v11664_v52 = vpop.eup %10030 }
 0x64f   :  { %v2707_v0 = vsel %vm571_vm3, %v11664_v52, 0.0 }
 0x650   :  { %10032 = vpow2.f32 %v2671_v46 }
 0x651   :  { %v2426_v12 = vpop.f32.mrf.mxu0 }
 0x653   :  { %v2619_v11 = vpop.xlane.xlu0 %2618 }
 0x654   :  { %v2657_v54 = vsub.f32 %v11589_v32, %v2619_v11  ;;  %2708 = vadd.xlane.f32.xlu2 %v2707_v0 }
 0x656   :  { %v11669_v37 = vpop.eup %10032  ;;  %v2677_v31 = vmul.f32 1.442695, %v2657_v54 }
 0x657   :  { %v2704_v47 = vsel %vm571_vm3, %v11669_v37, 0.0 }
 0x658   :  { %10034 = vpow2.f32 %v2677_v31  ;;  %2705 = vadd.xlane.f32.xlu1 %v2704_v47 }
 0x659   :  { %v2516_v5 = vpop.f32.mrf.mxu0  ;;  %10036 = vpow2.f32 %v2675_v3 }
 0x65e   :  { %v11676_v6 = vpop.eup %10034 }
 0x65f   :  { %v2713_v32 = vsel %vm571_vm3, %v11676_v6, 0.0  ;;  %v11682_v2 = vpop.eup %10036 }
 0x660   :  { %2714 = vadd.xlane.f32.xlu0 %v2713_v32  ;;  %2630 = vmax.xlane.f32.xlu1 %v2629_v8  ;;  %v2710_v33 = vsel %vm571_vm3, %v11682_v2, 0.0  ;;  %v11704_v8 = vmul.f32 0.35355338, %v2516_v5 }
 0x661   :  { %v2518_v53 = vpop.f32.mrf.mxu0 }
 0x663   :  { %v2625_v27 = vpop.xlane.xlu1 %2624 }
 0x664   :  { %v2659_v28 = vsub.f32 %v11599_v17, %v2625_v27 }
 0x666   :  { %v2681_v4 = vmul.f32 1.442695, %v2659_v28 }
 0x668   :  { %10038 = vpow2.f32 %v2681_v4  ;;  %2711 = vadd.xlane.f32.xlu0 %v2710_v33  ;;  %v2641_v4 = vsel %vm571_vm3, %v11704_v8, -inf }
 0x66b   :  { %v2622_v13 = vpop.xlane.xlu1 %2621 }
 0x66c   :  { %v2658_v46 = vsub.f32 %v11607_v60, %v2622_v13  ;;  %v11711_v13 = vpop.permute.xlu0 %3028 }
 0x66e   :  { %v11688_v12 = vpop.eup %10038  ;;  %v2679_v61 = vmul.f32 1.442695, %v2658_v46  ;;  %v2634_v11 = vpop.xlane.xlu2 %2633 }
 0x66f   :  { %v2662_v0 = vsub.f32 %v11613_v34, %v2634_v11  ;;  %v2719_v54 = vsel %vm571_vm3, %v11688_v12, 0.0 }
 0x670   :  { %10040 = vpow2.f32 %v2679_v61  ;;  %2720 = vadd.xlane.f32.xlu2 %v2719_v54 }
 0x671   :  { %v2687_v17 = vmul.f32 1.442695, %v2662_v0 }
 0x673   :  { %10042 = vpow2.f32 %v2687_v17 }
 0x674   :  { %v2987_v54 = vpop.permute.xlu0 %2986 }
 0x676   :  { %v11693_v59 = vpop.eup %10040  ;;  %v2637_v31 = vpop.xlane.xlu2 %2636 }
 0x677   :  { %v2716_v47 = vsel %vm571_vm3, %v11693_v59, 0.0  ;;  %v2663_v3 = vsub.f32 %v11619_v35, %v2637_v31 }
 0x678   :  { %2717 = vadd.xlane.f32.xlu2 %v2716_v47 }
 0x679   :  { %v11697_v60 = vpop.eup %10042  ;;  %v2689_v32 = vmul.f32 1.442695, %v2663_v3 }
 0x67a   :  { %v2728_v34 = vsel %vm571_vm3, %v11697_v60, 0.0 }
 0x67b   :  { %2729 = vadd.xlane.f32.xlu1 %v2728_v34  ;;  %10044 = vpow2.f32 %v2689_v32 }
 0x67c   :  { %3049 = vrot.lane.b32.xlu0 %v10719_v7, %s10505_s17 }
 0x67e   :  { %v2646_v53 = vpop.xlane.xlu2 %2645 }
 0x67f   :  { %v2666_v27 = vsub.f32 %v11623_v50, %v2646_v53 }
 0x681   :  { %v2695_v28 = vmul.f32 1.442695, %v2666_v27  ;;  %v11709_v33 = vpop.eup %10044 }
 0x682   :  { %v2731_v50 = vsel %vm571_vm3, %v11709_v33, 0.0 }
 0x683   :  { %10046 = vpow2.f32 %v2695_v28  ;;  %2642 = vmax.xlane.f32.xlu1 %v2641_v4  ;;  %v2966_v28 = vpop.permute.xlu1 %2965 }
 0x686   :  { %v2628_v35 = vpop.xlane.xlu2 %2627 }
 0x687   :  { %v2660_v46 = vsub.f32 %v11627_v56, %v2628_v35 }
 0x689   :  { %v11714_v61 = vpop.eup %10046  ;;  %v2683_v5 = vmul.f32 1.442695, %v2660_v46 }
 0x68a   :  { %v2740_v11 = vsel %vm571_vm3, %v11714_v61, 0.0 }
 0x68b   :  { %10048 = vpow2.f32 %v2683_v5  ;;  %2732 = vadd.xlane.f32.xlu1 %v2731_v50  ;;  %2741 = vadd.xlane.f32.xlu2 %v2740_v11 }
 0x691   :  { %v11720_v0 = vpop.eup %10048 }
 0x692   :  { %v2722_v17 = vsel %vm571_vm3, %v11720_v0, 0.0 }
 0x693   :  { %2723 = vadd.xlane.f32.xlu1 %v2722_v17 }
 0x699   :  { %v2649_v56 = vpop.xlane.xlu0 %2648 }
 0x69a   :  { %v2667_v31 = vsub.f32 %v11635_v22, %v2649_v56 }
 0x69c   :  { %v2697_v47 = vmul.f32 1.442695, %v2667_v31 }
 0x69e   :  { %10050 = vpow2.f32 %v2697_v47  ;;  %v2971_v47 = vsel %vm770_vm2, %v2966_v28, 0 }
 0x6a1   :  { %v2640_v3 = vpop.xlane.xlu0 %2639 }
 0x6a2   :  { %v2664_v34 = vsub.f32 %v11641_v43, %v2640_v3  ;;  %v3008_v3 = vpop.permute.xlu2 %3007 }
 0x6a4   :  { %v11726_v32 = vpop.eup %10050  ;;  %v2691_v53 = vmul.f32 1.442695, %v2664_v34 }
 0x6a5   :  { %v2743_v27 = vsel %vm571_vm3, %v11726_v32, 0.0 }
 0x6a6   :  { %10052 = vpow2.f32 %v2691_v53  ;;  %2744 = vadd.xlane.f32.xlu2 %v2743_v27 }
 0x6ac   :  { %v11730_v4 = vpop.eup %10052 }
 0x6ad   :  { %v2734_v35 = vsel %vm571_vm3, %v11730_v4, 0.0 }
 0x6ae   :  { %2735 = vadd.xlane.f32.xlu2 %v2734_v35  ;;  %v2652_v22 = vpop.xlane.xlu1 %2651  ;;  %v3013_v35 = vsel %vm770_vm2, %v3008_v3, 0 }
 0x6af   :  { %v2668_v46 = vsub.f32 %v11650_v40, %v2652_v22 }
 0x6b1   :  { %v2699_v5 = vmul.f32 1.442695, %v2668_v46 }
 0x6b3   :  { %10054 = vpow2.f32 %v2699_v5  ;;  %v2703_v43 = vpop.xlane.xlu0 %2702 }
 0x6b4   :  { %10056 = vrcp.f32 %v2703_v43 }
 0x6b9   :  { %v11735_v50 = vpop.eup %10054 }
 0x6ba   :  { %v10057_v11 = vpop.eup %10056  ;;  %v2746_v17 = vsel %vm571_vm3, %v11735_v50, 0.0 }
 0x6bb   :  { %v2765_v56 = vmul.f32 %v10057_v11, %v11656_v19  ;;  %2747 = vadd.xlane.f32.xlu1 %v2746_v17 }
 0x6bd   :  { %v2781_v31 = vpack.c.bf16 %v2765_v56, %v2765_v56 }
 0x6bf   :  { %9576 = vmatmul.msk.bf16.vlgmr.msra.gmra.mxu0 %vm766_vm4, %v2781_v31 }
 0x6c0   :  { %2980 = vmatpush.bf16.msra.mxu0 %v2971_v47 }
 0x6c6   :  { %3112 = vrot.lane.b32.xlu2 %v10748_v26, %s10505_s17 }
 0x6c7   :  { %v2709_v40 = vpop.xlane.xlu2 %2708 }
 0x6c8   :  { %10058 = vrcp.f32 %v2709_v40 }
 0x6cb   :  { %v2706_v34 = vpop.xlane.xlu1 %2705 }
 0x6cc   :  { %10060 = vrcp.f32 %v2706_v34 }
 0x6ce   :  { %v10059_v53 = vpop.eup %10058  ;;  %3269 = vrot.lane.b32.xlu2 %v10639_v24, %s10506_s22 }
 0x6cf   :  { %v2767_v19 = vmul.f32 %v10059_v53, %v11664_v52  ;;  %v2992_v52 = vsel %vm770_vm2, %v2987_v54, 0  ;;  %v3034_v53 = vsel %vm770_vm2, %v11711_v13, 0 }
 0x6d1   :  { %v2783_v27 = vpack.c.bf16 %v2767_v19, %v2767_v19 }
 0x6d2   :  { %v10061_v28 = vpop.eup %10060 }
 0x6d3   :  { %v2766_v22 = vmul.f32 %v10061_v28, %v11669_v37  ;;  %v2715_v46 = vpop.xlane.xlu0 %2714  ;;  %9578 = vmatmul.msk.bf16.vlgmr.msrb.gmra.mxu2 %vm766_vm4, %v2783_v27  ;;  %v2631_v5 = vpop.xlane.xlu1 %2630 }
 0x6d4   :  { %10062 = vrcp.f32 %v2715_v46  ;;  %3022 = vmatpush.bf16.msrb.mxu2 %v3013_v35  ;;  %v2661_v43 = vsub.f32 %v11674_v44, %v2631_v5  ;;  %3091 = vrot.lane.b32.xlu1 %v10736_v14, %s10505_s17 }
 0x6d5   :  { %v2782_v11 = vpack.c.bf16 %v2766_v22, %v2766_v22 }
 0x6d6   :  { %v2685_v17 = vmul.f32 1.442695, %v2661_v43  ;;  %3267 = vrot.lane.b32.xlu2 %v10639_v24, %s10507_s23 }
 0x6d7   :  { %9577 = vmatmul.msk.bf16.vlgmr.msrb.gmra.mxu1 %vm766_vm4, %v2782_v11 }
 0x6d8   :  { %10064 = vpow2.f32 %v2685_v17  ;;  %3001 = vmatpush.bf16.msrb.mxu1 %v2992_v52 }
 0x6da   :  { %v10063_v37 = vpop.eup %10062 }
 0x6db   :  { %v2769_v56 = vmul.f32 %v10063_v37, %v11676_v6  ;;  %v2712_v31 = vpop.xlane.xlu0 %2711 }
 0x6dc   :  { %10066 = vrcp.f32 %v2712_v31  ;;  %3292 = vrot.lane.b32.xlu1 %v10651_v30, %s10506_s22 }
 0x6dd   :  { %v2785_v44 = vpack.c.bf16 %v2769_v56, %v2769_v56 }
 0x6de   :  { %v11760_v47 = vpop.eup %10064  ;;  %3338 = vrot.lane.b32.xlu2 %v10664_v39, %s10506_s22 }
 0x6df   :  { %9580 = vmatmul.msk.bf16.vlgmr.msrb.gmra.mxu0 %vm766_vm4, %v2785_v44  ;;  %v2725_v54 = vsel %vm571_vm3, %v11760_v47, 0.0 }
 0x6e0   :  { %2726 = vadd.xlane.f32.xlu0 %v2725_v54 }
 0x6e2   :  { %v10067_v3 = vpop.eup %10066 }
 0x6e3   :  { %v2768_v6 = vmul.f32 %v10067_v3, %v11682_v2  ;;  %v2721_v40 = vpop.xlane.xlu2 %2720 }
 0x6e4   :  { %10068 = vrcp.f32 %v2721_v40  ;;  %3290 = vrot.lane.b32.xlu1 %v10651_v30, %s10507_s23 }
 0x6e5   :  { %v2784_v34 = vpack.c.bf16 %v2768_v6, %v2768_v6 }
 0x6e6   :  { %3336 = vrot.lane.b32.xlu2 %v10664_v39, %s10507_s23 }
 0x6e7   :  { %9579 = vmatmul.msk.bf16.vlgmr.msrb.gmra.mxu3 %vm766_vm4, %v2784_v34 }
 0x6e8   :  { %3043 = vmatpush.bf16.msrb.mxu3 %v3034_v53 }
 0x6ea   :  { %v10069_v19 = vpop.eup %10068 }
 0x6eb   :  { %v2771_v27 = vmul.f32 %v10069_v19, %v11688_v12  ;;  %v2718_v28 = vpop.xlane.xlu2 %2717 }
 0x6ec   :  { %10070 = vrcp.f32 %v2718_v28  ;;  %3361 = vrot.lane.b32.xlu1 %v10667_v42, %s10506_s22 }
 0x6ed   :  { %v2787_v2 = vpack.c.bf16 %v2771_v27, %v2771_v27 }
 0x6ee   :  { %v3050_v35 = vpop.permute.xlu0 %3049  ;;  %3407 = vrot.lane.b32.xlu2 %v10684_v51, %s10506_s22  ;;  %v2730_v22 = vpop.xlane.xlu1 %2729 }
 0x6ef   :  { %v3055_v46 = vsel %vm770_vm2, %v3050_v35, 0  ;;  %9582 = vmatmul.msk.bf16.vlgmr.msra.gmra.mxu2 %vm766_vm4, %v2787_v2  ;;  %10072 = vrcp.f32 %v2730_v22 }
 0x6f0   :  { %3064 = vmatpush.bf16.msrb.mxu0 %v3055_v46 }
 0x6f2   :  { %v10071_v13 = vpop.eup %10070 }
 0x6f3   :  { %v2770_v5 = vmul.f32 %v10071_v13, %v11693_v59 }
 0x6f4   :  { %3359 = vrot.lane.b32.xlu1 %v10667_v42, %s10507_s23 }
 0x6f5   :  { %v2786_v12 = vpack.c.bf16 %v2770_v5, %v2770_v5  ;;  %v10073_v52 = vpop.eup %10072 }
 0x6f6   :  { %3405 = vrot.lane.b32.xlu2 %v10684_v51, %s10507_s23  ;;  %v2643_v43 = vpop.xlane.xlu1 %2642  ;;  %v2774_v56 = vmul.f32 %v10073_v52, %v11697_v60 }
 0x6f7   :  { %v2665_v11 = vsub.f32 %v11704_v8, %v2643_v43  ;;  %9581 = vmatmul.msk.bf16.vlgmr.msra.gmra.mxu1 %vm766_vm4, %v2786_v12 }
 0x6f8   :  { %v2790_v31 = vpack.c.bf16 %v2774_v56, %v2774_v56 }
 0x6f9   :  { %v2693_v17 = vmul.f32 1.442695, %v2665_v11 }
 0x6fb   :  { %10074 = vpow2.f32 %v2693_v17 }
 0x6fc   :  { %3430 = vrot.lane.b32.xlu1 %v10694_v55, %s10506_s22 }
 0x6fe   :  { %3476 = vrot.lane.b32.xlu2 %v10704_v62, %s10506_s22  ;;  %v2733_v59 = vpop.xlane.xlu1 %2732  ;;  %v11810_v53 = vpop.xlane.xlu2 %2741 }
 0x6ff   :  { %10076 = vrcp.f32 %v2733_v59 }
 0x701   :  { %v11793_v37 = vpop.eup %10074 }
 0x702   :  { %v2737_v8 = vsel %vm571_vm3, %v11793_v37, 0.0 }
 0x703   :  { %2738 = vadd.xlane.f32.xlu0 %v2737_v8 }
 0x704   :  { %3428 = vrot.lane.b32.xlu1 %v10694_v55, %s10507_s23 }
 0x705   :  { %v10077_v44 = vpop.eup %10076 }
 0x706   :  { %3497 = vrot.lane.b32.xlu2 %v10707_v1, %s10507_s23  ;;  %v2724_v54 = vpop.xlane.xlu1 %2723  ;;  %v2775_v3 = vmul.f32 %v10077_v44, %v11709_v33 }
 0x707   :  { %10078 = vrcp.f32 %v2724_v54  ;;  %9585 = vmatmul.msk.bf16.vlgmr.msrb.gmra.mxu1 %vm766_vm4, %v2790_v31 }
 0x708   :  { %v2791_v6 = vpack.c.bf16 %v2775_v3, %v2775_v3 }
 0x70a   :  { %9586 = vmatmul.msk.bf16.vlgmr.msrb.gmra.mxu2 %vm766_vm4, %v2791_v6 }
 0x70c   :  { %3499 = vrot.lane.b32.xlu1 %v10707_v1, %s10506_s22 }
 0x70d   :  { %v10079_v60 = vpop.eup %10078 }
 0x70e   :  { %v2772_v40 = vmul.f32 %v10079_v60, %v11720_v0  ;;  %3591 = vrot.lane.b32.xlu2 %v10748_v26, %s10506_s22 }
 0x710   :  { %v2788_v34 = vpack.c.bf16 %v2772_v40, %v2772_v40 }
 0x712   :  { %9583 = vmatmul.msk.bf16.vlgmr.msra.gmra.mxu3 %vm766_vm4, %v2788_v34 }
 0x714   :  { %3453 = vrot.lane.b32.xlu1 %v10734_v20, %s10506_s22 }
 0x716   :  { %3589 = vrot.lane.b32.xlu2 %v10748_v26, %s10507_s23 }
 0x717   :  { %3070 = vrot.lane.b32.xlu0 %v10746_v25, %s10505_s17 }
 0x719   :  { %v2745_v33 = vpop.xlane.xlu2 %2744 }
 0x71c   :  { %3451 = vrot.lane.b32.xlu1 %v10734_v20, %s10507_s23 }
 0x71e   :  { %3520 = vrot.lane.b32.xlu2 %v10719_v7, %s10507_s23 }
 0x71f   :  { %3246 = vrot.lane.b32.xlu0 %v10636_v21, %s10506_s22 }
 0x721   :  { %v2736_v0 = vpop.xlane.xlu2 %2735 }
 0x722   :  { %10080 = vrcp.f32 %v2736_v0 }
 0x724   :  { %3522 = vrot.lane.b32.xlu1 %v10719_v7, %s10506_s22 }
 0x726   :  { %3820 = vrot.lane.b32.xlu2 %v10636_v21, %s10508_s24 }
 0x727   :  { %3244 = vrot.lane.b32.xlu0 %v10636_v21, %s10507_s23 }
 0x728   :  { %v10081_v19 = vpop.eup %10080 }
 0x729   :  { %v2776_v27 = vmul.f32 %v10081_v19, %v11730_v4  ;;  %v3113_v28 = vpop.permute.xlu2 %3112 }
 0x72a   :  { %v3118_v2 = vsel %vm770_vm2, %v3113_v28, 0 }
 0x72b   :  { %v2792_v35 = vpack.c.bf16 %v2776_v27, %v2776_v27  ;;  %3127 = vmatpush.bf16.msra.mxu3 %v3118_v2 }
 0x72c   :  { %3543 = vrot.lane.b32.xlu1 %v10746_v25, %s10507_s23 }
 0x72d   :  { %9587 = vmatmul.msk.bf16.vlgmr.msrb.gmra.mxu3 %vm766_vm4, %v2792_v35 }
 0x72e   :  { %3946 = vrot.lane.b32.xlu2 %v10681_v48, %s10508_s24  ;;  %v2748_v22 = vpop.xlane.xlu1 %2747 }
 0x72f   :  { %10082 = vrcp.f32 %v2748_v22  ;;  %3315 = vrot.lane.b32.xlu0 %v10662_v38, %s10506_s22 }
 0x730   :  { %10084 = vrcp.f32 %v2745_v33 }
 0x731   :  { %v3270_v21 = vpop.permute.xlu2 %3269 }
 0x734   :  { %3862 = vrot.lane.b32.xlu1 %v10651_v30, %s10508_s24 }
 0x735   :  { %v10083_v4 = vpop.eup %10082 }
 0x736   :  { %v2780_v46 = vmul.f32 %v10083_v4, %v11735_v50  ;;  %v10085_v43 = vpop.eup %10084 }
 0x737   :  { %3313 = vrot.lane.b32.xlu0 %v10662_v38, %s10507_s23  ;;  %v2779_v50 = vmul.f32 %v10085_v43, %v11726_v32 }
 0x738   :  { %v2796_v5 = vpack.c.bf16 %v2780_v46, %v2780_v46 }
 0x739   :  { %v3268_v13 = vpop.permute.xlu2 %3267  ;;  %v2795_v59 = vpack.c.bf16 %v2779_v50, %v2779_v50 }
 0x73c   :  { %v2814_v12 = vpop.f32.mrf.mxu0  ;;  %3904 = vrot.lane.b32.xlu1 %v10664_v39, %s10508_s24  ;;  %v3275_v39 = vsel %vm175_vm1, %v3270_v21, 0 }
 0x73d   :  { %3149 = vst [vmem:[#allocation1] ss:$2 sm:$0xff] %v2814_v12  ;;  %9591 = vmatmul.msk.bf16.vlgmr.msra.gmra.mxu3 %vm766_vm4, %v2796_v5  ;;  %v152_v12 = vld [vmem:[%s14298_s3 + $0x8] sm:$0xf] }
 0x73f   :  { %3384 = vrot.lane.b32.xlu0 %v10681_v48, %s10506_s22 }
 0x741   :  { %v3339_v30 = vpop.permute.xlu2 %3338 }
 0x742   :  { %v3344_v8 = vsel %vm175_vm1, %v3339_v30, 0  ;;  %v3205_v30 = vsel %vm2144_vm5, %v152_v12, 0 }
 0x744   :  { %v2816_v11 = vpop.f32.mrf.mxu0  ;;  %4030 = vrot.lane.b32.xlu1 %v10704_v62, %s10508_s24 }
 0x746   :  { %v3092_v17 = vpop.permute.xlu1 %3091 }
 0x747   :  { %v3097_v52 = vsel %vm770_vm2, %v3092_v17, 0  ;;  %3382 = vrot.lane.b32.xlu0 %v10681_v48, %s10507_s23 }
 0x748   :  { %3106 = vmatpush.bf16.msra.mxu2 %v3097_v52 }
 0x749   :  { %v3337_v56 = vpop.permute.xlu2 %3336 }
 0x74b   :  { %9590 = vmatmul.msk.bf16.vlgmr.msra.gmra.mxu2 %vm766_vm4, %v2795_v59 }
 0x74c   :  { %3284 = vmatpush.bf16.xpose.msrb.mxu2 %v3275_v39 }
 0x74e   :  { %v3293_v31 = vpop.permute.xlu1 %3292 }
 0x74f   :  { %v3298_v32 = vsel %vm175_vm1, %v3293_v31, 0  ;;  %3474 = vrot.lane.b32.xlu0 %v10704_v62, %s10507_s23 }
 0x750   :  { %3307 = vmatpush.bf16.xpose.msrb.mxu3 %v3298_v32 }
 0x751   :  { %v3408_v44 = vpop.permute.xlu2 %3407 }
 0x752   :  { %v3413_v34 = vsel %vm175_vm1, %v3408_v44, 0 }
 0x753   :  { %v2727_v48 = vpop.xlane.xlu0 %2726 }
 0x754   :  { %3353 = vmatpush.bf16.xpose.msra.mxu2 %v3344_v8  ;;  %10086 = vrcp.f32 %v2727_v48  ;;  %v2835_v54 = vpop.f32.mrf.mxu1 }
 0x755   :  { %3151 = vst [vmem:[#allocation1 + $0x1] ss:$2 sm:$0xff] %v2835_v54 }
 0x756   :  { %v2856_v3 = vpop.f32.mrf.mxu2  ;;  %v3291_v6 = vpop.permute.xlu1 %3290 }
 0x757   :  { %3153 = vst [vmem:[#allocation1 + $0x10] ss:$2 sm:$0xff] %v2856_v3  ;;  %3568 = vrot.lane.b32.xlu0 %v10736_v14, %s10506_s22  ;;  %9598 = vmatmul.msk.bf16.vlgmr.msrb.gmra.mxu3 %vm175_vm1, %v3291_v6 }
 0x759   :  { %v3406_v60 = vpop.permute.xlu2 %3405 }
 0x75a   :  { %v10087_v40 = vpop.eup %10086 }
 0x75b   :  { %v2773_v62 = vmul.f32 %v10087_v40, %v11760_v47  ;;  %9597 = vmatmul.msk.bf16.vlgmr.msrb.gmra.mxu2 %vm175_vm1, %v3268_v13 }
 0x75c   :  { %3422 = vmatpush.bf16.xpose.msrb.mxu2 %v3413_v34  ;;  %v2837_v33 = vpop.f32.mrf.mxu1  ;;  %v2898_v0 = vpop.f32.mrf.mxu0  ;;  %v3164_v54 = vld.sshfl [vmem:[#allocation1] sm:$0xff pattern:$0x75316420] }
 0x75d   :  { %v2789_v19 = vpack.c.bf16 %v2773_v62, %v2773_v62  ;;  %3157 = vst [vmem:[#allocation1 + $0x20] ss:$2 sm:$0xff] %v2898_v0 }
 0x75e   :  { %v2858_v27 = vpop.f32.mrf.mxu2  ;;  %v3362_v28 = vpop.permute.xlu1 %3361 }
 0x75f   :  { %v3367_v2 = vsel %vm175_vm1, %v3362_v28, 0  ;;  %9584 = vmatmul.msk.bf16.vlgmr.msra.gmra.mxu0 %vm766_vm4, %v2789_v19  ;;  %3566 = vrot.lane.b32.xlu0 %v10736_v14, %s10507_s23 }
 0x760   :  { %3376 = vmatpush.bf16.xpose.msra.mxu3 %v3367_v2  ;;  %3214 = vmatpush.bf16.msra.mxu0 %v3205_v30 }
 0x761   :  { %v3477_v35 = vpop.permute.xlu2 %3476 }
 0x762   :  { %v3482_v4 = vsel %vm175_vm1, %v3477_v35, 0 }
 0x764   :  { %v2900_v22 = vpop.f32.mrf.mxu0 }
 0x766   :  { %v3360_v47 = vpop.permute.xlu1 %3359 }
 0x767   :  { %3545 = vrot.lane.b32.xlu0 %v10746_v25, %s10506_s22  ;;  %9601 = vmatmul.msk.bf16.vlgmr.msra.gmra.mxu3 %vm175_vm1, %v3360_v47 }
 0x769   :  { %v3498_v46 = vpop.permute.xlu2 %3497 }
 0x76a   :  { %v2877_v21 = vpop.f32.mrf.mxu3 }
 0x76b   :  { %3155 = vst [vmem:[#allocation1 + $0x11] ss:$2 sm:$0xff] %v2877_v21  ;;  %9600 = vmatmul.msk.bf16.vlgmr.msra.gmra.mxu2 %vm175_vm1, %v3337_v56 }
 0x76c   :  { %3491 = vmatpush.bf16.xpose.msra.mxu2 %v3482_v4 }
 0x76e   :  { %v3431_v13 = vpop.permute.xlu1 %3430 }
 0x76f   :  { %v3436_v5 = vsel %vm175_vm1, %v3431_v13, 0  ;;  %3883 = vrot.lane.b32.xlu0 %v10662_v38, %s10508_s24 }
 0x770   :  { %3445 = vmatpush.bf16.xpose.msrb.mxu3 %v3436_v5 }
 0x771   :  { %v3592_v39 = vpop.permute.xlu2 %3591 }
 0x772   :  { %v2879_v43 = vpop.f32.mrf.mxu3  ;;  %v2940_v11 = vpop.f32.mrf.mxu2  ;;  %v3597_v44 = vsel %vm175_vm1, %v3592_v39, 0  ;;  %v3165_v33 = vld.sshfl [vmem:[#allocation1 + $0x10] sm:$0xff pattern:$0x75316420] }
 0x773   :  { %3161 = vst [vmem:[#allocation1 + $0x30] ss:$2 sm:$0xff] %v2940_v11 }
 0x774   :  { %v2919_v50 = vpop.f32.mrf.mxu1 }
 0x775   :  { %3159 = vst [vmem:[#allocation1 + $0x21] ss:$2 sm:$0xff] %v2919_v50 }
 0x776   :  { %v2739_v17 = vpop.xlane.xlu0 %2738  ;;  %v3429_v52 = vpop.permute.xlu1 %3428 }
 0x777   :  { %10088 = vrcp.f32 %v2739_v17  ;;  %3841 = vrot.lane.b32.xlu0 %v10639_v24, %s10508_s24  ;;  %9604 = vmatmul.msk.bf16.vlgmr.msrb.gmra.mxu3 %vm175_vm1, %v3429_v52 }
 0x778   :  { %10090 = vrcp.f32 %v11810_v53 }
 0x779   :  { %v3590_v48 = vpop.permute.xlu2 %3589 }
 0x77a   :  { %v2942_v38 = vpop.f32.mrf.mxu2 }
 0x77b   :  { %9603 = vmatmul.msk.bf16.vlgmr.msrb.gmra.mxu2 %vm175_vm1, %v3406_v60 }
 0x77c   :  { %v2921_v59 = vpop.f32.mrf.mxu1  ;;  %v3166_v13 = vld.sshfl [vmem:[#allocation1 + $0x20] sm:$0xff pattern:$0x75316420] }
 0x77d   :  { %v10089_v56 = vpop.eup %10088 }
 0x77e   :  { %v2777_v8 = vmul.f32 %v10089_v56, %v11793_v37  ;;  %v3500_v31 = vpop.permute.xlu1 %3499  ;;  %v10091_v6 = vpop.eup %10090 }
 0x77f   :  { %v3505_v32 = vsel %vm175_vm1, %v3500_v31, 0  ;;  %3967 = vrot.lane.b32.xlu0 %v10684_v51, %s10508_s24  ;;  %v2778_v51 = vmul.f32 %v10091_v6, %v11714_v61 }
 0x780   :  { %v2793_v24 = vpack.c.bf16 %v2777_v8, %v2777_v8  ;;  %3514 = vmatpush.bf16.xpose.msra.mxu3 %v3505_v32 }
 0x781   :  { %v11900_v40 = vpop.permute.xlu2 %3520  ;;  %v2794_v34 = vpack.c.bf16 %v2778_v51, %v2778_v51 }
 0x782   :  { %9588 = vmatmul.msk.bf16.vlgmr.msrb.gmra.mxu0 %vm766_vm4, %v2793_v24 }
 0x784   :  { %v3003_v3 = vpop.f32.mrf.mxu1 }
 0x785   :  { %3169 = vst [vmem:[#allocation1 + $0x1] ss:$2 sm:$0xff] %v3003_v3 }
 0x786   :  { %v3454_v37 = vpop.permute.xlu1 %3453 }
 0x787   :  { %3925 = vrot.lane.b32.xlu0 %v10667_v42, %s10508_s24  ;;  %9607 = vmatmul.msk.bf16.vlgmr.msra.gmra.mxu3 %vm175_vm1, %v3498_v46  ;;  %v3188_v42 = vpack.c.bf16 %v3165_v33, %v3164_v54  ;;  %v3459_v52 = vsel %vm175_vm1, %v3454_v37, 0 }
 0x788   :  { %3606 = vmatpush.bf16.xpose.msrb.mxu3 %v3597_v44 }
 0x789   :  { %v3071_v53 = vpop.permute.xlu0 %3070  ;;  %v3821_v28 = vpop.permute.xlu2 %3820 }
 0x78a   :  { %v3076_v60 = vsel %vm770_vm2, %v3071_v53, 0  ;;  %v3826_v21 = vsel %vm770_vm2, %v3821_v28, 0 }
 0x78b   :  { %3085 = vmatpush.bf16.msra.mxu1 %v3076_v60 }
 0x78c   :  { %v3005_v62 = vpop.f32.mrf.mxu1 }
 0x78d   :  { %v3024_v0 = vpop.f32.mrf.mxu2 }
 0x78e   :  { %9589 = vmatmul.msk.bf16.vlgmr.msra.gmra.mxu1 %vm766_vm4, %v2794_v34  ;;  %v3452_v19 = vpop.permute.xlu1 %3451  ;;  %3170 = vst [vmem:[#allocation1 + $0x10] ss:$2 sm:$0xff] %v3024_v0 }
 0x78f   :  { %4051 = vrot.lane.b32.xlu0 %v10707_v1, %s10508_s24 }
 0x791   :  { %v3247_v27 = vpop.permute.xlu0 %3246  ;;  %v3947_v3 = vpop.permute.xlu2 %3946 }
 0x792   :  { %v3252_v61 = vsel %vm175_vm1, %v3247_v27, 0  ;;  %9592 = vmatmul.msk.bf16.vlgmr.msra.gmra.mxu0 %vm175_vm1, %v3188_v42  ;;  %v3952_v37 = vsel %vm770_vm2, %v3947_v3, 0 }
 0x793   :  { %3261 = vmatpush.bf16.xpose.msrb.mxu1 %v3252_v61 }
 0x795   :  { %v2961_v2 = vpop.f32.mrf.mxu3  ;;  %v3026_v35 = vpop.f32.mrf.mxu2 }
 0x796   :  { %3163 = vst [vmem:[#allocation1 + $0x31] ss:$2 sm:$0xff] %v2961_v2  ;;  %v3523_v22 = vpop.permute.xlu1 %3522 }
 0x797   :  { %v3528_v47 = vsel %vm175_vm1, %v3523_v22, 0  ;;  %9611 = vmatmul.msk.bf16.vlgmr.msrb.gmra.mxu3 %vm175_vm1, %v3590_v48 }
 0x798   :  { %3537 = vmatpush.bf16.xpose.msrb.mxu0 %v3528_v47 }
 0x799   :  { %v3245_v1 = vpop.permute.xlu0 %3244 }
 0x79d   :  { %v3167_v4 = vld.sshfl [vmem:[#allocation1 + $0x30] sm:$0xff pattern:$0x75316420]  ;;  %v2963_v46 = vpop.f32.mrf.mxu3 }
 0x79e   :  { %9596 = vmatmul.msk.bf16.vlgmr.msrb.gmra.mxu1 %vm175_vm1, %v3245_v1  ;;  %v3189_v5 = vpack.c.bf16 %v3167_v4, %v3166_v13  ;;  %v3544_v59 = vpop.permute.xlu1 %3543 }
 0x7a0   :  { %3835 = vmatpush.bf16.msra.mxu0 %v3826_v21 }
 0x7a1   :  { %v3316_v12 = vpop.permute.xlu0 %3315 }
 0x7a2   :  { %v3321_v30 = vsel %vm175_vm1, %v3316_v12, 0  ;;  %9593 = vmatmul.msk.bf16.gmra.mxu0 %vm175_vm1, %v3189_v5 }
 0x7a3   :  { %3330 = vmatpush.bf16.xpose.msra.mxu1 %v3321_v30 }
 0x7a6   :  { %v3863_v31 = vpop.permute.xlu1 %3862 }
 0x7a7   :  { %v3868_v48 = vsel %vm770_vm2, %v3863_v31, 0 }
 0x7a9   :  { %v3314_v43 = vpop.permute.xlu0 %3313 }
 0x7ae   :  { %9599 = vmatmul.msk.bf16.vlgmr.msra.gmra.mxu1 %vm175_vm1, %v3314_v43 }
 0x7b0   :  { %v3045_v11 = vpop.f32.mrf.mxu3 }
 0x7b1   :  { %3171 = vst [vmem:[#allocation1 + $0x11] ss:$2 sm:$0xff] %v3045_v11  ;;  %v3385_v50 = vpop.permute.xlu0 %3384 }
 0x7b2   :  { %v3390_v17 = vsel %vm175_vm1, %v3385_v50, 0 }
 0x7b3   :  { %3399 = vmatpush.bf16.xpose.msrb.mxu1 %v3390_v17 }
 0x7b8   :  { %v3047_v39 = vpop.f32.mrf.mxu3  ;;  %v3177_v28 = vld.sshfl [vmem:[#allocation1 + $0x10] sm:$0xff pattern:$0x75316420] }
 0x7b9   :  { %v3383_v38 = vpop.permute.xlu0 %3382 }
 0x7bb   :  { %3468 = vmatpush.bf16.xpose.msra.mxu1 %v3459_v52 }
 0x7be   :  { %9602 = vmatmul.msk.bf16.vlgmr.msrb.gmra.mxu1 %vm175_vm1, %v3383_v38 }
 0x7c0   :  { %v3129_v56 = vpop.f32.mrf.mxu3 }
 0x7c1   :  { %3175 = vst [vmem:[#allocation1 + $0x31] ss:$2 sm:$0xff] %v3129_v56  ;;  %v3475_v8 = vpop.permute.xlu0 %3474 }
 0x7c2   :  { %9606 = vmatmul.msk.bf16.vlgmr.msra.gmra.mxu2 %vm175_vm1, %v3475_v8 }
 0x7c8   :  { %v3131_v32 = vpop.f32.mrf.mxu3 }
 0x7c9   :  { %v3569_v44 = vpop.permute.xlu0 %3568 }
 0x7ca   :  { %v3574_v24 = vsel %vm175_vm1, %v3569_v44, 0 }
 0x7cb   :  { %3583 = vmatpush.bf16.xpose.msrb.mxu2 %v3574_v24 }
 0x7ce   :  { %v3108_v54 = vpop.f32.mrf.mxu2  ;;  %9605 = vmatmul.msk.bf16.vlgmr.msra.gmra.mxu1 %vm175_vm1, %v3452_v19 }
 0x7cf   :  { %3174 = vst [vmem:[#allocation1 + $0x30] ss:$2 sm:$0xff] %v3108_v54 }
 0x7d1   :  { %v3567_v6 = vpop.permute.xlu0 %3566 }
 0x7d2   :  { %9610 = vmatmul.msk.bf16.vlgmr.msrb.gmra.mxu2 %vm175_vm1, %v3567_v6 }
 0x7d3   :  { %3877 = vmatpush.bf16.msra.mxu2 %v3868_v48 }
 0x7d6   :  { %v3110_v51 = vpop.f32.mrf.mxu2  ;;  %v3179_v6 = vld.sshfl [vmem:[#allocation1 + $0x30] sm:$0xff pattern:$0x75316420] }
 0x7d7   :  { %3961 = vmatpush.bf16.msrb.mxu2 %v3952_v37 }
 0x7d9   :  { %v3546_v53 = vpop.permute.xlu0 %3545 }
 0x7da   :  { %v3551_v60 = vsel %vm175_vm1, %v3546_v53, 0  ;;  %v3309_v34 = vpop.f32.mrf.mxu3 }
 0x7db   :  { %3560 = vmatpush.bf16.xpose.msrb.mxu1 %v3551_v60  ;;  %v11937_v11 = vmul.f32 0.35355338, %v3309_v34 }
 0x7dc   :  { %v2982_v62 = vpop.f32.mrf.mxu0 }
 0x7dd   :  { %3168 = vst [vmem:[#allocation1] ss:$2 sm:$0xff] %v2982_v62  ;;  %v3634_v52 = vsel %vm571_vm3, %v11937_v11, -inf }
 0x7de   :  { %v3286_v33 = vpop.f32.mrf.mxu2 }
 0x7df   :  { %v11924_v0 = vmul.f32 0.35355338, %v3286_v33 }
 0x7e1   :  { %v3884_v19 = vpop.permute.xlu0 %3883  ;;  %v3631_v42 = vsel %vm571_vm3, %v11924_v0, -inf }
 0x7e2   :  { %v3889_v27 = vsel %vm770_vm2, %v3884_v19, 0  ;;  %3632 = vmax.xlane.f32.xlu0 %v3631_v42  ;;  %v3311_v61 = vpop.f32.mrf.mxu3  ;;  %9609 = vmatmul.msk.bf16.vlgmr.msrb.gmra.mxu1 %vm175_vm1, %v3544_v59 }
 0x7e3   :  { %3898 = vmatpush.bf16.msra.mxu3 %v3889_v27 }
 0x7e4   :  { %v3176_v2 = vld.sshfl [vmem:[#allocation1] sm:$0xff pattern:$0x75316420]  ;;  %v2984_v35 = vpop.f32.mrf.mxu0 }
 0x7e5   :  { %v3190_v22 = vpack.c.bf16 %v3177_v28, %v3176_v2  ;;  %v3905_v28 = vpop.permute.xlu1 %3904 }
 0x7e6   :  { %v3288_v47 = vpop.f32.mrf.mxu2  ;;  %v3910_v35 = vsel %vm770_vm2, %v3905_v28, 0 }
 0x7e7   :  { %9594 = vmatmul.msk.bf16.gmra.mxu0 %vm175_vm1, %v3190_v22 }
 0x7e9   :  { %v3842_v21 = vpop.permute.xlu0 %3841 }
 0x7ea   :  { %v3847_v1 = vsel %vm770_vm2, %v3842_v21, 0  ;;  %v3378_v4 = vpop.f32.mrf.mxu3 }
 0x7eb   :  { %3856 = vmatpush.bf16.msra.mxu1 %v3847_v1 }
 0x7ee   :  { %v3355_v46 = vpop.f32.mrf.mxu2 }
 0x7ef   :  { %v11932_v13 = vmul.f32 0.35355338, %v3355_v46 }
 0x7f1   :  { %v3968_v5 = vpop.permute.xlu0 %3967  ;;  %v3640_v12 = vsel %vm571_vm3, %v11932_v13, -inf }
 0x7f2   :  { %v3973_v30 = vsel %vm770_vm2, %v3968_v5, 0  ;;  %3641 = vmax.xlane.f32.xlu0 %v3640_v12  ;;  %v3380_v43 = vpop.f32.mrf.mxu3 }
 0x7f3   :  { %3982 = vmatpush.bf16.msrb.mxu3 %v3973_v30 }
 0x7f6   :  { %v3357_v50 = vpop.f32.mrf.mxu2 }
 0x7f9   :  { %v3926_v17 = vpop.permute.xlu0 %3925 }
 0x7fa   :  { %v3931_v39 = vsel %vm770_vm2, %v3926_v17, 0  ;;  %3635 = vmax.xlane.f32.xlu0 %v3634_v52  ;;  %v3447_v38 = vpop.f32.mrf.mxu3 }
 0x7fb   :  { %3940 = vmatpush.bf16.msrb.mxu1 %v3931_v39  ;;  %v11980_v39 = vmul.f32 0.35355338, %v3447_v38 }
 0x7fe   :  { %v3424_v59 = vpop.f32.mrf.mxu2 }
 0x7ff   :  { %v3066_v56 = vpop.f32.mrf.mxu0  ;;  %v11957_v27 = vmul.f32 0.35355338, %v3424_v59 }
 0x800   :  { %3172 = vst [vmem:[#allocation1 + $0x20] ss:$2 sm:$0xff] %v3066_v56 }
 0x801   :  { %v3649_v22 = vsel %vm571_vm3, %v11957_v27, -inf }
 0x802   :  { %v3449_v8 = vpop.f32.mrf.mxu3 }
 0x803   :  { %v11984_v8 = vpop.permute.xlu0 %4051 }
 0x806   :  { %v3426_v31 = vpop.f32.mrf.mxu2 }
 0x807   :  { %v3068_v32 = vpop.f32.mrf.mxu0  ;;  %v3652_v31 = vsel %vm571_vm3, %v11980_v39, -inf }
 0x80a   :  { %v11942_v44 = vpop.f32.mrf.mxu3 }
 0x80b   :  { %v3087_v24 = vpop.f32.mrf.mxu1 }
 0x80c   :  { %3173 = vst [vmem:[#allocation1 + $0x21] ss:$2 sm:$0xff] %v3087_v24 }
 0x80f   :  { %v3216_v48 = vpop.f32.mrf.mxu0 }
 0x810   :  { %v11945_v54 = vadd.f32 %v3216_v48, %v11585_v49 }
 0x812   :  { %v3518_v3 = vpop.f32.mrf.mxu3 }
 0x813   :  { %v3178_v37 = vld.sshfl [vmem:[#allocation1 + $0x20] sm:$0xff pattern:$0x75316420]  ;;  %v3089_v51 = vpop.f32.mrf.mxu1 }
 0x814   :  { %v3191_v53 = vpack.c.bf16 %v3179_v6, %v3178_v37 }
 0x816   :  { %9595 = vmatmul.msk.bf16.gmra.mxu0 %vm175_vm1, %v3191_v53 }
 0x817   :  { %v11948_v60 = vpop.f32.mrf.mxu0 }
 0x81a   :  { %v3608_v34 = vpop.f32.mrf.mxu3 }
 0x81b   :  { %v3263_v62 = vpop.f32.mrf.mxu1  ;;  %v11990_v24 = vmul.f32 0.35355338, %v3608_v34  ;;  %v12000_v34 = vmul.f32 0.35355338, %v11942_v44 }
 0x81c   :  { %v11950_v33 = vmul.f32 0.35355338, %v3263_v62 }
 0x81d   :  { %v3673_v51 = vsel %vm571_vm3, %v11990_v24, -inf }
 0x81e   :  { %v3628_v19 = vsel %vm571_vm3, %v11950_v33, -inf }
 0x81f   :  { %3629 = vmax.xlane.f32.xlu1 %v3628_v19  ;;  %v3221_v42 = vpop.f32.mrf.mxu0 }
 0x820   :  { %v11955_v49 = vadd.f32 %v3221_v42, %v11605_v57 }
 0x822   :  { %v3610_v61 = vpop.f32.mrf.mxu3 }
 0x823   :  { %v3265_v2 = vpop.f32.mrf.mxu1 }
 0x824   :  { %v3661_v2 = vsel %vm571_vm3, %v12000_v34, -inf }
 0x826   :  { %9608 = vmatmul.msk.bf16.vlgmr.msrb.gmra.mxu0 %vm175_vm1, %v11900_v40  ;;  %v11972_v40 = vmul.f32 0.35355338, %v3378_v4 }
 0x827   :  { %3919 = vmatpush.bf16.msrb.mxu0 %v3910_v35  ;;  %3650 = vmax.xlane.f32.xlu1 %v3649_v22  ;;  %v12002_v19 = vpop.f32.mrf.mxu0  ;;  %v2212_v22 = vadd.f32 %v11580_v16, %v11639_v10  ;;  %v2217_v10 = vadd.f32 %v11595_v9, %v11652_v15 }
 0x828   :  { %v3643_v17 = vsel %vm571_vm3, %v11972_v40, -inf }
 0x82b   :  { %v3332_v47 = vpop.f32.mrf.mxu1 }
 0x82c   :  { %v11964_v21 = vmul.f32 0.35355338, %v3332_v47 }
 0x82e   :  { %v3637_v57 = vsel %vm571_vm3, %v11964_v21, -inf }
 0x82f   :  { %3638 = vmax.xlane.f32.xlu2 %v3637_v57 }
 0x833   :  { %v3334_v1 = vpop.f32.mrf.mxu1 }
 0x83b   :  { %v3401_v46 = vpop.f32.mrf.mxu1 }
 0x83c   :  { %v11968_v5 = vmul.f32 0.35355338, %v3401_v46 }
 0x83e   :  { %v3646_v12 = vsel %vm571_vm3, %v11968_v5, -inf }
 0x83f   :  { %3647 = vmax.xlane.f32.xlu2 %v3646_v12 }
 0x843   :  { %v3403_v30 = vpop.f32.mrf.mxu1 }
 0x845   :  { %v3493_v43 = vpop.f32.mrf.mxu2 }
 0x846   :  { %v11974_v50 = vmul.f32 0.35355338, %v3493_v43 }
 0x847   :  { %3644 = vmax.xlane.f32.xlu2 %v3643_v17 }
 0x848   :  { %v3658_v52 = vsel %vm571_vm3, %v11974_v50, -inf }
 0x849   :  { %3659 = vmax.xlane.f32.xlu1 %v3658_v52 }
 0x84b   :  { %v3470_v59 = vpop.f32.mrf.mxu1 }
 0x84c   :  { %v11982_v56 = vmul.f32 0.35355338, %v3470_v59  ;;  %v12023_v59 = vpop.permute.xlu1 %4030 }
 0x84d   :  { %v3495_v4 = vpop.f32.mrf.mxu2 }
 0x84e   :  { %v3655_v32 = vsel %vm571_vm3, %v11982_v56, -inf }
 0x84f   :  { %3653 = vmax.xlane.f32.xlu2 %v3652_v31 }
 0x851   :  { %3656 = vmax.xlane.f32.xlu1 %v3655_v32 }
 0x853   :  { %v3472_v48 = vpop.f32.mrf.mxu1 }
 0x855   :  { %v3633_v3 = vpop.xlane.xlu0 %3632  ;;  %v3585_v38 = vpop.f32.mrf.mxu2 }
 0x856   :  { %v3677_v6 = vsub.f32 %v11924_v0, %v3633_v3  ;;  %v11993_v37 = vmul.f32 0.35355338, %v3585_v38 }
 0x857   :  { %3674 = vmax.xlane.f32.xlu2 %v3673_v51 }
 0x858   :  { %v3694_v53 = vmul.f32 1.442695, %v3677_v6  ;;  %v3670_v62 = vsel %vm571_vm3, %v11993_v37, -inf }
 0x859   :  { %3671 = vmax.xlane.f32.xlu0 %v3670_v62 }
 0x85a   :  { %10092 = vpow2.f32 %v3694_v53 }
 0x85d   :  { %v3587_v42 = vpop.f32.mrf.mxu2 }
 0x85f   :  { %v3562_v61 = vpop.f32.mrf.mxu1 }
 0x860   :  { %v12004_v0 = vpop.eup %10092  ;;  %v12006_v28 = vmul.f32 0.35355338, %v3562_v61 }
 0x861   :  { %3662 = vmax.xlane.f32.xlu0 %v3661_v2  ;;  %v3727_v35 = vsel %vm571_vm3, %v12004_v0, 0.0 }
 0x862   :  { %3728 = vadd.xlane.f32.xlu2 %v3727_v35  ;;  %v3667_v44 = vsel %vm571_vm3, %v12006_v28, -inf }
 0x863   :  { %3668 = vmax.xlane.f32.xlu1 %v3667_v44 }
 0x864   :  { %v3226_v47 = vpop.f32.mrf.mxu0 }
 0x865   :  { %v12016_v57 = vadd.f32 %v3226_v47, %v2212_v22  ;;  %v3642_v1 = vpop.xlane.xlu0 %3641 }
 0x866   :  { %v3680_v48 = vsub.f32 %v11932_v13, %v3642_v1 }
 0x867   :  { %v3564_v46 = vpop.f32.mrf.mxu1 }
 0x868   :  { %v3700_v38 = vmul.f32 1.442695, %v3680_v48 }
 0x86c   :  { %v12025_v16 = vpop.f32.mrf.mxu0 }
 0x86d   :  { %v3636_v12 = vpop.xlane.xlu0 %3635 }
 0x86e   :  { %v3678_v30 = vsub.f32 %v11937_v11, %v3636_v12 }
 0x870   :  { %v3696_v43 = vmul.f32 1.442695, %v3678_v30 }
 0x872   :  { %10094 = vpow2.f32 %v3696_v43 }
 0x878   :  { %v12019_v17 = vpop.eup %10094 }
 0x879   :  { %v3730_v52 = vsel %vm571_vm3, %v12019_v17, 0.0 }
 0x87a   :  { %3731 = vadd.xlane.f32.xlu1 %v3730_v52 }
 0x892   :  { %v3630_v4 = vpop.xlane.xlu1 %3629 }
 0x893   :  { %v3676_v31 = vsub.f32 %v11950_v33, %v3630_v4  ;;  %v3231_v32 = vpop.f32.mrf.mxu0 }
 0x894   :  { %v12030_v11 = vadd.f32 %v3231_v32, %v2217_v10 }
 0x895   :  { %v3692_v3 = vmul.f32 1.442695, %v3676_v31 }
 0x897   :  { %10096 = vpow2.f32 %v3692_v3 }
 0x898   :  { %10098 = vpow2.f32 %v3700_v38 }
 0x89a   :  { %v3651_v6 = vpop.xlane.xlu1 %3650 }
 0x89b   :  { %v3683_v51 = vsub.f32 %v11957_v27, %v3651_v6  ;;  %v12034_v53 = vpop.f32.mrf.mxu0 }
 0x89d   :  { %v12036_v62 = vpop.eup %10096  ;;  %v3706_v9 = vmul.f32 1.442695, %v3683_v51 }
 0x89e   :  { %v3724_v15 = vsel %vm571_vm3, %v12036_v62, 0.0  ;;  %v12040_v42 = vpop.eup %10098 }
 0x89f   :  { %10100 = vpow2.f32 %v3706_v9  ;;  %3725 = vadd.xlane.f32.xlu0 %v3724_v15  ;;  %v3736_v35 = vsel %vm571_vm3, %v12040_v42, 0.0 }
 0x8a2   :  { %v3639_v33 = vpop.xlane.xlu2 %3638 }
 0x8a3   :  { %v3679_v13 = vsub.f32 %v11964_v21, %v3639_v33  ;;  %v3539_v61 = vpop.f32.mrf.mxu0 }
 0x8a5   :  { %v12043_v2 = vpop.eup %10100  ;;  %v3698_v27 = vmul.f32 1.442695, %v3679_v13 }
 0x8a6   :  { %v3745_v44 = vsel %vm571_vm3, %v12043_v2, 0.0 }
 0x8a7   :  { %10102 = vpow2.f32 %v3698_v27  ;;  %3737 = vadd.xlane.f32.xlu0 %v3736_v35  ;;  %3746 = vadd.xlane.f32.xlu2 %v3745_v44 }
 0x8ab   :  { %v3541_v22 = vpop.f32.mrf.mxu0 }
 0x8ac   :  { %v12078_v22 = vmul.f32 0.35355338, %v3539_v61 }
 0x8ad   :  { %v12049_v47 = vpop.eup %10102 }
 0x8ae   :  { %v3733_v1 = vsel %vm571_vm3, %v12049_v47, 0.0 }
 0x8af   :  { %3734 = vadd.xlane.f32.xlu0 %v3733_v1 }
 0x8b2   :  { %v3648_v21 = vpop.xlane.xlu2 %3647 }
 0x8b3   :  { %v3682_v46 = vsub.f32 %v11968_v5, %v3648_v21 }
 0x8b5   :  { %v3704_v12 = vmul.f32 1.442695, %v3682_v46 }
 0x8b7   :  { %10104 = vpow2.f32 %v3704_v12 }
 0x8ba   :  { %v3645_v30 = vpop.xlane.xlu2 %3644 }
 0x8bb   :  { %v3681_v43 = vsub.f32 %v11972_v40, %v3645_v30 }
 0x8bc   :  { %v3660_v52 = vpop.xlane.xlu1 %3659 }
 0x8bd   :  { %v12055_v10 = vpop.eup %10104  ;;  %v3702_v4 = vmul.f32 1.442695, %v3681_v43  ;;  %v3686_v31 = vsub.f32 %v11974_v50, %v3660_v52  ;;  %v3664_v43 = vsel %vm571_vm3, %v12078_v22, -inf }
 0x8be   :  { %v3742_v32 = vsel %vm571_vm3, %v12055_v10, 0.0 }
 0x8bf   :  { %10106 = vpow2.f32 %v3702_v4  ;;  %v3712_v48 = vmul.f32 1.442695, %v3686_v31  ;;  %3743 = vadd.xlane.f32.xlu1 %v3742_v32 }
 0x8c1   :  { %10108 = vpow2.f32 %v3712_v48 }
 0x8c2   :  { %v3654_v3 = vpop.xlane.xlu2 %3653 }
 0x8c3   :  { %v3684_v5 = vsub.f32 %v11980_v39, %v3654_v3 }
 0x8c4   :  { %v3657_v38 = vpop.xlane.xlu1 %3656 }
 0x8c5   :  { %v12061_v6 = vpop.eup %10106  ;;  %v3708_v40 = vmul.f32 1.442695, %v3684_v5  ;;  %v3685_v51 = vsub.f32 %v11982_v56, %v3657_v38 }
 0x8c6   :  { %v3739_v9 = vsel %vm571_vm3, %v12061_v6, 0.0 }
 0x8c7   :  { %v12066_v50 = vpop.eup %10108  ;;  %10110 = vpow2.f32 %v3708_v40  ;;  %v3710_v15 = vmul.f32 1.442695, %v3685_v51  ;;  %3740 = vadd.xlane.f32.xlu1 %v3739_v9 }
 0x8c8   :  { %v3754_v33 = vsel %vm571_vm3, %v12066_v50, 0.0 }
 0x8c9   :  { %10112 = vpow2.f32 %v3710_v15  ;;  %3755 = vadd.xlane.f32.xlu2 %v3754_v33  ;;  %v4036_v15 = vsel %vm770_vm2, %v12023_v59, 0 }
 0x8ca   :  { %v3675_v27 = vpop.xlane.xlu2 %3674 }
 0x8cb   :  { %v3691_v33 = vsub.f32 %v11990_v24, %v3675_v27 }
 0x8cc   :  { %v3672_v39 = vpop.xlane.xlu0 %3671 }
 0x8cd   :  { %v12070_v13 = vpop.eup %10110  ;;  %v3690_v12 = vsub.f32 %v11993_v37, %v3672_v39  ;;  %v3722_v39 = vmul.f32 1.442695, %v3691_v33 }
 0x8ce   :  { %v3748_v56 = vsel %vm571_vm3, %v12070_v13, 0.0 }
 0x8cf   :  { %v12074_v35 = vpop.eup %10112  ;;  %3749 = vadd.xlane.f32.xlu0 %v3748_v56  ;;  %v3720_v52 = vmul.f32 1.442695, %v3690_v12 }
 0x8d0   :  { %v3751_v44 = vsel %vm571_vm3, %v12074_v35, 0.0 }
 0x8d1   :  { %3752 = vadd.xlane.f32.xlu2 %v3751_v44 }
 0x8d4   :  { %v3663_v1 = vpop.xlane.xlu0 %3662 }
 0x8d5   :  { %v3687_v21 = vsub.f32 %v12000_v34, %v3663_v1  ;;  %v3729_v46 = vpop.xlane.xlu2 %3728 }
 0x8d6   :  { %10114 = vrcp.f32 %v3729_v46  ;;  %v3669_v31 = vpop.xlane.xlu1 %3668 }
 0x8d7   :  { %v3714_v30 = vmul.f32 1.442695, %v3687_v21  ;;  %v3689_v34 = vsub.f32 %v12006_v28, %v3669_v31 }
 0x8d9   :  { %10116 = vpow2.f32 %v3714_v30  ;;  %3665 = vmax.xlane.f32.xlu2 %v3664_v43  ;;  %v3718_v3 = vmul.f32 1.442695, %v3689_v34 }
 0x8da   :  { %10118 = vpow2.f32 %v3720_v52 }
 0x8db   :  { %10120 = vpow2.f32 %v3718_v3 }
 0x8dc   :  { %v10115_v4 = vpop.eup %10114 }
 0x8dd   :  { %v3789_v32 = vmul.f32 %v10115_v4, %v12004_v0 }
 0x8df   :  { %v12085_v61 = vpop.eup %10116  ;;  %v3805_v48 = vpack.c.bf16 %v3789_v32, %v3789_v32 }
 0x8e0   :  { %v3757_v37 = vsel %vm571_vm3, %v12085_v61, 0.0  ;;  %v12093_v5 = vpop.eup %10118 }
 0x8e1   :  { %9613 = vmatmul.msk.bf16.vlgmr.msra.gmra.mxu1 %vm766_vm4, %v3805_v48  ;;  %3758 = vadd.xlane.f32.xlu1 %v3757_v37  ;;  %v3766_v0 = vsel %vm571_vm3, %v12093_v5, 0.0  ;;  %v12097_v38 = vpop.eup %10120 }
 0x8e2   :  { %v3763_v40 = vsel %vm571_vm3, %v12097_v38, 0.0 }
 0x8e3   :  { %4009 = vrot.lane.b32.xlu0 %v10734_v20, %s10508_s24 }
 0x8e9   :  { %3767 = vadd.xlane.f32.xlu1 %v3766_v0 }
 0x8ed   :  { %v3732_v28 = vpop.xlane.xlu1 %3731 }
 0x8ee   :  { %10122 = vrcp.f32 %v3732_v28 }
 0x8ef   :  { %10124 = vpow2.f32 %v3722_v39 }
 0x8f1   :  { %3988 = vrot.lane.b32.xlu2 %v10694_v55, %s10508_s24  ;;  %3764 = vadd.xlane.f32.xlu1 %v3763_v40 }
 0x8f4   :  { %v10123_v51 = vpop.eup %10122 }
 0x8f5   :  { %v3790_v20 = vmul.f32 %v10123_v51, %v12019_v17  ;;  %v12110_v55 = vpop.eup %10124 }
 0x8f6   :  { %v3769_v17 = vsel %vm571_vm3, %v12110_v55, 0.0 }
 0x8f7   :  { %v3806_v9 = vpack.c.bf16 %v3790_v20, %v3790_v20 }
 0x8f9   :  { %9614 = vmatmul.msk.bf16.vlgmr.msra.gmra.mxu2 %vm766_vm4, %v3806_v9 }
 0x8fa   :  { %4045 = vmatpush.bf16.msra.mxu2 %v4036_v15 }
 0x90a   :  { %4072 = vrot.lane.b32.xlu1 %v10719_v7, %s10508_s24 }
 0x912   :  { %v3726_v56 = vpop.xlane.xlu0 %3725 }
 0x913   :  { %10126 = vrcp.f32 %v3726_v56 }
 0x919   :  { %v10127_v44 = vpop.eup %10126 }
 0x91a   :  { %v3788_v59 = vmul.f32 %v10127_v44, %v12036_v62  ;;  %v3738_v1 = vpop.xlane.xlu0 %3737  ;;  %3770 = vadd.xlane.f32.xlu2 %v3769_v17  ;;  %v3747_v43 = vpop.xlane.xlu2 %3746  ;;  %v4057_v62 = vsel %vm770_vm2, %v11984_v8, 0 }
 0x91b   :  { %10128 = vrcp.f32 %v3738_v1 }
 0x91c   :  { %v3804_v21 = vpack.c.bf16 %v3788_v59, %v3788_v59 }
 0x91e   :  { %9612 = vmatmul.msk.bf16.vlgmr.msra.gmra.mxu0 %vm766_vm4, %v3804_v21 }
 0x921   :  { %v10129_v7 = vpop.eup %10128 }
 0x922   :  { %v3735_v24 = vpop.xlane.xlu0 %3734  ;;  %v3792_v27 = vmul.f32 %v10129_v7, %v12040_v42 }
 0x923   :  { %10130 = vrcp.f32 %v3735_v24 }
 0x924   :  { %v3808_v30 = vpack.c.bf16 %v3792_v27, %v3792_v27  ;;  %10132 = vrcp.f32 %v3747_v43 }
 0x929   :  { %v10131_v46 = vpop.eup %10130 }
 0x92a   :  { %v3791_v12 = vmul.f32 %v10131_v46, %v12049_v47  ;;  %v10133_v42 = vpop.eup %10132 }
 0x92b   :  { %v3795_v47 = vmul.f32 %v10133_v42, %v12043_v2 }
 0x92c   :  { %v3807_v52 = vpack.c.bf16 %v3791_v12, %v3791_v12 }
 0x92d   :  { %v3811_v48 = vpack.c.bf16 %v3795_v47, %v3795_v47 }
 0x92e   :  { %9615 = vmatmul.msk.bf16.vlgmr.msra.gmra.mxu3 %vm766_vm4, %v3807_v52  ;;  %9616 = vmatmul.msk.bf16.vlgmr.msrb.gmra.mxu0 %vm766_vm4, %v3808_v30 }
 0x92f   :  { %4066 = vmatpush.bf16.msra.mxu3 %v4057_v62 }
 0x932   :  { %4114 = vrot.lane.b32.xlu2 %v10736_v14, %s10508_s24  ;;  %v3744_v4 = vpop.xlane.xlu1 %3743 }
 0x933   :  { %10134 = vrcp.f32 %v3744_v4 }
 0x939   :  { %v10135_v31 = vpop.eup %10134 }
 0x93a   :  { %v3794_v32 = vmul.f32 %v10135_v31, %v12055_v10  ;;  %4093 = vrot.lane.b32.xlu2 %v10746_v25, %s10508_s24  ;;  %v3741_v8 = vpop.xlane.xlu1 %3740 }
 0x93b   :  { %10136 = vrcp.f32 %v3741_v8 }
 0x93c   :  { %v3810_v34 = vpack.c.bf16 %v3794_v32, %v3794_v32  ;;  %v3756_v37 = vpop.xlane.xlu2 %3755 }
 0x93d   :  { %10138 = vrcp.f32 %v3756_v37 }
 0x93e   :  { %9618 = vmatmul.msk.bf16.vlgmr.msrb.gmra.mxu2 %vm766_vm4, %v3810_v34  ;;  %9619 = vmatmul.msk.bf16.vlgmr.msrb.gmra.mxu3 %vm766_vm4, %v3811_v48 }
 0x941   :  { %v10137_v14 = vpop.eup %10136 }
 0x942   :  { %v3793_v3 = vmul.f32 %v10137_v14, %v12061_v6  ;;  %v3750_v10 = vpop.xlane.xlu0 %3749 }
 0x943   :  { %v10139_v28 = vpop.eup %10138  ;;  %10140 = vrcp.f32 %v3750_v10 }
 0x944   :  { %v3809_v2 = vpack.c.bf16 %v3793_v3, %v3793_v3  ;;  %v3753_v0 = vpop.xlane.xlu2 %3752  ;;  %v3798_v25 = vmul.f32 %v10139_v28, %v12066_v50 }
 0x945   :  { %10142 = vrcp.f32 %v3753_v0 }
 0x946   :  { %9617 = vmatmul.msk.bf16.vlgmr.msrb.gmra.mxu1 %vm766_vm4, %v3809_v2  ;;  %v3814_v40 = vpack.c.bf16 %v3798_v25, %v3798_v25 }
 0x949   :  { %v10141_v15 = vpop.eup %10140 }
 0x94a   :  { %v3796_v6 = vmul.f32 %v10141_v15, %v12070_v13 }
 0x94b   :  { %v10143_v33 = vpop.eup %10142 }
 0x94c   :  { %v3666_v51 = vpop.xlane.xlu2 %3665  ;;  %v3797_v39 = vmul.f32 %v10143_v33, %v12074_v35  ;;  %v3812_v1 = vpack.c.bf16 %v3796_v6, %v3796_v6 }
 0x94d   :  { %v3688_v20 = vsub.f32 %v12078_v22, %v3666_v51  ;;  %v153_v51 = vld [vmem:[%s14298_s3 + $0xc] sm:$0xf] }
 0x94e   :  { %9622 = vmatmul.msk.bf16.vlgmr.msra.gmra.mxu2 %vm766_vm4, %v3814_v40  ;;  %v3813_v21 = vpack.c.bf16 %v3797_v39, %v3797_v39 }
 0x94f   :  { %v3716_v9 = vmul.f32 1.442695, %v3688_v20  ;;  %v4228_v20 = vsel %vm2144_vm5, %v153_v51, 0 }
 0x951   :  { %10144 = vpow2.f32 %v3716_v9 }
 0x954   :  { %v3989_v56 = vpop.permute.xlu2 %3988  ;;  %v3759_v44 = vpop.xlane.xlu1 %3758 }
 0x955   :  { %v3994_v50 = vsel %vm770_vm2, %v3989_v56, 0  ;;  %10146 = vrcp.f32 %v3759_v44  ;;  %v4010_v17 = vpop.permute.xlu0 %4009 }
 0x956   :  { %v4015_v59 = vsel %vm770_vm2, %v4010_v17, 0  ;;  %4003 = vmatpush.bf16.msra.mxu0 %v3994_v50 }
 0x957   :  { %v12139_v22 = vpop.eup %10144  ;;  %4024 = vmatpush.bf16.msra.mxu1 %v4015_v59 }
 0x958   :  { %v3760_v24 = vsel %vm571_vm3, %v12139_v22, 0.0 }
 0x959   :  { %3761 = vadd.xlane.f32.xlu0 %v3760_v24  ;;  %9620 = vmatmul.msk.bf16.vlgmr.msra.gmra.mxu0 %vm766_vm4, %v3812_v1 }
 0x95a   :  { %9621 = vmatmul.msk.bf16.vlgmr.msra.gmra.mxu1 %vm766_vm4, %v3813_v21 }
 0x95b   :  { %v10147_v13 = vpop.eup %10146 }
 0x95c   :  { %v3799_v35 = vmul.f32 %v10147_v13, %v12085_v61  ;;  %v3768_v12 = vpop.xlane.xlu1 %3767 }
 0x95d   :  { %10148 = vrcp.f32 %v3768_v12 }
 0x95e   :  { %v3815_v7 = vpack.c.bf16 %v3799_v35, %v3799_v35  ;;  %v3858_v27 = vpop.f32.mrf.mxu1 }
 0x95f   :  { %4174 = vst [vmem:[#allocation1 + $0x1] ss:$2 sm:$0xff] %v3858_v27 }
 0x960   :  { %9623 = vmatmul.msk.bf16.vlgmr.msra.gmra.mxu3 %vm766_vm4, %v3815_v7 }
 0x963   :  { %v10149_v42 = vpop.eup %10148 }
 0x964   :  { %v3765_v30 = vpop.xlane.xlu1 %3764  ;;  %v3802_v47 = vmul.f32 %v10149_v42, %v12093_v5 }
 0x965   :  { %10150 = vrcp.f32 %v3765_v30 }
 0x966   :  { %v3860_v46 = vpop.f32.mrf.mxu1  ;;  %v3818_v8 = vpack.c.bf16 %v3802_v47, %v3802_v47 }
 0x96d   :  { %4135 = vrot.lane.b32.xlu0 %v10748_v26, %s10508_s24  ;;  %v10151_v26 = vpop.eup %10150 }
 0x96e   :  { %v3801_v34 = vmul.f32 %v10151_v26, %v12097_v38 }
 0x970   :  { %v3817_v3 = vpack.c.bf16 %v3801_v34, %v3801_v34 }
 0x97c   :  { %v3879_v43 = vpop.f32.mrf.mxu2  ;;  %v4073_v52 = vpop.permute.xlu1 %4072 }
 0x97d   :  { %4176 = vst [vmem:[#allocation1 + $0x10] ss:$2 sm:$0xff] %v3879_v43  ;;  %v4078_v62 = vsel %vm770_vm2, %v4073_v52, 0 }
 0x97e   :  { %4087 = vmatpush.bf16.msrb.mxu0 %v4078_v62 }
 0x982   :  { %4237 = vmatpush.bf16.msra.mxu0 %v4228_v20 }
 0x984   :  { %v3881_v4 = vpop.f32.mrf.mxu2 }
 0x98d   :  { %v3771_v61 = vpop.xlane.xlu2 %3770 }
 0x995   :  { %v4115_v31 = vpop.permute.xlu2 %4114 }
 0x996   :  { %v4120_v32 = vsel %vm770_vm2, %v4115_v31, 0 }
 0x997   :  { %4129 = vmatpush.bf16.msrb.mxu2 %v4120_v32 }
 0x99a   :  { %9626 = vmatmul.msk.bf16.vlgmr.msrb.gmra.mxu2 %vm766_vm4, %v3818_v8 }
 0x99b   :  { %v3837_v48 = vpop.f32.mrf.mxu0 }
 0x99c   :  { %4172 = vst [vmem:[#allocation1] ss:$2 sm:$0xff] %v3837_v48 }
 0x99d   :  { %v4094_v37 = vpop.permute.xlu2 %4093 }
 0x99e   :  { %v4099_v14 = vsel %vm770_vm2, %v4094_v37, 0  ;;  %v12171_v37 = vld [vmem:[%s14299_s4] ss:$0 sm:$0xff] }
 0x99f   :  { %4108 = vmatpush.bf16.msrb.mxu1 %v4099_v14 }
 0x9a2   :  { %9625 = vmatmul.msk.bf16.vlgmr.msrb.gmra.mxu1 %vm766_vm4, %v3817_v3 }
 0x9a3   :  { %v3839_v5 = vpop.f32.mrf.mxu0  ;;  %v4187_v17 = vld.sshfl [vmem:[#allocation1] sm:$0xff pattern:$0x75316420] }
 0x9ab   :  { %v3921_v2 = vpop.f32.mrf.mxu0 }
 0x9ac   :  { %4180 = vst [vmem:[#allocation1 + $0x20] ss:$2 sm:$0xff] %v3921_v2 }
 0x9b1   :  { %v3900_v0 = vpop.f32.mrf.mxu3 }
 0x9b2   :  { %4178 = vst [vmem:[#allocation1 + $0x11] ss:$2 sm:$0xff] %v3900_v0  ;;  %v2204_v0 = vadd.f32 %v11561_v45, %v11597_v23  ;;  %v10465_v45 = vld [vmem:[%s14295_s0 + $0x8] sm:$0xff] }
 0x9b3   :  { %v3923_v28 = vpop.f32.mrf.mxu0 }
 0x9b4   :  { %v10464_v28 = vld [vmem:[%s14295_s0] sm:$0xff] }
 0x9b9   :  { %v3902_v10 = vpop.f32.mrf.mxu3  ;;  %v4188_v39 = vld.sshfl [vmem:[#allocation1 + $0x10] sm:$0xff pattern:$0x75316420] }
 0x9ba   :  { %v4211_v43 = vpack.c.bf16 %v4188_v39, %v4187_v17 }
 0x9c1   :  { %v3963_v25 = vpop.f32.mrf.mxu2  ;;  %v3984_v40 = vpop.f32.mrf.mxu3 }
 0x9c2   :  { %4184 = vst [vmem:[#allocation1 + $0x30] ss:$2 sm:$0xff] %v3963_v25  ;;  %v3237_v25 = vadd.f32 %v11948_v60, %v2204_v0 }
 0x9c3   :  { %4186 = vst [vmem:[#allocation1 + $0x31] ss:$2 sm:$0xff] %v3984_v40  ;;  %v3942_v38 = vpop.f32.mrf.mxu1 }
 0x9c4   :  { %4182 = vst [vmem:[#allocation1 + $0x21] ss:$2 sm:$0xff] %v3942_v38 }
 0x9c9   :  { %v3965_v9 = vpop.f32.mrf.mxu2  ;;  %v3986_v15 = vpop.f32.mrf.mxu3 }
 0x9ca   :  { %v4190_v4 = vld.sshfl [vmem:[#allocation1 + $0x30] sm:$0xff pattern:$0x75316420] }
 0x9cb   :  { %v3944_v33 = vpop.f32.mrf.mxu1  ;;  %v4189_v62 = vld.sshfl [vmem:[#allocation1 + $0x20] sm:$0xff pattern:$0x75316420] }
 0x9cc   :  { %v3762_v6 = vpop.xlane.xlu0 %3761 }
 0x9cd   :  { %10152 = vrcp.f32 %v3762_v6 }
 0x9ce   :  { %10154 = vrcp.f32 %v3771_v61  ;;  %v4212_v61 = vpack.c.bf16 %v4190_v4, %v4189_v62 }
 0x9d1   :  { %v4047_v56 = vpop.f32.mrf.mxu2 }
 0x9d2   :  { %4193 = vst [vmem:[#allocation1 + $0x10] ss:$2 sm:$0xff] %v4047_v56 }
 0x9d3   :  { %v10153_v44 = vpop.eup %10152 }
 0x9d4   :  { %v3800_v50 = vmul.f32 %v10153_v44, %v12139_v22  ;;  %v10155_v13 = vpop.eup %10154  ;;  %v2209_v44 = vadd.f32 %v11570_v63, %v11633_v29 }
 0x9d5   :  { %v3803_v35 = vmul.f32 %v10155_v13, %v12110_v55 }
 0x9d6   :  { %v3816_v59 = vpack.c.bf16 %v3800_v50, %v3800_v50  ;;  %v4005_v1 = vpop.f32.mrf.mxu0  ;;  %v10466_v50 = vld [vmem:[%s14295_s0 + $0x10] sm:$0xff] }
 0x9d7   :  { %4191 = vst [vmem:[#allocation1] ss:$2 sm:$0xff] %v4005_v1  ;;  %v4026_v21 = vpop.f32.mrf.mxu1  ;;  %v3819_v22 = vpack.c.bf16 %v3803_v35, %v3803_v35 }
 0x9d8   :  { %4192 = vst [vmem:[#allocation1 + $0x1] ss:$2 sm:$0xff] %v4026_v21  ;;  %9624 = vmatmul.msk.bf16.vlgmr.msrb.gmra.mxu0 %vm766_vm4, %v3816_v59  ;;  %v3239_v59 = vadd.f32 %v12002_v19, %v2209_v44 }
 0x9d9   :  { %v4049_v24 = vpop.f32.mrf.mxu2 }
 0x9de   :  { %v4007_v7 = vpop.f32.mrf.mxu0 }
 0x9df   :  { %v4136_v27 = vpop.permute.xlu0 %4135  ;;  %v4028_v46 = vpop.f32.mrf.mxu1  ;;  %v4199_v42 = vld.sshfl [vmem:[#allocation1] sm:$0xff pattern:$0x75316420] }
 0x9e0   :  { %v4141_v12 = vsel %vm770_vm2, %v4136_v27, 0  ;;  %v2214_v27 = vadd.f32 %v11591_v41, %v11647_v36  ;;  %v10468_v46 = vld [vmem:[%s14295_s0 + $0x20] sm:$0xff]  ;;  %v10509_v36 = vmov 32.0  }
 0x9e1   :  { %4150 = vmatpush.bf16.msrb.mxu3 %v4141_v12  ;;  %10156 = vrcp.f32 %v10509_v36 }
 0x9e3   :  { %v4068_v30 = vpop.f32.mrf.mxu3 }
 0x9e4   :  { %4194 = vst [vmem:[#allocation1 + $0x11] ss:$2 sm:$0xff] %v4068_v30  ;;  %9627 = vmatmul.msk.bf16.vlgmr.msrb.gmra.mxu3 %vm766_vm4, %v3819_v22  ;;  %v3241_v22 = vadd.f32 %v12025_v16, %v2214_v27 }
 0x9e8   :  { %9628 = vmatmul.msk.bf16.vlgmr.msra.gmra.mxu0 %vm175_vm1, %v4211_v43 }
 0x9eb   :  { %v4070_v52 = vpop.f32.mrf.mxu3  ;;  %v4200_v55 = vld.sshfl [vmem:[#allocation1 + $0x10] sm:$0xff pattern:$0x75316420] }
 0x9ec   :  { %v4213_v47 = vpack.c.bf16 %v4200_v55, %v4199_v42 }
 0x9f8   :  { %9629 = vmatmul.msk.bf16.gmra.mxu0 %vm175_vm1, %v4212_v61  ;;  %v10157_v61 = vpop.eup %10156 }
 0x9f9   :  { %v4312_v55 = vmul.f32 32.0, %v10157_v61  ;;  %vm4316_vm6 = vweird.f32 %v10157_v61 }
 0x9fb   :  { %v4313_v16 = vsub.f32 1.0, %v4312_v55 }
 0x9fd   :  { %v4314_v42 = vmul.f32 %v10157_v61, %v4313_v16 }
 0xa08   :  { %9630 = vmatmul.msk.bf16.gmra.mxu0 %vm175_vm1, %v4213_v47  ;;  %v4315_v47 = vadd.f32 %v10157_v61, %v4314_v42 }
 0xa1d   :  { %v4131_v31 = vpop.f32.mrf.mxu2 }
 0xa1e   :  { %4197 = vst [vmem:[#allocation1 + $0x30] ss:$2 sm:$0xff] %v4131_v31  ;;  %v12216_v31 = vsel %vm4316_vm6, %v10157_v61, %v4315_v47 }
 0xa1f   :  { %v4110_v32 = vpop.f32.mrf.mxu1  ;;  %14321 = vst [vmem:[#allocation5_spill] sm:$0xff] %v12216_v31 }
 0xa20   :  { %4196 = vst [vmem:[#allocation1 + $0x21] ss:$2 sm:$0xff] %v4110_v32 }
 0xa25   :  { %v4133_v8 = vpop.f32.mrf.mxu2 }
 0xa27   :  { %v4112_v26 = vpop.f32.mrf.mxu1 }
 0xa55   :  { %v4089_v48 = vpop.f32.mrf.mxu0 }
 0xa56   :  { %4195 = vst [vmem:[#allocation1 + $0x20] ss:$2 sm:$0xff] %v4089_v48 }
 0xa5d   :  { %v4091_v34 = vpop.f32.mrf.mxu0 }
 0xa65   :  { %v4239_v14 = vpop.f32.mrf.mxu0 }
 0xa66   :  { %v4259_v3 = vadd.f32 %v4239_v14, %v11945_v54  ;;  %v4201_v54 = vld.sshfl [vmem:[#allocation1 + $0x20] sm:$0xff pattern:$0x75316420] }
 0xa67   :  { %v4152_v5 = vpop.f32.mrf.mxu3 }
 0xa68   :  { %v4271_v2 = vadd.f32 %v12171_v37, %v4259_v3  ;;  %4198 = vst [vmem:[#allocation1 + $0x31] ss:$2 sm:$0xff] %v4152_v5 }
 0xa6a   :  { %v4279_v10 = vadd.f32 %v10464_v28, %v4271_v2 }
 0xa6c   :  { %v4287_v40 = vsel %vm84_vm0, %v4279_v10, 0.0 }
 0xa6d   :  { %4288 = vadd.xlane.f32.xlu0 %v4287_v40  ;;  %v4241_v38 = vpop.f32.mrf.mxu0 }
 0xa6e   :  { %v4260_v51 = vadd.f32 %v4241_v38, %v3237_v25 }
 0xa6f   :  { %v4202_v20 = vld.sshfl [vmem:[#allocation1 + $0x30] sm:$0xff pattern:$0x75316420]  ;;  %v4154_v9 = vpop.f32.mrf.mxu3 }
 0xa70   :  { %v4272_v15 = vadd.f32 %v12171_v37, %v4260_v51  ;;  %v4214_v33 = vpack.c.bf16 %v4202_v20, %v4201_v54  ;;  %v2219_v54 = vadd.f32 %v11601_v18, %v11660_v58  ;;  %v10470_v20 = vld [vmem:[%s14295_s0 + $0x30] sm:$0xff] }
 0xa72   :  { %9631 = vmatmul.msk.bf16.gmra.mxu0 %vm175_vm1, %v4214_v33  ;;  %v4280_v23 = vadd.f32 %v10465_v45, %v4272_v15 }
 0xa74   :  { %v4290_v60 = vsel %vm84_vm0, %v4280_v23, 0.0 }
 0xa75   :  { %4291 = vadd.xlane.f32.xlu2 %v4290_v60  ;;  %v4244_v6 = vpop.f32.mrf.mxu0 }
 0xa76   :  { %v4261_v39 = vadd.f32 %v4244_v6, %v11955_v49  ;;  %v10467_v49 = vld [vmem:[%s14295_s0 + $0x18] sm:$0xff] }
 0xa78   :  { %v4273_v56 = vadd.f32 %v12171_v37, %v4261_v39 }
 0xa7a   :  { %v4281_v17 = vadd.f32 %v10466_v50, %v4273_v56  ;;  %v10471_v56 = vld [vmem:[%s14295_s0 + $0x38] sm:$0xff] }
 0xa7c   :  { %v4293_v1 = vsel %vm84_vm0, %v4281_v17, 0.0 }
 0xa7d   :  { %4294 = vadd.xlane.f32.xlu1 %v4293_v1  ;;  %v4246_v21 = vpop.f32.mrf.mxu0 }
 0xa7e   :  { %v4262_v24 = vadd.f32 %v4246_v21, %v3239_v59 }
 0xa80   :  { %v4274_v13 = vadd.f32 %v12171_v37, %v4262_v24 }
 0xa82   :  { %v4282_v35 = vadd.f32 %v10467_v49, %v4274_v13 }
 0xa84   :  { %v4296_v63 = vsel %vm84_vm0, %v4282_v35, 0.0 }
 0xa85   :  { %4297 = vadd.xlane.f32.xlu0 %v4296_v63  ;;  %v4249_v29 = vpop.f32.mrf.mxu0 }
 0xa86   :  { %v4263_v7 = vadd.f32 %v4249_v29, %v12016_v57  ;;  %v10469_v57 = vld [vmem:[%s14295_s0 + $0x28] sm:$0xff] }
 0xa88   :  { %v4275_v19 = vadd.f32 %v12171_v37, %v4263_v7 }
 0xa8a   :  { %v4283_v12 = vadd.f32 %v10468_v46, %v4275_v19  ;;  %v9862_v19 = vld [vmem:[%s14304_s9 + $0x8] sm:$0xff] }
 0xa8b   :  { %4536 = vmatpush.bf16.msra.mxu1 %v9862_v19 }
 0xa8c   :  { %v4299_v30 = vsel %vm84_vm0, %v4283_v12, 0.0 }
 0xa8d   :  { %4300 = vadd.xlane.f32.xlu2 %v4299_v30  ;;  %v4251_v43 = vpop.f32.mrf.mxu0 }
 0xa8e   :  { %v4264_v52 = vadd.f32 %v4251_v43, %v3241_v22 }
 0xa90   :  { %v4276_v62 = vadd.f32 %v12171_v37, %v4264_v52 }
 0xa92   :  { %v4284_v4 = vadd.f32 %v10469_v57, %v4276_v62 }
 0xa94   :  { %v4302_v41 = vsel %vm84_vm0, %v4284_v4, 0.0 }
 0xa95   :  { %4303 = vadd.xlane.f32.xlu0 %v4302_v41 }
 0xae0   :  { %v4289_v32 = vpop.xlane.xlu0 %4288 }
 0xae1   :  { %v4318_v8 = vmul.f32 %v12216_v31, %v4289_v32 }
 0xae3   :  { %v12219_v26 = vsub.f32 %v4279_v10, %v4318_v8 }
 0xae5   :  { %v4334_v48 = vmul.f32 %v12219_v26, %v12219_v26 }
 0xae7   :  { %v4342_v34 = vsel %vm84_vm0, %v4334_v48, 0.0 }
 0xae8   :  { %v4292_v14 = vpop.xlane.xlu2 %4291  ;;  %4343 = vadd.xlane.f32.xlu1 %v4342_v34 }
 0xae9   :  { %v4319_v3 = vmul.f32 %v12216_v31, %v4292_v14 }
 0xaeb   :  { %v12225_v5 = vsub.f32 %v4280_v23, %v4319_v3 }
 0xaed   :  { %v4335_v2 = vmul.f32 %v12225_v5, %v12225_v5 }
 0xaef   :  { %v4254_v0 = vpop.f32.mrf.mxu0  ;;  %v4345_v28 = vsel %vm84_vm0, %v4335_v2, 0.0 }
 0xaf0   :  { %v4265_v10 = vadd.f32 %v4254_v0, %v12030_v11  ;;  %v4295_v25 = vpop.xlane.xlu1 %4294  ;;  %4346 = vadd.xlane.f32.xlu2 %v4345_v28  ;;  %v3243_v11 = vadd.f32 %v12034_v53, %v2219_v54 }
 0xaf1   :  { %v4320_v40 = vmul.f32 %v12216_v31, %v4295_v25 }
 0xaf2   :  { %v4277_v38 = vadd.f32 %v12171_v37, %v4265_v10 }
 0xaf3   :  { %v12233_v51 = vsub.f32 %v4281_v17, %v4320_v40 }
 0xaf4   :  { %v4285_v9 = vadd.f32 %v10470_v20, %v4277_v38 }
 0xaf5   :  { %v4336_v15 = vmul.f32 %v12233_v51, %v12233_v51 }
 0xaf6   :  { %v4305_v33 = vsel %vm84_vm0, %v4285_v9, 0.0 }
 0xaf7   :  { %4306 = vadd.xlane.f32.xlu0 %v4305_v33  ;;  %v4256_v45 = vpop.f32.mrf.mxu0  ;;  %v4348_v23 = vsel %vm84_vm0, %v4336_v15, 0.0 }
 0xaf8   :  { %v4266_v60 = vadd.f32 %v4256_v45, %v3243_v11  ;;  %v4298_v6 = vpop.xlane.xlu0 %4297  ;;  %4349 = vadd.xlane.f32.xlu2 %v4348_v23 }
 0xaf9   :  { %v4321_v18 = vmul.f32 %v12216_v31, %v4298_v6 }
 0xafa   :  { %v4278_v58 = vadd.f32 %v12171_v37, %v4266_v60 }
 0xafb   :  { %v12247_v39 = vsub.f32 %v4282_v35, %v4321_v18 }
 0xafc   :  { %v4286_v53 = vadd.f32 %v10471_v56, %v4278_v58  ;;  %v12299_v58 = vld [vmem:[%s14301_s6] ss:$0 sm:$0xff] }
 0xafd   :  { %v4337_v44 = vmul.f32 %v12247_v39, %v12247_v39 }
 0xafe   :  { %v4308_v50 = vsel %vm84_vm0, %v4286_v53, 0.0 }
 0xaff   :  { %4309 = vadd.xlane.f32.xlu1 %v4308_v50  ;;  %v4351_v17 = vsel %vm84_vm0, %v4337_v44, 0.0 }
 0xb00   :  { %v4301_v59 = vpop.xlane.xlu2 %4300  ;;  %4352 = vadd.xlane.f32.xlu0 %v4351_v17 }
 0xb01   :  { %v4322_v1 = vmul.f32 %v12216_v31, %v4301_v59 }
 0xb03   :  { %v12257_v37 = vsub.f32 %v4283_v12, %v4322_v1  ;;  %v9861_v12 = vld [vmem:[%s14304_s9] sm:$0xff] }
 0xb04   :  { %4537 = vmatpush.bf16.msra.mxu1 %v9861_v12 }
 0xb05   :  { %v4338_v21 = vmul.f32 %v12257_v37, %v12257_v37 }
 0xb07   :  { %v4354_v24 = vsel %vm84_vm0, %v4338_v21, 0.0 }
 0xb08   :  { %v4304_v13 = vpop.xlane.xlu0 %4303  ;;  %4355 = vadd.xlane.f32.xlu1 %v4354_v24 }
 0xb09   :  { %v4323_v49 = vmul.f32 %v12216_v31, %v4304_v13 }
 0xb0b   :  { %v12263_v35 = vsub.f32 %v4284_v4, %v4323_v49 }
 0xb0d   :  { %v4339_v63 = vmul.f32 %v12263_v35, %v12263_v35 }
 0xb0f   :  { %v4357_v29 = vsel %vm84_vm0, %v4339_v63, 0.0 }
 0xb10   :  { %4358 = vadd.xlane.f32.xlu2 %v4357_v29 }
 0xb5b   :  { %v4344_v7 = vpop.xlane.xlu1 %4343 }
 0xb5c   :  { %v4366_v27 = vmul.f32 %v4344_v7, %v12216_v31 }
 0xb5e   :  { %v4374_v46 = vadd.f32 1e-05, %v4366_v27 }
 0xb60   :  { %10158 = vrsqrt.f32 %v4374_v46  ;;  %vm4388_vm8 = vweird.f32 %v4374_v46 }
 0xb63   :  { %v4347_v22 = vpop.xlane.xlu2 %4346 }
 0xb64   :  { %v4367_v30 = vmul.f32 %v4347_v22, %v12216_v31 }
 0xb66   :  { %v10159_v43 = vpop.eup %10158  ;;  %v4375_v52 = vadd.f32 1e-05, %v4367_v30 }
 0xb67   :  { %v4383_v62 = vmul.f32 %v10159_v43, %v4374_v46  ;;  %vm4389_vm7 = vweird.f32 %v10159_v43 }
 0xb68   :  { %10160 = vrsqrt.f32 %v4375_v52  ;;  %vm4390_vm9 = vmor %vm4388_vm8, %vm4389_vm7  ;;  %vm4398_vm11 = vweird.f32 %v4375_v52 }
 0xb69   :  { %v4384_v57 = vmul.f32 %v10159_v43, %v4383_v62 }
 0xb6a   :  { %v4307_v4 = vpop.xlane.xlu0 %4306 }
 0xb6b   :  { %v4385_v41 = vmul.f32 0.5, %v4384_v57  ;;  %v4324_v36 = vmul.f32 %v12216_v31, %v4307_v4  ;;  %v4350_v61 = vpop.xlane.xlu2 %4349 }
 0xb6c   :  { %v4368_v55 = vmul.f32 %v4350_v61, %v12216_v31 }
 0xb6d   :  { %v4386_v16 = vsub.f32 1.5, %v4385_v41  ;;  %v12278_v42 = vsub.f32 %v4285_v9, %v4324_v36  ;;  %v12290_v9 = vld [vmem:[%s14300_s5] ss:$0 sm:$0xff] }
 0xb6e   :  { %v10161_v47 = vpop.eup %10160  ;;  %v4376_v32 = vadd.f32 1e-05, %v4368_v55 }
 0xb6f   :  { %v4387_v8 = vmul.f32 %v10159_v43, %v4386_v16  ;;  %v4393_v48 = vmul.f32 %v10161_v47, %v4375_v52  ;;  %v4340_v34 = vmul.f32 %v12278_v42, %v12278_v42  ;;  %vm4399_vm10 = vweird.f32 %v10161_v47 }
 0xb70   :  { %10162 = vrsqrt.f32 %v4376_v32  ;;  %vm4400_vm12 = vmor %vm4398_vm11, %vm4399_vm10  ;;  %vm4408_vm14 = vweird.f32 %v4376_v32 }
 0xb71   :  { %v4394_v14 = vmul.f32 %v10161_v47, %v4393_v48  ;;  %v4360_v3 = vsel %vm84_vm0, %v4340_v34, 0.0  ;;  %v4391_v0 = vsel %vm4390_vm9, %v10159_v43, %v4387_v8 }
 0xb72   :  { %4361 = vadd.xlane.f32.xlu0 %v4360_v3  ;;  %v4310_v2 = vpop.xlane.xlu1 %4309  ;;  %v4462_v15 = vmul.f32 %v4391_v0, %v12219_v26 }
 0xb73   :  { %v4395_v28 = vmul.f32 0.5, %v4394_v14  ;;  %v4325_v10 = vmul.f32 %v12216_v31, %v4310_v2  ;;  %v4353_v25 = vpop.xlane.xlu0 %4352 }
 0xb74   :  { %v4369_v40 = vmul.f32 %v4353_v25, %v12216_v31  ;;  %v4474_v26 = vmul.f32 %v12290_v9, %v4462_v15 }
 0xb75   :  { %v4396_v38 = vsub.f32 1.5, %v4395_v28  ;;  %v12285_v54 = vsub.f32 %v4286_v53, %v4325_v10 }
 0xb76   :  { %v10163_v20 = vpop.eup %10162  ;;  %v4377_v11 = vadd.f32 1e-05, %v4369_v40  ;;  %v12306_v21 = vadd.f32 %v12299_v58, %v4474_v26 }
 0xb77   :  { %v4397_v33 = vmul.f32 %v10161_v47, %v4396_v38  ;;  %v4403_v45 = vmul.f32 %v10163_v20, %v4376_v32  ;;  %v4341_v23 = vmul.f32 %v12285_v54, %v12285_v54  ;;  %vm4409_vm13 = vweird.f32 %v10163_v20 }
 0xb78   :  { %10164 = vrsqrt.f32 %v4377_v11  ;;  %vm4410_vm15 = vmor %vm4408_vm14, %vm4409_vm13  ;;  %vm4418_vm7 = vweird.f32 %v4377_v11 }
 0xb79   :  { %v4401_v60 = vsel %vm4400_vm12, %v10161_v47, %v4397_v33  ;;  %v4404_v6 = vmul.f32 %v10163_v20, %v4403_v45  ;;  %v4363_v18 = vsel %vm84_vm0, %v4341_v23, 0.0 }
 0xb7a   :  { %v4463_v56 = vmul.f32 %v4401_v60, %v12225_v5  ;;  %4364 = vadd.xlane.f32.xlu1 %v4363_v18 }
 0xb7b   :  { %v4405_v53 = vmul.f32 0.5, %v4404_v6  ;;  %v4356_v44 = vpop.xlane.xlu1 %4355 }
 0xb7c   :  { %v4475_v50 = vmul.f32 %v12290_v9, %v4463_v56  ;;  %v4370_v17 = vmul.f32 %v4356_v44, %v12216_v31 }
 0xb7d   :  { %v4406_v59 = vsub.f32 1.5, %v4405_v53 }
 0xb7e   :  { %v10165_v1 = vpop.eup %10164  ;;  %v12309_v24 = vadd.f32 %v12299_v58, %v4475_v50  ;;  %v4378_v13 = vadd.f32 1e-05, %v4370_v17 }
 0xb7f   :  { %v4407_v49 = vmul.f32 %v10163_v20, %v4406_v59  ;;  %v4413_v63 = vmul.f32 %v10165_v1, %v4377_v11  ;;  %vm4419_vm6 = vweird.f32 %v10165_v1 }
 0xb80   :  { %v4494_v5 = vpack.c.bf16 %v12309_v24, %v12306_v21  ;;  %10166 = vrsqrt.f32 %v4378_v13  ;;  %vm4420_vm8 = vmor %vm4418_vm7, %vm4419_vm6  ;;  %vm4428_vm10 = vweird.f32 %v4378_v13 }
 0xb81   :  { %v4414_v29 = vmul.f32 %v10165_v1, %v4413_v63  ;;  %v4411_v7 = vsel %vm4410_vm15, %v10163_v20, %v4407_v49 }
 0xb82   :  { %9640 = vmatmul.msk.bf16.vlgmr.msra.gmra.mxu1 %vm84_vm0, %v4494_v5  ;;  %v4464_v30 = vmul.f32 %v4411_v7, %v12233_v51 }
 0xb83   :  { %v4415_v19 = vmul.f32 0.5, %v4414_v29  ;;  %v4359_v27 = vpop.xlane.xlu2 %4358 }
 0xb84   :  { %v4371_v46 = vmul.f32 %v4359_v27, %v12216_v31  ;;  %v4476_v36 = vmul.f32 %v12290_v9, %v4464_v30 }
 0xb85   :  { %v4416_v12 = vsub.f32 1.5, %v4415_v19  ;;  %v9888_v19 = vld [vmem:[%s14305_s10] ss:$0 sm:$0xff] }
 0xb86   :  { %v10167_v22 = vpop.eup %10166  ;;  %v4379_v43 = vadd.f32 1e-05, %v4371_v46  ;;  %v12320_v32 = vadd.f32 %v12299_v58, %v4476_v36 }
 0xb87   :  { %v4417_v52 = vmul.f32 %v10165_v1, %v4416_v12  ;;  %v4423_v62 = vmul.f32 %v10167_v22, %v4378_v13  ;;  %vm4429_vm9 = vweird.f32 %v10167_v22 }
 0xb88   :  { %10168 = vrsqrt.f32 %v4379_v43  ;;  %vm4430_vm11 = vmor %vm4428_vm10, %vm4429_vm9  ;;  %vm4438_vm13 = vweird.f32 %v4379_v43 }
 0xb89   :  { %v4421_v57 = vsel %vm4420_vm8, %v10165_v1, %v4417_v52  ;;  %v4424_v4 = vmul.f32 %v10167_v22, %v4423_v62 }
 0xb8a   :  { %v4465_v41 = vmul.f32 %v4421_v57, %v12247_v39 }
 0xb8b   :  { %v4425_v61 = vmul.f32 0.5, %v4424_v4 }
 0xb8c   :  { %v4477_v55 = vmul.f32 %v12290_v9, %v4465_v41 }
 0xb8d   :  { %v4426_v16 = vsub.f32 1.5, %v4425_v61 }
 0xb8e   :  { %v10169_v47 = vpop.eup %10168  ;;  %v12323_v51 = vadd.f32 %v12299_v58, %v4477_v55 }
 0xb8f   :  { %v4427_v8 = vmul.f32 %v10167_v22, %v4426_v16  ;;  %v4433_v48 = vmul.f32 %v10169_v47, %v4379_v43  ;;  %vm4439_vm12 = vweird.f32 %v10169_v47 }
 0xb90   :  { %v4495_v34 = vpack.c.bf16 %v12323_v51, %v12320_v32  ;;  %vm4440_vm14 = vmor %vm4438_vm13, %vm4439_vm12 }
 0xb91   :  { %v4434_v39 = vmul.f32 %v10169_v47, %v4433_v48  ;;  %v4431_v14 = vsel %vm4430_vm11, %v10167_v22, %v4427_v8  ;;  %vm4583_vm11 = vcmask 130048  }
 0xb92   :  { %9641 = vmatmul.msk.bf16.gmra.mxu1 %vm84_vm0, %v4495_v34  ;;  %v4466_v0 = vmul.f32 %v4431_v14, %v12257_v37 }
 0xb93   :  { %v4435_v3 = vmul.f32 0.5, %v4434_v39 }
 0xb94   :  { %v4478_v40 = vmul.f32 %v12290_v9, %v4466_v0 }
 0xb95   :  { %v4436_v2 = vsub.f32 1.5, %v4435_v3 }
 0xb96   :  { %v12333_v20 = vadd.f32 %v12299_v58, %v4478_v40 }
 0xb97   :  { %v4437_v28 = vmul.f32 %v10169_v47, %v4436_v2 }
 0xb99   :  { %v4441_v10 = vsel %vm4440_vm14, %v10169_v47, %v4437_v28  ;;  %v12368_v28 = vld [vmem:[%s14307_s12] ss:$0 sm:$0xff] }
 0xb9a   :  { %v4467_v25 = vmul.f32 %v4441_v10, %v12263_v35  ;;  %v9863_v35 = vld [vmem:[%s14306_s11] sm:$0xff] }
 0xb9b   :  { %4603 = vmatpush.bf16.msra.mxu2 %v9863_v35 }
 0xb9c   :  { %v4479_v38 = vmul.f32 %v12290_v9, %v4467_v25 }
 0xb9e   :  { %v12336_v15 = vadd.f32 %v12299_v58, %v4479_v38 }
 0xba0   :  { %v4496_v11 = vpack.c.bf16 %v12336_v15, %v12333_v20 }
 0xba2   :  { %9642 = vmatmul.msk.bf16.gmra.mxu1 %vm84_vm0, %v4496_v11 }
 0xbe5   :  { %v4362_v37 = vpop.xlane.xlu0 %4361 }
 0xbe6   :  { %v4372_v33 = vmul.f32 %v4362_v37, %v12216_v31 }
 0xbe8   :  { %v4380_v45 = vadd.f32 1e-05, %v4372_v33 }
 0xbea   :  { %10170 = vrsqrt.f32 %v4380_v45  ;;  %vm4448_vm6 = vweird.f32 %v4380_v45 }
 0xbed   :  { %v4365_v23 = vpop.xlane.xlu1 %4364 }
 0xbee   :  { %v4373_v60 = vmul.f32 %v4365_v23, %v12216_v31 }
 0xbf0   :  { %v10171_v6 = vpop.eup %10170  ;;  %v4381_v18 = vadd.f32 1e-05, %v4373_v60 }
 0xbf1   :  { %v4443_v26 = vmul.f32 %v10171_v6, %v4380_v45  ;;  %vm4449_vm15 = vweird.f32 %v10171_v6 }
 0xbf2   :  { %10172 = vrsqrt.f32 %v4381_v18  ;;  %vm4450_vm7 = vmor %vm4448_vm6, %vm4449_vm15  ;;  %vm4458_vm9 = vweird.f32 %v4381_v18 }
 0xbf3   :  { %v4444_v56 = vmul.f32 %v10171_v6, %v4443_v26 }
 0xbf5   :  { %v4445_v53 = vmul.f32 0.5, %v4444_v56 }
 0xbf7   :  { %v4446_v44 = vsub.f32 1.5, %v4445_v53 }
 0xbf8   :  { %v10173_v50 = vpop.eup %10172 }
 0xbf9   :  { %v4447_v17 = vmul.f32 %v10171_v6, %v4446_v44  ;;  %v4453_v59 = vmul.f32 %v10173_v50, %v4381_v18  ;;  %vm4459_vm8 = vweird.f32 %v10173_v50 }
 0xbfa   :  { %vm4460_vm10 = vmor %vm4458_vm9, %vm4459_vm8 }
 0xbfb   :  { %v4454_v1 = vmul.f32 %v10173_v50, %v4453_v59  ;;  %v4451_v13 = vsel %vm4450_vm7, %v10171_v6, %v4447_v17 }
 0xbfc   :  { %v4468_v29 = vmul.f32 %v4451_v13, %v12278_v42 }
 0xbfd   :  { %v4455_v49 = vmul.f32 0.5, %v4454_v1 }
 0xbfe   :  { %v4480_v12 = vmul.f32 %v12290_v9, %v4468_v29 }
 0xbff   :  { %v4456_v63 = vsub.f32 1.5, %v4455_v49  ;;  %v4539_v5 = vpop.f32.mrf.mxu1 }
 0xc00   :  { %v4540_v22 = vadd.f32 %v9888_v19, %v4539_v5  ;;  %v12354_v62 = vadd.f32 %v12299_v58, %v4480_v12 }
 0xc01   :  { %v4457_v7 = vmul.f32 %v10173_v50, %v4456_v63 }
 0xc02   :  { %v4559_v57 = vmax.f32 %v4540_v22, 0.0 }
 0xc03   :  { %v4461_v27 = vsel %vm4460_vm10, %v10173_v50, %v4457_v7 }
 0xc04   :  { %v4469_v46 = vmul.f32 %v4461_v27, %v12285_v54 }
 0xc06   :  { %v4481_v30 = vmul.f32 %v12290_v9, %v4469_v46 }
 0xc07   :  { %v4541_v43 = vpop.f32.mrf.mxu1 }
 0xc08   :  { %v4542_v52 = vadd.f32 %v9888_v19, %v4541_v43  ;;  %v12357_v42 = vadd.f32 %v12299_v58, %v4481_v30 }
 0xc0a   :  { %v4560_v4 = vmax.f32 %v4542_v52, 0.0  ;;  %v4497_v41 = vpack.c.bf16 %v12357_v42, %v12354_v62 }
 0xc0c   :  { %v4567_v54 = vpack.c.bf16 %v4560_v4, %v4559_v57  ;;  %9643 = vmatmul.msk.bf16.gmra.mxu1 %vm84_vm0, %v4497_v41 }
 0xc0e   :  { %9648 = vmatmul.msk.bf16.vlgmr.msra.gmra.mxu2 %vm4583_vm11, %v4567_v54 }
 0xc0f   :  { %v4544_v9 = vpop.f32.mrf.mxu1 }
 0xc10   :  { %v4545_v36 = vadd.f32 %v9888_v19, %v4544_v9 }
 0xc12   :  { %v4561_v16 = vmax.f32 %v4545_v36, 0.0 }
 0xc17   :  { %v4546_v61 = vpop.f32.mrf.mxu1 }
 0xc18   :  { %v4547_v55 = vadd.f32 %v9888_v19, %v4546_v61 }
 0xc1a   :  { %v4562_v47 = vmax.f32 %v4547_v55, 0.0 }
 0xc1c   :  { %v4568_v8 = vpack.c.bf16 %v4562_v47, %v4561_v16 }
 0xc1e   :  { %9649 = vmatmul.msk.bf16.gmra.mxu2 %vm4583_vm11, %v4568_v8 }
 0xc1f   :  { %v4549_v58 = vpop.f32.mrf.mxu1 }
 0xc20   :  { %v4550_v48 = vadd.f32 %v9888_v19, %v4549_v58 }
 0xc22   :  { %v4563_v14 = vmax.f32 %v4550_v48, 0.0 }
 0xc27   :  { %v4551_v34 = vpop.f32.mrf.mxu1 }
 0xc28   :  { %v4552_v39 = vadd.f32 %v9888_v19, %v4551_v34 }
 0xc2a   :  { %v4564_v3 = vmax.f32 %v4552_v39, 0.0 }
 0xc2c   :  { %v4569_v2 = vpack.c.bf16 %v4564_v3, %v4563_v14 }
 0xc2e   :  { %9650 = vmatmul.msk.bf16.gmra.mxu2 %vm4583_vm11, %v4569_v2 }
 0xc89   :  { %v4554_v0 = vpop.f32.mrf.mxu1 }
 0xc8a   :  { %v4555_v10 = vadd.f32 %v9888_v19, %v4554_v0 }
 0xc8c   :  { %v4565_v37 = vmax.f32 %v4555_v10, 0.0 }
 0xc91   :  { %v4556_v25 = vpop.f32.mrf.mxu1  ;;  %v4605_v40 = vpop.f32.mrf.mxu2 }
 0xc92   :  { %v4557_v38 = vadd.f32 %v9888_v19, %v4556_v25  ;;  %v4606_v11 = vadd.f32 %v12368_v28, %v4605_v40 }
 0xc94   :  { %v4566_v33 = vmax.f32 %v4557_v38, 0.0  ;;  %v4625_v45 = vadd.f32 %v4606_v11, %v12306_v21 }
 0xc96   :  { %v4570_v35 = vpack.c.bf16 %v4566_v33, %v4565_v37  ;;  %v4633_v23 = vsel %vm84_vm0, %v4625_v45, 0.0  ;;  %v9865_v33 = vld [vmem:[%s14296_s1 + $0x18] sm:$0xff] }
 0xc97   :  { %4634 = vadd.xlane.f32.xlu2 %v4633_v23  ;;  %4877 = vmatpush.bf16.msra.mxu3 %v9865_v33  ;;  %v9864_v23 = vld [vmem:[%s14296_s1 + $0x10] sm:$0xff] }
 0xc98   :  { %9651 = vmatmul.msk.bf16.gmra.mxu2 %vm4583_vm11, %v4570_v35 }
 0xc99   :  { %v4607_v60 = vpop.f32.mrf.mxu2 }
 0xc9a   :  { %v4608_v6 = vadd.f32 %v12368_v28, %v4607_v60 }
 0xc9b   :  { %4878 = vmatpush.bf16.msra.mxu3 %v9864_v23 }
 0xc9c   :  { %v4626_v18 = vadd.f32 %v4608_v6, %v12309_v24 }
 0xc9e   :  { %v4636_v26 = vsel %vm84_vm0, %v4626_v18, 0.0 }
 0xc9f   :  { %4637 = vadd.xlane.f32.xlu0 %v4636_v26 }
 0xca1   :  { %v4610_v56 = vpop.f32.mrf.mxu2 }
 0xca2   :  { %v4611_v53 = vadd.f32 %v12368_v28, %v4610_v56 }
 0xca4   :  { %v4627_v44 = vadd.f32 %v4611_v53, %v12320_v32 }
 0xca6   :  { %v4639_v21 = vsel %vm84_vm0, %v4627_v44, 0.0 }
 0xca7   :  { %4640 = vadd.xlane.f32.xlu1 %v4639_v21 }
 0xca9   :  { %v4612_v50 = vpop.f32.mrf.mxu2 }
 0xcaa   :  { %v4613_v17 = vadd.f32 %v12368_v28, %v4612_v50 }
 0xcac   :  { %v4628_v59 = vadd.f32 %v4613_v17, %v12323_v51 }
 0xcae   :  { %v4642_v1 = vsel %vm84_vm0, %v4628_v59, 0.0 }
 0xcaf   :  { %4643 = vadd.xlane.f32.xlu2 %v4642_v1 }
 0xcb1   :  { %v4615_v24 = vpop.f32.mrf.mxu2 }
 0xcb2   :  { %v4616_v13 = vadd.f32 %v12368_v28, %v4615_v24 }
 0xcb4   :  { %v4629_v49 = vadd.f32 %v4616_v13, %v12333_v20 }
 0xcb6   :  { %v4645_v63 = vsel %vm84_vm0, %v4629_v49, 0.0 }
 0xcb7   :  { %4646 = vadd.xlane.f32.xlu0 %v4645_v63 }
 0xcb9   :  { %v4617_v32 = vpop.f32.mrf.mxu2 }
 0xcba   :  { %v4618_v5 = vadd.f32 %v12368_v28, %v4617_v32 }
 0xcbc   :  { %v4630_v29 = vadd.f32 %v4618_v5, %v12336_v15 }
 0xcbe   :  { %v4648_v7 = vsel %vm84_vm0, %v4630_v29, 0.0 }
 0xcbf   :  { %4649 = vadd.xlane.f32.xlu1 %v4648_v7 }
 0xd0a   :  { %v4635_v51 = vpop.xlane.xlu2 %4634 }
 0xd0b   :  { %v4657_v19 = vmul.f32 %v4635_v51, %v12216_v31 }
 0xd0d   :  { %v12390_v27 = vsub.f32 %v4625_v45, %v4657_v19 }
 0xd0f   :  { %v4673_v46 = vmul.f32 %v12390_v27, %v12390_v27 }
 0xd11   :  { %v4681_v20 = vsel %vm84_vm0, %v4673_v46, 0.0 }
 0xd12   :  { %4682 = vadd.xlane.f32.xlu2 %v4681_v20  ;;  %v4638_v12 = vpop.xlane.xlu0 %4637 }
 0xd13   :  { %v4658_v22 = vmul.f32 %v4638_v12, %v12216_v31 }
 0xd15   :  { %v12396_v30 = vsub.f32 %v4626_v18, %v4658_v22 }
 0xd17   :  { %v4674_v15 = vmul.f32 %v12396_v30, %v12396_v30 }
 0xd19   :  { %v4684_v43 = vsel %vm84_vm0, %v4674_v15, 0.0 }
 0xd1a   :  { %4685 = vadd.xlane.f32.xlu0 %v4684_v43  ;;  %v4641_v52 = vpop.xlane.xlu1 %4640 }
 0xd1b   :  { %v4659_v57 = vmul.f32 %v4641_v52, %v12216_v31  ;;  %v4620_v4 = vpop.f32.mrf.mxu2 }
 0xd1c   :  { %v4621_v41 = vadd.f32 %v12368_v28, %v4620_v4 }
 0xd1d   :  { %v12403_v54 = vsub.f32 %v4627_v44, %v4659_v57  ;;  %v12453_v57 = vld [vmem:[%s14302_s7] ss:$0 sm:$0xff] }
 0xd1e   :  { %v4631_v9 = vadd.f32 %v4621_v41, %v12354_v62 }
 0xd1f   :  { %v4675_v36 = vmul.f32 %v12403_v54, %v12403_v54 }
 0xd20   :  { %v4651_v61 = vsel %vm84_vm0, %v4631_v9, 0.0 }
 0xd21   :  { %4652 = vadd.xlane.f32.xlu1 %v4651_v61  ;;  %v4687_v55 = vsel %vm84_vm0, %v4675_v36, 0.0 }
 0xd22   :  { %v4644_v16 = vpop.xlane.xlu2 %4643  ;;  %4688 = vadd.xlane.f32.xlu0 %v4687_v55 }
 0xd23   :  { %v4660_v47 = vmul.f32 %v4644_v16, %v12216_v31  ;;  %v4622_v8 = vpop.f32.mrf.mxu2 }
 0xd24   :  { %v4623_v58 = vadd.f32 %v12368_v28, %v4622_v8  ;;  %v12462_v8 = vld [vmem:[%s14303_s8] ss:$0 sm:$0xff] }
 0xd25   :  { %v12412_v48 = vsub.f32 %v4628_v59, %v4660_v47 }
 0xd26   :  { %v4632_v34 = vadd.f32 %v4623_v58, %v12357_v42 }
 0xd27   :  { %v4676_v62 = vmul.f32 %v12412_v48, %v12412_v48 }
 0xd28   :  { %v4654_v39 = vsel %vm84_vm0, %v4632_v34, 0.0 }
 0xd29   :  { %4655 = vadd.xlane.f32.xlu2 %v4654_v39  ;;  %v4690_v14 = vsel %vm84_vm0, %v4676_v62, 0.0 }
 0xd2a   :  { %v4647_v3 = vpop.xlane.xlu0 %4646  ;;  %4691 = vadd.xlane.f32.xlu1 %v4690_v14 }
 0xd2b   :  { %v4661_v2 = vmul.f32 %v4647_v3, %v12216_v31 }
 0xd2d   :  { %v12420_v0 = vsub.f32 %v4629_v49, %v4661_v2 }
 0xd2f   :  { %v4677_v28 = vmul.f32 %v12420_v0, %v12420_v0 }
 0xd31   :  { %v4693_v10 = vsel %vm84_vm0, %v4677_v28, 0.0 }
 0xd32   :  { %4694 = vadd.xlane.f32.xlu2 %v4693_v10  ;;  %v4650_v42 = vpop.xlane.xlu1 %4649 }
 0xd33   :  { %v4662_v25 = vmul.f32 %v4650_v42, %v12216_v31 }
 0xd35   :  { %v12426_v40 = vsub.f32 %v4630_v29, %v4662_v25 }
 0xd37   :  { %v4678_v38 = vmul.f32 %v12426_v40, %v12426_v40 }
 0xd39   :  { %v4696_v11 = vsel %vm84_vm0, %v4678_v38, 0.0 }
 0xd3a   :  { %4697 = vadd.xlane.f32.xlu0 %v4696_v11 }
 0xd85   :  { %v4683_v37 = vpop.xlane.xlu2 %4682 }
 0xd86   :  { %v4705_v45 = vmul.f32 %v4683_v37, %v12216_v31 }
 0xd88   :  { %v4713_v35 = vadd.f32 1e-05, %v4705_v45 }
 0xd8a   :  { %10174 = vrsqrt.f32 %v4713_v35  ;;  %vm4727_vm13 = vweird.f32 %v4713_v35 }
 0xd8d   :  { %v4686_v60 = vpop.xlane.xlu0 %4685 }
 0xd8e   :  { %v4706_v6 = vmul.f32 %v4686_v60, %v12216_v31 }
 0xd90   :  { %v10175_v18 = vpop.eup %10174  ;;  %v4714_v26 = vadd.f32 1e-05, %v4706_v6 }
 0xd91   :  { %v4722_v56 = vmul.f32 %v10175_v18, %v4713_v35  ;;  %vm4728_vm12 = vweird.f32 %v10175_v18 }
 0xd92   :  { %10176 = vrsqrt.f32 %v4714_v26  ;;  %vm4729_vm14 = vmor %vm4727_vm13, %vm4728_vm12  ;;  %vm4737_vm6 = vweird.f32 %v4714_v26 }
 0xd93   :  { %v4723_v53 = vmul.f32 %v10175_v18, %v4722_v56 }
 0xd94   :  { %v4653_v44 = vpop.xlane.xlu1 %4652 }
 0xd95   :  { %v4724_v21 = vmul.f32 0.5, %v4723_v53  ;;  %v4663_v50 = vmul.f32 %v4653_v44, %v12216_v31  ;;  %v4689_v17 = vpop.xlane.xlu0 %4688 }
 0xd96   :  { %v4707_v59 = vmul.f32 %v4689_v17, %v12216_v31 }
 0xd97   :  { %v4725_v1 = vsub.f32 1.5, %v4724_v21  ;;  %v12441_v24 = vsub.f32 %v4631_v9, %v4663_v50 }
 0xd98   :  { %v10177_v13 = vpop.eup %10176  ;;  %v4715_v49 = vadd.f32 1e-05, %v4707_v59 }
 0xd99   :  { %v4726_v63 = vmul.f32 %v10175_v18, %v4725_v1  ;;  %v4732_v32 = vmul.f32 %v10177_v13, %v4714_v26  ;;  %v4679_v5 = vmul.f32 %v12441_v24, %v12441_v24  ;;  %vm4738_vm15 = vweird.f32 %v10177_v13 }
 0xd9a   :  { %10178 = vrsqrt.f32 %v4715_v49  ;;  %vm4739_vm7 = vmor %vm4737_vm6, %vm4738_vm15  ;;  %vm4747_vm9 = vweird.f32 %v4715_v49 }
 0xd9b   :  { %v4733_v29 = vmul.f32 %v10177_v13, %v4732_v32  ;;  %v4699_v7 = vsel %vm84_vm0, %v4679_v5, 0.0  ;;  %v4730_v19 = vsel %vm4729_vm14, %v10175_v18, %v4726_v63 }
 0xd9c   :  { %v4656_v51 = vpop.xlane.xlu2 %4655  ;;  %4700 = vadd.xlane.f32.xlu1 %v4699_v7  ;;  %v4801_v4 = vmul.f32 %v4730_v19, %v12390_v27 }
 0xd9d   :  { %v4734_v46 = vmul.f32 0.5, %v4733_v29  ;;  %v4664_v20 = vmul.f32 %v4656_v51, %v12216_v31  ;;  %v4692_v12 = vpop.xlane.xlu1 %4691 }
 0xd9e   :  { %v4708_v22 = vmul.f32 %v4692_v12, %v12216_v31  ;;  %v4813_v27 = vmul.f32 %v12453_v57, %v4801_v4 }
 0xd9f   :  { %v4735_v15 = vsub.f32 1.5, %v4734_v46  ;;  %v12448_v43 = vsub.f32 %v4632_v34, %v4664_v20 }
 0xda0   :  { %v10179_v52 = vpop.eup %10178  ;;  %v4716_v41 = vadd.f32 1e-05, %v4708_v22  ;;  %v12469_v28 = vadd.f32 %v12462_v8, %v4813_v27 }
 0xda1   :  { %v4736_v9 = vmul.f32 %v10177_v13, %v4735_v15  ;;  %v4742_v36 = vmul.f32 %v10179_v52, %v4715_v49  ;;  %v4680_v61 = vmul.f32 %v12448_v43, %v12448_v43  ;;  %vm4748_vm8 = vweird.f32 %v10179_v52 }
 0xda2   :  { %10180 = vrsqrt.f32 %v4716_v41  ;;  %14322 = vst [vmem:[#allocation6_spill] sm:$0xff] %v12469_v28  ;;  %vm4749_vm10 = vmor %vm4747_vm9, %vm4748_vm8  ;;  %vm4757_vm13 = vweird.f32 %v4716_v41 }
 0xda3   :  { %v4740_v55 = vsel %vm4739_vm7, %v10177_v13, %v4736_v9  ;;  %v4743_v16 = vmul.f32 %v10179_v52, %v4742_v36  ;;  %v4702_v47 = vsel %vm84_vm0, %v4680_v61, 0.0 }
 0xda4   :  { %v4802_v58 = vmul.f32 %v4740_v55, %v12396_v30  ;;  %4703 = vadd.xlane.f32.xlu2 %v4702_v47 }
 0xda5   :  { %v4744_v34 = vmul.f32 0.5, %v4743_v16  ;;  %v4695_v62 = vpop.xlane.xlu2 %4694 }
 0xda6   :  { %v4814_v39 = vmul.f32 %v12453_v57, %v4802_v58  ;;  %v4709_v14 = vmul.f32 %v4695_v62, %v12216_v31 }
 0xda7   :  { %v4745_v3 = vsub.f32 1.5, %v4744_v34 }
 0xda8   :  { %v10181_v2 = vpop.eup %10180  ;;  %v12472_v10 = vadd.f32 %v12462_v8, %v4814_v39  ;;  %v4717_v42 = vadd.f32 1e-05, %v4709_v14 }
 0xda9   :  { %v4746_v25 = vmul.f32 %v10179_v52, %v4745_v3  ;;  %v4752_v38 = vmul.f32 %v10181_v2, %v4716_v41  ;;  %vm4758_vm12 = vweird.f32 %v10181_v2 }
 0xdaa   :  { %14323 = vst [vmem:[#allocation7_spill] sm:$0xff] %v12472_v10  ;;  %v4838_v30 = vpack.c.bf16 %v12472_v10, %v12469_v28  ;;  %10182 = vrsqrt.f32 %v4717_v42  ;;  %vm4759_vm14 = vmor %vm4757_vm13, %vm4758_vm12  ;;  %vm4767_vm6 = vweird.f32 %v4717_v42 }
 0xdab   :  { %v4753_v11 = vmul.f32 %v10181_v2, %v4752_v38  ;;  %v4750_v37 = vsel %vm4749_vm10, %v10179_v52, %v4746_v25 }
 0xdac   :  { %9665 = vmatmul.msk.bf16.vlgmr.msra.gmra.mxu3 %vm84_vm0, %v4838_v30  ;;  %v4803_v6 = vmul.f32 %v4750_v37, %v12403_v54 }
 0xdad   :  { %v4754_v33 = vmul.f32 0.5, %v4753_v11  ;;  %v4698_v45 = vpop.xlane.xlu0 %4697 }
 0xdae   :  { %v4710_v35 = vmul.f32 %v4698_v45, %v12216_v31  ;;  %v4815_v50 = vmul.f32 %v12453_v57, %v4803_v6 }
 0xdaf   :  { %v4755_v23 = vsub.f32 1.5, %v4754_v33 }
 0xdb0   :  { %v10183_v60 = vpop.eup %10182  ;;  %v4718_v18 = vadd.f32 1e-05, %v4710_v35  ;;  %v12483_v49 = vadd.f32 %v12462_v8, %v4815_v50 }
 0xdb1   :  { %v4756_v26 = vmul.f32 %v10181_v2, %v4755_v23  ;;  %v4762_v56 = vmul.f32 %v10183_v60, %v4717_v42  ;;  %vm4768_vm15 = vweird.f32 %v10183_v60  ;;  %v12513_v23 = vld [vmem:[%s14297_s2 + $0x1] ss:$0 sm:$0xff] }
 0xdb2   :  { %10184 = vrsqrt.f32 %v4718_v18  ;;  %14324 = vst [vmem:[#allocation8_spill] sm:$0xff] %v12483_v49  ;;  %vm4769_vm7 = vmor %vm4767_vm6, %vm4768_vm15  ;;  %vm4777_vm9 = vweird.f32 %v4718_v18 }
 0xdb3   :  { %v4760_v53 = vsel %vm4759_vm14, %v10181_v2, %v4756_v26  ;;  %v4763_v44 = vmul.f32 %v10183_v60, %v4762_v56 }
 0xdb4   :  { %v4804_v21 = vmul.f32 %v4760_v53, %v12412_v48 }
 0xdb5   :  { %v4764_v17 = vmul.f32 0.5, %v4763_v44 }
 0xdb6   :  { %v4816_v59 = vmul.f32 %v12453_v57, %v4804_v21 }
 0xdb7   :  { %v4765_v1 = vsub.f32 1.5, %v4764_v17 }
 0xdb8   :  { %v10185_v13 = vpop.eup %10184  ;;  %v12486_v54 = vadd.f32 %v12462_v8, %v4816_v59 }
 0xdb9   :  { %v4766_v63 = vmul.f32 %v10183_v60, %v4765_v1  ;;  %v4772_v32 = vmul.f32 %v10185_v13, %v4718_v18  ;;  %vm4778_vm8 = vweird.f32 %v10185_v13 }
 0xdba   :  { %14325 = vst [vmem:[#allocation9_spill] sm:$0xff] %v12486_v54  ;;  %v4839_v5 = vpack.c.bf16 %v12486_v54, %v12483_v49  ;;  %vm4779_vm10 = vmor %vm4777_vm9, %vm4778_vm8 }
 0xdbb   :  { %v4773_v48 = vmul.f32 %v10185_v13, %v4772_v32  ;;  %v4770_v29 = vsel %vm4769_vm7, %v10183_v60, %v4766_v63 }
 0xdbc   :  { %9666 = vmatmul.msk.bf16.gmra.mxu3 %vm84_vm0, %v4839_v5  ;;  %v4805_v19 = vmul.f32 %v4770_v29, %v12420_v0 }
 0xdbd   :  { %v4774_v7 = vmul.f32 0.5, %v4773_v48 }
 0xdbe   :  { %v4817_v22 = vmul.f32 %v12453_v57, %v4805_v19 }
 0xdbf   :  { %v4775_v51 = vsub.f32 1.5, %v4774_v7 }
 0xdc0   :  { %v12496_v52 = vadd.f32 %v12462_v8, %v4817_v22 }
 0xdc1   :  { %v4776_v46 = vmul.f32 %v10185_v13, %v4775_v51 }
 0xdc2   :  { %14326 = vst [vmem:[#allocation10_spill] sm:$0xff] %v12496_v52 }
 0xdc3   :  { %v4780_v20 = vsel %vm4779_vm10, %v10185_v13, %v4776_v46 }
 0xdc4   :  { %v4806_v12 = vmul.f32 %v4780_v20, %v12426_v40 }
 0xdc6   :  { %v4818_v15 = vmul.f32 %v12453_v57, %v4806_v12 }
 0xdc8   :  { %v12499_v4 = vadd.f32 %v12462_v8, %v4818_v15 }
 0xdca   :  { %14327 = vst [vmem:[#allocation11_spill] sm:$0xff] %v12499_v4  ;;  %v4840_v41 = vpack.c.bf16 %v12499_v4, %v12496_v52 }
 0xdcc   :  { %9667 = vmatmul.msk.bf16.gmra.mxu3 %vm84_vm0, %v4840_v41 }
 0xe0f   :  { %v4701_v0 = vpop.xlane.xlu1 %4700 }
 0xe10   :  { %v4711_v9 = vmul.f32 %v4701_v0, %v12216_v31 }
 0xe12   :  { %v4719_v36 = vadd.f32 1e-05, %v4711_v9 }
 0xe14   :  { %10186 = vrsqrt.f32 %v4719_v36  ;;  %vm4787_vm13 = vweird.f32 %v4719_v36 }
 0xe17   :  { %v4704_v40 = vpop.xlane.xlu2 %4703 }
 0xe18   :  { %v4712_v61 = vmul.f32 %v4704_v40, %v12216_v31 }
 0xe1a   :  { %v10187_v55 = vpop.eup %10186  ;;  %v4720_v16 = vadd.f32 1e-05, %v4712_v61 }
 0xe1b   :  { %v4782_v47 = vmul.f32 %v10187_v55, %v4719_v36  ;;  %vm4788_vm12 = vweird.f32 %v10187_v55 }
 0xe1c   :  { %10188 = vrsqrt.f32 %v4720_v16  ;;  %vm4789_vm14 = vmor %vm4787_vm13, %vm4788_vm12  ;;  %vm4797_vm6 = vweird.f32 %v4720_v16 }
 0xe1d   :  { %v4783_v27 = vmul.f32 %v10187_v55, %v4782_v47 }
 0xe1f   :  { %v4784_v58 = vmul.f32 0.5, %v4783_v27 }
 0xe21   :  { %v4785_v34 = vsub.f32 1.5, %v4784_v58 }
 0xe22   :  { %v10189_v62 = vpop.eup %10188 }
 0xe23   :  { %v4786_v39 = vmul.f32 %v10187_v55, %v4785_v34  ;;  %v4792_v14 = vmul.f32 %v10189_v62, %v4720_v16  ;;  %vm4798_vm15 = vweird.f32 %v10189_v62 }
 0xe24   :  { %vm4799_vm7 = vmor %vm4797_vm6, %vm4798_vm15 }
 0xe25   :  { %v4793_v3 = vmul.f32 %v10189_v62, %v4792_v14  ;;  %v4790_v2 = vsel %vm4789_vm14, %v10187_v55, %v4786_v39 }
 0xe26   :  { %v4807_v38 = vmul.f32 %v4790_v2, %v12441_v24 }
 0xe27   :  { %v4794_v42 = vmul.f32 0.5, %v4793_v3 }
 0xe28   :  { %v4819_v33 = vmul.f32 %v12453_v57, %v4807_v38 }
 0xe29   :  { %v4795_v25 = vsub.f32 1.5, %v4794_v42 }
 0xe2a   :  { %v12516_v60 = vadd.f32 %v12462_v8, %v4819_v33 }
 0xe2b   :  { %v4796_v30 = vmul.f32 %v10189_v62, %v4795_v25 }
 0xe2c   :  { %14328 = vst [vmem:[#allocation12_spill] sm:$0xff] %v12516_v60 }
 0xe2d   :  { %v4800_v11 = vsel %vm4799_vm7, %v10189_v62, %v4796_v30 }
 0xe2e   :  { %v4808_v37 = vmul.f32 %v4800_v11, %v12448_v43 }
 0xe2f   :  { %v4880_v45 = vpop.f32.mrf.mxu3 }
 0xe30   :  { %v4820_v35 = vmul.f32 %v12453_v57, %v4808_v37  ;;  %v4881_v43 = vadd.f32 %v12513_v23, %v4880_v45 }
 0xe32   :  { %v12519_v24 = vadd.f32 %v12462_v8, %v4820_v35  ;;  %v4908_v26 = vrot.slane %v4881_v43, 4  ;;  %v12536_v1 = vpack.c.bf16 %v4881_v43, %v4881_v43 }
 0xe34   :  { %14329 = vst [vmem:[#allocation13_spill] sm:$0xff] %v12519_v24  ;;  %v4841_v6 = vpack.c.bf16 %v12519_v24, %v12516_v60  ;;  %v12531_v8 = vpack.c.bf16 %v4908_v26, %v4908_v26  ;;  %v4946_v32 = vunpack.c.l.b16 %v12536_v1 }
 0xe36   :  { %9668 = vmatmul.msk.bf16.gmra.mxu3 %vm84_vm0, %v4841_v6  ;;  %v4970_v63 = vunpack.c.l.b16 %v12531_v8  ;;  %v12548_v29 = vpack.c.b16 %v4946_v32, %v4946_v32 }
 0xe37   :  { %v4882_v18 = vpop.f32.mrf.mxu3 }
 0xe38   :  { %v4883_v57 = vadd.f32 %v12513_v23, %v4882_v18  ;;  %v12546_v5 = vpack.c.b16 %v4970_v63, %v4970_v63 }
 0xe3a   :  { %v4909_v56 = vrot.slane %v4883_v57, 4  ;;  %v12526_v53 = vpack.c.bf16 %v4883_v57, %v4883_v57 }
 0xe3c   :  { %v12528_v44 = vpack.c.bf16 %v4909_v56, %v4909_v56  ;;  %v4994_v21 = vunpack.c.l.b16 %v12526_v53 }
 0xe3e   :  { %v12533_v50 = vpack.c.b16 %v4994_v21, %v4994_v21  ;;  %v5018_v17 = vunpack.c.l.b16 %v12528_v44 }
 0xe3f   :  { %v4885_v59 = vpop.f32.mrf.mxu3 }
 0xe40   :  { %v12538_v13 = vpack.c.b16 %v5018_v17, %v5018_v17  ;;  %4996 = vrot.lane.b32.xlu0 %v12533_v50, %s10498_s25  ;;  %v4886_v46 = vadd.f32 %v12513_v23, %v4885_v59 }
 0xe42   :  { %5020 = vrot.lane.b32.xlu1 %v12538_v13, %s10498_s25  ;;  %v12564_v0 = vpack.c.bf16 %v4886_v46, %v4886_v46  ;;  %v4910_v16 = vrot.slane %v4886_v46, 4 }
 0xe44   :  { %v5042_v36 = vunpack.c.l.b16 %v12564_v0  ;;  %v12583_v62 = vpack.c.bf16 %v4910_v16, %v4910_v16 }
 0xe46   :  { %v12573_v61 = vpack.c.b16 %v5042_v36, %v5042_v36  ;;  %v5066_v2 = vunpack.c.l.b16 %v12583_v62 }
 0xe47   :  { %v4887_v48 = vpop.f32.mrf.mxu3 }
 0xe48   :  { %v4888_v7 = vadd.f32 %v12513_v23, %v4887_v48  ;;  %4972 = vrot.lane.b32.xlu0 %v12546_v5, %s10498_s25  ;;  %v12596_v25 = vpack.c.b16 %v5066_v2, %v5066_v2 }
 0xe4a   :  { %v4911_v51 = vrot.slane %v4888_v7, 4  ;;  %v12553_v19 = vpack.c.bf16 %v4888_v7, %v4888_v7  ;;  %4948 = vrot.lane.b32.xlu1 %v12548_v29, %s10498_s25 }
 0xe4c   :  { %v12558_v20 = vpack.c.bf16 %v4911_v51, %v4911_v51  ;;  %v5090_v12 = vunpack.c.l.b16 %v12553_v19 }
 0xe4e   :  { %v12561_v22 = vpack.c.b16 %v5090_v12, %v5090_v12  ;;  %v5114_v15 = vunpack.c.l.b16 %v12558_v20 }
 0xe4f   :  { %v4890_v41 = vpop.f32.mrf.mxu3 }
 0xe50   :  { %v12566_v9 = vpack.c.b16 %v5114_v15, %v5114_v15  ;;  %5092 = vrot.lane.b32.xlu2 %v12561_v22, %s10498_s25  ;;  %v4891_v42 = vadd.f32 %v12513_v23, %v4890_v41 }
 0xe52   :  { %5116 = vrot.lane.b32.xlu0 %v12566_v9, %s10498_s25  ;;  %v12598_v38 = vpack.c.bf16 %v4891_v42, %v4891_v42 }
 0xe54   :  { %v5138_v30 = vunpack.c.l.b16 %v12598_v38 }
 0xe56   :  { %v12603_v11 = vpack.c.b16 %v5138_v30, %v5138_v30 }
 0xe57   :  { %v4892_v40 = vpop.f32.mrf.mxu3 }
 0xe58   :  { %v4893_v55 = vadd.f32 %v12513_v23, %v4892_v40  ;;  %v4912_v40 = vrot.slane %v4891_v42, 4 }
 0xe5a   :  { %v4913_v47 = vrot.slane %v4893_v55, 4  ;;  %v12576_v27 = vpack.c.bf16 %v4893_v55, %v4893_v55  ;;  %5044 = vrot.lane.b32.xlu0 %v12573_v61, %s10498_s25 }
 0xe5c   :  { %v12580_v58 = vpack.c.bf16 %v4913_v47, %v4913_v47  ;;  %v5186_v34 = vunpack.c.l.b16 %v12576_v27 }
 0xe5e   :  { %v12585_v39 = vpack.c.b16 %v5186_v34, %v5186_v34  ;;  %v5210_v14 = vunpack.c.l.b16 %v12580_v58  ;;  %v12642_v34 = vpack.c.bf16 %v4912_v40, %v4912_v40 }
 0xe60   :  { %v12588_v3 = vpack.c.b16 %v5210_v14, %v5210_v14  ;;  %5188 = vrot.lane.b32.xlu2 %v12585_v39, %s10498_s25  ;;  %v5162_v2 = vunpack.c.l.b16 %v12642_v34 }
 0xe62   :  { %5212 = vrot.lane.b32.xlu1 %v12588_v3, %s10498_s25 }
 0xe68   :  { %5068 = vrot.lane.b32.xlu2 %v12596_v25, %s10498_s25 }
 0xe70   :  { %5140 = vrot.lane.b32.xlu2 %v12603_v11, %s10498_s25 }
 0xeaa   :  { %v5093_v37 = vpop.permute.xlu2 %5092 }
 0xeab   :  { %v5098_v35 = vsel %vm175_vm1, %v5093_v37, 0  ;;  %v12659_v37 = vpack.c.b16 %v5162_v2, %v5162_v2 }
 0xeb2   :  { %v4997_v33 = vpop.permute.xlu0 %4996 }
 0xeb3   :  { %v5002_v45 = vsel %vm175_vm1, %v4997_v33, 0 }
 0xeb4   :  { %5011 = vmatpush.bf16.xpose.msrb.mxu2 %v5002_v45  ;;  %v5021_v6 = vpop.permute.xlu1 %5020 }
 0xeb5   :  { %v5026_v43 = vsel %vm175_vm1, %v5021_v6, 0 }
 0xeb6   :  { %5035 = vmatpush.bf16.xpose.msrb.mxu3 %v5026_v43 }
 0xeb9   :  { %v4895_v18 = vpop.f32.mrf.mxu3 }
 0xeba   :  { %v4896_v57 = vadd.f32 %v12513_v23, %v4895_v18  ;;  %v4973_v26 = vpop.permute.xlu0 %4972  ;;  %v5189_v56 = vpop.permute.xlu2 %5188 }
 0xebb   :  { %v4978_v21 = vsel %vm175_vm1, %v4973_v26, 0  ;;  %v5194_v17 = vsel %vm175_vm1, %v5189_v56, 0  ;;  %9675 = vmatmul.msk.bf16.vlgmr.msrb.gmra.mxu2 %vm175_vm1, %v12526_v53 }
 0xebc   :  { %5107 = vmatpush.bf16.xpose.msra.mxu2 %v5098_v35  ;;  %v4914_v59 = vrot.slane %v4896_v57, 4  ;;  %v12615_v63 = vpack.c.bf16 %v4896_v57, %v4896_v57  ;;  %4987 = vmatpush.bf16.xpose.msrb.mxu1 %v4978_v21  ;;  %v4949_v32 = vpop.permute.xlu1 %4948 }
 0xebd   :  { %v4954_v48 = vsel %vm175_vm1, %v4949_v32, 0  ;;  %9676 = vmatmul.msk.bf16.vlgmr.msrb.gmra.mxu3 %vm175_vm1, %v12528_v44 }
 0xebe   :  { %v12620_v7 = vpack.c.bf16 %v4914_v59, %v4914_v59  ;;  %v5234_v51 = vunpack.c.l.b16 %v12615_v63  ;;  %4963 = vmatpush.bf16.xpose.msrb.mxu0 %v4954_v48 }
 0xec0   :  { %v12623_v46 = vpack.c.b16 %v5234_v51, %v5234_v51  ;;  %v5258_v53 = vunpack.c.l.b16 %v12620_v7 }
 0xec1   :  { %v4897_v12 = vpop.f32.mrf.mxu3 }
 0xec2   :  { %v12626_v15 = vpack.c.b16 %v5258_v53, %v5258_v53  ;;  %v4898_v41 = vadd.f32 %v12513_v23, %v4897_v12  ;;  %v5069_v36 = vpop.permute.xlu2 %5068  ;;  %5236 = vrot.lane.b32.xlu0 %v12623_v46, %s10498_s25 }
 0xec3   :  { %v5074_v44 = vsel %vm175_vm1, %v5069_v36, 0  ;;  %9674 = vmatmul.msk.bf16.vlgmr.msrb.gmra.mxu1 %vm175_vm1, %v12531_v8 }
 0xec4   :  { %5203 = vmatpush.bf16.xpose.msrb.mxu2 %v5194_v17  ;;  %v12634_v55 = vpack.c.bf16 %v4898_v41, %v4898_v41  ;;  %v5117_v16 = vpop.permute.xlu0 %5116  ;;  %5083 = vmatpush.bf16.xpose.msra.mxu1 %v5074_v44 }
 0xec5   :  { %5260 = vrot.lane.b32.xlu2 %v12626_v15, %s10498_s25  ;;  %v5122_v47 = vsel %vm175_vm1, %v5117_v16, 0  ;;  %9673 = vmatmul.msk.bf16.vlgmr.msrb.gmra.mxu0 %vm175_vm1, %v12536_v1 }
 0xec6   :  { %v5282_v23 = vunpack.c.l.b16 %v12634_v55  ;;  %5131 = vmatpush.bf16.xpose.msra.mxu3 %v5122_v47 }
 0xec8   :  { %v12644_v14 = vpack.c.b16 %v5282_v23, %v5282_v23 }
 0xeca   :  { %5284 = vrot.lane.b32.xlu1 %v12644_v14, %s10498_s25  ;;  %5600 = vrot.lane.b32.xlu0 %v12538_v13, %s10499_s26  ;;  %v5141_v8 = vpop.permute.xlu2 %5140 }
 0xecb   :  { %9679 = vmatmul.msk.bf16.vlgmr.msra.gmra.mxu2 %vm175_vm1, %v12553_v19  ;;  %v5146_v30 = vsel %vm175_vm1, %v5141_v8, 0  ;;  %v4915_v19 = vrot.slane %v4898_v41, 4 }
 0xecc   :  { %v5045_v1 = vpop.permute.xlu0 %5044 }
 0xecd   :  { %5558 = vrot.lane.b32.xlu2 %v12546_v5, %s10499_s26  ;;  %v5050_v42 = vsel %vm175_vm1, %v5045_v1, 0  ;;  %9680 = vmatmul.msk.bf16.vlgmr.msra.gmra.mxu3 %vm175_vm1, %v12558_v20  ;;  %v12672_v45 = vpack.c.bf16 %v4915_v19, %v4915_v19 }
 0xece   :  { %5059 = vmatpush.bf16.xpose.msra.mxu0 %v5050_v42 }
 0xed2   :  { %5164 = vrot.lane.b32.xlu1 %v12659_v37, %s10498_s25  ;;  %5621 = vrot.lane.b32.xlu0 %v12573_v61, %s10499_s26 }
 0xed3   :  { %9678 = vmatmul.msk.bf16.vlgmr.msra.gmra.mxu1 %vm175_vm1, %v12583_v62  ;;  %v5306_v62 = vunpack.c.l.b16 %v12672_v45 }
 0xed4   :  { %v5213_v20 = vpop.permute.xlu1 %5212 }
 0xed5   :  { %5747 = vrot.lane.b32.xlu2 %v12585_v39, %s10499_s26  ;;  %v5218_v33 = vsel %vm175_vm1, %v5213_v20, 0  ;;  %9677 = vmatmul.msk.bf16.vlgmr.msra.gmra.mxu0 %vm175_vm1, %v12564_v0  ;;  %v12685_v0 = vpack.c.b16 %v5306_v62, %v5306_v62 }
 0xed6   :  { %5155 = vmatpush.bf16.xpose.msrb.mxu0 %v5146_v30  ;;  %5227 = vmatpush.bf16.xpose.msrb.mxu3 %v5218_v33 }
 0xeda   :  { %5579 = vrot.lane.b32.xlu1 %v12533_v50, %s10499_s26  ;;  %5768 = vrot.lane.b32.xlu0 %v12588_v3, %s10499_s26 }
 0xedb   :  { %9683 = vmatmul.msk.bf16.vlgmr.msrb.gmra.mxu2 %vm175_vm1, %v12576_v27 }
 0xedd   :  { %5726 = vrot.lane.b32.xlu2 %v12659_v37, %s10499_s26  ;;  %9684 = vmatmul.msk.bf16.vlgmr.msrb.gmra.mxu3 %vm175_vm1, %v12580_v58 }
 0xee2   :  { %5537 = vrot.lane.b32.xlu1 %v12548_v29, %s10499_s26  ;;  %5308 = vrot.lane.b32.xlu0 %v12685_v0, %s10498_s25 }
 0xee5   :  { %6001 = vrot.lane.b32.xlu2 %v12538_v13, %s10501_s28  ;;  %9681 = vmatmul.msk.bf16.vlgmr.msrb.gmra.mxu0 %vm175_vm1, %v12598_v38 }
 0xeea   :  { %5663 = vrot.lane.b32.xlu1 %v12561_v22, %s10499_s26  ;;  %5831 = vrot.lane.b32.xlu0 %v12644_v14, %s10499_s26 }
 0xeed   :  { %5932 = vrot.lane.b32.xlu2 %v12548_v29, %s10501_s28 }
 0xef2   :  { %5684 = vrot.lane.b32.xlu1 %v12566_v9, %s10499_s26  ;;  %5789 = vrot.lane.b32.xlu0 %v12623_v46, %s10499_s26 }
 0xefa   :  { %5642 = vrot.lane.b32.xlu1 %v12596_v25, %s10499_s26  ;;  %5810 = vrot.lane.b32.xlu0 %v12626_v15, %s10499_s26 }
 0xf02   :  { %5705 = vrot.lane.b32.xlu1 %v12603_v11, %s10499_s26  ;;  %5980 = vrot.lane.b32.xlu0 %v12533_v50, %s10500_s27 }
 0xf0a   :  { %5934 = vrot.lane.b32.xlu1 %v12548_v29, %s10500_s27  ;;  %6003 = vrot.lane.b32.xlu0 %v12538_v13, %s10500_s27 }
 0xf12   :  { %5955 = vrot.lane.b32.xlu1 %v12546_v5, %s10501_s28  ;;  %5978 = vrot.lane.b32.xlu0 %v12533_v50, %s10501_s28 }
 0xf1a   :  { %5957 = vrot.lane.b32.xlu0 %v12546_v5, %s10500_s27 }
 0xf1f   :  { %v5261_v18 = vpop.permute.xlu2 %5260 }
 0xf20   :  { %v5266_v53 = vsel %vm175_vm1, %v5261_v18, 0 }
 0xf22   :  { %6072 = vrot.lane.b32.xlu0 %v12561_v22, %s10500_s27 }
 0xf27   :  { %v5559_v40 = vpop.permute.xlu2 %5558 }
 0xf28   :  { %v5564_v8 = vsel %vm770_vm2, %v5559_v40, 0 }
 0xf2a   :  { %6095 = vrot.lane.b32.xlu0 %v12566_v9, %s10500_s27 }
 0xf32   :  { %5852 = vrot.lane.b32.xlu0 %v12685_v0, %s10499_s26 }
 0xf34   :  { %v5237_v27 = vpop.permute.xlu0 %5236 }
 0xf35   :  { %v5242_v58 = vsel %vm175_vm1, %v5237_v27, 0 }
 0xf36   :  { %5251 = vmatpush.bf16.xpose.msra.mxu0 %v5242_v58 }
 0xf3c   :  { %v5601_v38 = vpop.permute.xlu0 %5600  ;;  %v5285_v35 = vpop.permute.xlu1 %5284 }
 0xf3d   :  { %v5290_v6 = vsel %vm175_vm1, %v5285_v35, 0  ;;  %9685 = vmatmul.msk.bf16.vlgmr.msra.gmra.mxu0 %vm175_vm1, %v12615_v63 }
 0xf3e   :  { %v5013_v43 = vpop.f32.mrf.mxu2  ;;  %5299 = vmatpush.bf16.xpose.msra.mxu2 %v5290_v6 }
 0xf3f   :  { %v12745_v41 = vmul.f32 0.35355338, %v5013_v43  ;;  %v5606_v43 = vsel %vm770_vm2, %v5601_v38, 0 }
 0xf40   :  { %v4989_v57 = vpop.f32.mrf.mxu1  ;;  %v5037_v26 = vpop.f32.mrf.mxu3 }
 0xf41   :  { %v12733_v56 = vmul.f32 0.35355338, %v4989_v57  ;;  %v5351_v47 = vsel %vm571_vm3, %v12745_v41, -inf  ;;  %v12766_v57 = vmul.f32 0.35355338, %v5037_v26 }
 0xf42   :  { %v4965_v21 = vpop.f32.mrf.mxu0 }
 0xf43   :  { %v12735_v17 = vmul.f32 0.35355338, %v4965_v21  ;;  %v5348_v59 = vsel %vm571_vm3, %v12733_v56, -inf }
 0xf44   :  { %5349 = vmax.xlane.f32.xlu1 %v5348_v59  ;;  %v5622_v32 = vpop.permute.xlu0 %5621  ;;  %v5165_v48 = vpop.permute.xlu1 %5164 }
 0xf45   :  { %v5170_v51 = vsel %vm175_vm1, %v5165_v48, 0  ;;  %9687 = vmatmul.msk.bf16.vlgmr.msra.gmra.mxu2 %vm175_vm1, %v12634_v55  ;;  %v5345_v63 = vsel %vm571_vm3, %v12735_v17, -inf  ;;  %v5627_v21 = vsel %vm770_vm2, %v5622_v32, 0 }
 0xf46   :  { %v5015_v12 = vpop.f32.mrf.mxu2  ;;  %5346 = vmax.xlane.f32.xlu2 %v5345_v63  ;;  %5179 = vmatpush.bf16.xpose.msrb.mxu1 %v5170_v51  ;;  %v5354_v63 = vsel %vm571_vm3, %v12766_v57, -inf }
 0xf48   :  { %v4991_v36 = vpop.f32.mrf.mxu1  ;;  %v5039_v44 = vpop.f32.mrf.mxu3 }
 0xf4a   :  { %v4967_v16 = vpop.f32.mrf.mxu0 }
 0xf4c   :  { %5352 = vmax.xlane.f32.xlu1 %v5351_v47  ;;  %v12749_v55 = vpop.permute.xlu0 %5768  ;;  %v5580_v23 = vpop.permute.xlu1 %5579 }
 0xf4d   :  { %v5585_v2 = vsel %vm770_vm2, %v5580_v23, 0  ;;  %9682 = vmatmul.msk.bf16.vlgmr.msrb.gmra.mxu1 %vm175_vm1, %v12642_v34 }
 0xf4e   :  { %5275 = vmatpush.bf16.xpose.msra.mxu1 %v5266_v53  ;;  %v5109_v1 = vpop.f32.mrf.mxu2  ;;  %5594 = vmatpush.bf16.msrb.mxu2 %v5585_v2 }
 0xf4f   :  { %v12785_v23 = vmul.f32 0.35355338, %v5109_v1 }
 0xf50   :  { %v5085_v42 = vpop.f32.mrf.mxu1  ;;  %v5133_v30 = vpop.f32.mrf.mxu3 }
 0xf51   :  { %v12755_v19 = vmul.f32 0.35355338, %v5133_v30  ;;  %v12776_v32 = vmul.f32 0.35355338, %v5085_v42  ;;  %v5363_v42 = vsel %vm571_vm3, %v12785_v23, -inf }
 0xf52   :  { %v5061_v20 = vpop.f32.mrf.mxu0 }
 0xf53   :  { %v12757_v33 = vmul.f32 0.35355338, %v5061_v20  ;;  %v5366_v62 = vsel %vm571_vm3, %v12755_v19, -inf  ;;  %v5360_v40 = vsel %vm571_vm3, %v12776_v32, -inf }
 0xf54   :  { %v5309_v27 = vpop.permute.xlu0 %5308  ;;  %5367 = vmax.xlane.f32.xlu2 %v5366_v62  ;;  %v5538_v58 = vpop.permute.xlu1 %5537 }
 0xf55   :  { %v5314_v35 = vsel %vm175_vm1, %v5309_v27, 0  ;;  %v5543_v34 = vsel %vm770_vm2, %v5538_v58, 0  ;;  %v5357_v6 = vsel %vm571_vm3, %v12757_v33, -inf }
 0xf56   :  { %5573 = vmatpush.bf16.msrb.mxu1 %v5564_v8  ;;  %v5111_v18 = vpop.f32.mrf.mxu2  ;;  %5358 = vmax.xlane.f32.xlu1 %v5357_v6 }
 0xf57   :  { %5323 = vmatpush.bf16.xpose.msra.mxu3 %v5314_v35  ;;  %5552 = vmatpush.bf16.msrb.mxu0 %v5543_v34 }
 0xf58   :  { %v5087_v59 = vpop.f32.mrf.mxu1  ;;  %v5135_v48 = vpop.f32.mrf.mxu3 }
 0xf5a   :  { %v5063_v51 = vpop.f32.mrf.mxu0 }
 0xf5b   :  { %5636 = vmatpush.bf16.msra.mxu0 %v5627_v21  ;;  %v12808_v21 = vpop.permute.xlu2 %5747 }
 0xf5c   :  { %5355 = vmax.xlane.f32.xlu0 %v5354_v63  ;;  %v5664_v53 = vpop.permute.xlu1 %5663  ;;  %v12789_v20 = vpop.permute.xlu0 %5831 }
 0xf5d   :  { %v5669_v38 = vsel %vm770_vm2, %v5664_v53, 0  ;;  %9686 = vmatmul.msk.bf16.vlgmr.msra.gmra.mxu1 %vm175_vm1, %v12620_v7 }
 0xf5e   :  { %9688 = vmatmul.msk.bf16.vlgmr.msra.gmra.mxu3 %vm175_vm1, %v12672_v45  ;;  %v5205_v26 = vpop.f32.mrf.mxu2  ;;  %5678 = vmatpush.bf16.msra.mxu2 %v5669_v38 }
 0xf5f   :  { %5615 = vmatpush.bf16.msrb.mxu3 %v5606_v43  ;;  %v12841_v52 = vmul.f32 0.35355338, %v5205_v26 }
 0xf60   :  { %v5229_v12 = vpop.f32.mrf.mxu3 }
 0xf61   :  { %v12778_v36 = vmul.f32 0.35355338, %v5229_v12 }
 0xf62   :  { %v5157_v44 = vpop.f32.mrf.mxu0 }
 0xf63   :  { %v5378_v16 = vsel %vm571_vm3, %v12778_v36, -inf  ;;  %v12792_v27 = vmul.f32 0.35355338, %v5157_v44  ;;  %v12814_v51 = vpop.permute.xlu2 %5726 }
 0xf64   :  { %5361 = vmax.xlane.f32.xlu0 %v5360_v40  ;;  %5379 = vmax.xlane.f32.xlu1 %v5378_v16  ;;  %v5685_v7 = vpop.permute.xlu1 %5684  ;;  %v12796_v1 = vpop.permute.xlu0 %5789 }
 0xf65   :  { %v5690_v47 = vsel %vm770_vm2, %v5685_v7, 0  ;;  %v5369_v58 = vsel %vm571_vm3, %v12792_v27, -inf }
 0xf66   :  { %v5207_v45 = vpop.f32.mrf.mxu2  ;;  %5699 = vmatpush.bf16.msra.mxu3 %v5690_v47 }
 0xf68   :  { %v5231_v8 = vpop.f32.mrf.mxu3 }
 0xf6a   :  { %v5159_v2 = vpop.f32.mrf.mxu0 }
 0xf6b   :  { %v12822_v44 = vpop.permute.xlu2 %6001 }
 0xf6c   :  { %5364 = vmax.xlane.f32.xlu0 %v5363_v42  ;;  %v5643_v30 = vpop.permute.xlu1 %5642  ;;  %v12798_v35 = vpop.permute.xlu0 %5810  ;;  %14331 = vst [vmem:[#allocation15_spill] sm:$0xff] %v12822_v44 }
 0xf6d   :  { %v5648_v62 = vsel %vm770_vm2, %v5643_v30, 0 }
 0xf6e   :  { %5657 = vmatpush.bf16.msra.mxu1 %v5648_v62 }
 0xf73   :  { %v12828_v45 = vpop.permute.xlu2 %5932 }
 0xf74   :  { %5370 = vmax.xlane.f32.xlu0 %v5369_v58  ;;  %v12800_v34 = vpop.permute.xlu0 %5980  ;;  %v12806_v18 = vpop.permute.xlu1 %5705 }
 0xf7c   :  { %v12802_v6 = vpop.permute.xlu0 %6003  ;;  %v12812_v48 = vpop.permute.xlu1 %5934 }
 0xf84   :  { %v12804_v43 = vpop.permute.xlu0 %5978  ;;  %v12818_v53 = vpop.permute.xlu1 %5955 }
 0xf85   :  { %14330 = vst [vmem:[#allocation14_spill] sm:$0xff] %v12818_v53 }
 0xf8c   :  { %v12810_v59 = vpop.permute.xlu0 %5957 }
 0xf94   :  { %v12816_v63 = vpop.permute.xlu0 %6072 }
 0xf9c   :  { %v12824_v40 = vpop.permute.xlu0 %6095 }
 0xfa4   :  { %v12830_v8 = vpop.permute.xlu0 %5852 }
 0xfb7   :  { %v5350_v16 = vpop.xlane.xlu1 %5349 }
 0xfba   :  { %v5253_v38 = vpop.f32.mrf.mxu0 }
 0xfbb   :  { %v12820_v12 = vmul.f32 0.35355338, %v5253_v38 }
 0xfbd   :  { %v5381_v7 = vsel %vm571_vm3, %v12820_v12, -inf }
 0xfbe   :  { %5382 = vmax.xlane.f32.xlu0 %v5381_v7  ;;  %v5347_v7 = vpop.xlane.xlu2 %5346 }
 0xfbf   :  { %v5353_v2 = vpop.xlane.xlu1 %5352  ;;  %v5393_v49 = vsub.f32 %v12735_v17, %v5347_v7 }
 0xfc1   :  { %v5409_v44 = vmul.f32 1.442695, %v5393_v49 }
 0xfc2   :  { %v5255_v47 = vpop.f32.mrf.mxu0 }
 0xfc8   :  { %v5301_v42 = vpop.f32.mrf.mxu2 }
 0xfc9   :  { %v12832_v30 = vmul.f32 0.35355338, %v5301_v42  ;;  %v5359_v47 = vpop.xlane.xlu1 %5358 }
 0xfca   :  { %v5181_v62 = vpop.f32.mrf.mxu1  ;;  %v5397_v42 = vsub.f32 %v12757_v33, %v5359_v47 }
 0xfcb   :  { %v12834_v58 = vmul.f32 0.35355338, %v5181_v62  ;;  %v5387_v38 = vsel %vm571_vm3, %v12832_v30, -inf }
 0xfcc   :  { %5388 = vmax.xlane.f32.xlu1 %v5387_v38  ;;  %v5375_v38 = vsel %vm571_vm3, %v12841_v52, -inf  ;;  %v5417_v10 = vmul.f32 1.442695, %v5397_v42 }
 0xfcd   :  { %v5372_v24 = vsel %vm571_vm3, %v12834_v58, -inf }
 0xfce   :  { %5373 = vmax.xlane.f32.xlu2 %v5372_v24  ;;  %v5368_v24 = vpop.xlane.xlu2 %5367 }
 0xfcf   :  { %v5356_v60 = vpop.xlane.xlu0 %5355 }
 0xfd0   :  { %v5396_v31 = vsub.f32 %v12766_v57, %v5356_v60  ;;  %v5303_v4 = vpop.f32.mrf.mxu2 }
 0xfd1   :  { %v5400_v4 = vsub.f32 %v12755_v19, %v5368_v24 }
 0xfd2   :  { %v5415_v62 = vmul.f32 1.442695, %v5396_v31  ;;  %v5183_v54 = vpop.f32.mrf.mxu1 }
 0xfd3   :  { %v5394_v54 = vsub.f32 %v12733_v56, %v5350_v16  ;;  %v5423_v57 = vmul.f32 1.442695, %v5400_v4  ;;  %v5395_v56 = vsub.f32 %v12745_v41, %v5353_v2 }
 0xfd4   :  { %10190 = vpow2.f32 %v5415_v62 }
 0xfd5   :  { %10192 = vpow2.f32 %v5417_v10  ;;  %v5411_v19 = vmul.f32 1.442695, %v5394_v54 }
 0xfd6   :  { %5376 = vmax.xlane.f32.xlu2 %v5375_v38  ;;  %10194 = vpow2.f32 %v5409_v44  ;;  %v5413_v38 = vmul.f32 1.442695, %v5395_v56 }
 0xfd7   :  { %v5362_v28 = vpop.xlane.xlu0 %5361  ;;  %10196 = vpow2.f32 %v5423_v57 }
 0xfd8   :  { %10198 = vpow2.f32 %v5411_v19 }
 0xfd9   :  { %10200 = vpow2.f32 %v5413_v38 }
 0xfda   :  { %v12847_v53 = vpop.eup %10190  ;;  %v5277_v60 = vpop.f32.mrf.mxu1 }
 0xfdb   :  { %v12850_v33 = vmul.f32 0.35355338, %v5277_v60  ;;  %v5450_v31 = vsel %vm571_vm3, %v12847_v53, 0.0  ;;  %v12857_v26 = vpop.eup %10192 }
 0xfdc   :  { %5451 = vadd.xlane.f32.xlu1 %v5450_v31  ;;  %v12861_v47 = vpop.eup %10194  ;;  %v5453_v16 = vsel %vm571_vm3, %v12857_v26, 0.0 }
 0xfdd   :  { %v5384_v17 = vsel %vm571_vm3, %v12850_v33, -inf  ;;  %v5441_v62 = vsel %vm571_vm3, %v12861_v47, 0.0  ;;  %v12870_v4 = vpop.eup %10196 }
 0xfde   :  { %5385 = vmax.xlane.f32.xlu2 %v5384_v17  ;;  %v12873_v2 = vpop.eup %10198  ;;  %v5462_v54 = vsel %vm571_vm3, %v12870_v4, 0.0  ;;  %v5398_v17 = vsub.f32 %v12776_v32, %v5362_v28 }
 0xfdf   :  { %v5365_v49 = vpop.xlane.xlu0 %5364  ;;  %v5444_v57 = vsel %vm571_vm3, %v12873_v2, 0.0 }
 0xfe0   :  { %v5419_v19 = vmul.f32 1.442695, %v5398_v17  ;;  %v5399_v56 = vsub.f32 %v12785_v23, %v5365_v49 }
 0xfe1   :  { %v5325_v10 = vpop.f32.mrf.mxu3 }
 0xfe2   :  { %v12859_v7 = vmul.f32 0.35355338, %v5325_v10  ;;  %v5279_v42 = vpop.f32.mrf.mxu1  ;;  %v12880_v10 = vpop.eup %10200  ;;  %v5421_v32 = vmul.f32 1.442695, %v5399_v56 }
 0xfe3   :  { %v5447_v28 = vsel %vm571_vm3, %v12880_v10, 0.0 }
 0xfe4   :  { %v5390_v44 = vsel %vm571_vm3, %v12859_v7, -inf  ;;  %5454 = vadd.xlane.f32.xlu1 %v5453_v16 }
 0xfe5   :  { %5391 = vmax.xlane.f32.xlu0 %v5390_v44 }
 0xfe6   :  { %5442 = vadd.xlane.f32.xlu2 %v5441_v62 }
 0xfe7   :  { %v5371_v24 = vpop.xlane.xlu0 %5370 }
 0xfe8   :  { %v5401_v60 = vsub.f32 %v12792_v27, %v5371_v24  ;;  %v5380_v24 = vpop.xlane.xlu1 %5379 }
 0xfe9   :  { %v5327_v41 = vpop.f32.mrf.mxu3 }
 0xfea   :  { %v5425_v31 = vmul.f32 1.442695, %v5401_v60 }
 0xfec   :  { %10202 = vpow2.f32 %v5425_v31 }
 0xfed   :  { %5463 = vadd.xlane.f32.xlu0 %v5462_v54  ;;  %10204 = vpow2.f32 %v5419_v19 }
 0xfee   :  { %5445 = vadd.xlane.f32.xlu2 %v5444_v57  ;;  %10206 = vpow2.f32 %v5421_v32 }
 0xff2   :  { %v12882_v27 = vpop.eup %10202 }
 0xff3   :  { %v5465_v42 = vsel %vm571_vm3, %v12882_v27, 0.0  ;;  %v12889_v44 = vpop.eup %10204 }
 0xff4   :  { %v5456_v16 = vsel %vm571_vm3, %v12889_v44, 0.0  ;;  %v12893_v62 = vpop.eup %10206 }
 0xff5   :  { %5466 = vadd.xlane.f32.xlu0 %v5465_v42  ;;  %v5459_v38 = vsel %vm571_vm3, %v12893_v62, 0.0 }
 0xff6   :  { %5448 = vadd.xlane.f32.xlu2 %v5447_v28 }
 0xffe   :  { %5457 = vadd.xlane.f32.xlu2 %v5456_v16 }
0x1006   :  { %5460 = vadd.xlane.f32.xlu2 %v5459_v38 }
0x101e   :  { %6093 = vrot.lane.b32.xlu2 %v12566_v9, %s10501_s28 }
0x1031   :  { %v5383_v23 = vpop.xlane.xlu0 %5382 }
0x1032   :  { %v5405_v49 = vsub.f32 %v12820_v12, %v5383_v23 }
0x1034   :  { %v5433_v60 = vmul.f32 1.442695, %v5405_v49 }
0x1036   :  { %10208 = vpow2.f32 %v5433_v60 }
0x103c   :  { %v12902_v19 = vpop.eup %10208 }
0x103d   :  { %v5477_v56 = vsel %vm571_vm3, %v12902_v19, 0.0 }
0x103f   :  { %v5389_v41 = vpop.xlane.xlu1 %5388 }
0x1040   :  { %v5407_v31 = vsub.f32 %v12832_v30, %v5389_v41  ;;  %v5404_v30 = vsub.f32 %v12778_v36, %v5380_v24 }
0x1041   :  { %v5374_v54 = vpop.xlane.xlu2 %5373 }
0x1042   :  { %v5437_v17 = vmul.f32 1.442695, %v5407_v31  ;;  %v5402_v57 = vsub.f32 %v12834_v58, %v5374_v54  ;;  %v5431_v60 = vmul.f32 1.442695, %v5404_v30 }
0x1044   :  { %v5427_v42 = vmul.f32 1.442695, %v5402_v57  ;;  %10210 = vpow2.f32 %v5437_v17 }
0x1046   :  { %10212 = vpow2.f32 %v5427_v42 }
0x1047   :  { %5478 = vadd.xlane.f32.xlu2 %v5477_v56  ;;  %v5774_v56 = vsel %vm770_vm2, %v12749_v55, 0 }
0x1049   :  { %v5377_v12 = vpop.xlane.xlu2 %5376 }
0x104a   :  { %v5403_v28 = vsub.f32 %v12841_v52, %v5377_v12  ;;  %v12907_v32 = vpop.eup %10210 }
0x104b   :  { %v5483_v23 = vsel %vm571_vm3, %v12907_v32, 0.0 }
0x104c   :  { %v12909_v16 = vpop.eup %10212  ;;  %v5429_v38 = vmul.f32 1.442695, %v5403_v28 }
0x104d   :  { %v5468_v58 = vsel %vm571_vm3, %v12909_v16, 0.0 }
0x104e   :  { %10214 = vpow2.f32 %v5429_v38  ;;  %5469 = vadd.xlane.f32.xlu1 %v5468_v58 }
0x104f   :  { %5484 = vadd.xlane.f32.xlu2 %v5483_v23  ;;  %v5452_v49 = vpop.xlane.xlu1 %5451 }
0x1050   :  { %10216 = vrcp.f32 %v5452_v49  ;;  %v5711_v49 = vsel %vm770_vm2, %v12806_v18, 0  ;;  %v5858_v18 = vsel %vm770_vm2, %v12830_v8, 0 }
0x1051   :  { %v12916_v52 = vpop.xlane.xlu2 %5385  ;;  %10218 = vpow2.f32 %v5431_v60 }
0x1054   :  { %v12918_v41 = vpop.eup %10214 }
0x1055   :  { %v5471_v36 = vsel %vm571_vm3, %v12918_v41, 0.0 }
0x1056   :  { %v10217_v24 = vpop.eup %10216  ;;  %5472 = vadd.xlane.f32.xlu0 %v5471_v36 }
0x1057   :  { %v5508_v31 = vmul.f32 %v10217_v24, %v12847_v53  ;;  %v12925_v42 = vpop.eup %10218  ;;  %v5455_v58 = vpop.xlane.xlu1 %5454 }
0x1058   :  { %v12923_v54 = vpop.xlane.xlu0 %5391  ;;  %v5474_v12 = vsel %vm571_vm3, %v12925_v42, 0.0 }
0x1059   :  { %v5524_v17 = vpack.c.bf16 %v5508_v31, %v5508_v31  ;;  %v5443_v57 = vpop.xlane.xlu2 %5442 }
0x105a   :  { %10220 = vrcp.f32 %v5443_v57 }
0x105b   :  { %9692 = vmatmul.msk.bf16.vlgmr.msrb.gmra.mxu3 %vm766_vm4, %v5524_v17 }
0x105c   :  { %5783 = vmatpush.bf16.msrb.mxu3 %v5774_v56 }
0x105e   :  { %5475 = vadd.xlane.f32.xlu0 %v5474_v12 }
0x1060   :  { %v5464_v28 = vpop.xlane.xlu0 %5463  ;;  %v10221_v30 = vpop.eup %10220 }
0x1061   :  { %10222 = vrcp.f32 %v5464_v28  ;;  %v5505_v53 = vmul.f32 %v10221_v30, %v12861_v47  ;;  %v5446_v38 = vpop.xlane.xlu2 %5445 }
0x1062   :  { %10224 = vrcp.f32 %v5446_v38 }
0x1063   :  { %v5521_v23 = vpack.c.bf16 %v5505_v53, %v5505_v53  ;;  %10226 = vrcp.f32 %v5455_v58 }
0x1065   :  { %9689 = vmatmul.msk.bf16.vlgmr.msrb.gmra.mxu0 %vm766_vm4, %v5521_v23 }
0x1066   :  { %5720 = vmatpush.bf16.msrb.mxu0 %v5711_v49  ;;  %v5406_v49 = vsub.f32 %v12850_v33, %v12916_v52  ;;  %v5408_v33 = vsub.f32 %v12859_v7, %v12923_v54 }
0x1067   :  { %v10223_v55 = vpop.eup %10222  ;;  %6026 = vrot.lane.b32.xlu1 %v12573_v61, %s10500_s27  ;;  %6164 = vrot.lane.b32.xlu2 %v12585_v39, %s10500_s27 }
0x1068   :  { %v5512_v60 = vmul.f32 %v10223_v55, %v12870_v4  ;;  %v10225_v47 = vpop.eup %10224  ;;  %v5732_v4 = vsel %vm770_vm2, %v12814_v51, 0  ;;  %v5467_v30 = vpop.xlane.xlu0 %5466  ;;  %v5753_v51 = vsel %vm770_vm2, %v12808_v21, 0 }
0x1069   :  { %v5506_v24 = vmul.f32 %v10225_v47, %v12873_v2  ;;  %v5449_v31 = vpop.xlane.xlu2 %5448  ;;  %v10227_v57 = vpop.eup %10226  ;;  %v5435_v47 = vmul.f32 1.442695, %v5406_v49 }
0x106a   :  { %v5528_v36 = vpack.c.bf16 %v5512_v60, %v5512_v60  ;;  %10228 = vrcp.f32 %v5449_v31  ;;  %v5509_v56 = vmul.f32 %v10227_v57, %v12857_v26  ;;  %v5795_v26 = vsel %vm770_vm2, %v12796_v1, 0 }
0x106b   :  { %v5522_v17 = vpack.c.bf16 %v5506_v24, %v5506_v24  ;;  %v5816_v1 = vsel %vm770_vm2, %v12798_v35, 0  ;;  %v5837_v35 = vsel %vm770_vm2, %v12789_v20, 0  ;;  %v5940_v31 = vsel %vm175_vm1, %v12812_v48, 0 }
0x106c   :  { %9696 = vmatmul.msk.bf16.vlgmr.msra.gmra.mxu3 %vm766_vm4, %v5528_v36  ;;  %v5525_v28 = vpack.c.bf16 %v5509_v56, %v5509_v56 }
0x106d   :  { %5867 = vmatpush.bf16.msra.mxu3 %v5858_v18  ;;  %9690 = vmatmul.msk.bf16.vlgmr.msrb.gmra.mxu1 %vm766_vm4, %v5522_v17 }
0x106e   :  { %5741 = vmatpush.bf16.msrb.mxu1 %v5732_v4 }
0x106f   :  { %6047 = vrot.lane.b32.xlu2 %v12596_v25, %s10501_s28 }
0x1070   :  { %v10229_v2 = vpop.eup %10228 }
0x1071   :  { %v5507_v12 = vmul.f32 %v10229_v2, %v12880_v10  ;;  %v5458_v8 = vpop.xlane.xlu2 %5457 }
0x1072   :  { %10230 = vrcp.f32 %v5458_v8  ;;  %6070 = vrot.lane.b32.xlu0 %v12561_v22, %s10501_s28 }
0x1073   :  { %v5523_v53 = vpack.c.bf16 %v5507_v12, %v5507_v12  ;;  %10232 = vrcp.f32 %v5467_v30  ;;  %v5963_v30 = vsel %vm175_vm1, %v12810_v59, 0  ;;  %v5986_v59 = vsel %vm175_vm1, %v12800_v34, 0 }
0x1075   :  { %9691 = vmatmul.msk.bf16.vlgmr.msrb.gmra.mxu2 %vm766_vm4, %v5523_v53  ;;  %9693 = vmatmul.msk.bf16.vlgmr.msra.gmra.mxu0 %vm766_vm4, %v5525_v28 }
0x1076   :  { %5762 = vmatpush.bf16.msrb.mxu2 %v5753_v51  ;;  %5804 = vmatpush.bf16.msra.mxu0 %v5795_v26 }
0x1077   :  { %6118 = vrot.lane.b32.xlu2 %v12603_v11, %s10500_s27 }
0x1078   :  { %v10231_v10 = vpop.eup %10230 }
0x1079   :  { %v5510_v38 = vmul.f32 %v10231_v10, %v12889_v44  ;;  %v5461_v58 = vpop.xlane.xlu2 %5460  ;;  %v10233_v21 = vpop.eup %10232 }
0x107a   :  { %10234 = vrcp.f32 %v5461_v58  ;;  %v5513_v55 = vmul.f32 %v10233_v21, %v12882_v27 }
0x107b   :  { %v5526_v23 = vpack.c.bf16 %v5510_v38, %v5510_v38  ;;  %10236 = vpow2.f32 %v5435_v47  ;;  %v6078_v47 = vsel %vm175_vm1, %v12816_v63, 0 }
0x107c   :  { %v5529_v36 = vpack.c.bf16 %v5513_v55, %v5513_v55 }
0x107d   :  { %9694 = vmatmul.msk.bf16.vlgmr.msra.gmra.mxu1 %vm766_vm4, %v5526_v23 }
0x107e   :  { %5825 = vmatpush.bf16.msra.mxu1 %v5816_v1 }
0x107f   :  { %6279 = vrot.lane.b32.xlu2 %v12685_v0, %s10500_s27 }
0x1080   :  { %v10235_v60 = vpop.eup %10234 }
0x1081   :  { %v5511_v44 = vmul.f32 %v10235_v60, %v12893_v62  ;;  %v12982_v27 = vpop.eup %10236  ;;  %v5439_v62 = vmul.f32 1.442695, %v5408_v33  ;;  %v13002_v7 = vpop.permute.xlu2 %6093 }
0x1082   :  { %v5480_v20 = vsel %vm571_vm3, %v12982_v27, 0.0 }
0x1083   :  { %v5527_v24 = vpack.c.bf16 %v5511_v44, %v5511_v44  ;;  %10238 = vpow2.f32 %v5439_v62 }
0x1085   :  { %9695 = vmatmul.msk.bf16.vlgmr.msra.gmra.mxu2 %vm766_vm4, %v5527_v24  ;;  %9697 = vmatmul.msk.bf16.vlgmr.msrb.gmra.mxu0 %vm766_vm4, %v5529_v36 }
0x1086   :  { %5846 = vmatpush.bf16.msra.mxu2 %v5837_v35  ;;  %5949 = vmatpush.bf16.xpose.msrb.mxu0 %v5940_v31 }
0x1087   :  { %6254 = vrot.lane.b32.xlu2 %v12644_v14, %s10501_s28 }
0x1089   :  { %v12990_v48 = vpop.eup %10238 }
0x108a   :  { %v5486_v52 = vsel %vm571_vm3, %v12990_v48, 0.0 }
0x108f   :  { %6233 = vrot.lane.b32.xlu2 %v12626_v15, %s10500_s27 }
0x1091   :  { %5481 = vadd.xlane.f32.xlu1 %v5480_v20 }
0x1097   :  { %6571 = vrot.lane.b32.xlu2 %v12538_v13, %s10502_s29 }
0x109c   :  { %5487 = vadd.xlane.f32.xlu0 %v5486_v52 }
0x109f   :  { %6592 = vrot.lane.b32.xlu2 %v12573_v61, %s10502_s29 }
0x10a7   :  { %6739 = vrot.lane.b32.xlu2 %v12588_v3, %s10502_s29 }
0x10aa   :  { %6187 = vrot.lane.b32.xlu1 %v12588_v3, %s10500_s27 }
0x10b0   :  { %6049 = vrot.lane.b32.xlu0 %v12596_v25, %s10500_s27 }
0x10b2   :  { %6162 = vrot.lane.b32.xlu1 %v12585_v39, %s10501_s28 }
0x10b8   :  { %6024 = vrot.lane.b32.xlu0 %v12573_v61, %s10501_s28 }
0x10ba   :  { %v5479_v54 = vpop.xlane.xlu2 %5478  ;;  %6141 = vrot.lane.b32.xlu1 %v12659_v37, %s10500_s27 }
0x10bb   :  { %10240 = vrcp.f32 %v5479_v54 }
0x10c0   :  { %6185 = vrot.lane.b32.xlu0 %v12588_v3, %s10501_s28 }
0x10c1   :  { %v10241_v18 = vpop.eup %10240  ;;  %v5470_v17 = vpop.xlane.xlu1 %5469 }
0x10c2   :  { %v5517_v57 = vmul.f32 %v10241_v18, %v12902_v19  ;;  %10242 = vrcp.f32 %v5470_v17  ;;  %6116 = vrot.lane.b32.xlu1 %v12603_v11, %s10501_s28  ;;  %v5485_v4 = vpop.xlane.xlu2 %5484 }
0x10c4   :  { %v5533_v56 = vpack.c.bf16 %v5517_v57, %v5517_v57 }
0x10c6   :  { %9701 = vmatmul.msk.bf16.vlgmr.msra.gmra.mxu0 %vm766_vm4, %v5533_v56 }
0x10c8   :  { %v10243_v2 = vpop.eup %10242  ;;  %6256 = vrot.lane.b32.xlu0 %v12644_v14, %s10500_s27 }
0x10c9   :  { %v5514_v12 = vmul.f32 %v10243_v2, %v12909_v16  ;;  %v5473_v8 = vpop.xlane.xlu0 %5472 }
0x10ca   :  { %10244 = vrcp.f32 %v5473_v8  ;;  %6277 = vrot.lane.b32.xlu1 %v12685_v0, %s10501_s28  ;;  %v6165_v19 = vpop.permute.xlu2 %6164 }
0x10cb   :  { %v5530_v28 = vpack.c.bf16 %v5514_v12, %v5514_v12  ;;  %v6170_v31 = vsel %vm175_vm1, %v6165_v19, 0 }
0x10cd   :  { %9698 = vmatmul.msk.bf16.vlgmr.msrb.gmra.mxu1 %vm766_vm4, %v5530_v28 }
0x10ce   :  { %5972 = vmatpush.bf16.xpose.msrb.mxu1 %v5963_v30 }
0x10d0   :  { %v10245_v53 = vpop.eup %10244  ;;  %6139 = vrot.lane.b32.xlu0 %v12659_v37, %s10501_s28 }
0x10d1   :  { %v5515_v51 = vmul.f32 %v10245_v53, %v12918_v41  ;;  %v5476_v16 = vpop.xlane.xlu0 %5475 }
0x10d2   :  { %10246 = vrcp.f32 %v5476_v16  ;;  %6208 = vrot.lane.b32.xlu1 %v12623_v46, %s10501_s28  ;;  %v13029_v26 = vpop.permute.xlu2 %6047 }
0x10d3   :  { %v5531_v10 = vpack.c.bf16 %v5515_v51, %v5515_v51  ;;  %10248 = vrcp.f32 %v5485_v4 }
0x10d5   :  { %9699 = vmatmul.msk.bf16.vlgmr.msrb.gmra.mxu2 %vm766_vm4, %v5531_v10 }
0x10d6   :  { %5995 = vmatpush.bf16.xpose.msrb.mxu2 %v5986_v59  ;;  %9705 = vmatmul.msk.bf16.vlgmr.msrb.gmra.mxu0 %vm175_vm1, %v12828_v45  ;;  %v6009_v45 = vsel %vm175_vm1, %v12802_v6, 0  ;;  %v6101_v59 = vsel %vm175_vm1, %v12824_v40, 0 }
0x10d8   :  { %v10247_v38 = vpop.eup %10246  ;;  %6210 = vrot.lane.b32.xlu0 %v12623_v46, %s10500_s27 }
0x10d9   :  { %v5516_v41 = vmul.f32 %v10247_v38, %v12925_v42  ;;  %v6027_v58 = vpop.permute.xlu1 %6026  ;;  %v10249_v49 = vpop.eup %10248 }
0x10da   :  { %v6032_v23 = vsel %vm175_vm1, %v6027_v58, 0  ;;  %6508 = vrot.lane.b32.xlu1 %v12548_v29, %s10502_s29  ;;  %v6119_v34 = vpop.permute.xlu2 %6118  ;;  %v5519_v55 = vmul.f32 %v10249_v49, %v12907_v32 }
0x10db   :  { %v5532_v21 = vpack.c.bf16 %v5516_v41, %v5516_v41  ;;  %v6124_v1 = vsel %vm175_vm1, %v6119_v34, 0  ;;  %6041 = vmatpush.bf16.xpose.msra.mxu0 %v6032_v23  ;;  %v14332_v41 = vld [vmem:[#allocation14_spill] sm:$0xff] }
0x10dc   :  { %v5535_v44 = vpack.c.bf16 %v5519_v55, %v5519_v55 }
0x10dd   :  { %9700 = vmatmul.msk.bf16.vlgmr.msrb.gmra.mxu3 %vm766_vm4, %v5532_v21 }
0x10de   :  { %6018 = vmatpush.bf16.xpose.msrb.mxu3 %v6009_v45  ;;  %v5617_v42 = vpop.f32.mrf.mxu3 }
0x10df   :  { %5895 = vst [vmem:[#allocation1 + $0x11] ss:$2 sm:$0xff] %v5617_v42 }
0x10e0   :  { %6231 = vrot.lane.b32.xlu0 %v12626_v15, %s10501_s28 }
0x10e2   :  { %v5554_v60 = vpop.f32.mrf.mxu0  ;;  %6655 = vrot.lane.b32.xlu1 %v12566_v9, %s10502_s29  ;;  %v6280_v16 = vpop.permute.xlu2 %6279 }
0x10e3   :  { %6133 = vmatpush.bf16.xpose.msrb.mxu0 %v6124_v1  ;;  %5889 = vst [vmem:[#allocation1] ss:$2 sm:$0xff] %v5554_v60  ;;  %v14333_v1 = vld [vmem:[#allocation15_spill] sm:$0xff] }
0x10e5   :  { %9703 = vmatmul.msk.bf16.vlgmr.msra.gmra.mxu2 %vm766_vm4, %v5535_v44 }
0x10e6   :  { %6087 = vmatpush.bf16.xpose.msra.mxu2 %v6078_v47  ;;  %v5619_v6 = vpop.f32.mrf.mxu3  ;;  %v6285_v47 = vsel %vm175_vm1, %v6280_v16, 0 }
0x10e8   :  { %6550 = vrot.lane.b32.xlu0 %v12533_v50, %s10502_s29 }
0x10ea   :  { %v5556_v32 = vpop.f32.mrf.mxu0  ;;  %v5575_v36 = vpop.f32.mrf.mxu1  ;;  %6718 = vrot.lane.b32.xlu1 %v12585_v39, %s10502_s29 }
0x10eb   :  { %5891 = vst [vmem:[#allocation1 + $0x1] ss:$2 sm:$0xff] %v5575_v36  ;;  %v6255_v58 = vpop.permute.xlu2 %6254 }
0x10ef   :  { %v5701_v24 = vpop.f32.mrf.mxu3 }
0x10f0   :  { %5903 = vst [vmem:[#allocation1 + $0x31] ss:$2 sm:$0xff] %v5701_v24  ;;  %6529 = vrot.lane.b32.xlu0 %v12546_v5, %s10502_s29 }
0x10f2   :  { %v5577_v35 = vpop.f32.mrf.mxu1  ;;  %v5638_v63 = vpop.f32.mrf.mxu0  ;;  %v13067_v18 = vld.sshfl [vmem:[#allocation1] sm:$0xff pattern:$0x75316420] }
0x10f3   :  { %5897 = vst [vmem:[#allocation1 + $0x20] ss:$2 sm:$0xff] %v5638_v63  ;;  %v6234_v49 = vpop.permute.xlu2 %6233 }
0x10f4   :  { %v6239_v42 = vsel %vm175_vm1, %v6234_v49, 0 }
0x10f5   :  { %9707 = vmatmul.msk.bf16.vlgmr.msrb.gmra.mxu2 %vm175_vm1, %v12804_v43  ;;  %v6071_v43 = vpop.permute.xlu0 %6070 }
0x10f6   :  { %6179 = vmatpush.bf16.xpose.msrb.mxu2 %v6170_v31 }
0x10f7   :  { %v5703_v33 = vpop.f32.mrf.mxu3 }
0x10f8   :  { %v5596_v62 = vpop.f32.mrf.mxu2  ;;  %6634 = vrot.lane.b32.xlu0 %v12561_v22, %s10502_s29 }
0x10f9   :  { %5893 = vst [vmem:[#allocation1 + $0x10] ss:$2 sm:$0xff] %v5596_v62 }
0x10fa   :  { %v5659_v20 = vpop.f32.mrf.mxu1  ;;  %v5640_v52 = vpop.f32.mrf.mxu0 }
0x10fb   :  { %5899 = vst [vmem:[#allocation1 + $0x21] ss:$2 sm:$0xff] %v5659_v20  ;;  %v6572_v63 = vpop.permute.xlu2 %6571 }
0x1100   :  { %v5598_v54 = vpop.f32.mrf.mxu2  ;;  %6613 = vrot.lane.b32.xlu0 %v12596_v25, %s10502_s29 }
0x1102   :  { %v5661_v17 = vpop.f32.mrf.mxu1  ;;  %v5722_v57 = vpop.f32.mrf.mxu0  ;;  %v13095_v24 = vld.sshfl [vmem:[#allocation1 + $0x20] sm:$0xff pattern:$0x75316420] }
0x1103   :  { %5908 = vst [vmem:[#allocation1] ss:$2 sm:$0xff] %v5722_v57  ;;  %v6593_v17 = vpop.permute.xlu2 %6592 }
0x1104   :  { %v5482_v4 = vpop.xlane.xlu1 %5481 }
0x1105   :  { %10250 = vrcp.f32 %v5482_v4  ;;  %9711 = vmatmul.msk.bf16.vlgmr.msra.gmra.mxu2 %vm175_vm1, %v6071_v43  ;;  %v6598_v4 = vsel %vm770_vm2, %v6593_v17, 0 }
0x1108   :  { %v5680_v56 = vpop.f32.mrf.mxu2  ;;  %6676 = vrot.lane.b32.xlu0 %v12603_v11, %s10502_s29 }
0x1109   :  { %5901 = vst [vmem:[#allocation1 + $0x30] ss:$2 sm:$0xff] %v5680_v56 }
0x110a   :  { %v5724_v2 = vpop.f32.mrf.mxu0 }
0x110b   :  { %v10251_v12 = vpop.eup %10250 }
0x110c   :  { %v5518_v8 = vmul.f32 %v10251_v12, %v12982_v27 }
0x110e   :  { %v5534_v19 = vpack.c.bf16 %v5518_v8, %v5518_v8  ;;  %v13110_v8 = vld.sshfl [vmem:[#allocation1 + $0x10] sm:$0xff pattern:$0x75316420] }
0x110f   :  { %v5488_v28 = vpop.xlane.xlu0 %5487 }
0x1110   :  { %10252 = vrcp.f32 %v5488_v28  ;;  %v5682_v30 = vpop.f32.mrf.mxu2  ;;  %9702 = vmatmul.msk.bf16.vlgmr.msra.gmra.mxu1 %vm766_vm4, %v5534_v19 }
0x1116   :  { %v10253_v53 = vpop.eup %10252 }
0x1117   :  { %v5520_v51 = vmul.f32 %v10253_v53, %v12990_v48 }
0x1119   :  { %v5536_v10 = vpack.c.bf16 %v5520_v51, %v5520_v51 }
0x111b   :  { %9704 = vmatmul.msk.bf16.vlgmr.msra.gmra.mxu3 %vm766_vm4, %v5536_v10 }
0x111c   :  { %6110 = vmatpush.bf16.xpose.msra.mxu3 %v6101_v59  ;;  %v6188_v38 = vpop.permute.xlu1 %6187 }
0x111d   :  { %v6193_v21 = vsel %vm175_vm1, %v6188_v38, 0 }
0x1120   :  { %9706 = vmatmul.msk.bf16.vlgmr.msrb.gmra.mxu1 %vm175_vm1, %v14332_v41 }
0x1122   :  { %v6050_v27 = vpop.permute.xlu0 %6049 }
0x1123   :  { %v6055_v23 = vsel %vm175_vm1, %v6050_v27, 0  ;;  %v13116_v27 = vld.sshfl [vmem:[#allocation1 + $0x30] sm:$0xff pattern:$0x75316420] }
0x1124   :  { %6064 = vmatpush.bf16.xpose.msra.mxu1 %v6055_v23  ;;  %v6163_v34 = vpop.permute.xlu1 %6162 }
0x1125   :  { %9715 = vmatmul.msk.bf16.vlgmr.msrb.gmra.mxu2 %vm175_vm1, %v6163_v34 }
0x112a   :  { %v6025_v48 = vpop.permute.xlu0 %6024 }
0x112b   :  { %9708 = vmatmul.msk.bf16.vlgmr.msrb.gmra.mxu3 %vm175_vm1, %v14333_v1  ;;  %9709 = vmatmul.msk.bf16.vlgmr.msra.gmra.mxu0 %vm175_vm1, %v6025_v48 }
0x112c   :  { %6202 = vmatpush.bf16.xpose.msrb.mxu3 %v6193_v21  ;;  %v6142_v40 = vpop.permute.xlu1 %6141 }
0x112d   :  { %v6147_v45 = vsel %vm175_vm1, %v6142_v40, 0 }
0x112e   :  { %6156 = vmatpush.bf16.xpose.msrb.mxu1 %v6147_v45 }
0x1130   :  { %9710 = vmatmul.msk.bf16.vlgmr.msra.gmra.mxu1 %vm175_vm1, %v13029_v26 }
0x1132   :  { %v6186_v55 = vpop.permute.xlu0 %6185 }
0x1134   :  { %v6117_v60 = vpop.permute.xlu1 %6116 }
0x1136   :  { %6248 = vmatpush.bf16.xpose.msra.mxu1 %v6239_v42 }
0x113a   :  { %v6257_v44 = vpop.permute.xlu0 %6256 }
0x113b   :  { %v6262_v6 = vsel %vm175_vm1, %v6257_v44, 0  ;;  %9712 = vmatmul.msk.bf16.vlgmr.msra.gmra.mxu3 %vm175_vm1, %v13002_v7  ;;  %9713 = vmatmul.msk.bf16.vlgmr.msrb.gmra.mxu0 %vm175_vm1, %v6117_v60  ;;  %v6577_v7 = vsel %vm770_vm2, %v6572_v63, 0 }
0x113c   :  { %6294 = vmatpush.bf16.xpose.msra.mxu3 %v6285_v47  ;;  %6271 = vmatpush.bf16.xpose.msra.mxu2 %v6262_v6  ;;  %v6278_v32 = vpop.permute.xlu1 %6277 }
0x1142   :  { %v6140_v36 = vpop.permute.xlu0 %6139 }
0x1143   :  { %v5806_v26 = vpop.f32.mrf.mxu0  ;;  %9714 = vmatmul.msk.bf16.vlgmr.msrb.gmra.mxu1 %vm175_vm1, %v6140_v36  ;;  %9719 = vmatmul.msk.bf16.vlgmr.msra.gmra.mxu2 %vm175_vm1, %v6255_v58 }
0x1144   :  { %5912 = vst [vmem:[#allocation1 + $0x20] ss:$2 sm:$0xff] %v5806_v26  ;;  %v6209_v35 = vpop.permute.xlu1 %6208 }
0x114a   :  { %v6211_v31 = vpop.permute.xlu0 %6210  ;;  %v5743_v33 = vpop.f32.mrf.mxu1 }
0x114b   :  { %v6216_v62 = vsel %vm175_vm1, %v6211_v31, 0  ;;  %5909 = vst [vmem:[#allocation1 + $0x1] ss:$2 sm:$0xff] %v5743_v33  ;;  %v5808_v20 = vpop.f32.mrf.mxu0  ;;  %9716 = vmatmul.msk.bf16.vlgmr.msrb.gmra.mxu3 %vm175_vm1, %v6186_v55 }
0x114c   :  { %6586 = vmatpush.bf16.msrb.mxu3 %v6577_v7  ;;  %6225 = vmatpush.bf16.xpose.msra.mxu0 %v6216_v62  ;;  %v6509_v52 = vpop.permute.xlu1 %6508 }
0x114d   :  { %v6514_v54 = vsel %vm770_vm2, %v6509_v52, 0 }
0x1152   :  { %v6232_v57 = vpop.permute.xlu0 %6231  ;;  %v5745_v43 = vpop.f32.mrf.mxu1 }
0x1153   :  { %v5951_v56 = vpop.f32.mrf.mxu0  ;;  %9717 = vmatmul.msk.bf16.vlgmr.msra.gmra.mxu0 %vm175_vm1, %v6209_v35  ;;  %9718 = vmatmul.msk.bf16.vlgmr.msra.gmra.mxu1 %vm175_vm1, %v6232_v57 }
0x1154   :  { %6523 = vmatpush.bf16.msrb.mxu0 %v6514_v54  ;;  %v13106_v2 = vmul.f32 0.35355338, %v5951_v56  ;;  %v6656_v19 = vpop.permute.xlu1 %6655 }
0x1155   :  { %v6661_v53 = vsel %vm770_vm2, %v6656_v19, 0 }
0x1156   :  { %v6316_v12 = vsel %vm571_vm3, %v13106_v2, -inf }
0x1157   :  { %6317 = vmax.xlane.f32.xlu0 %v6316_v12 }
0x1158   :  { %6607 = vmatpush.bf16.msra.mxu0 %v6598_v4  ;;  %v5764_v28 = vpop.f32.mrf.mxu2 }
0x1159   :  { %5910 = vst [vmem:[#allocation1 + $0x10] ss:$2 sm:$0xff] %v5764_v28 }
0x115a   :  { %v6551_v30 = vpop.permute.xlu0 %6550 }
0x115b   :  { %v6556_v51 = vsel %vm770_vm2, %v6551_v30, 0  ;;  %v5953_v16 = vpop.f32.mrf.mxu0  ;;  %9720 = vmatmul.msk.bf16.vlgmr.msra.gmra.mxu3 %vm175_vm1, %v6278_v32 }
0x115c   :  { %6670 = vmatpush.bf16.msra.mxu3 %v6661_v53  ;;  %6565 = vmatpush.bf16.msrb.mxu2 %v6556_v51 }
0x1160   :  { %v5766_v10 = vpop.f32.mrf.mxu2  ;;  %v5785_v59 = vpop.f32.mrf.mxu3 }
0x1161   :  { %5911 = vst [vmem:[#allocation1 + $0x11] ss:$2 sm:$0xff] %v5785_v59 }
0x1162   :  { %v6530_v38 = vpop.permute.xlu0 %6529 }
0x1163   :  { %v6535_v41 = vsel %vm770_vm2, %v6530_v38, 0 }
0x1164   :  { %6544 = vmatpush.bf16.msrb.mxu1 %v6535_v41 }
0x1168   :  { %v5787_v58 = vpop.f32.mrf.mxu3  ;;  %v5848_v23 = vpop.f32.mrf.mxu2 }
0x1169   :  { %5914 = vst [vmem:[#allocation1 + $0x30] ss:$2 sm:$0xff] %v5848_v23 }
0x116a   :  { %v6635_v34 = vpop.permute.xlu0 %6634 }
0x116b   :  { %v6640_v48 = vsel %vm770_vm2, %v6635_v34, 0  ;;  %6802 = vrot.lane.b32.xlu0 %v12644_v14, %s10502_s29 }
0x116c   :  { %6649 = vmatpush.bf16.msra.mxu2 %v6640_v48 }
0x1170   :  { %v5850_v21 = vpop.f32.mrf.mxu2 }
0x1172   :  { %v6614_v1 = vpop.permute.xlu0 %6613 }
0x1173   :  { %v6619_v40 = vsel %vm770_vm2, %v6614_v1, 0 }
0x1174   :  { %6628 = vmatpush.bf16.msra.mxu1 %v6619_v40 }
0x1178   :  { %v5997_v49 = vpop.f32.mrf.mxu2 }
0x1179   :  { %v13132_v54 = vmul.f32 0.35355338, %v5997_v49 }
0x117b   :  { %v6322_v4 = vsel %vm571_vm3, %v13132_v54, -inf }
0x1180   :  { %v5999_v45 = vpop.f32.mrf.mxu2 }
0x1188   :  { %v6089_v42 = vpop.f32.mrf.mxu2 }
0x1189   :  { %v13150_v58 = vmul.f32 0.35355338, %v6089_v42 }
0x118b   :  { %v6334_v1 = vsel %vm571_vm3, %v13150_v58, -inf }
0x118d   :  { %v5827_v55 = vpop.f32.mrf.mxu1 }
0x118e   :  { %5913 = vst [vmem:[#allocation1 + $0x21] ss:$2 sm:$0xff] %v5827_v55 }
0x1190   :  { %v6091_v60 = vpop.f32.mrf.mxu2 }
0x1195   :  { %v5829_v44 = vpop.f32.mrf.mxu1 }
0x119d   :  { %v5974_v47 = vpop.f32.mrf.mxu1 }
0x119e   :  { %v13122_v6 = vmul.f32 0.35355338, %v5974_v47  ;;  %v5869_v32 = vpop.f32.mrf.mxu3 }
0x119f   :  { %5915 = vst [vmem:[#allocation1 + $0x31] ss:$2 sm:$0xff] %v5869_v32 }
0x11a0   :  { %v6319_v36 = vsel %vm571_vm3, %v13122_v6, -inf }
0x11a1   :  { %6320 = vmax.xlane.f32.xlu2 %v6319_v36 }
0x11a5   :  { %v5976_v26 = vpop.f32.mrf.mxu1 }
0x11a6   :  { %v5871_v35 = vpop.f32.mrf.mxu3 }
0x11a8   :  { %v6043_v63 = vpop.f32.mrf.mxu0  ;;  %v6181_v31 = vpop.f32.mrf.mxu2 }
0x11a9   :  { %v13126_v33 = vmul.f32 0.35355338, %v6043_v63  ;;  %v13168_v26 = vmul.f32 0.35355338, %v6181_v31 }
0x11ab   :  { %v6328_v7 = vsel %vm571_vm3, %v13126_v33, -inf }
0x11ac   :  { %6329 = vmax.xlane.f32.xlu2 %v6328_v7  ;;  %v6346_v7 = vsel %vm571_vm3, %v13168_v26, -inf }
0x11ad   :  { %v6066_v62 = vpop.f32.mrf.mxu1 }
0x11ae   :  { %v13130_v20 = vmul.f32 0.35355338, %v6066_v62  ;;  %v6020_v52 = vpop.f32.mrf.mxu3 }
0x11af   :  { %v13138_v56 = vmul.f32 0.35355338, %v6020_v52 }
0x11b0   :  { %v6045_v17 = vpop.f32.mrf.mxu0  ;;  %v6183_v57 = vpop.f32.mrf.mxu2  ;;  %v6331_v43 = vsel %vm571_vm3, %v13130_v20, -inf }
0x11b1   :  { %6332 = vmax.xlane.f32.xlu1 %v6331_v43  ;;  %v6325_v30 = vsel %vm571_vm3, %v13138_v56, -inf  ;;  %v13176_v43 = vpop.permute.xlu0 %6676 }
0x11b4   :  { %6323 = vmax.xlane.f32.xlu2 %v6322_v4 }
0x11b5   :  { %v6068_v12 = vpop.f32.mrf.mxu1 }
0x11b6   :  { %v6022_v19 = vpop.f32.mrf.mxu3 }
0x11b8   :  { %v6135_v28 = vpop.f32.mrf.mxu0 }
0x11b9   :  { %6326 = vmax.xlane.f32.xlu1 %v6325_v30  ;;  %v13142_v53 = vmul.f32 0.35355338, %v6135_v28 }
0x11bb   :  { %v6340_v59 = vsel %vm571_vm3, %v13142_v53, -inf }
0x11be   :  { %v6112_v51 = vpop.f32.mrf.mxu3 }
0x11bf   :  { %v13152_v48 = vmul.f32 0.35355338, %v6112_v51 }
0x11c0   :  { %v6137_v16 = vpop.f32.mrf.mxu0  ;;  %v6158_v10 = vpop.f32.mrf.mxu1 }
0x11c1   :  { %v13146_v38 = vmul.f32 0.35355338, %v6158_v10  ;;  %6341 = vmax.xlane.f32.xlu1 %v6340_v59  ;;  %v6337_v40 = vsel %vm571_vm3, %v13152_v48, -inf  ;;  %v13191_v59 = vpop.permute.xlu2 %6739 }
0x11c3   :  { %v6343_v41 = vsel %vm571_vm3, %v13146_v38, -inf }
0x11c4   :  { %6344 = vmax.xlane.f32.xlu0 %v6343_v41 }
0x11c6   :  { %v6114_v23 = vpop.f32.mrf.mxu3  ;;  %v6273_v34 = vpop.f32.mrf.mxu2 }
0x11c7   :  { %v13183_v30 = vmul.f32 0.35355338, %v6273_v34  ;;  %v13194_v34 = vpop.permute.xlu1 %6718 }
0x11c8   :  { %v6160_v21 = vpop.f32.mrf.mxu1 }
0x11c9   :  { %6335 = vmax.xlane.f32.xlu1 %v6334_v1  ;;  %v6358_v51 = vsel %vm571_vm3, %v13183_v30, -inf }
0x11ca   :  { %v6318_v4 = vpop.xlane.xlu0 %6317 }
0x11cb   :  { %v6364_v31 = vsub.f32 %v13106_v2, %v6318_v4 }
0x11cc   :  { %6697 = vrot.lane.b32.xlu2 %v12659_v37, %s10502_s29  ;;  %6338 = vmax.xlane.f32.xlu0 %v6337_v40 }
0x11cd   :  { %v6380_v28 = vmul.f32 1.442695, %v6364_v31 }
0x11ce   :  { %v6204_v49 = vpop.f32.mrf.mxu3  ;;  %v6275_v45 = vpop.f32.mrf.mxu2 }
0x11cf   :  { %v13178_v12 = vmul.f32 0.35355338, %v6204_v49  ;;  %10254 = vpow2.f32 %v6380_v28 }
0x11d0   :  { %v6227_v42 = vpop.f32.mrf.mxu0  ;;  %v6250_v55 = vpop.f32.mrf.mxu1 }
0x11d1   :  { %v13160_v60 = vmul.f32 0.35355338, %v6227_v42  ;;  %v13162_v44 = vmul.f32 0.35355338, %v6250_v55  ;;  %v6349_v19 = vsel %vm571_vm3, %v13178_v12, -inf }
0x11d3   :  { %v6355_v47 = vsel %vm571_vm3, %v13162_v44, -inf  ;;  %v6352_v32 = vsel %vm571_vm3, %v13160_v60, -inf }
0x11d4   :  { %6356 = vmax.xlane.f32.xlu0 %v6355_v47  ;;  %6353 = vmax.xlane.f32.xlu1 %v6352_v32 }
0x11d5   :  { %v13187_v16 = vpop.eup %10254 }
0x11d6   :  { %v6206_v36 = vpop.f32.mrf.mxu3  ;;  %v6412_v10 = vsel %vm571_vm3, %v13187_v16, 0.0 }
0x11d8   :  { %v6229_v35 = vpop.f32.mrf.mxu0  ;;  %v6252_v63 = vpop.f32.mrf.mxu1 }
0x11dc   :  { %6347 = vmax.xlane.f32.xlu0 %v6346_v7 }
0x11de   :  { %v6296_v62 = vpop.f32.mrf.mxu3 }
0x11df   :  { %v13172_v52 = vmul.f32 0.35355338, %v6296_v62 }
0x11e1   :  { %v6361_v17 = vsel %vm571_vm3, %v13172_v52, -inf }
0x11e2   :  { %6362 = vmax.xlane.f32.xlu1 %v6361_v17  ;;  %v13210_v17 = vpop.permute.xlu0 %6802 }
0x11e6   :  { %v6298_v57 = vpop.f32.mrf.mxu3 }
0x11f5   :  { %6350 = vmax.xlane.f32.xlu2 %v6349_v19 }
0x11fd   :  { %6359 = vmax.xlane.f32.xlu2 %v6358_v51 }
0x1205   :  { %6413 = vadd.xlane.f32.xlu2 %v6412_v10 }
0x1214   :  { %v6321_v2 = vpop.xlane.xlu2 %6320 }
0x1215   :  { %v6365_v41 = vsub.f32 %v13122_v6, %v6321_v2 }
0x1217   :  { %v6382_v23 = vmul.f32 1.442695, %v6365_v41 }
0x1219   :  { %10256 = vpow2.f32 %v6382_v23 }
0x121f   :  { %v13196_v21 = vpop.eup %10256  ;;  %v6330_v1 = vpop.xlane.xlu2 %6329 }
0x1220   :  { %v6368_v40 = vsub.f32 %v13126_v33, %v6330_v1  ;;  %v6415_v49 = vsel %vm571_vm3, %v13196_v21, 0.0 }
0x1221   :  { %6416 = vadd.xlane.f32.xlu1 %v6415_v49 }
0x1222   :  { %v6388_v45 = vmul.f32 1.442695, %v6368_v40 }
0x1224   :  { %10258 = vpow2.f32 %v6388_v45  ;;  %v6333_v42 = vpop.xlane.xlu1 %6332 }
0x1225   :  { %v6369_v55 = vsub.f32 %v13130_v20, %v6333_v42 }
0x1227   :  { %v6390_v47 = vmul.f32 1.442695, %v6369_v55  ;;  %v6324_v6 = vpop.xlane.xlu2 %6323 }
0x1228   :  { %v6366_v32 = vsub.f32 %v13132_v54, %v6324_v6 }
0x1229   :  { %10260 = vpow2.f32 %v6390_v47 }
0x122a   :  { %v13203_v36 = vpop.eup %10258  ;;  %v6384_v35 = vmul.f32 1.442695, %v6366_v32 }
0x122b   :  { %v6424_v33 = vsel %vm571_vm3, %v13203_v36, 0.0 }
0x122c   :  { %10262 = vpow2.f32 %v6384_v35  ;;  %6425 = vadd.xlane.f32.xlu1 %v6424_v33  ;;  %v6327_v63 = vpop.xlane.xlu1 %6326 }
0x122d   :  { %v6367_v7 = vsub.f32 %v13138_v56, %v6327_v63 }
0x122f   :  { %v13208_v62 = vpop.eup %10260  ;;  %v6386_v20 = vmul.f32 1.442695, %v6367_v7 }
0x1230   :  { %v6427_v54 = vsel %vm571_vm3, %v13208_v62, 0.0 }
0x1231   :  { %10264 = vpow2.f32 %v6386_v20  ;;  %6428 = vadd.xlane.f32.xlu2 %v6427_v54 }
0x1232   :  { %v13214_v57 = vpop.eup %10262 }
0x1233   :  { %v6418_v4 = vsel %vm571_vm3, %v13214_v57, 0.0 }
0x1234   :  { %6419 = vadd.xlane.f32.xlu0 %v6418_v4  ;;  %v6342_v31 = vpop.xlane.xlu1 %6341 }
0x1235   :  { %v6372_v19 = vsub.f32 %v13142_v53, %v6342_v31 }
0x1237   :  { %v13219_v56 = vpop.eup %10264  ;;  %v6396_v28 = vmul.f32 1.442695, %v6372_v19  ;;  %v6345_v51 = vpop.xlane.xlu0 %6344 }
0x1238   :  { %v6373_v10 = vsub.f32 %v13146_v38, %v6345_v51  ;;  %v6421_v2 = vsel %vm571_vm3, %v13219_v56, 0.0 }
0x1239   :  { %10266 = vpow2.f32 %v6396_v28  ;;  %6422 = vadd.xlane.f32.xlu2 %v6421_v2 }
0x123a   :  { %v6398_v41 = vmul.f32 1.442695, %v6373_v10 }
0x123c   :  { %10268 = vpow2.f32 %v6398_v41  ;;  %v6336_v23 = vpop.xlane.xlu1 %6335 }
0x123d   :  { %v6370_v1 = vsub.f32 %v13150_v58, %v6336_v23 }
0x123f   :  { %v13225_v40 = vpop.eup %10266  ;;  %v6392_v49 = vmul.f32 1.442695, %v6370_v1  ;;  %v6339_v53 = vpop.xlane.xlu0 %6338 }
0x1240   :  { %v6371_v45 = vsub.f32 %v13152_v48, %v6339_v53  ;;  %v6436_v42 = vsel %vm571_vm3, %v13225_v40, 0.0 }
0x1241   :  { %10270 = vpow2.f32 %v6392_v49  ;;  %6437 = vadd.xlane.f32.xlu2 %v6436_v42  ;;  %v6698_v49 = vpop.permute.xlu2 %6697 }
0x1242   :  { %v13230_v38 = vpop.eup %10268  ;;  %v6394_v55 = vmul.f32 1.442695, %v6371_v45 }
0x1243   :  { %v6439_v47 = vsel %vm571_vm3, %v13230_v38, 0.0 }
0x1244   :  { %10272 = vpow2.f32 %v6394_v55  ;;  %6440 = vadd.xlane.f32.xlu0 %v6439_v47 }
0x1247   :  { %v13234_v58 = vpop.eup %10270  ;;  %v6357_v6 = vpop.xlane.xlu0 %6356 }
0x1248   :  { %v6354_v32 = vpop.xlane.xlu1 %6353  ;;  %v6377_v35 = vsub.f32 %v13162_v44, %v6357_v6  ;;  %v6430_v33 = vsel %vm571_vm3, %v13234_v58, 0.0 }
0x1249   :  { %v6376_v48 = vsub.f32 %v13160_v60, %v6354_v32  ;;  %6431 = vadd.xlane.f32.xlu2 %v6430_v33 }
0x124a   :  { %v13240_v63 = vpop.eup %10272  ;;  %v6406_v7 = vmul.f32 1.442695, %v6377_v35 }
0x124b   :  { %v6404_v20 = vmul.f32 1.442695, %v6376_v48  ;;  %v6433_v54 = vsel %vm571_vm3, %v13240_v63, 0.0 }
0x124c   :  { %10274 = vpow2.f32 %v6406_v7  ;;  %6434 = vadd.xlane.f32.xlu0 %v6433_v54  ;;  %v6682_v54 = vsel %vm770_vm2, %v13176_v43, 0 }
0x124d   :  { %10276 = vpow2.f32 %v6404_v20 }
0x124f   :  { %v6348_v4 = vpop.xlane.xlu0 %6347 }
0x1250   :  { %v6374_v31 = vsub.f32 %v13168_v26, %v6348_v4 }
0x1252   :  { %v13245_v44 = vpop.eup %10274  ;;  %v6400_v60 = vmul.f32 1.442695, %v6374_v31 }
0x1253   :  { %v13247_v19 = vpop.eup %10276  ;;  %v6451_v28 = vsel %vm571_vm3, %v13245_v44, 0.0 }
0x1254   :  { %10278 = vpow2.f32 %v6400_v60  ;;  %6452 = vadd.xlane.f32.xlu1 %v6451_v28  ;;  %v6448_v51 = vsel %vm571_vm3, %v13247_v19, 0.0  ;;  %v6703_v28 = vsel %vm770_vm2, %v6698_v49, 0 }
0x1255   :  { %6449 = vadd.xlane.f32.xlu2 %v6448_v51  ;;  %v6363_v10 = vpop.xlane.xlu1 %6362 }
0x1256   :  { %v6379_v2 = vsub.f32 %v13172_v52, %v6363_v10 }
0x1258   :  { %v6410_v41 = vmul.f32 1.442695, %v6379_v2 }
0x125a   :  { %v13254_v23 = vpop.eup %10278  ;;  %10280 = vpow2.f32 %v6410_v41 }
0x125b   :  { %v6442_v26 = vsel %vm571_vm3, %v13254_v23, 0.0 }
0x125c   :  { %6443 = vadd.xlane.f32.xlu0 %v6442_v26 }
0x1260   :  { %v13258_v1 = vpop.eup %10280 }
0x1261   :  { %v6457_v53 = vsel %vm571_vm3, %v13258_v1, 0.0 }
0x1264   :  { %6458 = vadd.xlane.f32.xlu0 %v6457_v53 }
0x1268   :  { %v6351_v45 = vpop.xlane.xlu2 %6350 }
0x1269   :  { %v6375_v42 = vsub.f32 %v13178_v12, %v6351_v45 }
0x126b   :  { %v6402_v55 = vmul.f32 1.442695, %v6375_v42 }
0x126d   :  { %10282 = vpow2.f32 %v6402_v55  ;;  %6823 = vrot.lane.b32.xlu2 %v12685_v0, %s10502_s29 }
0x1270   :  { %v6360_v52 = vpop.xlane.xlu2 %6359 }
0x1271   :  { %v6378_v47 = vsub.f32 %v13183_v30, %v6360_v52 }
0x1273   :  { %v13266_v6 = vpop.eup %10282  ;;  %v6408_v32 = vmul.f32 1.442695, %v6378_v47 }
0x1274   :  { %v6445_v35 = vsel %vm571_vm3, %v13266_v6, 0.0 }
0x1275   :  { %10284 = vpow2.f32 %v6408_v32  ;;  %7016 = vrot.lane.b32.xlu2 %v12546_v5, %s10504_s16  ;;  %6446 = vadd.xlane.f32.xlu1 %v6445_v35 }
0x1278   :  { %v6414_v12 = vpop.xlane.xlu2 %6413  ;;  %6781 = vrot.lane.b32.xlu0 %v12626_v15, %s10502_s29 }
0x1279   :  { %10286 = vrcp.f32 %v6414_v12  ;;  %v6745_v12 = vsel %vm770_vm2, %v13191_v59, 0 }
0x127b   :  { %v13274_v48 = vpop.eup %10284 }
0x127c   :  { %v6454_v30 = vsel %vm571_vm3, %v13274_v48, 0.0 }
0x127d   :  { %7039 = vrot.lane.b32.xlu2 %v12533_v50, %s10504_s16  ;;  %6455 = vadd.xlane.f32.xlu1 %v6454_v30 }
0x127f   :  { %v10287_v33 = vpop.eup %10286 }
0x1280   :  { %v6476_v7 = vmul.f32 %v10287_v33, %v13187_v16  ;;  %6993 = vrot.lane.b32.xlu0 %v12548_v29, %s10504_s16 }
0x1282   :  { %v6492_v20 = vpack.c.bf16 %v6476_v7, %v6476_v7 }
0x1284   :  { %9721 = vmatmul.msk.bf16.vlgmr.msrb.gmra.mxu0 %vm766_vm4, %v6492_v20 }
0x1285   :  { %6691 = vmatpush.bf16.msrb.mxu0 %v6682_v54  ;;  %7060 = vrot.lane.b32.xlu2 %v12538_v13, %s10503_s30 }
0x1288   :  { %7014 = vrot.lane.b32.xlu0 %v12546_v5, %s10503_s30 }
0x128d   :  { %7083 = vrot.lane.b32.xlu2 %v12573_v61, %s10503_s30 }
0x1290   :  { %7037 = vrot.lane.b32.xlu0 %v12533_v50, %s10503_s30 }
0x1294   :  { %v6417_v16 = vpop.xlane.xlu1 %6416 }
0x1295   :  { %7154 = vrot.lane.b32.xlu2 %v12566_v9, %s10504_s16  ;;  %10288 = vrcp.f32 %v6417_v16 }
0x1296   :  { %6760 = vrot.lane.b32.xlu1 %v12623_v46, %s10502_s29 }
0x1298   :  { %7108 = vrot.lane.b32.xlu0 %v12596_v25, %s10504_s16 }
0x129b   :  { %v10289_v43 = vpop.eup %10288 }
0x129c   :  { %v6477_v4 = vmul.f32 %v10289_v43, %v13196_v21 }
0x129d   :  { %7223 = vrot.lane.b32.xlu2 %v12585_v39, %s10504_s16 }
0x129e   :  { %v6493_v31 = vpack.c.bf16 %v6477_v4, %v6477_v4  ;;  %6991 = vrot.lane.b32.xlu1 %v12548_v29, %s10503_s30 }
0x129f   :  { %v6426_v60 = vpop.xlane.xlu1 %6425 }
0x12a0   :  { %10290 = vrcp.f32 %v6426_v60  ;;  %7131 = vrot.lane.b32.xlu0 %v12561_v22, %s10504_s16  ;;  %9722 = vmatmul.msk.bf16.vlgmr.msrb.gmra.mxu1 %vm766_vm4, %v6493_v31  ;;  %v6808_v31 = vsel %vm770_vm2, %v13210_v17, 0 }
0x12a1   :  { %6712 = vmatpush.bf16.msrb.mxu1 %v6703_v28 }
0x12a4   :  { %v6429_v51 = vpop.xlane.xlu2 %6428 }
0x12a5   :  { %10292 = vrcp.f32 %v6429_v51  ;;  %7244 = vrot.lane.b32.xlu2 %v12588_v3, %s10503_s30 }
0x12a6   :  { %v10291_v21 = vpop.eup %10290  ;;  %7062 = vrot.lane.b32.xlu1 %v12538_v13, %s10504_s16 }
0x12a7   :  { %v6480_v10 = vmul.f32 %v10291_v21, %v13203_v36  ;;  %v6420_v2 = vpop.xlane.xlu0 %6419 }
0x12a8   :  { %10294 = vrcp.f32 %v6420_v2  ;;  %7152 = vrot.lane.b32.xlu0 %v12566_v9, %s10503_s30 }
0x12a9   :  { %v6496_v41 = vpack.c.bf16 %v6480_v10, %v6480_v10 }
0x12ab   :  { %v10293_v26 = vpop.eup %10292  ;;  %9725 = vmatmul.msk.bf16.vlgmr.msra.gmra.mxu0 %vm766_vm4, %v6496_v41 }
0x12ac   :  { %v6481_v49 = vmul.f32 %v10293_v26, %v13208_v62  ;;  %v6423_v53 = vpop.xlane.xlu2 %6422  ;;  %v6724_v62 = vsel %vm770_vm2, %v13194_v34, 0 }
0x12ad   :  { %10296 = vrcp.f32 %v6423_v53  ;;  %7315 = vrot.lane.b32.xlu2 %v12644_v14, %s10504_s16 }
0x12ae   :  { %v10295_v45 = vpop.eup %10294  ;;  %v6497_v42 = vpack.c.bf16 %v6481_v49, %v6481_v49  ;;  %7085 = vrot.lane.b32.xlu1 %v12573_v61, %s10504_s16 }
0x12af   :  { %v6478_v36 = vmul.f32 %v10295_v45, %v13214_v57 }
0x12b0   :  { %7221 = vrot.lane.b32.xlu0 %v12585_v39, %s10503_s30  ;;  %9726 = vmatmul.msk.bf16.vlgmr.msra.gmra.mxu1 %vm766_vm4, %v6497_v42 }
0x12b1   :  { %v6494_v55 = vpack.c.bf16 %v6478_v36, %v6478_v36 }
0x12b3   :  { %v10297_v52 = vpop.eup %10296  ;;  %9723 = vmatmul.msk.bf16.vlgmr.msrb.gmra.mxu2 %vm766_vm4, %v6494_v55 }
0x12b4   :  { %v6479_v47 = vmul.f32 %v10297_v52, %v13219_v56  ;;  %6733 = vmatpush.bf16.msrb.mxu2 %v6724_v62  ;;  %v6438_v32 = vpop.xlane.xlu2 %6437 }
0x12b5   :  { %10298 = vrcp.f32 %v6438_v32  ;;  %7198 = vrot.lane.b32.xlu2 %v12659_v37, %s10503_s30 }
0x12b6   :  { %v6495_v57 = vpack.c.bf16 %v6479_v47, %v6479_v47  ;;  %7106 = vrot.lane.b32.xlu1 %v12596_v25, %s10503_s30 }
0x12b7   :  { %v6441_v35 = vpop.xlane.xlu0 %6440 }
0x12b8   :  { %10300 = vrcp.f32 %v6441_v35  ;;  %9724 = vmatmul.msk.bf16.vlgmr.msrb.gmra.mxu3 %vm766_vm4, %v6495_v57  ;;  %7200 = vrot.lane.b32.xlu0 %v12659_v37, %s10504_s16 }
0x12b9   :  { %6754 = vmatpush.bf16.msrb.mxu3 %v6745_v12 }
0x12bb   :  { %v10299_v34 = vpop.eup %10298 }
0x12bc   :  { %v6484_v56 = vmul.f32 %v10299_v34, %v13225_v40  ;;  %v6432_v30 = vpop.xlane.xlu2 %6431 }
0x12bd   :  { %10302 = vrcp.f32 %v6432_v30  ;;  %7269 = vrot.lane.b32.xlu2 %v12623_v46, %s10504_s16 }
0x12be   :  { %v10301_v33 = vpop.eup %10300  ;;  %v6500_v7 = vpack.c.bf16 %v6484_v56, %v6484_v56  ;;  %7129 = vrot.lane.b32.xlu1 %v12561_v22, %s10503_s30 }
0x12bf   :  { %v6485_v59 = vmul.f32 %v10301_v33, %v13230_v38  ;;  %v6435_v20 = vpop.xlane.xlu0 %6434 }
0x12c0   :  { %10304 = vrcp.f32 %v6435_v20  ;;  %7175 = vrot.lane.b32.xlu0 %v12603_v11, %s10503_s30  ;;  %9729 = vmatmul.msk.bf16.vlgmr.msrb.gmra.mxu0 %vm766_vm4, %v6500_v7 }
0x12c1   :  { %v6501_v40 = vpack.c.bf16 %v6485_v59, %v6485_v59 }
0x12c3   :  { %v10303_v54 = vpop.eup %10302  ;;  %9730 = vmatmul.msk.bf16.vlgmr.msrb.gmra.mxu1 %vm766_vm4, %v6501_v40  ;;  %v5928_v40 = vpack.c.bf16 %v13110_v8, %v13067_v18 }
0x12c4   :  { %v6482_v16 = vmul.f32 %v10303_v54, %v13234_v58 }
0x12c5   :  { %7290 = vrot.lane.b32.xlu2 %v12626_v15, %s10503_s30 }
0x12c6   :  { %v10305_v43 = vpop.eup %10304  ;;  %v6498_v4 = vpack.c.bf16 %v6482_v16, %v6482_v16  ;;  %7246 = vrot.lane.b32.xlu1 %v12588_v3, %s10504_s16 }
0x12c7   :  { %v6483_v38 = vmul.f32 %v10305_v43, %v13240_v63  ;;  %v6453_v2 = vpop.xlane.xlu1 %6452 }
0x12c8   :  { %v13357_v60 = vpop.xlane.xlu2 %6449  ;;  %9727 = vmatmul.msk.bf16.vlgmr.msra.gmra.mxu2 %vm766_vm4, %v6498_v4  ;;  %7336 = vrot.lane.b32.xlu0 %v12685_v0, %s10503_s30 }
0x12c9   :  { %v6499_v58 = vpack.c.bf16 %v6483_v38, %v6483_v38  ;;  %6817 = vmatpush.bf16.msra.mxu2 %v6808_v31 }
0x12cb   :  { %9728 = vmatmul.msk.bf16.vlgmr.msra.gmra.mxu3 %vm766_vm4, %v6499_v58 }
0x12cd   :  { %7567 = vrot.lane.b32.xlu2 %v12548_v29, %s10505_s17 }
0x12ce   :  { %7177 = vrot.lane.b32.xlu1 %v12603_v11, %s10504_s16 }
0x12cf   :  { %v6444_v63 = vpop.xlane.xlu0 %6443 }
0x12d0   :  { %10306 = vrcp.f32 %v6444_v63  ;;  %v6824_v17 = vpop.permute.xlu2 %6823  ;;  %7267 = vrot.lane.b32.xlu0 %v12623_v46, %s10503_s30 }
0x12d1   :  { %v6829_v28 = vsel %vm770_vm2, %v6824_v17, 0  ;;  %10308 = vrcp.f32 %v6453_v2  ;;  %v5929_v17 = vpack.c.bf16 %v13116_v27, %v13095_v24 }
0x12d2   :  { %6838 = vmatpush.bf16.msra.mxu3 %v6829_v28 }
0x12d5   :  { %7714 = vrot.lane.b32.xlu2 %v12566_v9, %s10505_s17 }
0x12d6   :  { %v10307_v51 = vpop.eup %10306  ;;  %7338 = vrot.lane.b32.xlu1 %v12685_v0, %s10504_s16 }
0x12d7   :  { %v6486_v21 = vmul.f32 %v10307_v51, %v13254_v23  ;;  %v6459_v41 = vpop.xlane.xlu0 %6458  ;;  %v10309_v26 = vpop.eup %10308  ;;  %v9669_v23 = vld [vmem:[%s14298_s3 + $0x10] sm:$0xf] }
0x12d8   :  { %7609 = vrot.lane.b32.xlu0 %v12533_v50, %s10505_s17  ;;  %v6489_v53 = vmul.f32 %v10309_v26, %v13245_v44  ;;  %v7017_v45 = vpop.permute.xlu2 %7016  ;;  %v6960_v36 = vsel %vm2144_vm5, %v9669_v23, 0  ;;  %v5917_v26 = vld.sshfl [vmem:[#allocation1 + $0x10] sm:$0xff pattern:$0x75316420] }
0x12d9   :  { %v6502_v10 = vpack.c.bf16 %v6486_v21, %v6486_v21  ;;  %v7022_v34 = vsel %vm175_vm1, %v7017_v45, 0  ;;  %v9670_v45 = vld [vmem:[%s14298_s3 + $0x14] sm:$0xf] }
0x12da   :  { %v6505_v52 = vpack.c.bf16 %v6489_v53, %v6489_v53 }
0x12db   :  { %9731 = vmatmul.msk.bf16.vlgmr.msrb.gmra.mxu2 %vm766_vm4, %v6502_v10 }
0x12de   :  { %7313 = vrot.lane.b32.xlu1 %v12644_v14, %s10503_s30 }
0x12e0   :  { %7588 = vrot.lane.b32.xlu0 %v12546_v5, %s10505_s17  ;;  %v7040_v35 = vpop.permute.xlu2 %7039 }
0x12e1   :  { %v7045_v59 = vsel %vm175_vm1, %v7040_v35, 0 }
0x12e6   :  { %7292 = vrot.lane.b32.xlu1 %v12626_v15, %s10504_s16  ;;  %s10510_s16 = smov [#allocation2]  }
0x12e8   :  { %7651 = vrot.lane.b32.xlu0 %v12573_v61, %s10505_s17  ;;  %v6447_v49 = vpop.xlane.xlu1 %6446  ;;  %v7061_v20 = vpop.permute.xlu2 %7060 }
0x12e9   :  { %10310 = vrcp.f32 %v6447_v49 }
0x12ea   :  { %v6782_v42 = vpop.permute.xlu0 %6781 }
0x12eb   :  { %v6787_v55 = vsel %vm770_vm2, %v6782_v42, 0 }
0x12ec   :  { %6796 = vmatpush.bf16.msra.mxu1 %v6787_v55  ;;  %v6916_v55 = vsel %vm2144_vm5, %v9670_v45, 0 }
0x12ee   :  { %7630 = vrot.lane.b32.xlu1 %v12538_v13, %s10505_s17 }
0x12ef   :  { %v10311_v62 = vpop.eup %10310  ;;  %9734 = vmatmul.msk.bf16.vlgmr.msra.gmra.mxu1 %vm766_vm4, %v6505_v52 }
0x12f0   :  { %6969 = vmatpush.bf16.msrb.mxu1 %v6960_v36  ;;  %v6487_v47 = vmul.f32 %v10311_v62, %v13266_v6  ;;  %7777 = vrot.lane.b32.xlu0 %v12585_v39, %s10505_s17  ;;  %v6456_v44 = vpop.xlane.xlu1 %6455  ;;  %v7084_v18 = vpop.permute.xlu2 %7083 }
0x12f1   :  { %10312 = vrcp.f32 %v6456_v44  ;;  %v5918_v44 = vld.sshfl [vmem:[#allocation1 + $0x20] sm:$0xff pattern:$0x75316420] }
0x12f2   :  { %v6503_v32 = vpack.c.bf16 %v6487_v47, %v6487_v47  ;;  %v6994_v57 = vpop.permute.xlu0 %6993  ;;  %10314 = vrcp.f32 %v6459_v41 }
0x12f3   :  { %v6999_v12 = vsel %vm175_vm1, %v6994_v57, 0  ;;  %10316 = vrcp.f32 %v13357_v60 }
0x12f4   :  { %9732 = vmatmul.msk.bf16.vlgmr.msrb.gmra.mxu3 %vm766_vm4, %v6503_v32  ;;  %7008 = vmatpush.bf16.xpose.msrb.mxu2 %v6999_v12  ;;  %v5919_v12 = vld.sshfl [vmem:[#allocation1 + $0x30] sm:$0xff pattern:$0x75316420] }
0x12f5   :  { %7031 = vmatpush.bf16.xpose.msrb.mxu3 %v7022_v34 }
0x12f6   :  { %7693 = vrot.lane.b32.xlu1 %v12561_v22, %s10505_s17 }
0x12f7   :  { %v10313_v6 = vpop.eup %10312 }
0x12f8   :  { %v6490_v56 = vmul.f32 %v10313_v6, %v13274_v48  ;;  %7756 = vrot.lane.b32.xlu0 %v12659_v37, %s10505_s17  ;;  %v10315_v7 = vpop.eup %10314  ;;  %v5916_v48 = vld.sshfl [vmem:[#allocation1] sm:$0xff pattern:$0x75316420]  ;;  %v7155_v51 = vpop.permute.xlu2 %7154 }
0x12f9   :  { %v6491_v54 = vmul.f32 %v10315_v7, %v13258_v1  ;;  %v10317_v38 = vpop.eup %10316  ;;  %v5930_v27 = vpack.c.bf16 %v5917_v26, %v5916_v48  ;;  %v7160_v52 = vsel %vm175_vm1, %v7155_v51, 0 }
0x12fa   :  { %v6506_v30 = vpack.c.bf16 %v6490_v56, %v6490_v56  ;;  %v7015_v33 = vpop.permute.xlu0 %7014  ;;  %v6488_v31 = vmul.f32 %v10317_v38, %v13247_v19  ;;  %v5931_v56 = vpack.c.bf16 %v5919_v12, %v5918_v44 }
0x12fb   :  { %v6507_v43 = vpack.c.bf16 %v6491_v54, %v6491_v54 }
0x12fc   :  { %9735 = vmatmul.msk.bf16.vlgmr.msra.gmra.mxu2 %vm766_vm4, %v6506_v30  ;;  %v6504_v63 = vpack.c.bf16 %v6488_v31, %v6488_v31 }
0x12fd   :  { %7054 = vmatpush.bf16.xpose.msra.mxu2 %v7045_v59 }
0x12fe   :  { %7672 = vrot.lane.b32.xlu1 %v12596_v25, %s10505_s17 }
0x12ff   :  { %9741 = vmatmul.msk.bf16.vlgmr.msrb.gmra.mxu1 %vm175_vm1, %v5928_v40 }
0x1300   :  { %v7224_v23 = vpop.permute.xlu2 %7223 }
0x1301   :  { %v6525_v16 = vpop.f32.mrf.mxu0  ;;  %v7229_v7 = vsel %vm175_vm1, %v7224_v23, 0 }
0x1302   :  { %6860 = vst [vmem:[#allocation1] ss:$2 sm:$0xff] %v6525_v16  ;;  %v7038_v4 = vpop.permute.xlu0 %7037 }
0x1304   :  { %9736 = vmatmul.msk.bf16.vlgmr.msra.gmra.mxu3 %vm766_vm4, %v6507_v43 }
0x1308   :  { %v6761_v8 = vpop.permute.xlu1 %6760  ;;  %v13440_v62 = vpop.permute.xlu2 %7244 }
0x1309   :  { %v6766_v60 = vsel %vm770_vm2, %v6761_v8, 0  ;;  %v6527_v1 = vpop.f32.mrf.mxu0 }
0x130a   :  { %v7109_v58 = vpop.permute.xlu0 %7108  ;;  %6775 = vmatpush.bf16.msra.mxu0 %v6766_v60 }
0x130b   :  { %v7114_v2 = vsel %vm175_vm1, %v7109_v58, 0 }
0x130d   :  { %9733 = vmatmul.msk.bf16.vlgmr.msra.gmra.mxu0 %vm766_vm4, %v6504_v63 }
0x130e   :  { %6925 = vmatpush.bf16.msrb.mxu0 %v6916_v55 }
0x130f   :  { %9742 = vmatmul.msk.bf16.gmra.mxu1 %vm175_vm1, %v5929_v17 }
0x1310   :  { %v6992_v28 = vpop.permute.xlu1 %6991  ;;  %v7316_v30 = vpop.permute.xlu2 %7315 }
0x1311   :  { %9745 = vmatmul.msk.bf16.vlgmr.msrb.gmra.mxu2 %vm175_vm1, %v6992_v28  ;;  %v7321_v1 = vsel %vm175_vm1, %v7316_v30, 0 }
0x1312   :  { %v7132_v19 = vpop.permute.xlu0 %7131 }
0x1313   :  { %v7137_v42 = vsel %vm175_vm1, %v7132_v19, 0 }
0x1314   :  { %9746 = vmatmul.msk.bf16.vlgmr.msrb.gmra.mxu3 %vm175_vm1, %v7015_v33 }
0x1318   :  { %v7063_v21 = vpop.permute.xlu1 %7062  ;;  %v7199_v48 = vpop.permute.xlu2 %7198 }
0x1319   :  { %v7068_v10 = vsel %vm175_vm1, %v7063_v21, 0 }
0x131a   :  { %v13426_v41 = vpop.permute.xlu0 %7152  ;;  %7077 = vmatpush.bf16.xpose.msra.mxu3 %v7068_v10 }
0x131d   :  { %v6546_v24 = vpop.f32.mrf.mxu1 }
0x131e   :  { %6862 = vst [vmem:[#allocation1 + $0x1] ss:$2 sm:$0xff] %v6546_v24 }
0x131f   :  { %9743 = vmatmul.msk.bf16.gmra.mxu1 %vm175_vm1, %v5930_v27 }
0x1320   :  { %v7086_v49 = vpop.permute.xlu1 %7085  ;;  %v7270_v17 = vpop.permute.xlu2 %7269 }
0x1321   :  { %v7091_v53 = vsel %vm175_vm1, %v7086_v49, 0  ;;  %9747 = vmatmul.msk.bf16.vlgmr.msra.gmra.mxu2 %vm175_vm1, %v7038_v4 }
0x1322   :  { %7123 = vmatpush.bf16.xpose.msrb.mxu3 %v7114_v2  ;;  %v13435_v36 = vpop.permute.xlu0 %7221  ;;  %7100 = vmatpush.bf16.xpose.msrb.mxu2 %v7091_v53  ;;  %v7275_v2 = vsel %vm175_vm1, %v7270_v17, 0 }
0x1324   :  { %9748 = vmatmul.msk.bf16.vlgmr.msra.gmra.mxu3 %vm175_vm1, %v7061_v20 }
0x1325   :  { %v6548_v47 = vpop.f32.mrf.mxu1  ;;  %v6875_v31 = vld.sshfl [vmem:[#allocation1] sm:$0xff pattern:$0x75316420] }
0x1328   :  { %v6609_v32 = vpop.f32.mrf.mxu0  ;;  %v7107_v57 = vpop.permute.xlu1 %7106 }
0x1329   :  { %6868 = vst [vmem:[#allocation1 + $0x20] ss:$2 sm:$0xff] %v6609_v32  ;;  %v7291_v49 = vpop.permute.xlu2 %7290 }
0x132a   :  { %7146 = vmatpush.bf16.xpose.msra.mxu2 %v7137_v42  ;;  %7169 = vmatpush.bf16.xpose.msra.mxu3 %v7160_v52  ;;  %v7201_v35 = vpop.permute.xlu0 %7200 }
0x132b   :  { %v7206_v34 = vsel %vm175_vm1, %v7201_v35, 0 }
0x132c   :  { %7215 = vmatpush.bf16.xpose.msra.mxu1 %v7206_v34 }
0x132d   :  { %v6630_v6 = vpop.f32.mrf.mxu1 }
0x132e   :  { %6870 = vst [vmem:[#allocation1 + $0x21] ss:$2 sm:$0xff] %v6630_v6 }
0x132f   :  { %9744 = vmatmul.msk.bf16.gmra.mxu1 %vm175_vm1, %v5931_v56 }
0x1330   :  { %v6611_v33 = vpop.f32.mrf.mxu0  ;;  %v7130_v59 = vpop.permute.xlu1 %7129 }
0x1331   :  { %9749 = vmatmul.msk.bf16.vlgmr.msrb.gmra.mxu2 %vm175_vm1, %v7084_v18  ;;  %v13468_v32 = vpop.permute.xlu2 %7567 }
0x1332   :  { %7238 = vmatpush.bf16.xpose.msrb.mxu2 %v7229_v7  ;;  %v13446_v20 = vpop.permute.xlu0 %7175 }
0x1334   :  { %9750 = vmatmul.msk.bf16.vlgmr.msrb.gmra.mxu3 %vm175_vm1, %v7107_v57 }
0x1335   :  { %v6632_v40 = vpop.f32.mrf.mxu1  ;;  %v6877_v47 = vld.sshfl [vmem:[#allocation1 + $0x20] sm:$0xff pattern:$0x75316420] }
0x1336   :  { %v6567_v54 = vpop.f32.mrf.mxu2 }
0x1337   :  { %6864 = vst [vmem:[#allocation1 + $0x10] ss:$2 sm:$0xff] %v6567_v54 }
0x1338   :  { %v7247_v16 = vpop.permute.xlu1 %7246 }
0x1339   :  { %v7252_v43 = vsel %vm175_vm1, %v7247_v16, 0  ;;  %v7715_v56 = vpop.permute.xlu2 %7714 }
0x133a   :  { %v13450_v4 = vpop.permute.xlu0 %7336  ;;  %7261 = vmatpush.bf16.xpose.msrb.mxu3 %v7252_v43  ;;  %v7720_v33 = vsel %vm770_vm2, %v7715_v56, 0 }
0x133b   :  { %v6588_v38 = vpop.f32.mrf.mxu3 }
0x133c   :  { %6866 = vst [vmem:[#allocation1 + $0x11] ss:$2 sm:$0xff] %v6588_v38 }
0x133d   :  { %v6693_v8 = vpop.f32.mrf.mxu0 }
0x133e   :  { %6879 = vst [vmem:[#allocation1] ss:$2 sm:$0xff] %v6693_v8  ;;  %v6569_v18 = vpop.f32.mrf.mxu2 }
0x133f   :  { %9754 = vmatmul.msk.bf16.vlgmr.msra.gmra.mxu1 %vm175_vm1, %v7199_v48 }
0x1340   :  { %v6714_v60 = vpop.f32.mrf.mxu1  ;;  %v7178_v58 = vpop.permute.xlu1 %7177 }
0x1341   :  { %6880 = vst [vmem:[#allocation1 + $0x1] ss:$2 sm:$0xff] %v6714_v60  ;;  %9751 = vmatmul.msk.bf16.vlgmr.msra.gmra.mxu2 %vm175_vm1, %v7130_v59  ;;  %v7183_v63 = vsel %vm175_vm1, %v7178_v58, 0 }
0x1342   :  { %7330 = vmatpush.bf16.xpose.msra.mxu2 %v7321_v1  ;;  %7192 = vmatpush.bf16.xpose.msra.mxu0 %v7183_v63  ;;  %v13456_v19 = vpop.permute.xlu0 %7267 }
0x1343   :  { %v6590_v28 = vpop.f32.mrf.mxu3  ;;  %v6876_v51 = vld.sshfl [vmem:[#allocation1 + $0x10] sm:$0xff pattern:$0x75316420] }
0x1344   :  { %9752 = vmatmul.msk.bf16.vlgmr.msra.gmra.mxu3 %vm175_vm1, %v13426_v41  ;;  %v6899_v21 = vpack.c.bf16 %v6876_v51, %v6875_v31 }
0x1345   :  { %v6695_v10 = vpop.f32.mrf.mxu0 }
0x1346   :  { %9737 = vmatmul.msk.bf16.vlgmr.msrb.gmra.mxu0 %vm175_vm1, %v6899_v21 }
0x1348   :  { %v6716_v26 = vpop.f32.mrf.mxu1  ;;  %v7339_v23 = vpop.permute.xlu1 %7338 }
0x1349   :  { %v7344_v24 = vsel %vm175_vm1, %v7339_v23, 0 }
0x134a   :  { %7284 = vmatpush.bf16.xpose.msrb.mxu0 %v7275_v2  ;;  %7353 = vmatpush.bf16.xpose.msra.mxu3 %v7344_v24  ;;  %v7610_v53 = vpop.permute.xlu0 %7609 }
0x134b   :  { %v6651_v27 = vpop.f32.mrf.mxu2  ;;  %v7615_v41 = vsel %vm770_vm2, %v7610_v53, 0 }
0x134c   :  { %6872 = vst [vmem:[#allocation1 + $0x30] ss:$2 sm:$0xff] %v6651_v27 }
0x134e   :  { %v6672_v45 = vpop.f32.mrf.mxu3 }
0x134f   :  { %6874 = vst [vmem:[#allocation1 + $0x31] ss:$2 sm:$0xff] %v6672_v45 }
0x1350   :  { %v7314_v42 = vpop.permute.xlu1 %7313 }
0x1351   :  { %9755 = vmatmul.msk.bf16.vlgmr.msrb.gmra.mxu2 %vm175_vm1, %v13435_v36 }
0x1352   :  { %7624 = vmatpush.bf16.msrb.mxu2 %v7615_v41  ;;  %v7589_v35 = vpop.permute.xlu0 %7588 }
0x1353   :  { %v6653_v55 = vpop.f32.mrf.mxu2  ;;  %v7594_v6 = vsel %vm770_vm2, %v7589_v35, 0  ;;  %v7573_v35 = vsel %vm770_vm2, %v13468_v32, 0 }
0x1354   :  { %9756 = vmatmul.msk.bf16.vlgmr.msrb.gmra.mxu3 %vm175_vm1, %v13440_v62 }
0x1356   :  { %v6674_v52 = vpop.f32.mrf.mxu3  ;;  %v6878_v44 = vld.sshfl [vmem:[#allocation1 + $0x30] sm:$0xff pattern:$0x75316420] }
0x1357   :  { %v6900_v57 = vpack.c.bf16 %v6878_v44, %v6877_v47 }
0x1358   :  { %v7293_v12 = vpop.permute.xlu1 %7292 }
0x1359   :  { %9738 = vmatmul.msk.bf16.gmra.mxu0 %vm175_vm1, %v6900_v57  ;;  %v7298_v34 = vsel %vm175_vm1, %v7293_v12, 0 }
0x135a   :  { %7307 = vmatpush.bf16.xpose.msrb.mxu1 %v7298_v34 }
0x135e   :  { %v6735_v36 = vpop.f32.mrf.mxu2 }
0x135f   :  { %6881 = vst [vmem:[#allocation1 + $0x10] ss:$2 sm:$0xff] %v6735_v36 }
0x1360   :  { %v7631_v62 = vpop.permute.xlu1 %7630 }
0x1361   :  { %9759 = vmatmul.msk.bf16.vlgmr.msra.gmra.mxu2 %vm175_vm1, %v7314_v42  ;;  %v7636_v30 = vsel %vm770_vm2, %v7631_v62, 0  ;;  %9758 = vmatmul.msk.bf16.vlgmr.msrb.gmra.mxu1 %vm175_vm1, %v7291_v49 }
0x1362   :  { %7603 = vmatpush.bf16.msra.mxu1 %v7594_v6  ;;  %7645 = vmatpush.bf16.msrb.mxu3 %v7636_v30 }
0x1364   :  { %9760 = vmatmul.msk.bf16.vlgmr.msra.gmra.mxu3 %vm175_vm1, %v13450_v4  ;;  %v6887_v4 = vld.sshfl [vmem:[#allocation1] sm:$0xff pattern:$0x75316420] }
0x1366   :  { %7729 = vmatpush.bf16.msra.mxu3 %v7720_v33  ;;  %v6737_v7 = vpop.f32.mrf.mxu2 }
0x1368   :  { %v7694_v59 = vpop.permute.xlu1 %7693 }
0x1369   :  { %v7699_v40 = vsel %vm770_vm2, %v7694_v59, 0 }
0x136a   :  { %7708 = vmatpush.bf16.msra.mxu2 %v7699_v40 }
0x136c   :  { %v6798_v54 = vpop.f32.mrf.mxu1 }
0x136d   :  { %6884 = vst [vmem:[#allocation1 + $0x21] ss:$2 sm:$0xff] %v6798_v54 }
0x1370   :  { %v7673_v48 = vpop.permute.xlu1 %7672 }
0x1371   :  { %v7678_v16 = vsel %vm770_vm2, %v7673_v48, 0 }
0x1372   :  { %7687 = vmatpush.bf16.msrb.mxu1 %v7678_v16 }
0x1374   :  { %v6800_v43 = vpop.f32.mrf.mxu1 }
0x1377   :  { %v6756_v38 = vpop.f32.mrf.mxu3 }
0x1378   :  { %6882 = vst [vmem:[#allocation1 + $0x11] ss:$2 sm:$0xff] %v6756_v38 }
0x137c   :  { %v13481_v31 = vpop.f32.mrf.mxu1 }
0x137f   :  { %v6758_v8 = vpop.f32.mrf.mxu3  ;;  %v6819_v18 = vpop.f32.mrf.mxu2  ;;  %v6888_v60 = vld.sshfl [vmem:[#allocation1 + $0x10] sm:$0xff pattern:$0x75316420] }
0x1380   :  { %6885 = vst [vmem:[#allocation1 + $0x30] ss:$2 sm:$0xff] %v6819_v18  ;;  %v6901_v1 = vpack.c.bf16 %v6888_v60, %v6887_v4 }
0x1382   :  { %9739 = vmatmul.msk.bf16.gmra.mxu0 %vm175_vm1, %v6901_v1 }
0x1384   :  { %v13484_v58 = vpop.f32.mrf.mxu1 }
0x1387   :  { %v6821_v63 = vpop.f32.mrf.mxu2  ;;  %v6840_v17 = vpop.f32.mrf.mxu3 }
0x1388   :  { %6886 = vst [vmem:[#allocation1 + $0x31] ss:$2 sm:$0xff] %v6840_v17 }
0x138a   :  { %v6777_v28 = vpop.f32.mrf.mxu0 }
0x138b   :  { %6883 = vst [vmem:[#allocation1 + $0x20] ss:$2 sm:$0xff] %v6777_v28 }
0x138c   :  { %v13486_v51 = vpop.f32.mrf.mxu1 }
0x138f   :  { %v6842_v21 = vpop.f32.mrf.mxu3  ;;  %v6890_v26 = vld.sshfl [vmem:[#allocation1 + $0x30] sm:$0xff pattern:$0x75316420] }
0x1392   :  { %v6779_v10 = vpop.f32.mrf.mxu0  ;;  %v6889_v2 = vld.sshfl [vmem:[#allocation1 + $0x20] sm:$0xff pattern:$0x75316420] }
0x1393   :  { %v6902_v23 = vpack.c.bf16 %v6890_v26, %v6889_v2 }
0x1394   :  { %v13488_v24 = vpop.f32.mrf.mxu1  ;;  %v7010_v27 = vpop.f32.mrf.mxu2 }
0x1395   :  { %v13490_v49 = vmul.f32 0.35355338, %v7010_v27  ;;  %9740 = vmatmul.msk.bf16.gmra.mxu0 %vm175_vm1, %v6902_v23 }
0x1397   :  { %v7033_v53 = vpop.f32.mrf.mxu3  ;;  %v7375_v45 = vsel %vm571_vm3, %v13490_v49, -inf }
0x1398   :  { %v13495_v41 = vmul.f32 0.35355338, %v7033_v53  ;;  %7376 = vmax.xlane.f32.xlu2 %v7375_v45 }
0x139a   :  { %v7378_v42 = vsel %vm571_vm3, %v13495_v41, -inf }
0x139b   :  { %7379 = vmax.xlane.f32.xlu1 %v7378_v42 }
0x139c   :  { %v13499_v55 = vpop.f32.mrf.mxu1  ;;  %v7012_v52 = vpop.f32.mrf.mxu2 }
0x139f   :  { %v7035_v47 = vpop.f32.mrf.mxu3 }
0x13a4   :  { %v13501_v44 = vpop.f32.mrf.mxu1  ;;  %v7056_v57 = vpop.f32.mrf.mxu2 }
0x13a5   :  { %v13505_v12 = vmul.f32 0.35355338, %v7056_v57  ;;  %9753 = vmatmul.msk.bf16.vlgmr.msra.gmra.mxu0 %vm175_vm1, %v13446_v20  ;;  %v7652_v20 = vpop.permute.xlu0 %7651 }
0x13a6   :  { %7582 = vmatpush.bf16.msra.mxu0 %v7573_v35  ;;  %v7657_v59 = vsel %vm770_vm2, %v7652_v20, 0 }
0x13a7   :  { %v7079_v34 = vpop.f32.mrf.mxu3  ;;  %v7381_v6 = vsel %vm571_vm3, %v13505_v12, -inf }
0x13a8   :  { %v13511_v36 = vmul.f32 0.35355338, %v7079_v34  ;;  %7382 = vmax.xlane.f32.xlu1 %v7381_v6 }
0x13aa   :  { %v7384_v56 = vsel %vm571_vm3, %v13511_v36, -inf }
0x13ab   :  { %7385 = vmax.xlane.f32.xlu0 %v7384_v56 }
0x13ac   :  { %v13515_v62 = vpop.f32.mrf.mxu1  ;;  %v7058_v32 = vpop.f32.mrf.mxu2 }
0x13af   :  { %v7081_v30 = vpop.f32.mrf.mxu3 }
0x13b0   :  { %7735 = vrot.lane.b32.xlu2 %v12603_v11, %s10505_s17 }
0x13b4   :  { %v13519_v33 = vpop.f32.mrf.mxu1  ;;  %v7102_v7 = vpop.f32.mrf.mxu2 }
0x13b5   :  { %14334 = vst [vmem:[#allocation14_spill] sm:$0xff] %v13519_v33  ;;  %9757 = vmatmul.msk.bf16.vlgmr.msrb.gmra.mxu0 %vm175_vm1, %v13456_v19  ;;  %v13549_v47 = vmul.f32 0.35355338, %v7102_v7 }
0x13b6   :  { %7666 = vmatpush.bf16.msrb.mxu0 %v7657_v59 }
0x13b7   :  { %v7125_v40 = vpop.f32.mrf.mxu3  ;;  %v7387_v30 = vsel %vm571_vm3, %v13549_v47, -inf }
0x13b8   :  { %7861 = vrot.lane.b32.xlu2 %v12644_v14, %s10505_s17  ;;  %v13539_v2 = vmul.f32 0.35355338, %v7125_v40 }
0x13ba   :  { %v7390_v53 = vsel %vm571_vm3, %v13539_v2, -inf }
0x13bc   :  { %v7104_v54 = vpop.f32.mrf.mxu2  ;;  %v7217_v48 = vpop.f32.mrf.mxu1 }
0x13bd   :  { %v13526_v16 = vmul.f32 0.35355338, %v7217_v48 }
0x13bf   :  { %v7127_v43 = vpop.f32.mrf.mxu3  ;;  %v7402_v38 = vsel %vm571_vm3, %v13526_v16, -inf }
0x13c0   :  { %7403 = vmax.xlane.f32.xlu0 %v7402_v38 }
0x13c1   :  { %7798 = vrot.lane.b32.xlu1 %v12588_v3, %s10505_s17 }
0x13c3   :  { %v6927_v8 = vpop.f32.mrf.mxu0 }
0x13c4   :  { %v13533_v19 = vadd.f32 %v13481_v31, %v6927_v8  ;;  %v7148_v18 = vpop.f32.mrf.mxu2  ;;  %v7219_v4 = vpop.f32.mrf.mxu1 }
0x13c5   :  { %v13547_v42 = vmul.f32 0.35355338, %v7148_v18 }
0x13c7   :  { %v7171_v60 = vpop.f32.mrf.mxu3  ;;  %v7393_v56 = vsel %vm571_vm3, %v13547_v42, -inf }
0x13c8   :  { %v13535_v1 = vmul.f32 0.35355338, %v7171_v60 }
0x13ca   :  { %v7396_v63 = vsel %vm571_vm3, %v13535_v1, -inf }
0x13cb   :  { %7397 = vmax.xlane.f32.xlu0 %v7396_v63  ;;  %v13551_v57 = vpop.f32.mrf.mxu0 }
0x13cc   :  { %v7150_v17 = vpop.f32.mrf.mxu2 }
0x13cd   :  { %v13581_v17 = vpop.permute.xlu0 %7777 }
0x13cf   :  { %v7173_v28 = vpop.f32.mrf.mxu3 }
0x13d4   :  { %v7240_v21 = vpop.f32.mrf.mxu2 }
0x13d5   :  { %v13553_v35 = vmul.f32 0.35355338, %v7240_v21 }
0x13d6   :  { %v13563_v59 = vpop.f32.mrf.mxu0 }
0x13d7   :  { %v7263_v10 = vpop.f32.mrf.mxu3  ;;  %v7405_v32 = vsel %vm571_vm3, %v13553_v35, -inf }
0x13d8   :  { %v13565_v40 = vmul.f32 0.35355338, %v7263_v10 }
0x13da   :  { %v7408_v43 = vsel %vm571_vm3, %v13565_v40, -inf }
0x13dc   :  { %v7242_v26 = vpop.f32.mrf.mxu2 }
0x13de   :  { %v7309_v23 = vpop.f32.mrf.mxu1  ;;  %v13573_v8 = vpop.f32.mrf.mxu0 }
0x13df   :  { %v7265_v27 = vpop.f32.mrf.mxu3  ;;  %v13541_v31 = vmul.f32 0.35355338, %v7309_v23 }
0x13e1   :  { %7391 = vmax.xlane.f32.xlu2 %v7390_v53  ;;  %v7414_v45 = vsel %vm571_vm3, %v13541_v31, -inf }
0x13e2   :  { %7415 = vmax.xlane.f32.xlu0 %v7414_v45  ;;  %v13589_v45 = vpop.permute.xlu0 %7756 }
0x13e4   :  { %v7332_v52 = vpop.f32.mrf.mxu2 }
0x13e5   :  { %v13571_v38 = vmul.f32 0.35355338, %v7332_v52 }
0x13e6   :  { %v7311_v34 = vpop.f32.mrf.mxu1 }
0x13e7   :  { %v7355_v6 = vpop.f32.mrf.mxu3  ;;  %v7417_v18 = vsel %vm571_vm3, %v13571_v38, -inf }
0x13e8   :  { %v13561_v20 = vmul.f32 0.35355338, %v7355_v6 }
0x13e9   :  { %7394 = vmax.xlane.f32.xlu2 %v7393_v56 }
0x13ea   :  { %7406 = vmax.xlane.f32.xlu0 %v7405_v32  ;;  %v7420_v48 = vsel %vm571_vm3, %v13561_v20, -inf }
0x13eb   :  { %7388 = vmax.xlane.f32.xlu1 %v7387_v30 }
0x13ec   :  { %v7334_v7 = vpop.f32.mrf.mxu2 }
0x13ef   :  { %v7357_v54 = vpop.f32.mrf.mxu3 }
0x13f1   :  { %7421 = vmax.xlane.f32.xlu2 %v7420_v48 }
0x13f3   :  { %7409 = vmax.xlane.f32.xlu1 %v7408_v43 }
0x13fb   :  { %7418 = vmax.xlane.f32.xlu1 %v7417_v18 }
0x13ff   :  { %v13577_v4 = vpop.f32.mrf.mxu0 }
0x1407   :  { %v13579_v60 = vpop.f32.mrf.mxu0 }
0x140b   :  { %v7377_v63 = vpop.xlane.xlu2 %7376 }
0x140c   :  { %v7423_v28 = vsub.f32 %v13490_v49, %v7377_v63 }
0x140e   :  { %v7439_v21 = vmul.f32 1.442695, %v7423_v28  ;;  %v7380_v10 = vpop.xlane.xlu1 %7379 }
0x140f   :  { %v7424_v26 = vsub.f32 %v13495_v41, %v7380_v10 }
0x1410   :  { %10318 = vpow2.f32 %v7439_v21 }
0x1411   :  { %v7441_v23 = vmul.f32 1.442695, %v7424_v26 }
0x1412   :  { %v13585_v27 = vpop.f32.mrf.mxu0 }
0x1413   :  { %10320 = vpow2.f32 %v7441_v23 }
0x1416   :  { %v13587_v53 = vpop.eup %10318 }
0x1417   :  { %v7471_v52 = vsel %vm571_vm3, %v13587_v53, 0.0 }
0x1418   :  { %7472 = vadd.xlane.f32.xlu1 %v7471_v52 }
0x1419   :  { %v13593_v34 = vpop.eup %10320 }
0x141a   :  { %v13595_v49 = vpop.f32.mrf.mxu0  ;;  %v7474_v41 = vsel %vm571_vm3, %v13593_v34, 0.0 }
0x141b   :  { %14335 = vst [vmem:[#allocation15_spill] sm:$0xff] %v13595_v49  ;;  %7475 = vadd.xlane.f32.xlu2 %v7474_v41  ;;  %v7383_v6 = vpop.xlane.xlu1 %7382 }
0x141c   :  { %v7425_v56 = vsub.f32 %v13505_v12, %v7383_v6 }
0x141e   :  { %v7443_v32 = vmul.f32 1.442695, %v7425_v56  ;;  %v7386_v30 = vpop.xlane.xlu0 %7385 }
0x141f   :  { %v7426_v7 = vsub.f32 %v13511_v36, %v7386_v30  ;;  %v13618_v30 = vpop.permute.xlu2 %7735 }
0x1420   :  { %10322 = vpow2.f32 %v7443_v32 }
0x1421   :  { %v7445_v54 = vmul.f32 1.442695, %v7426_v7 }
0x1422   :  { %v7194_v48 = vpop.f32.mrf.mxu0 }
0x1423   :  { %10324 = vpow2.f32 %v7445_v54  ;;  %v13601_v43 = vmul.f32 0.35355338, %v7194_v48 }
0x1425   :  { %v7399_v18 = vsel %vm571_vm3, %v13601_v43, -inf }
0x1426   :  { %v13605_v63 = vpop.eup %10322  ;;  %7400 = vmax.xlane.f32.xlu2 %v7399_v18 }
0x1427   :  { %v7477_v28 = vsel %vm571_vm3, %v13605_v63, 0.0  ;;  %v13624_v48 = vpop.permute.xlu2 %7861 }
0x1428   :  { %7478 = vadd.xlane.f32.xlu0 %v7477_v28 }
0x1429   :  { %v13609_v12 = vpop.eup %10324 }
0x142a   :  { %v7196_v21 = vpop.f32.mrf.mxu0  ;;  %v7480_v36 = vsel %vm571_vm3, %v13609_v12, 0.0 }
0x142b   :  { %7481 = vadd.xlane.f32.xlu1 %v7480_v36 }
0x1432   :  { %v7286_v10 = vpop.f32.mrf.mxu0 }
0x1433   :  { %v13613_v26 = vmul.f32 0.35355338, %v7286_v10  ;;  %v7404_v52 = vpop.xlane.xlu0 %7403  ;;  %v13627_v21 = vpop.permute.xlu1 %7798 }
0x1435   :  { %v7411_v23 = vsel %vm571_vm3, %v13613_v26, -inf }
0x1436   :  { %7412 = vmax.xlane.f32.xlu2 %v7411_v23 }
0x143a   :  { %v7288_v41 = vpop.f32.mrf.mxu0 }
0x143e   :  { %v7398_v6 = vpop.xlane.xlu0 %7397 }
0x143f   :  { %v7430_v56 = vsub.f32 %v13535_v1, %v7398_v6 }
0x1441   :  { %v7453_v32 = vmul.f32 1.442695, %v7430_v56 }
0x1443   :  { %10326 = vpow2.f32 %v7453_v32 }
0x1449   :  { %v13620_v7 = vpop.eup %10326 }
0x144a   :  { %v7492_v54 = vsel %vm571_vm3, %v13620_v7, 0.0 }
0x144b   :  { %7493 = vadd.xlane.f32.xlu1 %v7492_v54 }
0x1454   :  { %v7392_v18 = vpop.xlane.xlu2 %7391 }
0x1455   :  { %v7428_v28 = vsub.f32 %v13539_v2, %v7392_v18  ;;  %v7416_v1 = vpop.xlane.xlu0 %7415  ;;  %v7432_v18 = vsub.f32 %v13526_v16, %v7404_v52 }
0x1456   :  { %v7436_v56 = vsub.f32 %v13541_v31, %v7416_v1 }
0x1457   :  { %v7449_v36 = vmul.f32 1.442695, %v7428_v28 }
0x1458   :  { %v7465_v28 = vmul.f32 1.442695, %v7436_v56 }
0x1459   :  { %10328 = vpow2.f32 %v7449_v36  ;;  %v7457_v36 = vmul.f32 1.442695, %v7432_v18 }
0x145c   :  { %v7395_v10 = vpop.xlane.xlu2 %7394 }
0x145d   :  { %v7429_v23 = vsub.f32 %v13547_v42, %v7395_v10  ;;  %v7407_v49 = vpop.xlane.xlu0 %7406 }
0x145e   :  { %v7389_v41 = vpop.xlane.xlu1 %7388 }
0x145f   :  { %v13630_v6 = vpop.eup %10328  ;;  %v7451_v32 = vmul.f32 1.442695, %v7429_v23  ;;  %v7427_v54 = vsub.f32 %v13549_v47, %v7389_v41 }
0x1460   :  { %v7486_v33 = vsel %vm571_vm3, %v13630_v6, 0.0 }
0x1461   :  { %10330 = vpow2.f32 %v7451_v32  ;;  %v7447_v2 = vmul.f32 1.442695, %v7427_v54  ;;  %7487 = vadd.xlane.f32.xlu0 %v7486_v33  ;;  %v7433_v33 = vsub.f32 %v13553_v35, %v7407_v49 }
0x1463   :  { %10332 = vpow2.f32 %v7447_v2  ;;  %v7459_v41 = vmul.f32 1.442695, %v7433_v33 }
0x1464   :  { %10334 = vpow2.f32 %v7465_v28  ;;  %v7422_v32 = vpop.xlane.xlu2 %7421 }
0x1465   :  { %10336 = vpow2.f32 %v7457_v36  ;;  %v7438_v35 = vsub.f32 %v13561_v20, %v7422_v32 }
0x1466   :  { %v7410_v42 = vpop.xlane.xlu1 %7409 }
0x1467   :  { %v13637_v10 = vpop.eup %10330  ;;  %v7434_v31 = vsub.f32 %v13565_v40, %v7410_v42  ;;  %v7469_v36 = vmul.f32 1.442695, %v7438_v35 }
0x1468   :  { %v7489_v47 = vsel %vm571_vm3, %v13637_v10, 0.0 }
0x1469   :  { %7490 = vadd.xlane.f32.xlu0 %v7489_v47  ;;  %v13642_v1 = vpop.eup %10332  ;;  %v7461_v16 = vmul.f32 1.442695, %v7434_v31 }
0x146a   :  { %v7483_v52 = vsel %vm571_vm3, %v13642_v1, 0.0  ;;  %v13647_v23 = vpop.eup %10334 }
0x146b   :  { %7484 = vadd.xlane.f32.xlu2 %v7483_v52  ;;  %10338 = vpow2.f32 %v7461_v16  ;;  %v13650_v54 = vpop.eup %10336  ;;  %v7510_v2 = vsel %vm571_vm3, %v13647_v23, 0.0 }
0x146c   :  { %10340 = vpow2.f32 %v7459_v41  ;;  %v7498_v18 = vsel %vm571_vm3, %v13650_v54, 0.0 }
0x146e   :  { %v7419_v56 = vpop.xlane.xlu1 %7418 }
0x146f   :  { %v7437_v40 = vsub.f32 %v13571_v38, %v7419_v56 }
0x1471   :  { %7511 = vadd.xlane.f32.xlu0 %v7510_v2  ;;  %v7467_v49 = vmul.f32 1.442695, %v7437_v40  ;;  %v13657_v28 = vpop.eup %10338 }
0x1472   :  { %v13659_v42 = vpop.eup %10340  ;;  %v7504_v38 = vsel %vm571_vm3, %v13657_v28, 0.0 }
0x1473   :  { %7499 = vadd.xlane.f32.xlu2 %v7498_v18  ;;  %10342 = vpow2.f32 %v7467_v49  ;;  %v7501_v31 = vsel %vm571_vm3, %v13659_v42, 0.0  ;;  %v7741_v49 = vsel %vm770_vm2, %v13618_v30, 0 }
0x1474   :  { %10344 = vpow2.f32 %v7469_v36 }
0x1479   :  { %7505 = vadd.xlane.f32.xlu0 %v7504_v38  ;;  %v13665_v20 = vpop.eup %10342  ;;  %v7762_v38 = vsel %vm770_vm2, %v13589_v45, 0 }
0x147a   :  { %v13667_v47 = vpop.eup %10344  ;;  %v7513_v33 = vsel %vm571_vm3, %v13665_v20, 0.0 }
0x147b   :  { %7502 = vadd.xlane.f32.xlu2 %v7501_v31  ;;  %v7516_v16 = vsel %vm571_vm3, %v13667_v47, 0.0 }
0x1481   :  { %7514 = vadd.xlane.f32.xlu0 %v7513_v33 }
0x1483   :  { %7517 = vadd.xlane.f32.xlu2 %v7516_v16 }
0x148b   :  { %v7473_v52 = vpop.xlane.xlu1 %7472 }
0x148c   :  { %10346 = vrcp.f32 %v7473_v52 }
0x148e   :  { %v7476_v41 = vpop.xlane.xlu2 %7475 }
0x148f   :  { %10348 = vrcp.f32 %v7476_v41 }
0x1492   :  { %v10347_v56 = vpop.eup %10346 }
0x1493   :  { %v7535_v32 = vmul.f32 %v10347_v56, %v13587_v53 }
0x1495   :  { %v10349_v40 = vpop.eup %10348  ;;  %v7551_v2 = vpack.c.bf16 %v7535_v32, %v7535_v32  ;;  %7819 = vrot.lane.b32.xlu0 %v12623_v46, %s10505_s17  ;;  %v7783_v32 = vsel %vm770_vm2, %v13581_v17, 0 }
0x1496   :  { %v7536_v35 = vmul.f32 %v10349_v40, %v13593_v34 }
0x1497   :  { %9761 = vmatmul.msk.bf16.vlgmr.msra.gmra.mxu0 %vm766_vm4, %v7551_v2  ;;  %v7804_v2 = vsel %vm770_vm2, %v13627_v21, 0 }
0x1498   :  { %v7552_v18 = vpack.c.bf16 %v7536_v35, %v7536_v35  ;;  %7750 = vmatpush.bf16.msra.mxu0 %v7741_v49 }
0x1499   :  { %v7401_v36 = vpop.xlane.xlu2 %7400 }
0x149a   :  { %v7431_v53 = vsub.f32 %v13601_v43, %v7401_v36  ;;  %9762 = vmatmul.msk.bf16.vlgmr.msra.gmra.mxu1 %vm766_vm4, %v7552_v18 }
0x149b   :  { %7771 = vmatpush.bf16.msra.mxu1 %v7762_v38  ;;  %v7479_v31 = vpop.xlane.xlu0 %7478  ;;  %7840 = vrot.lane.b32.xlu2 %v12626_v15, %s10505_s17 }
0x149c   :  { %v7455_v33 = vmul.f32 1.442695, %v7431_v53  ;;  %10350 = vrcp.f32 %v7479_v31 }
0x149d   :  { %8062 = vrot.lane.b32.xlu0 %v12533_v50, %s10506_s22 }
0x149e   :  { %10352 = vpow2.f32 %v7455_v33  ;;  %v7482_v34 = vpop.xlane.xlu1 %7481 }
0x149f   :  { %10354 = vrcp.f32 %v7482_v34 }
0x14a2   :  { %v10351_v30 = vpop.eup %10350 }
0x14a3   :  { %v7537_v45 = vmul.f32 %v10351_v30, %v13605_v63  ;;  %8016 = vrot.lane.b32.xlu2 %v12548_v29, %s10506_s22 }
0x14a4   :  { %v13689_v16 = vpop.eup %10352 }
0x14a5   :  { %v10355_v43 = vpop.eup %10354  ;;  %v7553_v52 = vpack.c.bf16 %v7537_v45, %v7537_v45  ;;  %8060 = vrot.lane.b32.xlu0 %v12533_v50, %s10507_s23  ;;  %v7495_v41 = vsel %vm571_vm3, %v13689_v16, 0.0 }
0x14a6   :  { %v7538_v56 = vmul.f32 %v10355_v43, %v13609_v12  ;;  %7496 = vadd.xlane.f32.xlu1 %v7495_v41 }
0x14a7   :  { %9763 = vmatmul.msk.bf16.vlgmr.msrb.gmra.mxu2 %vm766_vm4, %v7553_v52 }
0x14a8   :  { %v7554_v63 = vpack.c.bf16 %v7538_v56, %v7538_v56  ;;  %7792 = vmatpush.bf16.msrb.mxu2 %v7783_v32  ;;  %v7867_v32 = vsel %vm770_vm2, %v13624_v48, 0 }
0x14a9   :  { %v7413_v40 = vpop.xlane.xlu2 %7412 }
0x14aa   :  { %v7435_v35 = vsub.f32 %v13613_v26, %v7413_v40  ;;  %9764 = vmatmul.msk.bf16.vlgmr.msrb.gmra.mxu3 %vm766_vm4, %v7554_v63 }
0x14ab   :  { %7813 = vmatpush.bf16.msrb.mxu3 %v7804_v2  ;;  %8014 = vrot.lane.b32.xlu2 %v12548_v29, %s10507_s23 }
0x14ac   :  { %v7463_v49 = vmul.f32 1.442695, %v7435_v35 }
0x14ad   :  { %8131 = vrot.lane.b32.xlu0 %v12596_v25, %s10506_s22 }
0x14ae   :  { %10356 = vpow2.f32 %v7463_v49 }
0x14b3   :  { %8085 = vrot.lane.b32.xlu2 %v12538_v13, %s10506_s22 }
0x14b4   :  { %v13709_v17 = vpop.eup %10356 }
0x14b5   :  { %8129 = vrot.lane.b32.xlu0 %v12596_v25, %s10507_s23  ;;  %v7507_v12 = vsel %vm571_vm3, %v13709_v17, 0.0 }
0x14b6   :  { %7508 = vadd.xlane.f32.xlu1 %v7507_v12 }
0x14bb   :  { %8083 = vrot.lane.b32.xlu2 %v12538_v13, %s10507_s23 }
0x14bd   :  { %8200 = vrot.lane.b32.xlu0 %v12603_v11, %s10506_s22 }
0x14be   :  { %v7494_v26 = vpop.xlane.xlu1 %7493 }
0x14bf   :  { %10358 = vrcp.f32 %v7494_v26 }
0x14c3   :  { %8154 = vrot.lane.b32.xlu2 %v12561_v22, %s10506_s22 }
0x14c5   :  { %v10359_v21 = vpop.eup %10358  ;;  %8198 = vrot.lane.b32.xlu0 %v12603_v11, %s10507_s23 }
0x14c6   :  { %v7542_v18 = vmul.f32 %v10359_v21, %v13620_v7 }
0x14c8   :  { %v7558_v36 = vpack.c.bf16 %v7542_v18, %v7542_v18 }
0x14ca   :  { %9768 = vmatmul.msk.bf16.vlgmr.msra.gmra.mxu3 %vm766_vm4, %v7558_v36 }
0x14cb   :  { %8152 = vrot.lane.b32.xlu2 %v12561_v22, %s10507_s23 }
0x14cd   :  { %8269 = vrot.lane.b32.xlu0 %v12588_v3, %s10506_s22 }
0x14cf   :  { %7882 = vrot.lane.b32.xlu1 %v12685_v0, %s10505_s17 }
0x14d3   :  { %8244 = vrot.lane.b32.xlu2 %v12585_v39, %s10507_s23 }
0x14d4   :  { %v7488_v38 = vpop.xlane.xlu0 %7487 }
0x14d5   :  { %10360 = vrcp.f32 %v7488_v38  ;;  %8223 = vrot.lane.b32.xlu0 %v12659_v37, %s10506_s22 }
0x14d7   :  { %8039 = vrot.lane.b32.xlu1 %v12546_v5, %s10506_s22 }
0x14db   :  { %v10361_v7 = vpop.eup %10360  ;;  %8338 = vrot.lane.b32.xlu2 %v12644_v14, %s10506_s22 }
0x14dc   :  { %v7540_v53 = vmul.f32 %v10361_v7, %v13630_v6  ;;  %v7491_v31 = vpop.xlane.xlu0 %7490 }
0x14dd   :  { %10362 = vrcp.f32 %v7491_v31  ;;  %8221 = vrot.lane.b32.xlu0 %v12659_v37, %s10507_s23 }
0x14de   :  { %v7556_v33 = vpack.c.bf16 %v7540_v53, %v7540_v53  ;;  %v7485_v34 = vpop.xlane.xlu2 %7484 }
0x14df   :  { %8037 = vrot.lane.b32.xlu1 %v12546_v5, %s10507_s23  ;;  %10364 = vrcp.f32 %v7485_v34 }
0x14e0   :  { %9766 = vmatmul.msk.bf16.vlgmr.msrb.gmra.mxu1 %vm766_vm4, %v7556_v33 }
0x14e3   :  { %v10363_v30 = vpop.eup %10362  ;;  %8336 = vrot.lane.b32.xlu2 %v12644_v14, %s10507_s23 }
0x14e4   :  { %v7541_v45 = vmul.f32 %v10363_v30, %v13637_v10  ;;  %v7512_v6 = vpop.xlane.xlu0 %7511 }
0x14e5   :  { %8292 = vrot.lane.b32.xlu0 %v12623_v46, %s10506_s22  ;;  %v10365_v43 = vpop.eup %10364 }
0x14e6   :  { %v7557_v52 = vpack.c.bf16 %v7541_v45, %v7541_v45  ;;  %v7539_v41 = vmul.f32 %v10365_v43, %v13642_v1  ;;  %v7500_v56 = vpop.xlane.xlu2 %7499 }
0x14e7   :  { %8108 = vrot.lane.b32.xlu1 %v12573_v61, %s10506_s22  ;;  %10366 = vrcp.f32 %v7500_v56 }
0x14e8   :  { %9767 = vmatmul.msk.bf16.vlgmr.msra.gmra.mxu2 %vm766_vm4, %v7557_v52  ;;  %v7555_v10 = vpack.c.bf16 %v7539_v41, %v7539_v41 }
0x14e9   :  { %7876 = vmatpush.bf16.msra.mxu2 %v7867_v32 }
0x14ea   :  { %9765 = vmatmul.msk.bf16.vlgmr.msrb.gmra.mxu0 %vm766_vm4, %v7555_v10 }
0x14eb   :  { %8315 = vrot.lane.b32.xlu2 %v12626_v15, %s10506_s22 }
0x14ec   :  { %v7506_v63 = vpop.xlane.xlu0 %7505 }
0x14ed   :  { %10368 = vrcp.f32 %v7506_v63  ;;  %8313 = vrot.lane.b32.xlu0 %v12626_v15, %s10507_s23  ;;  %v10367_v1 = vpop.eup %10366 }
0x14ee   :  { %v7544_v40 = vmul.f32 %v10367_v1, %v13650_v54  ;;  %v7503_v2 = vpop.xlane.xlu2 %7502  ;;  %v9671_v1 = vld [vmem:[%s14298_s3 + $0x18] sm:$0xf] }
0x14ef   :  { %8106 = vrot.lane.b32.xlu1 %v12573_v61, %s10507_s23  ;;  %10370 = vrcp.f32 %v7503_v2  ;;  %v7975_v2 = vsel %vm2144_vm5, %v9671_v1, 0 }
0x14f0   :  { %v7560_v48 = vpack.c.bf16 %v7544_v40, %v7544_v40  ;;  %10372 = vrcp.f32 %v7512_v6 }
0x14f2   :  { %9770 = vmatmul.msk.bf16.vlgmr.msra.gmra.mxu1 %vm766_vm4, %v7560_v48 }
0x14f3   :  { %v10369_v35 = vpop.eup %10368  ;;  %8653 = vrot.lane.b32.xlu2 %v12538_v13, %s10508_s24 }
0x14f4   :  { %v7546_v49 = vmul.f32 %v10369_v35, %v13657_v28  ;;  %v7515_v28 = vpop.xlane.xlu0 %7514 }
0x14f5   :  { %8632 = vrot.lane.b32.xlu0 %v12533_v50, %s10508_s24  ;;  %v10371_v12 = vpop.eup %10370  ;;  %10374 = vrcp.f32 %v7515_v28 }
0x14f6   :  { %v7562_v54 = vpack.c.bf16 %v7546_v49, %v7546_v49  ;;  %v7545_v26 = vmul.f32 %v10371_v12, %v13659_v42  ;;  %v13773_v21 = vpop.xlane.xlu2 %7517  ;;  %v10373_v36 = vpop.eup %10372 }
0x14f7   :  { %8177 = vrot.lane.b32.xlu1 %v12566_v9, %s10506_s22  ;;  %v7548_v50 = vmul.f32 %v10373_v36, %v13647_v23 }
0x14f8   :  { %9772 = vmatmul.msk.bf16.vlgmr.msrb.gmra.mxu3 %vm766_vm4, %v7562_v54  ;;  %v7561_v18 = vpack.c.bf16 %v7545_v26, %v7545_v26 }
0x14f9   :  { %v7564_v7 = vpack.c.bf16 %v7548_v50, %v7548_v50 }
0x14fa   :  { %9771 = vmatmul.msk.bf16.vlgmr.msrb.gmra.mxu2 %vm766_vm4, %v7561_v18 }
0x14fb   :  { %8674 = vrot.lane.b32.xlu2 %v12573_v61, %s10508_s24  ;;  %v10375_v38 = vpop.eup %10374 }
0x14fc   :  { %v7549_v53 = vmul.f32 %v10375_v38, %v13665_v20 }
0x14fd   :  { %8611 = vrot.lane.b32.xlu0 %v12546_v5, %s10508_s24 }
0x14fe   :  { %v7841_v13 = vpop.permute.xlu2 %7840  ;;  %v7565_v33 = vpack.c.bf16 %v7549_v53, %v7549_v53 }
0x14ff   :  { %8175 = vrot.lane.b32.xlu1 %v12566_v9, %s10507_s23  ;;  %v7846_v42 = vsel %vm770_vm2, %v7841_v13, 0 }
0x1500   :  { %7855 = vmatpush.bf16.msrb.mxu1 %v7846_v42 }
0x1503   :  { %9774 = vmatmul.msk.bf16.vlgmr.msrb.gmra.mxu1 %vm766_vm4, %v7564_v7 }
0x1505   :  { %8716 = vrot.lane.b32.xlu0 %v12561_v22, %s10508_s24 }
0x1506   :  { %v8017_v61 = vpop.permute.xlu2 %8016 }
0x1507   :  { %8246 = vrot.lane.b32.xlu1 %v12585_v39, %s10506_s22  ;;  %v7820_v5 = vpop.permute.xlu0 %7819  ;;  %v8022_v23 = vsel %vm175_vm1, %v8017_v61, 0 }
0x1508   :  { %v7825_v31 = vsel %vm770_vm2, %v7820_v5, 0  ;;  %8031 = vmatpush.bf16.xpose.msra.mxu1 %v8022_v23 }
0x1509   :  { %7834 = vmatpush.bf16.msrb.mxu0 %v7825_v31 }
0x150a   :  { %9775 = vmatmul.msk.bf16.vlgmr.msra.gmra.mxu2 %vm766_vm4, %v7565_v33 }
0x150d   :  { %8695 = vrot.lane.b32.xlu0 %v12596_v25, %s10508_s24 }
0x150e   :  { %v8015_v20 = vpop.permute.xlu2 %8014 }
0x150f   :  { %8267 = vrot.lane.b32.xlu1 %v12588_v3, %s10507_s23  ;;  %v8063_v22 = vpop.permute.xlu0 %8062 }
0x1513   :  { %9781 = vmatmul.msk.bf16.vlgmr.msra.gmra.mxu1 %vm175_vm1, %v8015_v20 }
0x1514   :  { %v7584_v34 = vpop.f32.mrf.mxu0 }
0x1515   :  { %7919 = vst [vmem:[#allocation1] ss:$2 sm:$0xff] %v7584_v34 }
0x1516   :  { %v8086_v30 = vpop.permute.xlu2 %8085 }
0x1517   :  { %v7605_v45 = vpop.f32.mrf.mxu1  ;;  %8361 = vrot.lane.b32.xlu1 %v12685_v0, %s10506_s22  ;;  %v8091_v6 = vsel %vm175_vm1, %v8086_v30, 0  ;;  %v13804_v43 = vpop.permute.xlu0 %8060 }
0x1518   :  { %7921 = vst [vmem:[#allocation1 + $0x1] ss:$2 sm:$0xff] %v7605_v45  ;;  %8100 = vmatpush.bf16.xpose.msrb.mxu1 %v8091_v6 }
0x1519   :  { %v7497_v25 = vpop.xlane.xlu1 %7496 }
0x151a   :  { %10376 = vrcp.f32 %v7497_v25 }
0x151c   :  { %v7586_v52 = vpop.f32.mrf.mxu0 }
0x151e   :  { %v8084_v41 = vpop.permute.xlu2 %8083 }
0x151f   :  { %v7607_v56 = vpop.f32.mrf.mxu1  ;;  %8359 = vrot.lane.b32.xlu1 %v12685_v0, %s10507_s23  ;;  %v8132_v10 = vpop.permute.xlu0 %8131  ;;  %v7934_v33 = vld.sshfl [vmem:[#allocation1] sm:$0xff pattern:$0x75316420] }
0x1520   :  { %v10377_v32 = vpop.eup %10376 }
0x1521   :  { %v7543_v63 = vmul.f32 %v10377_v32, %v13689_v16 }
0x1523   :  { %v7559_v40 = vpack.c.bf16 %v7543_v63, %v7543_v63  ;;  %9784 = vmatmul.msk.bf16.vlgmr.msrb.gmra.mxu1 %vm175_vm1, %v8084_v41 }
0x1525   :  { %9769 = vmatmul.msk.bf16.vlgmr.msra.gmra.mxu0 %vm766_vm4, %v7559_v40 }
0x1526   :  { %7984 = vmatpush.bf16.msra.mxu0 %v7975_v2  ;;  %v8155_v48 = vpop.permute.xlu2 %8154 }
0x1527   :  { %8290 = vrot.lane.b32.xlu1 %v12623_v46, %s10507_s23  ;;  %v8160_v35 = vsel %vm175_vm1, %v8155_v48, 0  ;;  %v13818_v49 = vpop.permute.xlu0 %8129 }
0x1528   :  { %8169 = vmatpush.bf16.xpose.msra.mxu1 %v8160_v35 }
0x1529   :  { %v7509_v16 = vpop.xlane.xlu1 %7508 }
0x152a   :  { %10378 = vrcp.f32 %v7509_v16  ;;  %v7626_v12 = vpop.f32.mrf.mxu2 }
0x152b   :  { %7923 = vst [vmem:[#allocation1 + $0x10] ss:$2 sm:$0xff] %v7626_v12  ;;  %10380 = vrcp.f32 %v13773_v21  ;;  %v8068_v21 = vsel %vm175_vm1, %v8063_v22, 0 }
0x152d   :  { %v7647_v54 = vpop.f32.mrf.mxu3 }
0x152e   :  { %7925 = vst [vmem:[#allocation1 + $0x11] ss:$2 sm:$0xff] %v7647_v54  ;;  %v8153_v26 = vpop.permute.xlu2 %8152 }
0x152f   :  { %8590 = vrot.lane.b32.xlu1 %v12548_v29, %s10508_s24  ;;  %v8201_v28 = vpop.permute.xlu0 %8200 }
0x1530   :  { %v10379_v18 = vpop.eup %10378  ;;  %v8206_v63 = vsel %vm175_vm1, %v8201_v28, 0 }
0x1531   :  { %v7547_v36 = vmul.f32 %v10379_v18, %v13709_v17  ;;  %v10381_v29 = vpop.eup %10380 }
0x1532   :  { %v7628_v50 = vpop.f32.mrf.mxu2  ;;  %v7550_v17 = vmul.f32 %v10381_v29, %v13667_v47 }
0x1533   :  { %v7563_v13 = vpack.c.bf16 %v7547_v36, %v7547_v36  ;;  %9787 = vmatmul.msk.bf16.vlgmr.msra.gmra.mxu1 %vm175_vm1, %v8153_v26 }
0x1534   :  { %v7566_v34 = vpack.c.bf16 %v7550_v17, %v7550_v17 }
0x1535   :  { %v7649_v42 = vpop.f32.mrf.mxu3  ;;  %9773 = vmatmul.msk.bf16.vlgmr.msrb.gmra.mxu0 %vm766_vm4, %v7563_v13  ;;  %v7935_v5 = vld.sshfl [vmem:[#allocation1 + $0x10] sm:$0xff pattern:$0x75316420] }
0x1536   :  { %v13826_v38 = vpop.permute.xlu2 %8244  ;;  %v7958_v20 = vpack.c.bf16 %v7935_v5, %v7934_v33 }
0x1537   :  { %8737 = vrot.lane.b32.xlu1 %v12566_v9, %s10508_s24  ;;  %v13830_v7 = vpop.permute.xlu0 %8198  ;;  %v8137_v9 = vsel %vm175_vm1, %v8132_v10, 0 }
0x153e   :  { %v13832_v53 = vpop.permute.xlu2 %8338 }
0x153f   :  { %v8270_v61 = vpop.permute.xlu0 %8269 }
0x1541   :  { %v7883_v23 = vpop.permute.xlu1 %7882 }
0x1542   :  { %v7888_v31 = vsel %vm770_vm2, %v7883_v23, 0 }
0x1543   :  { %7897 = vmatpush.bf16.msra.mxu3 %v7888_v31 }
0x1545   :  { %9777 = vmatmul.msk.bf16.vlgmr.msra.gmra.mxu0 %vm175_vm1, %v7958_v20 }
0x1546   :  { %9776 = vmatmul.msk.bf16.vlgmr.msra.gmra.mxu3 %vm766_vm4, %v7566_v34  ;;  %v13840_v30 = vpop.permute.xlu2 %8336 }
0x1547   :  { %8077 = vmatpush.bf16.xpose.msrb.mxu3 %v8068_v21  ;;  %v8224_v47 = vpop.permute.xlu0 %8223 }
0x1548   :  { %v8229_v45 = vsel %vm175_vm1, %v8224_v47, 0 }
0x1549   :  { %v8040_v6 = vpop.permute.xlu1 %8039  ;;  %8238 = vmatpush.bf16.xpose.msrb.mxu1 %v8229_v45 }
0x154a   :  { %v8045_v22 = vsel %vm175_vm1, %v8040_v6, 0 }
0x154b   :  { %8054 = vmatpush.bf16.xpose.msrb.mxu2 %v8045_v22 }
0x154d   :  { %v7731_v25 = vpop.f32.mrf.mxu3 }
0x154e   :  { %7933 = vst [vmem:[#allocation1 + $0x31] ss:$2 sm:$0xff] %v7731_v25  ;;  %v8316_v52 = vpop.permute.xlu2 %8315 }
0x154f   :  { %8146 = vmatpush.bf16.xpose.msra.mxu3 %v8137_v9  ;;  %v8321_v41 = vsel %vm175_vm1, %v8316_v52, 0  ;;  %v8222_v56 = vpop.permute.xlu0 %8221  ;;  %v8344_v9 = vsel %vm175_vm1, %v13832_v53, 0 }
0x1550   :  { %9790 = vmatmul.msk.bf16.vlgmr.msrb.gmra.mxu1 %vm175_vm1, %v8222_v56 }
0x1551   :  { %v8038_v32 = vpop.permute.xlu1 %8037  ;;  %8330 = vmatpush.bf16.xpose.msra.mxu1 %v8321_v41 }
0x1552   :  { %9782 = vmatmul.msk.bf16.vlgmr.msrb.gmra.mxu2 %vm175_vm1, %v8038_v32 }
0x1555   :  { %v7733_v10 = vpop.f32.mrf.mxu3 }
0x1556   :  { %9783 = vmatmul.msk.bf16.vlgmr.msrb.gmra.mxu3 %vm175_vm1, %v13804_v43  ;;  %v8275_v43 = vsel %vm175_vm1, %v8270_v61, 0  ;;  %v8654_v56 = vpop.permute.xlu2 %8653 }
0x1557   :  { %8215 = vmatpush.bf16.xpose.msrb.mxu3 %v8206_v63  ;;  %v8293_v1 = vpop.permute.xlu0 %8292 }
0x1558   :  { %v8298_v40 = vsel %vm175_vm1, %v8293_v1, 0  ;;  %v8659_v1 = vsel %vm770_vm2, %v8654_v56, 0 }
0x1559   :  { %v8109_v2 = vpop.permute.xlu1 %8108  ;;  %8307 = vmatpush.bf16.xpose.msrb.mxu0 %v8298_v40 }
0x155a   :  { %v8114_v48 = vsel %vm175_vm1, %v8109_v2, 0 }
0x155b   :  { %8123 = vmatpush.bf16.xpose.msra.mxu2 %v8114_v48 }
0x155d   :  { %v7689_v35 = vpop.f32.mrf.mxu1 }
0x155e   :  { %7929 = vst [vmem:[#allocation1 + $0x21] ss:$2 sm:$0xff] %v7689_v35 }
0x155f   :  { %v8314_v16 = vpop.permute.xlu0 %8313 }
0x1560   :  { %9794 = vmatmul.msk.bf16.vlgmr.msra.gmra.mxu1 %vm175_vm1, %v8314_v16 }
0x1561   :  { %v8107_v12 = vpop.permute.xlu1 %8106 }
0x1562   :  { %9785 = vmatmul.msk.bf16.vlgmr.msra.gmra.mxu2 %vm175_vm1, %v8107_v12 }
0x1565   :  { %v7691_v54 = vpop.f32.mrf.mxu1 }
0x1566   :  { %9786 = vmatmul.msk.bf16.vlgmr.msra.gmra.mxu3 %vm175_vm1, %v13818_v49 }
0x1567   :  { %8284 = vmatpush.bf16.xpose.msra.mxu3 %v8275_v43  ;;  %v8633_v26 = vpop.permute.xlu0 %8632  ;;  %v7668_v18 = vpop.f32.mrf.mxu0 }
0x1568   :  { %7927 = vst [vmem:[#allocation1 + $0x20] ss:$2 sm:$0xff] %v7668_v18 }
0x1569   :  { %v8178_v28 = vpop.permute.xlu1 %8177 }
0x156a   :  { %v8183_v36 = vsel %vm175_vm1, %v8178_v28, 0 }
0x156b   :  { %v7710_v50 = vpop.f32.mrf.mxu2  ;;  %8192 = vmatpush.bf16.xpose.msrb.mxu2 %v8183_v36 }
0x156c   :  { %7931 = vst [vmem:[#allocation1 + $0x30] ss:$2 sm:$0xff] %v7710_v50 }
0x156f   :  { %v7773_v13 = vpop.f32.mrf.mxu1  ;;  %v8612_v42 = vpop.permute.xlu0 %8611  ;;  %v7936_v5 = vld.sshfl [vmem:[#allocation1 + $0x20] sm:$0xff pattern:$0x75316420] }
0x1570   :  { %7939 = vst [vmem:[#allocation1 + $0x1] ss:$2 sm:$0xff] %v7773_v13  ;;  %v8617_v29 = vsel %vm770_vm2, %v8612_v42, 0  ;;  %v7670_v17 = vpop.f32.mrf.mxu0 }
0x1571   :  { %v8176_v61 = vpop.permute.xlu1 %8175  ;;  %8626 = vmatpush.bf16.msrb.mxu1 %v8617_v29 }
0x1572   :  { %9788 = vmatmul.msk.bf16.vlgmr.msrb.gmra.mxu2 %vm175_vm1, %v8176_v61 }
0x1573   :  { %v7712_v49 = vpop.f32.mrf.mxu2  ;;  %v7937_v23 = vld.sshfl [vmem:[#allocation1 + $0x30] sm:$0xff pattern:$0x75316420] }
0x1574   :  { %v7959_v31 = vpack.c.bf16 %v7937_v23, %v7936_v5 }
0x1576   :  { %9778 = vmatmul.msk.bf16.gmra.mxu0 %vm175_vm1, %v7959_v31  ;;  %9789 = vmatmul.msk.bf16.vlgmr.msrb.gmra.mxu3 %vm175_vm1, %v13830_v7  ;;  %v8638_v7 = vsel %vm770_vm2, %v8633_v26, 0 }
0x1577   :  { %v7775_v33 = vpop.f32.mrf.mxu1  ;;  %v8717_v21 = vpop.permute.xlu0 %8716 }
0x1579   :  { %v8247_v20 = vpop.permute.xlu1 %8246 }
0x157a   :  { %v8252_v34 = vsel %vm175_vm1, %v8247_v20, 0 }
0x157b   :  { %v7815_v47 = vpop.f32.mrf.mxu3  ;;  %8261 = vmatpush.bf16.xpose.msra.mxu2 %v8252_v34 }
0x157c   :  { %7941 = vst [vmem:[#allocation1 + $0x11] ss:$2 sm:$0xff] %v7815_v47 }
0x157d   :  { %v7794_v45 = vpop.f32.mrf.mxu2 }
0x157e   :  { %7940 = vst [vmem:[#allocation1 + $0x10] ss:$2 sm:$0xff] %v7794_v45 }
0x157f   :  { %v8696_v6 = vpop.permute.xlu0 %8695 }
0x1580   :  { %v8701_v22 = vsel %vm770_vm2, %v8696_v6, 0  ;;  %v7857_v25 = vpop.f32.mrf.mxu1 }
0x1581   :  { %v8268_v52 = vpop.permute.xlu1 %8267  ;;  %7943 = vst [vmem:[#allocation1 + $0x21] ss:$2 sm:$0xff] %v7857_v25  ;;  %8710 = vmatpush.bf16.msra.mxu1 %v8701_v22 }
0x1582   :  { %9791 = vmatmul.msk.bf16.vlgmr.msra.gmra.mxu2 %vm175_vm1, %v13826_v38  ;;  %v8722_v38 = vsel %vm770_vm2, %v8717_v21, 0 }
0x1583   :  { %8353 = vmatpush.bf16.xpose.msrb.mxu2 %v8344_v9  ;;  %v7817_v41 = vpop.f32.mrf.mxu3 }
0x1585   :  { %v7796_v53 = vpop.f32.mrf.mxu2  ;;  %v7947_v29 = vld.sshfl [vmem:[#allocation1 + $0x10] sm:$0xff pattern:$0x75316420] }
0x1586   :  { %9792 = vmatmul.msk.bf16.vlgmr.msra.gmra.mxu3 %vm175_vm1, %v8268_v52 }
0x1588   :  { %v7859_v32 = vpop.f32.mrf.mxu1 }
0x1589   :  { %v8362_v10 = vpop.permute.xlu1 %8361 }
0x158a   :  { %v8367_v63 = vsel %vm175_vm1, %v8362_v10, 0 }
0x158b   :  { %8647 = vmatpush.bf16.msra.mxu2 %v8638_v7  ;;  %8376 = vmatpush.bf16.xpose.msrb.mxu3 %v8367_v63 }
0x158d   :  { %v7878_v40 = vpop.f32.mrf.mxu2 }
0x158e   :  { %7944 = vst [vmem:[#allocation1 + $0x30] ss:$2 sm:$0xff] %v7878_v40 }
0x1590   :  { %v8033_v2 = vpop.f32.mrf.mxu1 }
0x1591   :  { %v8360_v48 = vpop.permute.xlu1 %8359  ;;  %v13874_v35 = vmul.f32 0.35355338, %v8033_v2 }
0x1592   :  { %9795 = vmatmul.msk.bf16.vlgmr.msrb.gmra.mxu2 %vm175_vm1, %v13840_v30 }
0x1593   :  { %8668 = vmatpush.bf16.msra.mxu3 %v8659_v1  ;;  %8731 = vmatpush.bf16.msrb.mxu2 %v8722_v38  ;;  %v8398_v16 = vsel %vm571_vm3, %v13874_v35, -inf  ;;  %v8675_v38 = vpop.permute.xlu2 %8674 }
0x1594   :  { %8399 = vmax.xlane.f32.xlu0 %v8398_v16 }
0x1595   :  { %v7880_v12 = vpop.f32.mrf.mxu2 }
0x1596   :  { %9796 = vmatmul.msk.bf16.vlgmr.msrb.gmra.mxu3 %vm175_vm1, %v8360_v48  ;;  %v8680_v12 = vsel %vm770_vm2, %v8675_v38, 0 }
0x1598   :  { %v8035_v54 = vpop.f32.mrf.mxu1 }
0x1599   :  { %v8291_v43 = vpop.permute.xlu1 %8290 }
0x15a0   :  { %v8102_v26 = vpop.f32.mrf.mxu1 }
0x15a1   :  { %v8591_v18 = vpop.permute.xlu1 %8590  ;;  %v13881_v28 = vmul.f32 0.35355338, %v8102_v26 }
0x15a2   :  { %v8596_v36 = vsel %vm770_vm2, %v8591_v18, 0  ;;  %v7752_v50 = vpop.f32.mrf.mxu0 }
0x15a3   :  { %7938 = vst [vmem:[#allocation1] ss:$2 sm:$0xff] %v7752_v50  ;;  %8605 = vmatpush.bf16.msra.mxu0 %v8596_v36  ;;  %v8407_v30 = vsel %vm571_vm3, %v13881_v28, -inf }
0x15a4   :  { %8408 = vmax.xlane.f32.xlu1 %v8407_v30 }
0x15a8   :  { %v8104_v13 = vpop.f32.mrf.mxu1 }
0x15a9   :  { %v8738_v42 = vpop.permute.xlu1 %8737 }
0x15aa   :  { %v8743_v17 = vsel %vm770_vm2, %v8738_v42, 0  ;;  %v7754_v61 = vpop.f32.mrf.mxu0  ;;  %v7946_v49 = vld.sshfl [vmem:[#allocation1] sm:$0xff pattern:$0x75316420] }
0x15ab   :  { %8752 = vmatpush.bf16.msrb.mxu3 %v8743_v17  ;;  %v7960_v5 = vpack.c.bf16 %v7947_v29, %v7946_v49  ;;  %v6977_v17 = vadd.f32 %v13486_v51, %v13563_v59 }
0x15ad   :  { %9779 = vmatmul.msk.bf16.gmra.mxu0 %vm175_vm1, %v7960_v5 }
0x15b0   :  { %v8171_v23 = vpop.f32.mrf.mxu1 }
0x15b1   :  { %v13888_v31 = vmul.f32 0.35355338, %v8171_v23 }
0x15b2   :  { %v7836_v33 = vpop.f32.mrf.mxu0 }
0x15b3   :  { %7942 = vst [vmem:[#allocation1 + $0x20] ss:$2 sm:$0xff] %v7836_v33  ;;  %v8416_v21 = vsel %vm571_vm3, %v13888_v31, -inf }
0x15b4   :  { %8417 = vmax.xlane.f32.xlu1 %v8416_v21 }
0x15b8   :  { %v8173_v20 = vpop.f32.mrf.mxu1 }
0x15ba   :  { %v7838_v34 = vpop.f32.mrf.mxu0  ;;  %v7948_v25 = vld.sshfl [vmem:[#allocation1 + $0x20] sm:$0xff pattern:$0x75316420] }
0x15c2   :  { %v7986_v9 = vpop.f32.mrf.mxu0 }
0x15c3   :  { %v13893_v47 = vadd.f32 %v7986_v9, %v13533_v19 }
0x15c9   :  { %v7899_v45 = vpop.f32.mrf.mxu3 }
0x15ca   :  { %7945 = vst [vmem:[#allocation1 + $0x31] ss:$2 sm:$0xff] %v7899_v45  ;;  %v13916_v13 = vpop.f32.mrf.mxu0 }
0x15cd   :  { %v8240_v6 = vpop.f32.mrf.mxu1 }
0x15ce   :  { %v13895_v22 = vmul.f32 0.35355338, %v8240_v6 }
0x15d0   :  { %v8425_v52 = vsel %vm571_vm3, %v13895_v22, -inf }
0x15d1   :  { %v7901_v7 = vpop.f32.mrf.mxu3  ;;  %v7949_v41 = vld.sshfl [vmem:[#allocation1 + $0x30] sm:$0xff pattern:$0x75316420]  ;;  %8426 = vmax.xlane.f32.xlu0 %v8425_v52 }
0x15d2   :  { %v7961_v53 = vpack.c.bf16 %v7949_v41, %v7948_v25 }
0x15d4   :  { %9780 = vmatmul.msk.bf16.gmra.mxu0 %vm175_vm1, %v7961_v53 }
0x15d5   :  { %v8056_v56 = vpop.f32.mrf.mxu2  ;;  %v8242_v19 = vpop.f32.mrf.mxu1 }
0x15d6   :  { %v13900_v32 = vmul.f32 0.35355338, %v8056_v56 }
0x15d8   :  { %v8401_v10 = vsel %vm571_vm3, %v13900_v32, -inf }
0x15d9   :  { %v8079_v63 = vpop.f32.mrf.mxu3  ;;  %8402 = vmax.xlane.f32.xlu2 %v8401_v10 }
0x15da   :  { %v13904_v1 = vmul.f32 0.35355338, %v8079_v63 }
0x15dc   :  { %v8404_v48 = vsel %vm571_vm3, %v13904_v1, -inf }
0x15dd   :  { %v8058_v40 = vpop.f32.mrf.mxu2  ;;  %v8332_v2 = vpop.f32.mrf.mxu1 }
0x15de   :  { %v13930_v34 = vmul.f32 0.35355338, %v8332_v2 }
0x15e0   :  { %v8437_v59 = vsel %vm571_vm3, %v13930_v34, -inf }
0x15e1   :  { %v8081_v16 = vpop.f32.mrf.mxu3  ;;  %8405 = vmax.xlane.f32.xlu2 %v8404_v48 }
0x15e4   :  { %9793 = vmatmul.msk.bf16.vlgmr.msrb.gmra.mxu0 %vm175_vm1, %v8291_v43 }
0x15e5   :  { %8689 = vmatpush.bf16.msrb.mxu0 %v8680_v12  ;;  %v8125_v54 = vpop.f32.mrf.mxu2  ;;  %v8334_v18 = vpop.f32.mrf.mxu1 }
0x15e6   :  { %v13910_v26 = vmul.f32 0.35355338, %v8125_v54 }
0x15e8   :  { %v8410_v36 = vsel %vm571_vm3, %v13910_v26, -inf }
0x15e9   :  { %v8148_v50 = vpop.f32.mrf.mxu3  ;;  %8411 = vmax.xlane.f32.xlu2 %v8410_v36 }
0x15ea   :  { %v13914_v30 = vmul.f32 0.35355338, %v8148_v50 }
0x15ec   :  { %v8413_v42 = vsel %vm571_vm3, %v13914_v30, -inf }
0x15ed   :  { %8414 = vmax.xlane.f32.xlu1 %v8413_v42  ;;  %v8127_v29 = vpop.f32.mrf.mxu2 }
0x15f1   :  { %v8150_v43 = vpop.f32.mrf.mxu3 }
0x15f3   :  { %v7991_v61 = vpop.f32.mrf.mxu0 }
0x15f4   :  { %v13922_v49 = vadd.f32 %v7991_v61, %v6977_v17 }
0x15f5   :  { %v8194_v5 = vpop.f32.mrf.mxu2 }
0x15f6   :  { %v13924_v23 = vmul.f32 0.35355338, %v8194_v5 }
0x15f8   :  { %v8419_v33 = vsel %vm571_vm3, %v13924_v23, -inf }
0x15f9   :  { %v8217_v21 = vpop.f32.mrf.mxu3  ;;  %8420 = vmax.xlane.f32.xlu0 %v8419_v33  ;;  %v6982_v33 = vadd.f32 %v13499_v55, %v13577_v4  ;;  %v6987_v4 = vadd.f32 %v13515_v62, %v13585_v27 }
0x15fa   :  { %v13928_v20 = vmul.f32 0.35355338, %v8217_v21 }
0x15fb   :  { %v13958_v17 = vpop.f32.mrf.mxu0 }
0x15fc   :  { %v8422_v9 = vsel %vm571_vm3, %v13928_v20, -inf }
0x15fd   :  { %8423 = vmax.xlane.f32.xlu1 %v8422_v9  ;;  %v8196_v51 = vpop.f32.mrf.mxu2 }
0x1601   :  { %v8219_v45 = vpop.f32.mrf.mxu3  ;;  %8438 = vmax.xlane.f32.xlu0 %v8437_v59 }
0x1605   :  { %v8263_v6 = vpop.f32.mrf.mxu2 }
0x1606   :  { %v13936_v25 = vmul.f32 0.35355338, %v8263_v6 }
0x1607   :  { %v8400_v53 = vpop.xlane.xlu0 %8399 }
0x1608   :  { %v8428_v52 = vsel %vm571_vm3, %v13936_v25, -inf  ;;  %v8446_v10 = vsub.f32 %v13874_v35, %v8400_v53 }
0x1609   :  { %8429 = vmax.xlane.f32.xlu0 %v8428_v52  ;;  %v8286_v7 = vpop.f32.mrf.mxu3 }
0x160a   :  { %v13940_v41 = vmul.f32 0.35355338, %v8286_v7  ;;  %v8462_v40 = vmul.f32 1.442695, %v8446_v10 }
0x160c   :  { %v8431_v56 = vsel %vm571_vm3, %v13940_v41, -inf  ;;  %10382 = vpow2.f32 %v8462_v40 }
0x160d   :  { %v8265_v19 = vpop.f32.mrf.mxu2  ;;  %8432 = vmax.xlane.f32.xlu2 %v8431_v56 }
0x1611   :  { %v8288_v63 = vpop.f32.mrf.mxu3 }
0x1612   :  { %v13954_v50 = vpop.eup %10382 }
0x1613   :  { %v8494_v29 = vsel %vm571_vm3, %v13954_v50, 0.0 }
0x1615   :  { %v8355_v2 = vpop.f32.mrf.mxu2 }
0x1616   :  { %v13945_v48 = vmul.f32 0.35355338, %v8355_v2 }
0x1617   :  { %v8409_v38 = vpop.xlane.xlu1 %8408 }
0x1618   :  { %v8440_v16 = vsel %vm571_vm3, %v13945_v48, -inf  ;;  %v8449_v12 = vsub.f32 %v13881_v28, %v8409_v38 }
0x1619   :  { %8441 = vmax.xlane.f32.xlu2 %v8440_v16  ;;  %v8378_v54 = vpop.f32.mrf.mxu3 }
0x161a   :  { %v13950_v18 = vmul.f32 0.35355338, %v8378_v54  ;;  %v8468_v36 = vmul.f32 1.442695, %v8449_v12 }
0x161c   :  { %v8443_v35 = vsel %vm571_vm3, %v13950_v18, -inf  ;;  %10384 = vpow2.f32 %v8468_v36 }
0x161d   :  { %v8357_v42 = vpop.f32.mrf.mxu2  ;;  %8444 = vmax.xlane.f32.xlu1 %v8443_v35 }
0x1621   :  { %8495 = vadd.xlane.f32.xlu2 %v8494_v29  ;;  %v8380_v43 = vpop.f32.mrf.mxu3 }
0x1622   :  { %v13960_v28 = vpop.eup %10384 }
0x1623   :  { %v8503_v5 = vsel %vm571_vm3, %v13960_v28, 0.0 }
0x1627   :  { %v8418_v61 = vpop.xlane.xlu1 %8417 }
0x1628   :  { %v8452_v21 = vsub.f32 %v13888_v31, %v8418_v61 }
0x1629   :  { %8504 = vadd.xlane.f32.xlu2 %v8503_v5 }
0x162a   :  { %v7996_v9 = vpop.f32.mrf.mxu0  ;;  %v8474_v51 = vmul.f32 1.442695, %v8452_v21 }
0x162b   :  { %v13967_v59 = vadd.f32 %v7996_v9, %v6982_v33 }
0x162c   :  { %10386 = vpow2.f32 %v8474_v51 }
0x1632   :  { %v13969_v45 = vpop.eup %10386  ;;  %v13973_v52 = vpop.f32.mrf.mxu0 }
0x1633   :  { %v8512_v6 = vsel %vm571_vm3, %v13969_v45, 0.0 }
0x1634   :  { %8513 = vadd.xlane.f32.xlu2 %v8512_v6 }
0x1644   :  { %v8427_v19 = vpop.xlane.xlu0 %8426 }
0x1645   :  { %v8455_v2 = vsub.f32 %v13895_v22, %v8427_v19 }
0x1647   :  { %v8480_v62 = vmul.f32 1.442695, %v8455_v2 }
0x164c   :  { %v8403_v7 = vpop.xlane.xlu2 %8402 }
0x164d   :  { %v8447_v53 = vsub.f32 %v13900_v32, %v8403_v7 }
0x164f   :  { %v8464_v55 = vmul.f32 1.442695, %v8447_v53 }
0x1651   :  { %10388 = vpow2.f32 %v8464_v55  ;;  %v8001_v31 = vpop.f32.mrf.mxu0 }
0x1652   :  { %v13978_v56 = vadd.f32 %v8001_v31, %v6987_v4 }
0x1654   :  { %v8406_v10 = vpop.xlane.xlu2 %8405 }
0x1655   :  { %v8448_v63 = vsub.f32 %v13904_v1, %v8406_v10 }
0x1657   :  { %v13981_v40 = vpop.eup %10388  ;;  %v8466_v38 = vmul.f32 1.442695, %v8448_v63 }
0x1658   :  { %v8497_v32 = vsel %vm571_vm3, %v13981_v40, 0.0 }
0x1659   :  { %10390 = vpow2.f32 %v8466_v38  ;;  %v13986_v16 = vpop.f32.mrf.mxu0  ;;  %8498 = vadd.xlane.f32.xlu1 %v8497_v32 }
0x165a   :  { %10392 = vpow2.f32 %v8480_v62 }
0x165c   :  { %v8412_v27 = vpop.xlane.xlu2 %8411 }
0x165d   :  { %v8450_v12 = vsub.f32 %v13910_v26, %v8412_v27 }
0x165f   :  { %v13989_v54 = vpop.eup %10390  ;;  %v8470_v1 = vmul.f32 1.442695, %v8450_v12 }
0x1660   :  { %v8415_v36 = vpop.xlane.xlu1 %8414  ;;  %v8500_v22 = vsel %vm571_vm3, %v13989_v54, 0.0  ;;  %v13994_v43 = vpop.eup %10392 }
0x1661   :  { %10394 = vpow2.f32 %v8470_v1  ;;  %v8451_v35 = vsub.f32 %v13914_v30, %v8415_v36  ;;  %8501 = vadd.xlane.f32.xlu0 %v8500_v22  ;;  %v8309_v42 = vpop.f32.mrf.mxu0  ;;  %v8521_v26 = vsel %vm571_vm3, %v13994_v43, 0.0 }
0x1662   :  { %v14026_v22 = vmul.f32 0.35355338, %v8309_v42 }
0x1663   :  { %v8472_v29 = vmul.f32 1.442695, %v8451_v35 }
0x1665   :  { %10396 = vpow2.f32 %v8472_v29 }
0x1667   :  { %v13996_v61 = vpop.eup %10394 }
0x1668   :  { %v8506_v5 = vsel %vm571_vm3, %v13996_v61, 0.0 }
0x1669   :  { %8522 = vadd.xlane.f32.xlu0 %v8521_v26  ;;  %8507 = vadd.xlane.f32.xlu1 %v8506_v5  ;;  %v8311_v33 = vpop.f32.mrf.mxu0 }
0x166b   :  { %v14002_v21 = vpop.eup %10396 }
0x166c   :  { %v8421_v30 = vpop.xlane.xlu0 %8420  ;;  %v8509_v9 = vsel %vm571_vm3, %v14002_v21, 0.0 }
0x166d   :  { %v8453_v51 = vsub.f32 %v13924_v23, %v8421_v30  ;;  %8510 = vadd.xlane.f32.xlu2 %v8509_v9 }
0x166f   :  { %v8476_v6 = vmul.f32 1.442695, %v8453_v51 }
0x1670   :  { %v8424_v7 = vpop.xlane.xlu1 %8423 }
0x1671   :  { %10398 = vpow2.f32 %v8476_v6  ;;  %v8454_v53 = vsub.f32 %v13928_v20, %v8424_v7 }
0x1673   :  { %v8478_v55 = vmul.f32 1.442695, %v8454_v53 }
0x1674   :  { %v8439_v4 = vpop.xlane.xlu0 %8438 }
0x1675   :  { %10400 = vpow2.f32 %v8478_v55  ;;  %v8459_v53 = vsub.f32 %v13930_v34, %v8439_v4 }
0x1677   :  { %v14008_v31 = vpop.eup %10398 }
0x1678   :  { %v8515_v19 = vsel %vm571_vm3, %v14008_v31, 0.0 }
0x1679   :  { %8516 = vadd.xlane.f32.xlu0 %v8515_v19 }
0x167b   :  { %v14012_v10 = vpop.eup %10400 }
0x167c   :  { %v8430_v63 = vpop.xlane.xlu0 %8429  ;;  %v8518_v23 = vsel %vm571_vm3, %v14012_v10, 0.0 }
0x167d   :  { %v8456_v2 = vsub.f32 %v13936_v25, %v8430_v63  ;;  %8519 = vadd.xlane.f32.xlu2 %v8518_v23 }
0x167f   :  { %v8482_v38 = vmul.f32 1.442695, %v8456_v2 }
0x1680   :  { %v8433_v20 = vpop.xlane.xlu2 %8432 }
0x1681   :  { %10402 = vpow2.f32 %v8482_v38  ;;  %v8457_v32 = vsub.f32 %v13940_v41, %v8433_v20  ;;  %v8434_v41 = vsel %vm571_vm3, %v14026_v22, -inf }
0x1683   :  { %v8484_v62 = vmul.f32 1.442695, %v8457_v32 }
0x1685   :  { %10404 = vpow2.f32 %v8484_v62 }
0x1687   :  { %v14018_v27 = vpop.eup %10402 }
0x1688   :  { %v8524_v12 = vsel %vm571_vm3, %v14018_v27, 0.0 }
0x1689   :  { %8525 = vadd.xlane.f32.xlu0 %v8524_v12 }
0x168b   :  { %v14022_v1 = vpop.eup %10404 }
0x168c   :  { %v8442_v36 = vpop.xlane.xlu2 %8441  ;;  %v8527_v25 = vsel %vm571_vm3, %v14022_v1, 0.0 }
0x168d   :  { %8528 = vadd.xlane.f32.xlu1 %v8527_v25 }
0x1694   :  { %v8496_v35 = vpop.xlane.xlu2 %8495 }
0x1695   :  { %8435 = vmax.xlane.f32.xlu1 %v8434_v41  ;;  %8821 = vrot.lane.b32.xlu2 %v12588_v3, %s10508_s24  ;;  %10406 = vrcp.f32 %v8496_v35  ;;  %v8445_v3 = vpop.xlane.xlu1 %8444 }
0x169b   :  { %v10407_v29 = vpop.eup %10406 }
0x169c   :  { %v8505_v26 = vpop.xlane.xlu2 %8504  ;;  %v8558_v5 = vmul.f32 %v10407_v29, %v13954_v50  ;;  %v8461_v50 = vsub.f32 %v13950_v18, %v8445_v3 }
0x169d   :  { %10408 = vrcp.f32 %v8505_v26  ;;  %8758 = vrot.lane.b32.xlu0 %v12603_v11, %s10508_s24  ;;  %8779 = vrot.lane.b32.xlu2 %v12659_v37, %s10508_s24  ;;  %v8460_v37 = vsub.f32 %v13945_v48, %v8442_v36 }
0x169e   :  { %v8574_v42 = vpack.c.bf16 %v8558_v5, %v8558_v5  ;;  %v8492_v51 = vmul.f32 1.442695, %v8461_v50 }
0x16a0   :  { %9797 = vmatmul.msk.bf16.vlgmr.msra.gmra.mxu0 %vm766_vm4, %v8574_v42  ;;  %10410 = vpow2.f32 %v8492_v51 }
0x16a3   :  { %v10409_v33 = vpop.eup %10408 }
0x16a4   :  { %v8561_v30 = vmul.f32 %v10409_v33, %v13960_v28  ;;  %v8490_v28 = vmul.f32 1.442695, %v8460_v37 }
0x16a6   :  { %v8577_v9 = vpack.c.bf16 %v8561_v30, %v8561_v30  ;;  %v14043_v11 = vpop.eup %10410 }
0x16a7   :  { %v8539_v6 = vsel %vm571_vm3, %v14043_v11, 0.0  ;;  %v8514_v2 = vpop.xlane.xlu2 %8513 }
0x16a8   :  { %9800 = vmatmul.msk.bf16.vlgmr.msra.gmra.mxu3 %vm766_vm4, %v8577_v9 }
0x16ae   :  { %8800 = vrot.lane.b32.xlu1 %v12585_v39, %s10508_s24  ;;  %v8488_v39 = vmul.f32 1.442695, %v8459_v53 }
0x16c7   :  { %8540 = vadd.xlane.f32.xlu0 %v8539_v6 }
0x16cc   :  { %v8499_v7 = vpop.xlane.xlu1 %8498 }
0x16cd   :  { %10412 = vrcp.f32 %v8499_v7 }
0x16ce   :  { %10414 = vpow2.f32 %v8490_v28 }
0x16d3   :  { %v10413_v55 = vpop.eup %10412 }
0x16d4   :  { %v14049_v19 = vpop.eup %10414  ;;  %v8559_v18 = vmul.f32 %v10413_v55, %v13981_v40  ;;  %v8502_v63 = vpop.xlane.xlu0 %8501 }
0x16d5   :  { %10416 = vrcp.f32 %v8502_v63  ;;  %v8536_v23 = vsel %vm571_vm3, %v14049_v19, 0.0 }
0x16d6   :  { %10418 = vpow2.f32 %v8488_v39  ;;  %v8575_v48 = vpack.c.bf16 %v8559_v18, %v8559_v18 }
0x16d8   :  { %8537 = vadd.xlane.f32.xlu1 %v8536_v23  ;;  %9798 = vmatmul.msk.bf16.vlgmr.msrb.gmra.mxu1 %vm766_vm4, %v8575_v48 }
0x16db   :  { %v10417_v38 = vpop.eup %10416  ;;  %8884 = vrot.lane.b32.xlu0 %v12644_v14, %s10508_s24 }
0x16dc   :  { %v14057_v34 = vpop.eup %10418  ;;  %v8560_v4 = vmul.f32 %v10417_v38, %v13989_v54  ;;  %v8508_v40 = vpop.xlane.xlu1 %8507 }
0x16dd   :  { %10420 = vrcp.f32 %v8508_v40  ;;  %v8533_v32 = vsel %vm571_vm3, %v14057_v34, 0.0  ;;  %v8523_v12 = vpop.xlane.xlu0 %8522 }
0x16de   :  { %v8576_v20 = vpack.c.bf16 %v8560_v4, %v8560_v4  ;;  %10422 = vrcp.f32 %v8514_v2 }
0x16e0   :  { %9799 = vmatmul.msk.bf16.vlgmr.msra.gmra.mxu2 %vm766_vm4, %v8576_v20  ;;  %8534 = vadd.xlane.f32.xlu1 %v8533_v32  ;;  %v8511_v62 = vpop.xlane.xlu2 %8510 }
0x16e1   :  { %10424 = vrcp.f32 %v8511_v62 }
0x16e3   :  { %8863 = vrot.lane.b32.xlu0 %v12626_v15, %s10508_s24  ;;  %v10421_v14 = vpop.eup %10420 }
0x16e4   :  { %v8562_v36 = vmul.f32 %v10421_v14, %v13996_v61  ;;  %v10423_v54 = vpop.eup %10422 }
0x16e5   :  { %v8564_v29 = vmul.f32 %v10423_v54, %v13969_v45 }
0x16e6   :  { %v8578_v35 = vpack.c.bf16 %v8562_v36, %v8562_v36 }
0x16e7   :  { %v10425_v25 = vpop.eup %10424  ;;  %v8580_v42 = vpack.c.bf16 %v8564_v29, %v8564_v29 }
0x16e8   :  { %v8563_v41 = vmul.f32 %v10425_v25, %v14002_v21  ;;  %9801 = vmatmul.msk.bf16.vlgmr.msrb.gmra.mxu0 %vm766_vm4, %v8578_v35 }
0x16ea   :  { %v8579_v26 = vpack.c.bf16 %v8563_v41, %v8563_v41 }
0x16ec   :  { %v8517_v5 = vpop.xlane.xlu0 %8516  ;;  %9802 = vmatmul.msk.bf16.vlgmr.msra.gmra.mxu1 %vm766_vm4, %v8579_v26 }
0x16ed   :  { %10426 = vrcp.f32 %v8517_v5 }
0x16ee   :  { %10428 = vrcp.f32 %v8523_v12 }
0x16f0   :  { %9803 = vmatmul.msk.bf16.vlgmr.msrb.gmra.mxu2 %vm766_vm4, %v8580_v42  ;;  %v8520_v15 = vpop.xlane.xlu2 %8519 }
0x16f3   :  { %v10427_v33 = vpop.eup %10426 }
0x16f4   :  { %v8565_v61 = vmul.f32 %v10427_v33, %v14008_v31  ;;  %v10429_v45 = vpop.eup %10428 }
0x16f5   :  { %v8567_v3 = vmul.f32 %v10429_v45, %v13994_v43 }
0x16f6   :  { %v8581_v30 = vpack.c.bf16 %v8565_v61, %v8565_v61 }
0x16f7   :  { %v8583_v31 = vpack.c.bf16 %v8567_v3, %v8567_v3 }
0x16f8   :  { %9804 = vmatmul.msk.bf16.vlgmr.msrb.gmra.mxu3 %vm766_vm4, %v8581_v30  ;;  %v8822_v21 = vpop.permute.xlu2 %8821 }
0x16f9   :  { %v8827_v9 = vsel %vm770_vm2, %v8822_v21, 0  ;;  %8842 = vrot.lane.b32.xlu1 %v12623_v46, %s10508_s24 }
0x16fa   :  { %8836 = vmatpush.bf16.msra.mxu3 %v8827_v9 }
0x16fc   :  { %v8526_v28 = vpop.xlane.xlu0 %8525 }
0x1700   :  { %v8780_v50 = vpop.permute.xlu2 %8779  ;;  %v8529_v51 = vpop.xlane.xlu1 %8528 }
0x1701   :  { %v8785_v37 = vsel %vm770_vm2, %v8780_v50, 0  ;;  %10430 = vrcp.f32 %v8529_v51 }
0x1702   :  { %8794 = vmatpush.bf16.msrb.mxu1 %v8785_v37  ;;  %10432 = vrcp.f32 %v8520_v15 }
0x1705   :  { %9806 = vmatmul.msk.bf16.vlgmr.msrb.gmra.mxu1 %vm766_vm4, %v8583_v31 }
0x1707   :  { %v10431_v6 = vpop.eup %10430 }
0x1708   :  { %v8569_v7 = vmul.f32 %v10431_v6, %v14022_v1  ;;  %v8436_v53 = vpop.xlane.xlu1 %8435  ;;  %v10433_v55 = vpop.eup %10432 }
0x1709   :  { %v8458_v46 = vsub.f32 %v14026_v22, %v8436_v53  ;;  %v8566_v18 = vmul.f32 %v10433_v55, %v14012_v10 }
0x170a   :  { %v8585_v39 = vpack.c.bf16 %v8569_v7, %v8569_v7 }
0x170b   :  { %v8486_v43 = vmul.f32 1.442695, %v8458_v46  ;;  %v8582_v23 = vpack.c.bf16 %v8566_v18, %v8566_v18 }
0x170c   :  { %9808 = vmatmul.msk.bf16.vlgmr.msra.gmra.mxu3 %vm766_vm4, %v8585_v39 }
0x170d   :  { %10434 = vpow2.f32 %v8486_v43 }
0x170e   :  { %10436 = vrcp.f32 %v8526_v28 }
0x170f   :  { %v8759_v63 = vpop.permute.xlu0 %8758 }
0x1710   :  { %v8764_v48 = vsel %vm770_vm2, %v8759_v63, 0 }
0x1711   :  { %8773 = vmatpush.bf16.msra.mxu0 %v8764_v48 }
0x1713   :  { %v14084_v2 = vpop.eup %10434 }
0x1714   :  { %9805 = vmatmul.msk.bf16.vlgmr.msra.gmra.mxu0 %vm766_vm4, %v8582_v23  ;;  %v8530_v1 = vsel %vm571_vm3, %v14084_v2, 0.0  ;;  %v10437_v22 = vpop.eup %10436 }
0x1715   :  { %8531 = vadd.xlane.f32.xlu2 %v8530_v1  ;;  %v8568_v4 = vmul.f32 %v10437_v22, %v14018_v27 }
0x1717   :  { %v8584_v20 = vpack.c.bf16 %v8568_v4, %v8568_v4 }
0x171d   :  { %v8607_v38 = vpop.f32.mrf.mxu0 }
0x171e   :  { %8942 = vst [vmem:[#allocation1] ss:$2 sm:$0xff] %v8607_v38 }
0x1720   :  { %v8801_v10 = vpop.permute.xlu1 %8800 }
0x1721   :  { %v8806_v40 = vsel %vm770_vm2, %v8801_v10, 0 }
0x1722   :  { %8815 = vmatpush.bf16.msra.mxu2 %v8806_v40 }
0x1725   :  { %9807 = vmatmul.msk.bf16.vlgmr.msra.gmra.mxu2 %vm766_vm4, %v8584_v20  ;;  %v8609_v32 = vpop.f32.mrf.mxu0 }
0x172b   :  { %v8670_v62 = vpop.f32.mrf.mxu3 }
0x172c   :  { %8948 = vst [vmem:[#allocation1 + $0x11] ss:$2 sm:$0xff] %v8670_v62 }
0x172d   :  { %8905 = vrot.lane.b32.xlu2 %v12685_v0, %s10508_s24 }
0x1733   :  { %v8672_v14 = vpop.f32.mrf.mxu3 }
0x173a   :  { %v8541_v12 = vpop.xlane.xlu0 %8540 }
0x174b   :  { %v8538_v36 = vpop.xlane.xlu1 %8537 }
0x174c   :  { %10438 = vrcp.f32 %v8538_v36 }
0x174d   :  { %v8885_v54 = vpop.permute.xlu0 %8884 }
0x174e   :  { %v8890_v27 = vsel %vm770_vm2, %v8885_v54, 0 }
0x174f   :  { %8899 = vmatpush.bf16.msrb.mxu2 %v8890_v27 }
0x1752   :  { %v10439_v25 = vpop.eup %10438 }
0x1753   :  { %v8572_v35 = vmul.f32 %v10439_v25, %v14049_v19  ;;  %v8535_v41 = vpop.xlane.xlu1 %8534 }
0x1754   :  { %10440 = vrcp.f32 %v8535_v41 }
0x1755   :  { %v8588_v29 = vpack.c.bf16 %v8572_v35, %v8572_v35  ;;  %v8864_v26 = vpop.permute.xlu0 %8863  ;;  %v8628_v5 = vpop.f32.mrf.mxu1  ;;  %10442 = vrcp.f32 %v8541_v12 }
0x1756   :  { %v8869_v42 = vsel %vm770_vm2, %v8864_v26, 0  ;;  %8944 = vst [vmem:[#allocation1 + $0x1] ss:$2 sm:$0xff] %v8628_v5 }
0x1757   :  { %8878 = vmatpush.bf16.msra.mxu1 %v8869_v42  ;;  %9811 = vmatmul.msk.bf16.vlgmr.msrb.gmra.mxu2 %vm766_vm4, %v8588_v29 }
0x175a   :  { %v10441_v0 = vpop.eup %10440 }
0x175b   :  { %v8571_v15 = vmul.f32 %v10441_v0, %v14057_v34  ;;  %v9672_v34 = vld [vmem:[%s14298_s3 + $0x1c] sm:$0xf]  ;;  %v10443_v43 = vpop.eup %10442  ;;  %s9465_s3 = sshll.u32 %s10510_s16, 4  ;;  %s9466_s3 = int_to_ptr.vmem [resolvable:$true] %s9465_s3 }
0x175c   :  { %v8998_v31 = vsel %vm2144_vm5, %v9672_v34, 0  ;;  %v8573_v63 = vmul.f32 %v10443_v43, %v14043_v11 }
0x175d   :  { %v8587_v33 = vpack.c.bf16 %v8571_v15, %v8571_v15  ;;  %v8630_v61 = vpop.f32.mrf.mxu1  ;;  %v8957_v53 = vld.sshfl [vmem:[#allocation1] sm:$0xff pattern:$0x75316420] }
0x175e   :  { %v8589_v40 = vpack.c.bf16 %v8573_v63, %v8573_v63  ;;  %v14116_v15 = vld [vmem:[%s14299_s4 + $0x1] ss:$0 sm:$0xff]  ;;  %s9467_s4 = sshll.u32 %s14310_s15, 4  ;;  %s9468_s4 = int_to_ptr.hbm [resolvable:$true] %s9467_s4 }
0x175f   :  { %9810 = vmatmul.msk.bf16.vlgmr.msra.gmra.mxu1 %vm766_vm4, %v8587_v33 }
0x1763   :  { %v8649_v30 = vpop.f32.mrf.mxu2 }
0x1764   :  { %8946 = vst [vmem:[#allocation1 + $0x10] ss:$2 sm:$0xff] %v8649_v30 }
0x1765   :  { %v8691_v19 = vpop.f32.mrf.mxu0 }
0x1766   :  { %8950 = vst [vmem:[#allocation1 + $0x20] ss:$2 sm:$0xff] %v8691_v19 }
0x1769   :  { %v8712_v21 = vpop.f32.mrf.mxu1 }
0x176a   :  { %8952 = vst [vmem:[#allocation1 + $0x21] ss:$2 sm:$0xff] %v8712_v21 }
0x176b   :  { %v8651_v9 = vpop.f32.mrf.mxu2  ;;  %v8843_v45 = vpop.permute.xlu1 %8842  ;;  %v8958_v23 = vld.sshfl [vmem:[#allocation1 + $0x10] sm:$0xff pattern:$0x75316420] }
0x176c   :  { %v8848_v3 = vsel %vm770_vm2, %v8843_v45, 0  ;;  %v8981_v11 = vpack.c.bf16 %v8958_v23, %v8957_v53 }
0x176d   :  { %8857 = vmatpush.bf16.msrb.mxu0 %v8848_v3  ;;  %v8693_v50 = vpop.f32.mrf.mxu0  ;;  %v6974_v3 = vadd.f32 %v13484_v58, %v13551_v57  ;;  %v6979_v57 = vadd.f32 %v13488_v24, %v13573_v8  ;;  %v6984_v8 = vadd.f32 %v13501_v44, %v13579_v60 }
0x176e   :  { %v14336_v50 = vld [vmem:[#allocation6_spill] sm:$0xff] }
0x176f   :  { %v8009_v43 = vadd.f32 %v13958_v17, %v6979_v57  ;;  %v14340_v17 = vld [vmem:[#allocation10_spill] sm:$0xff] }
0x1771   :  { %v8714_v51 = vpop.f32.mrf.mxu1  ;;  %9007 = vmatpush.bf16.msra.mxu0 %v8998_v31  ;;  %v8959_v12 = vld.sshfl [vmem:[#allocation1 + $0x20] sm:$0xff pattern:$0x75316420] }
0x1773   :  { %v8733_v37 = vpop.f32.mrf.mxu2 }
0x1774   :  { %8954 = vst [vmem:[#allocation1 + $0x30] ss:$2 sm:$0xff] %v8733_v37  ;;  %v8007_v37 = vadd.f32 %v13916_v13, %v6974_v3  ;;  %v14338_v13 = vld [vmem:[#allocation8_spill] sm:$0xff] }
0x177b   :  { %v8735_v6 = vpop.f32.mrf.mxu2  ;;  %v8754_v28 = vpop.f32.mrf.mxu3 }
0x177c   :  { %8956 = vst [vmem:[#allocation1 + $0x31] ss:$2 sm:$0xff] %v8754_v28 }
0x1782   :  { %v8796_v7 = vpop.f32.mrf.mxu1 }
0x1783   :  { %v8756_v46 = vpop.f32.mrf.mxu3  ;;  %8962 = vst [vmem:[#allocation1 + $0x1] ss:$2 sm:$0xff] %v8796_v7  ;;  %v14337_v7 = vld [vmem:[#allocation7_spill] sm:$0xff] }
0x1788   :  { %v8532_v39 = vpop.xlane.xlu2 %8531 }
0x1789   :  { %10444 = vrcp.f32 %v8532_v39 }
0x178a   :  { %v8798_v55 = vpop.f32.mrf.mxu1 }
0x178f   :  { %v10445_v18 = vpop.eup %10444  ;;  %v8838_v48 = vpop.f32.mrf.mxu3 }
0x1790   :  { %v8570_v1 = vmul.f32 %v10445_v18, %v14084_v2  ;;  %v8906_v22 = vpop.permute.xlu2 %8905  ;;  %8964 = vst [vmem:[#allocation1 + $0x11] ss:$2 sm:$0xff] %v8838_v48  ;;  %v8960_v2 = vld.sshfl [vmem:[#allocation1 + $0x30] sm:$0xff pattern:$0x75316420] }
0x1791   :  { %v8911_v38 = vsel %vm770_vm2, %v8906_v22, 0  ;;  %v8775_v4 = vpop.f32.mrf.mxu0  ;;  %v8982_v36 = vpack.c.bf16 %v8960_v2, %v8959_v12  ;;  %v14341_v2 = vld [vmem:[#allocation11_spill] sm:$0xff] }
0x1792   :  { %v8586_v10 = vpack.c.bf16 %v8570_v1, %v8570_v1  ;;  %8920 = vmatpush.bf16.msrb.mxu3 %v8911_v38  ;;  %8961 = vst [vmem:[#allocation1] ss:$2 sm:$0xff] %v8775_v4  ;;  %v14339_v1 = vld [vmem:[#allocation9_spill] sm:$0xff] }
0x1794   :  { %9809 = vmatmul.msk.bf16.vlgmr.msrb.gmra.mxu0 %vm766_vm4, %v8586_v10 }
0x1795   :  { %9812 = vmatmul.msk.bf16.vlgmr.msrb.gmra.mxu3 %vm766_vm4, %v8589_v40  ;;  %v8011_v40 = vadd.f32 %v13973_v52, %v6984_v8 }
0x1797   :  { %v8840_v20 = vpop.f32.mrf.mxu3 }
0x1799   :  { %v8777_v32 = vpop.f32.mrf.mxu0  ;;  %v8969_v27 = vld.sshfl [vmem:[#allocation1] sm:$0xff pattern:$0x75316420] }
0x17a4   :  { %9813 = vmatmul.msk.bf16.vlgmr.msra.gmra.mxu0 %vm175_vm1, %v8981_v11 }
0x17a8   :  { %v8817_v62 = vpop.f32.mrf.mxu2 }
0x17a9   :  { %8963 = vst [vmem:[#allocation1 + $0x10] ss:$2 sm:$0xff] %v8817_v62 }
0x17b0   :  { %v8819_v14 = vpop.f32.mrf.mxu2  ;;  %v8970_v54 = vld.sshfl [vmem:[#allocation1 + $0x10] sm:$0xff pattern:$0x75316420] }
0x17b1   :  { %v8983_v25 = vpack.c.bf16 %v8970_v54, %v8969_v27 }
0x17b4   :  { %9814 = vmatmul.msk.bf16.gmra.mxu0 %vm175_vm1, %v8982_v36  ;;  %v14342_v36 = vld [vmem:[#allocation5_spill] sm:$0xff] }
0x17c4   :  { %9815 = vmatmul.msk.bf16.gmra.mxu0 %vm175_vm1, %v8983_v25 }
0x17da   :  { %v8901_v35 = vpop.f32.mrf.mxu2 }
0x17db   :  { %8967 = vst [vmem:[#allocation1 + $0x30] ss:$2 sm:$0xff] %v8901_v35 }
0x17dc   :  { %v8880_v41 = vpop.f32.mrf.mxu1 }
0x17dd   :  { %8966 = vst [vmem:[#allocation1 + $0x21] ss:$2 sm:$0xff] %v8880_v41 }
0x17e2   :  { %v8903_v29 = vpop.f32.mrf.mxu2 }
0x17e3   :  { %v14343_v29 = vld [vmem:[#allocation15_spill] sm:$0xff] }
0x17e4   :  { %v8882_v26 = vpop.f32.mrf.mxu1 }
0x17e5   :  { %v14344_v26 = vld [vmem:[#allocation14_spill] sm:$0xff] }
0x1811   :  { %v8859_v5 = vpop.f32.mrf.mxu0 }
0x1812   :  { %8965 = vst [vmem:[#allocation1 + $0x20] ss:$2 sm:$0xff] %v8859_v5  ;;  %v6989_v5 = vadd.f32 %v14344_v26, %v14343_v29 }
0x1818   :  { %v8922_v42 = vpop.f32.mrf.mxu3 }
0x1819   :  { %8968 = vst [vmem:[#allocation1 + $0x31] ss:$2 sm:$0xff] %v8922_v42  ;;  %v8861_v0 = vpop.f32.mrf.mxu0  ;;  %v8971_v61 = vld.sshfl [vmem:[#allocation1 + $0x20] sm:$0xff pattern:$0x75316420] }
0x181a   :  { %v14345_v0 = vld [vmem:[#allocation12_spill] sm:$0xff] }
0x1820   :  { %v8924_v33 = vpop.f32.mrf.mxu3  ;;  %v8972_v30 = vld.sshfl [vmem:[#allocation1 + $0x30] sm:$0xff pattern:$0x75316420] }
0x1821   :  { %v9009_v19 = vpop.f32.mrf.mxu0  ;;  %v8984_v21 = vpack.c.bf16 %v8972_v30, %v8971_v61  ;;  %v8013_v61 = vadd.f32 %v13986_v16, %v6989_v5 }
0x1822   :  { %v9029_v9 = vadd.f32 %v9009_v19, %v13893_v47 }
0x1823   :  { %9816 = vmatmul.msk.bf16.gmra.mxu0 %vm175_vm1, %v8984_v21 }
0x1824   :  { %v9042_v45 = vadd.f32 %v14116_v15, %v9029_v9 }
0x1826   :  { %v9050_v51 = vadd.f32 %v9042_v45, %v14336_v50 }
0x1828   :  { %v9058_v34 = vsel %vm84_vm0, %v9050_v51, 0.0 }
0x1829   :  { %9059 = vadd.xlane.f32.xlu0 %v9058_v34  ;;  %v9011_v31 = vpop.f32.mrf.mxu0 }
0x182a   :  { %v9030_v6 = vadd.f32 %v9011_v31, %v8007_v37  ;;  %v14346_v37 = vld [vmem:[#allocation13_spill] sm:$0xff] }
0x182c   :  { %v9043_v28 = vadd.f32 %v14116_v15, %v9030_v6 }
0x182e   :  { %v9051_v47 = vadd.f32 %v9043_v28, %v14337_v7 }
0x1830   :  { %v9061_v53 = vsel %vm84_vm0, %v9051_v47, 0.0 }
0x1831   :  { %9062 = vadd.xlane.f32.xlu2 %v9061_v53  ;;  %v9014_v46 = vpop.f32.mrf.mxu0 }
0x1832   :  { %v9031_v39 = vadd.f32 %v9014_v46, %v13922_v49 }
0x1834   :  { %v9044_v58 = vadd.f32 %v14116_v15, %v9031_v39 }
0x1836   :  { %v9052_v55 = vadd.f32 %v9044_v58, %v14338_v13 }
0x1838   :  { %v9064_v18 = vsel %vm84_vm0, %v9052_v55, 0.0 }
0x1839   :  { %9065 = vadd.xlane.f32.xlu1 %v9064_v18  ;;  %v9016_v63 = vpop.f32.mrf.mxu0 }
0x183a   :  { %v9032_v48 = vadd.f32 %v9016_v63, %v8009_v43 }
0x183c   :  { %v9045_v23 = vadd.f32 %v14116_v15, %v9032_v48 }
0x183e   :  { %v9053_v22 = vadd.f32 %v9045_v23, %v14339_v1 }
0x1840   :  { %v9067_v49 = vsel %vm84_vm0, %v9053_v22, 0.0 }
0x1841   :  { %9068 = vadd.xlane.f32.xlu2 %v9067_v49  ;;  %v9019_v38 = vpop.f32.mrf.mxu0 }
0x1842   :  { %v9033_v4 = vadd.f32 %v9019_v38, %v13967_v59 }
0x1844   :  { %v9046_v24 = vadd.f32 %v14116_v15, %v9033_v4 }
0x1846   :  { %v9054_v10 = vadd.f32 %v9046_v24, %v14340_v17  ;;  %v9866_v24 = vld [vmem:[%s14304_s9 + $0x10] sm:$0xff] }
0x1848   :  { %v9070_v20 = vsel %vm84_vm0, %v9054_v10, 0.0 }
0x1849   :  { %9071 = vadd.xlane.f32.xlu0 %v9070_v20  ;;  %v9021_v32 = vpop.f32.mrf.mxu0 }
0x184a   :  { %v9034_v11 = vadd.f32 %v9021_v32, %v8011_v40 }
0x184c   :  { %v9047_v62 = vadd.f32 %v14116_v15, %v9034_v11 }
0x184e   :  { %v9055_v14 = vadd.f32 %v9047_v62, %v14341_v2 }
0x1850   :  { %v9073_v59 = vsel %vm84_vm0, %v9055_v14, 0.0 }
0x1851   :  { %9074 = vadd.xlane.f32.xlu1 %v9073_v59 }
0x189c   :  { %v9060_v12 = vpop.xlane.xlu0 %9059 }
0x189d   :  { %v9082_v54 = vmul.f32 %v9060_v12, %v14342_v36 }
0x189f   :  { %v14150_v44 = vsub.f32 %v9050_v51, %v9082_v54 }
0x18a0   :  { %v9024_v60 = vpop.f32.mrf.mxu0 }
0x18a1   :  { %v9035_v52 = vadd.f32 %v9024_v60, %v13978_v56  ;;  %v9098_v27 = vmul.f32 %v14150_v44, %v14150_v44 }
0x18a3   :  { %v9048_v25 = vadd.f32 %v14116_v15, %v9035_v52  ;;  %v9106_v35 = vsel %vm84_vm0, %v9098_v27, 0.0 }
0x18a4   :  { %v9063_v41 = vpop.xlane.xlu2 %9062  ;;  %9107 = vadd.xlane.f32.xlu2 %v9106_v35 }
0x18a5   :  { %v9083_v42 = vmul.f32 %v9063_v41, %v14342_v36  ;;  %v9056_v33 = vadd.f32 %v9048_v25, %v14345_v0 }
0x18a7   :  { %v14162_v30 = vsub.f32 %v9051_v47, %v9083_v42  ;;  %v9076_v56 = vsel %vm84_vm0, %v9056_v33, 0.0 }
0x18a8   :  { %9077 = vadd.xlane.f32.xlu1 %v9076_v56  ;;  %v9026_v19 = vpop.f32.mrf.mxu0 }
0x18a9   :  { %v9036_v21 = vadd.f32 %v9026_v19, %v8013_v61  ;;  %v9099_v9 = vmul.f32 %v14162_v30, %v14162_v30 }
0x18ab   :  { %v9049_v45 = vadd.f32 %v14116_v15, %v9036_v21  ;;  %v9109_v3 = vsel %vm84_vm0, %v9099_v9, 0.0 }
0x18ac   :  { %v9066_v50 = vpop.xlane.xlu1 %9065  ;;  %9110 = vadd.xlane.f32.xlu0 %v9109_v3 }
0x18ad   :  { %v9084_v51 = vmul.f32 %v9066_v50, %v14342_v36  ;;  %v9057_v16 = vadd.f32 %v9049_v45, %v14346_v37  ;;  %v14220_v45 = vld [vmem:[%s14300_s5 + $0x1] ss:$0 sm:$0xff] }
0x18af   :  { %v14171_v34 = vsub.f32 %v9052_v55, %v9084_v51  ;;  %v9079_v31 = vsel %vm84_vm0, %v9057_v16, 0.0 }
0x18b0   :  { %9080 = vadd.xlane.f32.xlu2 %v9079_v31 }
0x18b1   :  { %v9100_v6 = vmul.f32 %v14171_v34, %v14171_v34 }
0x18b3   :  { %v9112_v28 = vsel %vm84_vm0, %v9100_v6, 0.0  ;;  %v14226_v6 = vld [vmem:[%s14301_s6 + $0x1] ss:$0 sm:$0xff] }
0x18b4   :  { %v9069_v7 = vpop.xlane.xlu2 %9068  ;;  %9113 = vadd.xlane.f32.xlu0 %v9112_v28 }
0x18b5   :  { %v9085_v15 = vmul.f32 %v9069_v7, %v14342_v36 }
0x18b7   :  { %v14178_v47 = vsub.f32 %v9053_v22, %v9085_v15  ;;  %v9867_v22 = vld [vmem:[%s14304_s9 + $0x18] sm:$0xff] }
0x18b8   :  { %9304 = vmatpush.bf16.msrb.mxu1 %v9867_v22 }
0x18b9   :  { %v9101_v53 = vmul.f32 %v14178_v47, %v14178_v47 }
0x18bb   :  { %v9115_v46 = vsel %vm84_vm0, %v9101_v53, 0.0 }
0x18bc   :  { %v9072_v39 = vpop.xlane.xlu0 %9071  ;;  %9116 = vadd.xlane.f32.xlu1 %v9115_v46  ;;  %9305 = vmatpush.bf16.msrb.mxu1 %v9866_v24 }
0x18bd   :  { %v9086_v58 = vmul.f32 %v9072_v39, %v14342_v36 }
0x18bf   :  { %v14184_v57 = vsub.f32 %v9054_v10, %v9086_v58 }
0x18c1   :  { %v9102_v13 = vmul.f32 %v14184_v57, %v14184_v57 }
0x18c3   :  { %v9118_v55 = vsel %vm84_vm0, %v9102_v13, 0.0 }
0x18c4   :  { %v9075_v43 = vpop.xlane.xlu1 %9074  ;;  %9119 = vadd.xlane.f32.xlu2 %v9118_v55 }
0x18c5   :  { %v9087_v18 = vmul.f32 %v9075_v43, %v14342_v36 }
0x18c7   :  { %v14190_v63 = vsub.f32 %v9055_v14, %v9087_v18 }
0x18c9   :  { %v9103_v48 = vmul.f32 %v14190_v63, %v14190_v63 }
0x18cb   :  { %v9121_v23 = vsel %vm84_vm0, %v9103_v48, 0.0 }
0x18cc   :  { %9122 = vadd.xlane.f32.xlu0 %v9121_v23 }
0x1917   :  { %v9108_v1 = vpop.xlane.xlu2 %9107 }
0x1918   :  { %v9130_v49 = vmul.f32 %v9108_v1, %v14342_v36 }
0x191a   :  { %v9138_v38 = vadd.f32 1e-05, %v9130_v49 }
0x191b   :  { %v9078_v4 = vpop.xlane.xlu1 %9077 }
0x191c   :  { %10446 = vrsqrt.f32 %v9138_v38  ;;  %v9088_v8 = vmul.f32 %v9078_v4, %v14342_v36  ;;  %vm9152_vm2 = vweird.f32 %v9138_v38 }
0x191e   :  { %v14203_v17 = vsub.f32 %v9056_v33, %v9088_v8 }
0x191f   :  { %v9111_v10 = vpop.xlane.xlu0 %9110 }
0x1920   :  { %v9131_v40 = vmul.f32 %v9111_v10, %v14342_v36  ;;  %v9104_v20 = vmul.f32 %v14203_v17, %v14203_v17 }
0x1922   :  { %v10447_v32 = vpop.eup %10446  ;;  %v9139_v11 = vadd.f32 1e-05, %v9131_v40  ;;  %v9124_v62 = vsel %vm84_vm0, %v9104_v20, 0.0 }
0x1923   :  { %v9147_v2 = vmul.f32 %v10447_v32, %v9138_v38  ;;  %9125 = vadd.xlane.f32.xlu1 %v9124_v62  ;;  %v9081_v14 = vpop.xlane.xlu2 %9080  ;;  %vm9153_vm1 = vweird.f32 %v10447_v32 }
0x1924   :  { %10448 = vrsqrt.f32 %v9139_v11  ;;  %v9089_v59 = vmul.f32 %v9081_v14, %v14342_v36  ;;  %vm9154_vm3 = vmor %vm9152_vm2, %vm9153_vm1  ;;  %vm9162_vm5 = vweird.f32 %v9139_v11 }
0x1925   :  { %v9148_v12 = vmul.f32 %v10447_v32, %v9147_v2 }
0x1926   :  { %v14210_v54 = vsub.f32 %v9057_v16, %v9089_v59 }
0x1927   :  { %v9149_v60 = vmul.f32 0.5, %v9148_v12  ;;  %v9114_v52 = vpop.xlane.xlu0 %9113 }
0x1928   :  { %v9132_v27 = vmul.f32 %v9114_v52, %v14342_v36  ;;  %v9105_v25 = vmul.f32 %v14210_v54, %v14210_v54 }
0x1929   :  { %v9150_v35 = vsub.f32 1.5, %v9149_v60 }
0x192a   :  { %v10449_v41 = vpop.eup %10448  ;;  %v9140_v29 = vadd.f32 1e-05, %v9132_v27  ;;  %v9127_v26 = vsel %vm84_vm0, %v9105_v25, 0.0 }
0x192b   :  { %v9151_v5 = vmul.f32 %v10447_v32, %v9150_v35  ;;  %v9157_v42 = vmul.f32 %v10449_v41, %v9139_v11  ;;  %9128 = vadd.xlane.f32.xlu2 %v9127_v26  ;;  %vm9163_vm4 = vweird.f32 %v10449_v41 }
0x192c   :  { %10450 = vrsqrt.f32 %v9140_v29  ;;  %vm9164_vm8 = vmor %vm9162_vm5, %vm9163_vm4  ;;  %vm9172_vm10 = vweird.f32 %v9140_v29 }
0x192d   :  { %v9158_v0 = vmul.f32 %v10449_v41, %v9157_v42  ;;  %v9155_v33 = vsel %vm9154_vm3, %v10447_v32, %v9151_v5 }
0x192e   :  { %v9226_v3 = vmul.f32 %v9155_v33, %v14150_v44 }
0x192f   :  { %v9159_v61 = vmul.f32 0.5, %v9158_v0  ;;  %v9117_v56 = vpop.xlane.xlu1 %9116 }
0x1930   :  { %v9133_v19 = vmul.f32 %v9117_v56, %v14342_v36  ;;  %v9239_v28 = vmul.f32 %v14220_v45, %v9226_v3 }
0x1931   :  { %v9160_v21 = vsub.f32 1.5, %v9159_v61 }
0x1932   :  { %v10451_v9 = vpop.eup %10450  ;;  %v9141_v50 = vadd.f32 1e-05, %v9133_v19  ;;  %v9252_v13 = vadd.f32 %v14226_v6, %v9239_v28 }
0x1933   :  { %v9161_v51 = vmul.f32 %v10449_v41, %v9160_v21  ;;  %v9167_v37 = vmul.f32 %v10451_v9, %v9140_v29  ;;  %vm9173_vm9 = vweird.f32 %v10451_v9 }
0x1934   :  { %10452 = vrsqrt.f32 %v9141_v50  ;;  %vm9174_vm12 = vmor %vm9172_vm10, %vm9173_vm9  ;;  %vm9182_vm14 = vweird.f32 %v9141_v50 }
0x1935   :  { %v9165_v16 = vsel %vm9164_vm8, %v10449_v41, %v9161_v51  ;;  %v9168_v31 = vmul.f32 %v10451_v9, %v9167_v37 }
0x1936   :  { %v9227_v7 = vmul.f32 %v9165_v16, %v14162_v30 }
0x1937   :  { %v9169_v15 = vmul.f32 0.5, %v9168_v31  ;;  %v9120_v53 = vpop.xlane.xlu2 %9119 }
0x1938   :  { %v9240_v44 = vmul.f32 %v14220_v45, %v9227_v7  ;;  %v9134_v46 = vmul.f32 %v9120_v53, %v14342_v36 }
0x1939   :  { %v9170_v39 = vsub.f32 1.5, %v9169_v15  ;;  %v9868_v15 = vld [vmem:[%s14306_s11 + $0x8] sm:$0xff] }
0x193a   :  { %v10453_v58 = vpop.eup %10452  ;;  %v9253_v55 = vadd.f32 %v14226_v6, %v9240_v44  ;;  %v9142_v43 = vadd.f32 1e-05, %v9134_v46  ;;  %9372 = vmatpush.bf16.msra.mxu2 %v9868_v15 }
0x193b   :  { %v9171_v18 = vmul.f32 %v10451_v9, %v9170_v39  ;;  %v9177_v48 = vmul.f32 %v10453_v58, %v9141_v50  ;;  %vm9183_vm13 = vweird.f32 %v10453_v58 }
0x193c   :  { %v9260_v23 = vpack.c.bf16 %v9253_v55, %v9252_v13  ;;  %10454 = vrsqrt.f32 %v9142_v43  ;;  %vm9184_vm15 = vmor %vm9182_vm14, %vm9183_vm13  ;;  %vm9192_vm7 = vweird.f32 %v9142_v43 }
0x193d   :  { %v9178_v30 = vmul.f32 %v10453_v58, %v9177_v48  ;;  %v9175_v1 = vsel %vm9174_vm12, %v10451_v9, %v9171_v18 }
0x193e   :  { %9833 = vmatmul.msk.bf16.vlgmr.msrb.gmra.mxu1 %vm84_vm0, %v9260_v23  ;;  %v9228_v8 = vmul.f32 %v9175_v1, %v14171_v34 }
0x193f   :  { %v9179_v22 = vmul.f32 0.5, %v9178_v30  ;;  %v9123_v49 = vpop.xlane.xlu0 %9122 }
0x1940   :  { %v9135_v38 = vmul.f32 %v9123_v49, %v14342_v36  ;;  %v9241_v2 = vmul.f32 %v14220_v45, %v9228_v8 }
0x1941   :  { %v9180_v4 = vsub.f32 1.5, %v9179_v22 }
0x1942   :  { %v10455_v24 = vpop.eup %10454  ;;  %v9143_v10 = vadd.f32 1e-05, %v9135_v38  ;;  %v9254_v52 = vadd.f32 %v14226_v6, %v9241_v2 }
0x1943   :  { %v9181_v40 = vmul.f32 %v10453_v58, %v9180_v4  ;;  %v9187_v20 = vmul.f32 %v10455_v24, %v9142_v43  ;;  %vm9193_vm6 = vweird.f32 %v10455_v24 }
0x1944   :  { %10456 = vrsqrt.f32 %v9143_v10  ;;  %vm9194_vm1 = vmor %vm9192_vm7, %vm9193_vm6  ;;  %vm9202_vm3 = vweird.f32 %v9143_v10  ;;  %vm9458_vm6 = vcmask 57344  }
0x1945   :  { %v9185_v32 = vsel %vm9184_vm15, %v10453_v58, %v9181_v40  ;;  %v9188_v11 = vmul.f32 %v10455_v24, %v9187_v20 }
0x1946   :  { %v9229_v62 = vmul.f32 %v9185_v32, %v14178_v47 }
0x1947   :  { %v9189_v14 = vmul.f32 0.5, %v9188_v11 }
0x1948   :  { %v9242_v59 = vmul.f32 %v14220_v45, %v9229_v62 }
0x1949   :  { %v9190_v12 = vsub.f32 1.5, %v9189_v14 }
0x194a   :  { %v10457_v60 = vpop.eup %10456  ;;  %v9255_v34 = vadd.f32 %v14226_v6, %v9242_v59 }
0x194b   :  { %v9191_v27 = vmul.f32 %v10455_v24, %v9190_v12  ;;  %v9197_v25 = vmul.f32 %v10457_v60, %v9143_v10  ;;  %vm9203_vm2 = vweird.f32 %v10457_v60 }
0x194c   :  { %v9261_v35 = vpack.c.bf16 %v9255_v34, %v9254_v52  ;;  %vm9204_vm4 = vmor %vm9202_vm3, %vm9203_vm2 }
0x194d   :  { %v9198_v41 = vmul.f32 %v10457_v60, %v9197_v25  ;;  %v9195_v47 = vsel %vm9194_vm1, %v10455_v24, %v9191_v27 }
0x194e   :  { %9834 = vmatmul.msk.bf16.gmra.mxu1 %vm84_vm0, %v9261_v35  ;;  %v9230_v5 = vmul.f32 %v9195_v47, %v14184_v57 }
0x194f   :  { %v9199_v29 = vmul.f32 0.5, %v9198_v41 }
0x1950   :  { %v9243_v61 = vmul.f32 %v14220_v45, %v9230_v5 }
0x1951   :  { %v9200_v26 = vsub.f32 1.5, %v9199_v29 }
0x1952   :  { %v9256_v19 = vadd.f32 %v14226_v6, %v9243_v61 }
0x1953   :  { %v9201_v42 = vmul.f32 %v10457_v60, %v9200_v26 }
0x1955   :  { %v9205_v0 = vsel %vm9204_vm4, %v10457_v60, %v9201_v42 }
0x1956   :  { %v9231_v33 = vmul.f32 %v9205_v0, %v14190_v63 }
0x1958   :  { %v9244_v56 = vmul.f32 %v14220_v45, %v9231_v33 }
0x195a   :  { %v9257_v21 = vadd.f32 %v14226_v6, %v9244_v56 }
0x195c   :  { %v9262_v9 = vpack.c.bf16 %v9257_v21, %v9256_v19 }
0x195e   :  { %9835 = vmatmul.msk.bf16.gmra.mxu1 %vm84_vm0, %v9262_v9 }
0x1996   :  { %v9126_v3 = vpop.xlane.xlu1 %9125 }
0x1997   :  { %v9136_v57 = vmul.f32 %v9126_v3, %v14342_v36 }
0x1999   :  { %v9144_v50 = vadd.f32 1e-05, %v9136_v57  ;;  %v9897_v57 = vld [vmem:[%s14307_s12 + $0x1] ss:$0 sm:$0xff] }
0x199b   :  { %10458 = vrsqrt.f32 %v9144_v50  ;;  %vm9212_vm8 = vweird.f32 %v9144_v50 }
0x199e   :  { %v9129_v51 = vpop.xlane.xlu2 %9128 }
0x199f   :  { %v9137_v37 = vmul.f32 %v9129_v51, %v14342_v36 }
0x19a1   :  { %v10459_v63 = vpop.eup %10458  ;;  %v9145_v16 = vadd.f32 1e-05, %v9137_v37 }
0x19a2   :  { %v9207_v31 = vmul.f32 %v10459_v63, %v9144_v50  ;;  %vm9213_vm5 = vweird.f32 %v10459_v63 }
0x19a3   :  { %10460 = vrsqrt.f32 %v9145_v16  ;;  %vm9214_vm9 = vmor %vm9212_vm8, %vm9213_vm5  ;;  %vm9222_vm12 = vweird.f32 %v9145_v16 }
0x19a4   :  { %v9208_v28 = vmul.f32 %v10459_v63, %v9207_v31 }
0x19a6   :  { %v9209_v7 = vmul.f32 0.5, %v9208_v28 }
0x19a8   :  { %v9210_v53 = vsub.f32 1.5, %v9209_v7 }
0x19a9   :  { %v10461_v44 = vpop.eup %10460 }
0x19aa   :  { %v9211_v46 = vmul.f32 %v10459_v63, %v9210_v53  ;;  %v9217_v39 = vmul.f32 %v10461_v44, %v9145_v16  ;;  %vm9223_vm10 = vweird.f32 %v10461_v44  ;;  %v9870_v53 = vld [vmem:[%s14308_s13 + $0x8] sm:$0xff] }
0x19ab   :  { %vm9224_vm13 = vmor %vm9222_vm12, %vm9223_vm10  ;;  %9451 = vmatpush.bf16.msra.mxu3 %v9870_v53 }
0x19ac   :  { %v9218_v58 = vmul.f32 %v10461_v44, %v9217_v39  ;;  %v9215_v13 = vsel %vm9214_vm9, %v10459_v63, %v9211_v46 }
0x19ad   :  { %v9232_v18 = vmul.f32 %v9215_v13, %v14203_v17  ;;  %v9896_v17 = vld [vmem:[%s14305_s10 + $0x1] ss:$0 sm:$0xff] }
0x19ae   :  { %v9219_v55 = vmul.f32 0.5, %v9218_v58 }
0x19af   :  { %v9245_v1 = vmul.f32 %v14220_v45, %v9232_v18 }
0x19b0   :  { %v9220_v43 = vsub.f32 1.5, %v9219_v55 }
0x19b1   :  { %v9258_v49 = vadd.f32 %v14226_v6, %v9245_v1 }
0x19b2   :  { %v9221_v48 = vmul.f32 %v10461_v44, %v9220_v43 }
0x19b4   :  { %v9225_v23 = vsel %vm9224_vm13, %v10461_v44, %v9221_v48  ;;  %v9869_v44 = vld [vmem:[%s14308_s13] sm:$0xff] }
0x19b5   :  { %v9233_v30 = vmul.f32 %v9225_v23, %v14210_v54  ;;  %9452 = vmatpush.bf16.msra.mxu3 %v9869_v44 }
0x19b7   :  { %v9246_v22 = vmul.f32 %v14220_v45, %v9233_v30  ;;  %v9898_v30 = vld [vmem:[%s14302_s7 + $0x1] ss:$0 sm:$0xff] }
0x19b9   :  { %v9259_v38 = vadd.f32 %v14226_v6, %v9246_v22 }
0x19bb   :  { %v9307_v4 = vpop.f32.mrf.mxu1  ;;  %v9263_v24 = vpack.c.bf16 %v9259_v38, %v9258_v49 }
0x19bc   :  { %v9308_v8 = vadd.f32 %v9896_v17, %v9307_v4 }
0x19bd   :  { %9836 = vmatmul.msk.bf16.gmra.mxu1 %vm84_vm0, %v9263_v24 }
0x19be   :  { %v9327_v54 = vmax.f32 %v9308_v8, 0.0 }
0x19c3   :  { %v9309_v10 = vpop.f32.mrf.mxu1 }
0x19c4   :  { %v9310_v40 = vadd.f32 %v9896_v17, %v9309_v10 }
0x19c6   :  { %v9328_v20 = vmax.f32 %v9310_v40, 0.0 }
0x19c8   :  { %v9335_v32 = vpack.c.bf16 %v9328_v20, %v9327_v54 }
0x19ca   :  { %9844 = vmatmul.msk.bf16.vlgmr.msra.gmra.mxu2 %vm4583_vm11, %v9335_v32 }
0x19cb   :  { %v9312_v45 = vpop.f32.mrf.mxu1 }
0x19cc   :  { %v9313_v11 = vadd.f32 %v9896_v17, %v9312_v45 }
0x19ce   :  { %v9329_v2 = vmax.f32 %v9313_v11, 0.0 }
0x19d3   :  { %v9314_v62 = vpop.f32.mrf.mxu1 }
0x19d4   :  { %v9315_v6 = vadd.f32 %v9896_v17, %v9314_v62 }
0x19d6   :  { %v9330_v14 = vmax.f32 %v9315_v6, 0.0 }
0x19d8   :  { %v9336_v59 = vpack.c.bf16 %v9330_v14, %v9329_v2 }
0x19da   :  { %9845 = vmatmul.msk.bf16.gmra.mxu2 %vm4583_vm11, %v9336_v59 }
0x19db   :  { %v9317_v12 = vpop.f32.mrf.mxu1 }
0x19dc   :  { %v9318_v60 = vadd.f32 %v9896_v17, %v9317_v12 }
0x19de   :  { %v9331_v27 = vmax.f32 %v9318_v60, 0.0 }
0x19e3   :  { %v9319_v52 = vpop.f32.mrf.mxu1 }
0x19e4   :  { %v9320_v34 = vadd.f32 %v9896_v17, %v9319_v52 }
0x19e6   :  { %v9332_v25 = vmax.f32 %v9320_v34, 0.0 }
0x19e8   :  { %v9337_v35 = vpack.c.bf16 %v9332_v25, %v9331_v27 }
0x19ea   :  { %9846 = vmatmul.msk.bf16.gmra.mxu2 %vm4583_vm11, %v9337_v35 }
0x1a3a   :  { %v9322_v41 = vpop.f32.mrf.mxu1 }
0x1a3b   :  { %v9323_v47 = vadd.f32 %v9896_v17, %v9322_v41 }
0x1a3d   :  { %v9333_v5 = vmax.f32 %v9323_v47, 0.0 }
0x1a42   :  { %v9324_v29 = vpop.f32.mrf.mxu1 }
0x1a43   :  { %v9325_v26 = vadd.f32 %v9896_v17, %v9324_v29  ;;  %v9427_v17 = vld [vmem:[%s14309_s14] sm:$0x1] }
0x1a45   :  { %v9334_v42 = vmax.f32 %v9325_v26, 0.0 }
0x1a47   :  { %v9338_v0 = vpack.c.bf16 %v9334_v42, %v9333_v5 }
0x1a49   :  { %9847 = vmatmul.msk.bf16.gmra.mxu2 %vm4583_vm11, %v9338_v0 }
0x1a4d   :  { %v9374_v33 = vpop.f32.mrf.mxu2 }
0x1a55   :  { %v9375_v61 = vpop.f32.mrf.mxu2 }
0x1a5d   :  { %v9377_v56 = vpop.f32.mrf.mxu2 }
0x1a65   :  { %v9378_v19 = vpop.f32.mrf.mxu2 }
0x1a6d   :  { %v9380_v21 = vpop.f32.mrf.mxu2 }
0x1a75   :  { %v9381_v9 = vpop.f32.mrf.mxu2 }
0x1acc   :  { %v9383_v3 = vpop.f32.mrf.mxu2 }
0x1ad4   :  { %v9384_v50 = vpop.f32.mrf.mxu2 }
0x1ad5   :  { %v9385_v51 = vadd.f32 %v9897_v57, %v9384_v50 }
0x1ad7   :  { %v9387_v37 = vadd.f32 %v9385_v51, %v9259_v38 }
0x1ad9   :  { %v9388_v63 = vsel %vm84_vm0, %v9387_v37, 0.0 }
0x1ada   :  { %9389 = vadd.xlane.f32.xlu0 %v9388_v63 }
0x1b4d   :  { %v9390_v16 = vpop.xlane.xlu0 %9389 }
0x1b4e   :  { %v9391_v31 = vmul.f32 %v9390_v16, %v14342_v36 }
0x1b50   :  { %v9392_v28 = vsub.f32 %v9387_v37, %v9391_v31 }
0x1b52   :  { %v9393_v7 = vmul.f32 %v9392_v28, %v9392_v28 }
0x1b54   :  { %v9394_v15 = vsel %vm84_vm0, %v9393_v7, 0.0 }
0x1b55   :  { %9395 = vadd.xlane.f32.xlu1 %v9394_v15 }
0x1bc8   :  { %v9396_v46 = vpop.xlane.xlu1 %9395 }
0x1bc9   :  { %v9397_v39 = vmul.f32 %v9396_v46, %v14342_v36  ;;  %v9899_v36 = vld [vmem:[%s14303_s8 + $0x1] ss:$0 sm:$0xff] }
0x1bcb   :  { %v9398_v58 = vadd.f32 1e-05, %v9397_v39 }
0x1bcd   :  { %10462 = vrsqrt.f32 %v9398_v58  ;;  %vm9405_vm14 = vweird.f32 %v9398_v58 }
0x1bd3   :  { %v10463_v13 = vpop.eup %10462 }
0x1bd4   :  { %v9400_v55 = vmul.f32 %v10463_v13, %v9398_v58  ;;  %vm9406_vm11 = vweird.f32 %v10463_v13 }
0x1bd5   :  { %vm9407_vm15 = vmor %vm9405_vm14, %vm9406_vm11 }
0x1bd6   :  { %v9401_v43 = vmul.f32 %v10463_v13, %v9400_v55 }
0x1bd8   :  { %v9402_v18 = vmul.f32 0.5, %v9401_v43 }
0x1bda   :  { %v9403_v48 = vsub.f32 1.5, %v9402_v18 }
0x1bdc   :  { %v9404_v23 = vmul.f32 %v10463_v13, %v9403_v48 }
0x1bde   :  { %v9408_v1 = vsel %vm9407_vm15, %v10463_v13, %v9404_v23 }
0x1bdf   :  { %v9409_v22 = vmul.f32 %v9408_v1, %v9392_v28 }
0x1be1   :  { %v9415_v49 = vmul.f32 %v9898_v30, %v9409_v22 }
0x1be3   :  { %v9421_v38 = vadd.f32 %v9899_v36, %v9415_v49 }
0x1be5   :  { %v9422_v4 = vpack.c.bf16 %v9421_v38, %v9421_v38 }
0x1be7   :  { %v9429_v24 = vrot.slane %v9422_v4, 2 }
0x1be9   :  { %9858 = vmatmul.msk.bf16.vlgmr.msra.gmra.mxu3 %vm84_vm0, %v9429_v24 }
0x1c6c   :  { %v9454_v8 = vpop.f32.mrf.mxu3 }
0x1c6d   :  { %v9455_v10 = vadd.f32 %v9454_v8, %v9427_v17 }
0x1c6f   :  { %9459 = vst.msk [vmem:[#allocation2] sm:$0x1] %vm9458_vm6, %v9455_v10 }
0x1c70   :  { %9470 = dma.vmem_to_hbm [thread:$0]  %s9466_s3, 16, %s9468_s4, [#allocation3]  }
0x1c74   :  { %v9456_v40 = vpop.f32.mrf.mxu3 }
0x1c75   :  { %10496 = dma.done.wait [#allocation3], 16  }
0x1c76   :  { %10497 = vsyncadd [#allocation3], 4294967280 }
0x1c77   :  { %9475 = vsyncpa [#allocation3], 1 }

</bundles_post_ra>
